<compile_context>
chip_gen: v7x
topology: tpu7x:2x2x1
jax: 0.10.0
libtpu: 0.0.40
codegen_flags: <defaults>
</compile_context>

<pallas_src>
import math

import jax
import jax.numpy as jnp
from jax import lax
from jax.experimental import pallas as pl
from jax.experimental.pallas import tpu as pltpu

D_MODEL = 128
N_HEADS = 8
HEAD_DIM = D_MODEL // N_HEADS          # 16
D_FF = 2048                            # nn.TransformerEncoderLayer default
N_LAYERS = 3
NUM_CLASSES = 10
LN_EPS = 1e-5

assert D_MODEL % N_HEADS == 0

# Parameter order must match the kernel signature.
PARAM_ORDER = [
    "vgg_w", "vgg_b",
    "wq", "bq", "wk", "bk", "wv", "bv",
    "wo", "bo", "w1", "b1", "w2", "b2",
    "ln1g", "ln1b", "ln2g", "ln2b",
    "fc1_w", "fc1_b", "fc2_w", "fc2_b",
]


def _layer_norm(x, g, b):
    mu = jnp.mean(x, axis=-1, keepdims=True)
    var = jnp.mean((x - mu) ** 2, axis=-1, keepdims=True)
    return (x - mu) * lax.rsqrt(var + LN_EPS) * g + b


def _mm(x_f32, w_bf16):
    """bf16 x bf16 matmul with f32 accumulation on the MXU."""
    return jnp.dot(x_f32.astype(jnp.bfloat16), w_bf16,
                   preferred_element_type=jnp.float32)


# ---------------- fused kernel ----------------

def fused_genre_kernel(x_ref, vgg_w_ref, vgg_b_ref,
                       wq_ref, bq_ref, wk_ref, bk_ref, wv_ref, bv_ref,
                       wo_ref, bo_ref, w1_ref, b1_ref, w2_ref, b2_ref,
                       ln1g_ref, ln1b_ref, ln2g_ref, ln2b_ref,
                       fc1_w_ref, fc1_b_ref, fc2_w_ref, fc2_b_ref,
                       emb_ref, logits_ref):
    """Process one clip: (S, F) frames -> pooled embedding + class logits."""
    x = x_ref[0]                                                    # (S, F) f32
    seq = x.shape[0]

    # vggish stub (the /255.0 from forward() is pre-folded into vgg_w / vgg_b).
    h = jnp.maximum(_mm(x, vgg_w_ref[...]) + vgg_b_ref[...], 0.0)   # (S, D) f32

    for li in range(N_LAYERS):                                      # static unroll
        # ---- multi-head self-attention, heads batched on the leading dim ----
        h_b = jnp.broadcast_to(h.astype(jnp.bfloat16)[None],
                               (N_HEADS, seq, D_MODEL))             # (H, S, D) bf16
        # per-head projections; weight layout (H, head_dim, D), contract over D.
        q = jnp.einsum("hsf,hdf->hsd", h_b, wq_ref[li],
                       preferred_element_type=jnp.float32) + bq_ref[li]
        k = jnp.einsum("hsf,hdf->hsd", h_b, wk_ref[li],
                       preferred_element_type=jnp.float32) + bk_ref[li]
        v = jnp.einsum("hsf,hdf->hsd", h_b, wv_ref[li],
                       preferred_element_type=jnp.float32) + bv_ref[li]
        # scores (q already scaled by 1/sqrt(head_dim); folded into wq/bq on host)
        s = jnp.einsum("hsd,htd->hst",
                       q.astype(jnp.bfloat16), k.astype(jnp.bfloat16),
                       preferred_element_type=jnp.float32)          # (H, S, S) f32
        s = s - jnp.max(s, axis=-1, keepdims=True)                  # f32 softmax
        p = jnp.exp(s)
        p = p / jnp.sum(p, axis=-1, keepdims=True)
        o = jnp.einsum("hst,htd->hsd",
                       p.astype(jnp.bfloat16), v.astype(jnp.bfloat16),
                       preferred_element_type=jnp.float32)          # (H, S, hd)
        # output projection: per-head (hd, D) slabs, summed over heads ≡ concat @ Wo
        attn = jnp.einsum("hsd,hdf->hsf",
                          o.astype(jnp.bfloat16), wo_ref[li],
                          preferred_element_type=jnp.float32)       # (H, S, D)
        attn = jnp.sum(attn, axis=0) + bo_ref[li]                   # (S, D)

        # ---- post-LN residual blocks (f32 elementwise), dropout = identity ----
        h1 = _layer_norm(h + attn, ln1g_ref[li], ln1b_ref[li])      # norm1
        ff = jnp.maximum(_mm(h1, w1_ref[li]) + b1_ref[li], 0.0)     # (S, D_FF)
        ff = _mm(ff, w2_ref[li]) + b2_ref[li]                       # (S, D)
        h = _layer_norm(h1 + ff, ln2g_ref[li], ln2b_ref[li])        # norm2

    # mean over the sequence dim, then the FC head
    pooled = jnp.mean(h, axis=0, keepdims=True)                     # (1, D)
    emb_ref[0] = pooled
    hh = jnp.maximum(_mm(pooled, fc1_w_ref[...]) + fc1_b_ref[...], 0.0)
    logits_ref[0] = _mm(hh, fc2_w_ref[...]) + fc2_b_ref[...]


# ---------------- host-side parameter init (folds /255 and q-scale) ----------------

def init_params(key, in_feats):
    keys = iter(jax.random.split(key, 8 + 12 * N_LAYERS))

    def w(shape, fan_in):
        return jax.random.normal(next(keys), shape, jnp.float32) / math.sqrt(fan_in)

    def b(shape, fan_in):
        lim = 1.0 / math.sqrt(fan_in)
        return jax.random.uniform(next(keys), shape, jnp.float32, -lim, lim)

    inv255 = 1.0 / 255.0
    q_scale = 1.0 / math.sqrt(HEAD_DIM)

    params = {
        # vggish stub; the /255.0 of forward() folded into weight AND bias.
        "vgg_w": (w((in_feats, D_MODEL), in_feats) * inv255).astype(jnp.bfloat16),
        "vgg_b": b((1, D_MODEL), in_feats) * inv255,
        "fc1_w": w((D_MODEL, 64), D_MODEL).astype(jnp.bfloat16),
        "fc1_b": b((1, 64), D_MODEL),
        "fc2_w": w((64, NUM_CLASSES), 64).astype(jnp.bfloat16),
        "fc2_b": b((1, NUM_CLASSES), 64),
    }

    stacks = {n: [] for n in ["wq", "bq", "wk", "bk", "wv", "bv", "wo", "bo",
                              "w1", "b1", "w2", "b2",
                              "ln1g", "ln1b", "ln2g", "ln2b"]}
    for _ in range(N_LAYERS):
        # per-head projection weights, layout (H, head_dim, D); 1/sqrt(hd) folded into wq/bq.
        stacks["wq"].append((w((N_HEADS, HEAD_DIM, D_MODEL), D_MODEL) * q_scale)
                            .astype(jnp.bfloat16))
        stacks["bq"].append(b((N_HEADS, 1, HEAD_DIM), D_MODEL) * q_scale)
        stacks["wk"].append(w((N_HEADS, HEAD_DIM, D_MODEL), D_MODEL).astype(jnp.bfloat16))
        stacks["bk"].append(b((N_HEADS, 1, HEAD_DIM), D_MODEL))
        stacks["wv"].append(w((N_HEADS, HEAD_DIM, D_MODEL), D_MODEL).astype(jnp.bfloat16))
        stacks["bv"].append(b((N_HEADS, 1, HEAD_DIM), D_MODEL))
        stacks["wo"].append(w((N_HEADS, HEAD_DIM, D_MODEL), D_MODEL).astype(jnp.bfloat16))
        stacks["bo"].append(b((1, D_MODEL), D_MODEL))
        stacks["w1"].append(w((D_MODEL, D_FF), D_MODEL).astype(jnp.bfloat16))
        stacks["b1"].append(b((1, D_FF), D_MODEL))
        stacks["w2"].append(w((D_FF, D_MODEL), D_FF).astype(jnp.bfloat16))
        stacks["b2"].append(b((1, D_MODEL), D_FF))
        stacks["ln1g"].append(jnp.ones((1, D_MODEL), jnp.float32))
        stacks["ln1b"].append(jnp.zeros((1, D_MODEL), jnp.float32))
        stacks["ln2g"].append(jnp.ones((1, D_MODEL), jnp.float32))
        stacks["ln2b"].append(jnp.zeros((1, D_MODEL), jnp.float32))

    for name, lst in stacks.items():
        params[name] = jnp.stack(lst)        # leading layer axis (N_LAYERS, ...)
    return params


# ---------------- pallas_call wrapper ----------------

def genre_classification_forward(x, params, return_embedding=False):
    B, S, C, H, W = x.shape
    F = C * H * W
    x3 = x.reshape(B, S, F).astype(jnp.float32)

    flat_params = [params[name] for name in PARAM_ORDER]

    in_specs = [pl.BlockSpec((1, S, F), lambda b: (b, 0, 0))]
    for arr in flat_params:
        nd = arr.ndim
        # full-shape block + constant index_map => weights fetched once, VMEM-resident
        in_specs.append(pl.BlockSpec(arr.shape, lambda b, _nd=nd: (0,) * _nd))

    out_shape = (jax.ShapeDtypeStruct((B, 1, D_MODEL), jnp.float32),
                 jax.ShapeDtypeStruct((B, 1, NUM_CLASSES), jnp.float32))
    out_specs = (pl.BlockSpec((1, 1, D_MODEL), lambda b: (b, 0, 0)),
                 pl.BlockSpec((1, 1, NUM_CLASSES), lambda b: (b, 0, 0)))

    # advisory cost estimate (dominant cost at these sizes: the FF GEMMs + weight DMA)
    per_layer_flops = (3 * 2 * S * D_MODEL * D_MODEL          # q/k/v projections
                       + 2 * 2 * N_HEADS * S * S * HEAD_DIM   # scores + attn@v
                       + 2 * S * D_MODEL * D_MODEL            # output projection
                       + 2 * 2 * S * D_MODEL * D_FF)          # ff1 + ff2
    flops = B * (2 * S * F * D_MODEL + N_LAYERS * per_layer_flops
                 + 2 * D_MODEL * 64 + 2 * 64 * NUM_CLASSES)
    transcendentals = B * N_LAYERS * (N_HEADS * S * S + 2 * S)
    bytes_accessed = (x3.size * 4
                      + sum(int(a.size) * a.dtype.itemsize for a in flat_params)
                      + B * (D_MODEL + NUM_CLASSES) * 4)

    emb, logits = pl.pallas_call(
        fused_genre_kernel,
        grid=(B,),
        in_specs=in_specs,
        out_specs=out_specs,
        out_shape=out_shape,
        compiler_params=pltpu.CompilerParams(
            dimension_semantics=("parallel",),
            vmem_limit_bytes=32 * 1024 * 1024),
        cost_estimate=pl.CostEstimate(flops=int(flops),
                                      transcendentals=int(transcendentals),
                                      bytes_accessed=int(bytes_accessed)),
    )(x3, *flat_params)

    if return_embedding:
        return emb.reshape(B, D_MODEL)
    return logits.reshape(B, NUM_CLASSES)


# ---------------- pure-JAX (XLA) reference of the same math, for validation ----------------

def reference_forward(x, params, return_embedding=False):
    B, S, C, H, W = x.shape
    F = C * H * W
    h = x.reshape(B, S, F).astype(jnp.float32)

    def mm(a, w):
        return jnp.einsum("...f,fd->...d", a.astype(jnp.bfloat16), w,
                          preferred_element_type=jnp.float32)

    h = jnp.maximum(mm(h, params["vgg_w"]) + params["vgg_b"], 0.0)      # (B,S,D)

    for li in range(N_LAYERS):
        hb = h.astype(jnp.bfloat16)
        q = jnp.einsum("bsf,hdf->bhsd", hb, params["wq"][li],
                       preferred_element_type=jnp.float32) + params["bq"][li]
        k = jnp.einsum("bsf,hdf->bhsd", hb, params["wk"][li],
                       preferred_element_type=jnp.float32) + params["bk"][li]
        v = jnp.einsum("bsf,hdf->bhsd", hb, params["wv"][li],
                       preferred_element_type=jnp.float32) + params["bv"][li]
        s = jnp.einsum("bhsd,bhtd->bhst", q.astype(jnp.bfloat16), k.astype(jnp.bfloat16),
                       preferred_element_type=jnp.float32)
        s = s - jnp.max(s, axis=-1, keepdims=True)
        p = jnp.exp(s)
        p = p / jnp.sum(p, axis=-1, keepdims=True)
        o = jnp.einsum("bhst,bhtd->bhsd", p.astype(jnp.bfloat16), v.astype(jnp.bfloat16),
                       preferred_element_type=jnp.float32)
        attn = jnp.einsum("bhsd,hdf->bsf", o.astype(jnp.bfloat16), params["wo"][li],
                          preferred_element_type=jnp.float32) + params["bo"][li]
        h1 = _layer_norm(h + attn, params["ln1g"][li], params["ln1b"][li])
        ff = jnp.maximum(mm(h1, params["w1"][li]) + params["b1"][li], 0.0)
        ff = mm(ff, params["w2"][li]) + params["b2"][li]
        h = _layer_norm(h1 + ff, params["ln2g"][li], params["ln2b"][li])

    pooled = jnp.mean(h, axis=1)                                        # (B, D)
    if return_embedding:
        return pooled
    hh = jnp.maximum(mm(pooled, params["fc1_w"]) + params["fc1_b"], 0.0)
    return mm(hh, params["fc2_w"]) + params["fc2_b"]


if __name__ == "__main__":
    key = jax.random.PRNGKey(0)
    k_x, k_p = jax.random.split(key)

    B, S, C, H, W = 2, 8, 1, 16, 16              # small shapes consistent with forward
    x = jax.random.uniform(k_x, (B, S, C, H, W), dtype=jnp.float32)
    params = init_params(k_p, C * H * W)

    logits = jax.block_until_ready(genre_classification_forward(x, params))
    assert logits.shape == (B, NUM_CLASSES) and logits.dtype == jnp.float32
    assert bool(jnp.all(jnp.isfinite(logits)))

    emb = jax.block_until_ready(genre_classification_forward(x, params, return_embedding=True))
    assert emb.shape == (B, D_MODEL)
    assert bool(jnp.all(jnp.isfinite(emb)))

    # Numerical check against the pure-JAX reference of identical math (loose tolerance;
    # both paths use bf16 matmuls with f32 accumulation).
    ref_logits = jax.block_until_ready(reference_forward(x, params))
    ref_emb = jax.block_until_ready(reference_forward(x, params, return_embedding=True))
    tol = 2e-2
    err_l = float(jnp.max(jnp.abs(logits - ref_logits)))
    err_e = float(jnp.max(jnp.abs(emb - ref_emb)))
    scale_l = float(jnp.max(jnp.abs(ref_logits))) + 1e-6
    scale_e = float(jnp.max(jnp.abs(ref_emb))) + 1e-6
    assert err_l <= tol + tol * scale_l, f"logits mismatch vs reference: {err_l}"
    assert err_e <= tol + tol * scale_e, f"embedding mismatch vs reference: {err_e}"

    print("KERNEL_OK")
</pallas_src>

<mosaic_0001>
module attributes {stable_mosaic.version = 11 : i64} {
  func.func @fused_genre_kernel(%arg0: i32, %arg1: memref<1x8x256xf32, #tpu.memory_space<vmem>>, %arg2: memref<256x128xbf16, #tpu.memory_space<vmem>>, %arg3: memref<1x128xf32, #tpu.memory_space<vmem>>, %arg4: memref<3x8x16x128xbf16, #tpu.memory_space<vmem>>, %arg5: memref<3x8x1x16xf32, #tpu.memory_space<vmem>>, %arg6: memref<3x8x16x128xbf16, #tpu.memory_space<vmem>>, %arg7: memref<3x8x1x16xf32, #tpu.memory_space<vmem>>, %arg8: memref<3x8x16x128xbf16, #tpu.memory_space<vmem>>, %arg9: memref<3x8x1x16xf32, #tpu.memory_space<vmem>>, %arg10: memref<3x8x16x128xbf16, #tpu.memory_space<vmem>>, %arg11: memref<3x1x128xf32, #tpu.memory_space<vmem>>, %arg12: memref<3x128x2048xbf16, #tpu.memory_space<vmem>>, %arg13: memref<3x1x2048xf32, #tpu.memory_space<vmem>>, %arg14: memref<3x2048x128xbf16, #tpu.memory_space<vmem>>, %arg15: memref<3x1x128xf32, #tpu.memory_space<vmem>>, %arg16: memref<3x1x128xf32, #tpu.memory_space<vmem>>, %arg17: memref<3x1x128xf32, #tpu.memory_space<vmem>>, %arg18: memref<3x1x128xf32, #tpu.memory_space<vmem>>, %arg19: memref<3x1x128xf32, #tpu.memory_space<vmem>>, %arg20: memref<128x64xbf16, #tpu.memory_space<vmem>>, %arg21: memref<1x64xf32, #tpu.memory_space<vmem>>, %arg22: memref<64x10xbf16, #tpu.memory_space<vmem>>, %arg23: memref<1x10xf32, #tpu.memory_space<vmem>>, %arg24: memref<1x1x128xf32, #tpu.memory_space<vmem>>, %arg25: memref<1x1x10xf32, #tpu.memory_space<vmem>>) attributes {dimension_semantics = [#tpu.dimension_semantics<parallel>], iteration_bounds = array<i64: 2>, scalar_prefetch = 0 : i64, scratch_operands = 0 : i64, tpu.core_type = #tpu.core_type<tc>, window_params = [{transform_indices = @transform_0, window_bounds = array<i64: 1, 8, 256>}, {pipeline_mode = #tpu.pipeline_mode<synchronous>, transform_indices = @transform_1, window_bounds = array<i64: 256, 128>}, {pipeline_mode = #tpu.pipeline_mode<synchronous>, transform_indices = @transform_2, window_bounds = array<i64: 1, 128>}, {pipeline_mode = #tpu.pipeline_mode<synchronous>, transform_indices = @transform_3, window_bounds = array<i64: 3, 8, 16, 128>}, {pipeline_mode = #tpu.pipeline_mode<synchronous>, transform_indices = @transform_4, window_bounds = array<i64: 3, 8, 1, 16>}, {pipeline_mode = #tpu.pipeline_mode<synchronous>, transform_indices = @transform_5, window_bounds = array<i64: 3, 8, 16, 128>}, {pipeline_mode = #tpu.pipeline_mode<synchronous>, transform_indices = @transform_6, window_bounds = array<i64: 3, 8, 1, 16>}, {pipeline_mode = #tpu.pipeline_mode<synchronous>, transform_indices = @transform_7, window_bounds = array<i64: 3, 8, 16, 128>}, {pipeline_mode = #tpu.pipeline_mode<synchronous>, transform_indices = @transform_8, window_bounds = array<i64: 3, 8, 1, 16>}, {pipeline_mode = #tpu.pipeline_mode<synchronous>, transform_indices = @transform_9, window_bounds = array<i64: 3, 8, 16, 128>}, {pipeline_mode = #tpu.pipeline_mode<synchronous>, transform_indices = @transform_10, window_bounds = array<i64: 3, 1, 128>}, {pipeline_mode = #tpu.pipeline_mode<synchronous>, transform_indices = @transform_11, window_bounds = array<i64: 3, 128, 2048>}, {pipeline_mode = #tpu.pipeline_mode<synchronous>, transform_indices = @transform_12, window_bounds = array<i64: 3, 1, 2048>}, {pipeline_mode = #tpu.pipeline_mode<synchronous>, transform_indices = @transform_13, window_bounds = array<i64: 3, 2048, 128>}, {pipeline_mode = #tpu.pipeline_mode<synchronous>, transform_indices = @transform_14, window_bounds = array<i64: 3, 1, 128>}, {pipeline_mode = #tpu.pipeline_mode<synchronous>, transform_indices = @transform_15, window_bounds = array<i64: 3, 1, 128>}, {pipeline_mode = #tpu.pipeline_mode<synchronous>, transform_indices = @transform_16, window_bounds = array<i64: 3, 1, 128>}, {pipeline_mode = #tpu.pipeline_mode<synchronous>, transform_indices = @transform_17, window_bounds = array<i64: 3, 1, 128>}, {pipeline_mode = #tpu.pipeline_mode<synchronous>, transform_indices = @transform_18, window_bounds = array<i64: 3, 1, 128>}, {pipeline_mode = #tpu.pipeline_mode<synchronous>, transform_indices = @transform_19, window_bounds = array<i64: 128, 64>}, {pipeline_mode = #tpu.pipeline_mode<synchronous>, transform_indices = @transform_20, window_bounds = array<i64: 1, 64>}, {pipeline_mode = #tpu.pipeline_mode<synchronous>, transform_indices = @transform_21, window_bounds = array<i64: 64, 10>}, {pipeline_mode = #tpu.pipeline_mode<synchronous>, transform_indices = @transform_22, window_bounds = array<i64: 1, 10>}, {transform_indices = @transform_23, window_bounds = array<i64: 1, 1, 128>}, {transform_indices = @transform_24, window_bounds = array<i64: 1, 1, 10>}]} {
    %c0 = arith.constant 0 : index
    %c0_0 = arith.constant 0 : index
    %c0_1 = arith.constant 0 : index
    %0 = vector.load %arg1[%c0, %c0_0, %c0_1] : memref<1x8x256xf32, #tpu.memory_space<vmem>>, vector<1x8x256xf32>
    %1 = vector.shape_cast %0 : vector<1x8x256xf32> to vector<8x256xf32>
    %c0_2 = arith.constant 0 : index
    %c0_3 = arith.constant 0 : index
    %2 = vector.load %arg2[%c0_2, %c0_3] : memref<256x128xbf16, #tpu.memory_space<vmem>>, vector<256x128xbf16>
    %3 = arith.truncf %1 : vector<8x256xf32> to vector<8x256xbf16>
    %cst = arith.constant dense<0.000000e+00> : vector<8x128xf32>
    %4 = tpu.matmul %3, %2, %cst {dimension_numbers = #tpu.dot_dimension_numbers<[1], [0], [0], [1], [0, 0, 1, 1], [], []>} : vector<8x256xbf16>, vector<256x128xbf16>, vector<8x128xf32> -> vector<8x128xf32>
    %c0_4 = arith.constant 0 : index
    %c0_5 = arith.constant 0 : index
    %5 = vector.load %arg3[%c0_4, %c0_5] : memref<1x128xf32, #tpu.memory_space<vmem>>, vector<1x128xf32>
    %6 = vector.broadcast %5 : vector<1x128xf32> to vector<8x128xf32>
    %7 = arith.addf %4, %6 : vector<8x128xf32>
    %cst_6 = arith.constant 0.000000e+00 : f32
    %8 = vector.broadcast %cst_6 : f32 to vector<8x128xf32>
    %9 = arith.maximumf %7, %8 : vector<8x128xf32>
    %10 = arith.truncf %9 : vector<8x128xf32> to vector<8x128xbf16>
    %11 = vector.shape_cast %10 : vector<8x128xbf16> to vector<1x8x128xbf16>
    %12 = vector.shape_cast %11 : vector<1x8x128xbf16> to vector<1x8x128xbf16>
    %13 = vector.broadcast %12 : vector<1x8x128xbf16> to vector<8x8x128xbf16>
    %c0_7 = arith.constant 0 : index
    %c0_8 = arith.constant 0 : index
    %c0_9 = arith.constant 0 : index
    %c0_10 = arith.constant 0 : index
    %14 = vector.load %arg4[%c0_7, %c0_8, %c0_9, %c0_10] : memref<3x8x16x128xbf16, #tpu.memory_space<vmem>>, vector<1x8x16x128xbf16>
    %15 = vector.shape_cast %14 : vector<1x8x16x128xbf16> to vector<8x16x128xbf16>
    "tpu.trace_start"() <{level = 10 : i32, message = "hsf,hdf->hsd"}> : () -> ()
    %cst_11 = arith.constant dense<0.000000e+00> : vector<8x8x16xf32>
    %16 = tpu.matmul %13, %15, %cst_11 {dimension_numbers = #tpu.dot_dimension_numbers<[2], [2], [1], [1], [0, 0, 0, 1, 1, 1], [0], [0]>} : vector<8x8x128xbf16>, vector<8x16x128xbf16>, vector<8x8x16xf32> -> vector<8x8x16xf32>
    "tpu.trace_stop"() : () -> ()
    %c0_12 = arith.constant 0 : index
    %c0_13 = arith.constant 0 : index
    %c0_14 = arith.constant 0 : index
    %c0_15 = arith.constant 0 : index
    %17 = vector.load %arg5[%c0_12, %c0_13, %c0_14, %c0_15] : memref<3x8x1x16xf32, #tpu.memory_space<vmem>>, vector<1x8x1x16xf32>
    %18 = vector.shape_cast %17 : vector<1x8x1x16xf32> to vector<8x1x16xf32>
    %19 = vector.broadcast %18 : vector<8x1x16xf32> to vector<8x8x16xf32>
    %20 = arith.addf %16, %19 : vector<8x8x16xf32>
    %c0_16 = arith.constant 0 : index
    %c0_17 = arith.constant 0 : index
    %c0_18 = arith.constant 0 : index
    %c0_19 = arith.constant 0 : index
    %21 = vector.load %arg6[%c0_16, %c0_17, %c0_18, %c0_19] : memref<3x8x16x128xbf16, #tpu.memory_space<vmem>>, vector<1x8x16x128xbf16>
    %22 = vector.shape_cast %21 : vector<1x8x16x128xbf16> to vector<8x16x128xbf16>
    "tpu.trace_start"() <{level = 10 : i32, message = "hsf,hdf->hsd"}> : () -> ()
    %cst_20 = arith.constant dense<0.000000e+00> : vector<8x8x16xf32>
    %23 = tpu.matmul %13, %22, %cst_20 {dimension_numbers = #tpu.dot_dimension_numbers<[2], [2], [1], [1], [0, 0, 0, 1, 1, 1], [0], [0]>} : vector<8x8x128xbf16>, vector<8x16x128xbf16>, vector<8x8x16xf32> -> vector<8x8x16xf32>
    "tpu.trace_stop"() : () -> ()
    %c0_21 = arith.constant 0 : index
    %c0_22 = arith.constant 0 : index
    %c0_23 = arith.constant 0 : index
    %c0_24 = arith.constant 0 : index
    %24 = vector.load %arg7[%c0_21, %c0_22, %c0_23, %c0_24] : memref<3x8x1x16xf32, #tpu.memory_space<vmem>>, vector<1x8x1x16xf32>
    %25 = vector.shape_cast %24 : vector<1x8x1x16xf32> to vector<8x1x16xf32>
    %26 = vector.broadcast %25 : vector<8x1x16xf32> to vector<8x8x16xf32>
    %27 = arith.addf %23, %26 : vector<8x8x16xf32>
    %c0_25 = arith.constant 0 : index
    %c0_26 = arith.constant 0 : index
    %c0_27 = arith.constant 0 : index
    %c0_28 = arith.constant 0 : index
    %28 = vector.load %arg8[%c0_25, %c0_26, %c0_27, %c0_28] : memref<3x8x16x128xbf16, #tpu.memory_space<vmem>>, vector<1x8x16x128xbf16>
    %29 = vector.shape_cast %28 : vector<1x8x16x128xbf16> to vector<8x16x128xbf16>
    "tpu.trace_start"() <{level = 10 : i32, message = "hsf,hdf->hsd"}> : () -> ()
    %cst_29 = arith.constant dense<0.000000e+00> : vector<8x8x16xf32>
    %30 = tpu.matmul %13, %29, %cst_29 {dimension_numbers = #tpu.dot_dimension_numbers<[2], [2], [1], [1], [0, 0, 0, 1, 1, 1], [0], [0]>} : vector<8x8x128xbf16>, vector<8x16x128xbf16>, vector<8x8x16xf32> -> vector<8x8x16xf32>
    "tpu.trace_stop"() : () -> ()
    %c0_30 = arith.constant 0 : index
    %c0_31 = arith.constant 0 : index
    %c0_32 = arith.constant 0 : index
    %c0_33 = arith.constant 0 : index
    %31 = vector.load %arg9[%c0_30, %c0_31, %c0_32, %c0_33] : memref<3x8x1x16xf32, #tpu.memory_space<vmem>>, vector<1x8x1x16xf32>
    %32 = vector.shape_cast %31 : vector<1x8x1x16xf32> to vector<8x1x16xf32>
    %33 = vector.broadcast %32 : vector<8x1x16xf32> to vector<8x8x16xf32>
    %34 = arith.addf %30, %33 : vector<8x8x16xf32>
    %35 = arith.truncf %20 : vector<8x8x16xf32> to vector<8x8x16xbf16>
    %36 = arith.truncf %27 : vector<8x8x16xf32> to vector<8x8x16xbf16>
    "tpu.trace_start"() <{level = 10 : i32, message = "hsd,htd->hst"}> : () -> ()
    %cst_34 = arith.constant dense<0.000000e+00> : vector<8x8x8xf32>
    %37 = tpu.matmul %35, %36, %cst_34 {dimension_numbers = #tpu.dot_dimension_numbers<[2], [2], [1], [1], [0, 0, 0, 1, 1, 1], [0], [0]>} : vector<8x8x16xbf16>, vector<8x8x16xbf16>, vector<8x8x8xf32> -> vector<8x8x8xf32>
    "tpu.trace_stop"() : () -> ()
    %cst_35 = arith.constant dense<0xFF800000> : vector<8x8xf32>
    %38 = vector.multi_reduction <maximumf>, %37, %cst_35 [2] : vector<8x8x8xf32> to vector<8x8xf32>
    %39 = vector.shape_cast %38 : vector<8x8xf32> to vector<8x8x1xf32>
    %40 = vector.broadcast %39 : vector<8x8x1xf32> to vector<8x8x8xf32>
    %41 = arith.subf %37, %40 : vector<8x8x8xf32>
    %42 = math.exp %41 : vector<8x8x8xf32>
    %cst_36 = arith.constant dense<0.000000e+00> : vector<8x8xf32>
    %43 = vector.multi_reduction <add>, %42, %cst_36 [2] : vector<8x8x8xf32> to vector<8x8xf32>
    %44 = vector.shape_cast %43 : vector<8x8xf32> to vector<8x8x1xf32>
    %45 = vector.broadcast %44 : vector<8x8x1xf32> to vector<8x8x8xf32>
    %46 = arith.divf %42, %45 : vector<8x8x8xf32>
    %47 = arith.truncf %46 : vector<8x8x8xf32> to vector<8x8x8xbf16>
    %48 = arith.truncf %34 : vector<8x8x16xf32> to vector<8x8x16xbf16>
    "tpu.trace_start"() <{level = 10 : i32, message = "hst,htd->hsd"}> : () -> ()
    %cst_37 = arith.constant dense<0.000000e+00> : vector<8x8x16xf32>
    %49 = tpu.matmul %47, %48, %cst_37 {dimension_numbers = #tpu.dot_dimension_numbers<[2], [1], [1], [2], [0, 0, 0, 1, 1, 2], [0], [0]>} : vector<8x8x8xbf16>, vector<8x8x16xbf16>, vector<8x8x16xf32> -> vector<8x8x16xf32>
    "tpu.trace_stop"() : () -> ()
    %50 = arith.truncf %49 : vector<8x8x16xf32> to vector<8x8x16xbf16>
    %c0_38 = arith.constant 0 : index
    %c0_39 = arith.constant 0 : index
    %c0_40 = arith.constant 0 : index
    %c0_41 = arith.constant 0 : index
    %51 = vector.load %arg10[%c0_38, %c0_39, %c0_40, %c0_41] : memref<3x8x16x128xbf16, #tpu.memory_space<vmem>>, vector<1x8x16x128xbf16>
    %52 = vector.shape_cast %51 : vector<1x8x16x128xbf16> to vector<8x16x128xbf16>
    "tpu.trace_start"() <{level = 10 : i32, message = "hsd,hdf->hsf"}> : () -> ()
    %cst_42 = arith.constant dense<0.000000e+00> : vector<8x8x128xf32>
    %53 = tpu.matmul %50, %52, %cst_42 {dimension_numbers = #tpu.dot_dimension_numbers<[2], [1], [1], [2], [0, 0, 0, 1, 1, 2], [0], [0]>} : vector<8x8x16xbf16>, vector<8x16x128xbf16>, vector<8x8x128xf32> -> vector<8x8x128xf32>
    "tpu.trace_stop"() : () -> ()
    %cst_43 = arith.constant dense<0.000000e+00> : vector<8x128xf32>
    %54 = vector.multi_reduction <add>, %53, %cst_43 [0] : vector<8x8x128xf32> to vector<8x128xf32>
    %c0_44 = arith.constant 0 : index
    %c0_45 = arith.constant 0 : index
    %c0_46 = arith.constant 0 : index
    %55 = vector.load %arg11[%c0_44, %c0_45, %c0_46] : memref<3x1x128xf32, #tpu.memory_space<vmem>>, vector<1x1x128xf32>
    %56 = vector.shape_cast %55 : vector<1x1x128xf32> to vector<1x128xf32>
    %57 = vector.broadcast %56 : vector<1x128xf32> to vector<8x128xf32>
    %58 = arith.addf %54, %57 : vector<8x128xf32>
    %59 = arith.addf %9, %58 : vector<8x128xf32>
    %c0_47 = arith.constant 0 : index
    %c0_48 = arith.constant 0 : index
    %c0_49 = arith.constant 0 : index
    %60 = vector.load %arg16[%c0_47, %c0_48, %c0_49] : memref<3x1x128xf32, #tpu.memory_space<vmem>>, vector<1x1x128xf32>
    %61 = vector.shape_cast %60 : vector<1x1x128xf32> to vector<1x128xf32>
    %c0_50 = arith.constant 0 : index
    %c0_51 = arith.constant 0 : index
    %c0_52 = arith.constant 0 : index
    %62 = vector.load %arg17[%c0_50, %c0_51, %c0_52] : memref<3x1x128xf32, #tpu.memory_space<vmem>>, vector<1x1x128xf32>
    %63 = vector.shape_cast %62 : vector<1x1x128xf32> to vector<1x128xf32>
    %cst_53 = arith.constant dense<0.000000e+00> : vector<8xf32>
    %64 = vector.multi_reduction <add>, %59, %cst_53 [1] : vector<8x128xf32> to vector<8xf32>
    %65 = vector.shape_cast %64 : vector<8xf32> to vector<8x1xf32>
    %cst_54 = arith.constant 1.280000e+02 : f32
    %66 = vector.broadcast %cst_54 : f32 to vector<8x1xf32>
    %67 = arith.divf %65, %66 : vector<8x1xf32>
    %68 = vector.broadcast %67 : vector<8x1xf32> to vector<8x128xf32>
    %69 = arith.subf %59, %68 : vector<8x128xf32>
    %70 = arith.mulf %69, %69 : vector<8x128xf32>
    %cst_55 = arith.constant dense<0.000000e+00> : vector<8xf32>
    %71 = vector.multi_reduction <add>, %70, %cst_55 [1] : vector<8x128xf32> to vector<8xf32>
    %72 = vector.shape_cast %71 : vector<8xf32> to vector<8x1xf32>
    %cst_56 = arith.constant 1.280000e+02 : f32
    %73 = vector.broadcast %cst_56 : f32 to vector<8x1xf32>
    %74 = arith.divf %72, %73 : vector<8x1xf32>
    %75 = vector.broadcast %67 : vector<8x1xf32> to vector<8x128xf32>
    %76 = arith.subf %59, %75 : vector<8x128xf32>
    %cst_57 = arith.constant 9.99999974E-6 : f32
    %77 = vector.broadcast %cst_57 : f32 to vector<8x1xf32>
    %78 = arith.addf %74, %77 : vector<8x1xf32>
    %79 = math.rsqrt %78 : vector<8x1xf32>
    %80 = vector.broadcast %79 : vector<8x1xf32> to vector<8x128xf32>
    %81 = arith.mulf %76, %80 : vector<8x128xf32>
    %82 = vector.broadcast %61 : vector<1x128xf32> to vector<8x128xf32>
    %83 = arith.mulf %81, %82 : vector<8x128xf32>
    %84 = vector.broadcast %63 : vector<1x128xf32> to vector<8x128xf32>
    %85 = arith.addf %83, %84 : vector<8x128xf32>
    %c0_58 = arith.constant 0 : index
    %c0_59 = arith.constant 0 : index
    %c0_60 = arith.constant 0 : index
    %86 = vector.load %arg12[%c0_58, %c0_59, %c0_60] : memref<3x128x2048xbf16, #tpu.memory_space<vmem>>, vector<1x128x2048xbf16>
    %87 = vector.shape_cast %86 : vector<1x128x2048xbf16> to vector<128x2048xbf16>
    %88 = arith.truncf %85 : vector<8x128xf32> to vector<8x128xbf16>
    %cst_61 = arith.constant dense<0.000000e+00> : vector<8x2048xf32>
    %89 = tpu.matmul %88, %87, %cst_61 {dimension_numbers = #tpu.dot_dimension_numbers<[1], [0], [0], [1], [0, 0, 1, 1], [], []>} : vector<8x128xbf16>, vector<128x2048xbf16>, vector<8x2048xf32> -> vector<8x2048xf32>
    %c0_62 = arith.constant 0 : index
    %c0_63 = arith.constant 0 : index
    %c0_64 = arith.constant 0 : index
    %90 = vector.load %arg13[%c0_62, %c0_63, %c0_64] : memref<3x1x2048xf32, #tpu.memory_space<vmem>>, vector<1x1x2048xf32>
    %91 = vector.shape_cast %90 : vector<1x1x2048xf32> to vector<1x2048xf32>
    %92 = vector.broadcast %91 : vector<1x2048xf32> to vector<8x2048xf32>
    %93 = arith.addf %89, %92 : vector<8x2048xf32>
    %cst_65 = arith.constant 0.000000e+00 : f32
    %94 = vector.broadcast %cst_65 : f32 to vector<8x2048xf32>
    %95 = arith.maximumf %93, %94 : vector<8x2048xf32>
    %c0_66 = arith.constant 0 : index
    %c0_67 = arith.constant 0 : index
    %c0_68 = arith.constant 0 : index
    %96 = vector.load %arg14[%c0_66, %c0_67, %c0_68] : memref<3x2048x128xbf16, #tpu.memory_space<vmem>>, vector<1x2048x128xbf16>
    %97 = vector.shape_cast %96 : vector<1x2048x128xbf16> to vector<2048x128xbf16>
    %98 = arith.truncf %95 : vector<8x2048xf32> to vector<8x2048xbf16>
    %cst_69 = arith.constant dense<0.000000e+00> : vector<8x128xf32>
    %99 = tpu.matmul %98, %97, %cst_69 {dimension_numbers = #tpu.dot_dimension_numbers<[1], [0], [0], [1], [0, 0, 1, 1], [], []>} : vector<8x2048xbf16>, vector<2048x128xbf16>, vector<8x128xf32> -> vector<8x128xf32>
    %c0_70 = arith.constant 0 : index
    %c0_71 = arith.constant 0 : index
    %c0_72 = arith.constant 0 : index
    %100 = vector.load %arg15[%c0_70, %c0_71, %c0_72] : memref<3x1x128xf32, #tpu.memory_space<vmem>>, vector<1x1x128xf32>
    %101 = vector.shape_cast %100 : vector<1x1x128xf32> to vector<1x128xf32>
    %102 = vector.broadcast %101 : vector<1x128xf32> to vector<8x128xf32>
    %103 = arith.addf %99, %102 : vector<8x128xf32>
    %104 = arith.addf %85, %103 : vector<8x128xf32>
    %c0_73 = arith.constant 0 : index
    %c0_74 = arith.constant 0 : index
    %c0_75 = arith.constant 0 : index
    %105 = vector.load %arg18[%c0_73, %c0_74, %c0_75] : memref<3x1x128xf32, #tpu.memory_space<vmem>>, vector<1x1x128xf32>
    %106 = vector.shape_cast %105 : vector<1x1x128xf32> to vector<1x128xf32>
    %c0_76 = arith.constant 0 : index
    %c0_77 = arith.constant 0 : index
    %c0_78 = arith.constant 0 : index
    %107 = vector.load %arg19[%c0_76, %c0_77, %c0_78] : memref<3x1x128xf32, #tpu.memory_space<vmem>>, vector<1x1x128xf32>
    %108 = vector.shape_cast %107 : vector<1x1x128xf32> to vector<1x128xf32>
    %cst_79 = arith.constant dense<0.000000e+00> : vector<8xf32>
    %109 = vector.multi_reduction <add>, %104, %cst_79 [1] : vector<8x128xf32> to vector<8xf32>
    %110 = vector.shape_cast %109 : vector<8xf32> to vector<8x1xf32>
    %cst_80 = arith.constant 1.280000e+02 : f32
    %111 = vector.broadcast %cst_80 : f32 to vector<8x1xf32>
    %112 = arith.divf %110, %111 : vector<8x1xf32>
    %113 = vector.broadcast %112 : vector<8x1xf32> to vector<8x128xf32>
    %114 = arith.subf %104, %113 : vector<8x128xf32>
    %115 = arith.mulf %114, %114 : vector<8x128xf32>
    %cst_81 = arith.constant dense<0.000000e+00> : vector<8xf32>
    %116 = vector.multi_reduction <add>, %115, %cst_81 [1] : vector<8x128xf32> to vector<8xf32>
    %117 = vector.shape_cast %116 : vector<8xf32> to vector<8x1xf32>
    %cst_82 = arith.constant 1.280000e+02 : f32
    %118 = vector.broadcast %cst_82 : f32 to vector<8x1xf32>
    %119 = arith.divf %117, %118 : vector<8x1xf32>
    %120 = vector.broadcast %112 : vector<8x1xf32> to vector<8x128xf32>
    %121 = arith.subf %104, %120 : vector<8x128xf32>
    %cst_83 = arith.constant 9.99999974E-6 : f32
    %122 = vector.broadcast %cst_83 : f32 to vector<8x1xf32>
    %123 = arith.addf %119, %122 : vector<8x1xf32>
    %124 = math.rsqrt %123 : vector<8x1xf32>
    %125 = vector.broadcast %124 : vector<8x1xf32> to vector<8x128xf32>
    %126 = arith.mulf %121, %125 : vector<8x128xf32>
    %127 = vector.broadcast %106 : vector<1x128xf32> to vector<8x128xf32>
    %128 = arith.mulf %126, %127 : vector<8x128xf32>
    %129 = vector.broadcast %108 : vector<1x128xf32> to vector<8x128xf32>
    %130 = arith.addf %128, %129 : vector<8x128xf32>
    %131 = arith.truncf %130 : vector<8x128xf32> to vector<8x128xbf16>
    %132 = vector.shape_cast %131 : vector<8x128xbf16> to vector<1x8x128xbf16>
    %133 = vector.shape_cast %132 : vector<1x8x128xbf16> to vector<1x8x128xbf16>
    %134 = vector.broadcast %133 : vector<1x8x128xbf16> to vector<8x8x128xbf16>
    %c1 = arith.constant 1 : index
    %c0_84 = arith.constant 0 : index
    %c0_85 = arith.constant 0 : index
    %c0_86 = arith.constant 0 : index
    %135 = vector.load %arg4[%c1, %c0_84, %c0_85, %c0_86] : memref<3x8x16x128xbf16, #tpu.memory_space<vmem>>, vector<1x8x16x128xbf16>
    %136 = vector.shape_cast %135 : vector<1x8x16x128xbf16> to vector<8x16x128xbf16>
    "tpu.trace_start"() <{level = 10 : i32, message = "hsf,hdf->hsd"}> : () -> ()
    %cst_87 = arith.constant dense<0.000000e+00> : vector<8x8x16xf32>
    %137 = tpu.matmul %134, %136, %cst_87 {dimension_numbers = #tpu.dot_dimension_numbers<[2], [2], [1], [1], [0, 0, 0, 1, 1, 1], [0], [0]>} : vector<8x8x128xbf16>, vector<8x16x128xbf16>, vector<8x8x16xf32> -> vector<8x8x16xf32>
    "tpu.trace_stop"() : () -> ()
    %c1_88 = arith.constant 1 : index
    %c0_89 = arith.constant 0 : index
    %c0_90 = arith.constant 0 : index
    %c0_91 = arith.constant 0 : index
    %138 = vector.load %arg5[%c1_88, %c0_89, %c0_90, %c0_91] : memref<3x8x1x16xf32, #tpu.memory_space<vmem>>, vector<1x8x1x16xf32>
    %139 = vector.shape_cast %138 : vector<1x8x1x16xf32> to vector<8x1x16xf32>
    %140 = vector.broadcast %139 : vector<8x1x16xf32> to vector<8x8x16xf32>
    %141 = arith.addf %137, %140 : vector<8x8x16xf32>
    %c1_92 = arith.constant 1 : index
    %c0_93 = arith.constant 0 : index
    %c0_94 = arith.constant 0 : index
    %c0_95 = arith.constant 0 : index
    %142 = vector.load %arg6[%c1_92, %c0_93, %c0_94, %c0_95] : memref<3x8x16x128xbf16, #tpu.memory_space<vmem>>, vector<1x8x16x128xbf16>
    %143 = vector.shape_cast %142 : vector<1x8x16x128xbf16> to vector<8x16x128xbf16>
    "tpu.trace_start"() <{level = 10 : i32, message = "hsf,hdf->hsd"}> : () -> ()
    %cst_96 = arith.constant dense<0.000000e+00> : vector<8x8x16xf32>
    %144 = tpu.matmul %134, %143, %cst_96 {dimension_numbers = #tpu.dot_dimension_numbers<[2], [2], [1], [1], [0, 0, 0, 1, 1, 1], [0], [0]>} : vector<8x8x128xbf16>, vector<8x16x128xbf16>, vector<8x8x16xf32> -> vector<8x8x16xf32>
    "tpu.trace_stop"() : () -> ()
    %c1_97 = arith.constant 1 : index
    %c0_98 = arith.constant 0 : index
    %c0_99 = arith.constant 0 : index
    %c0_100 = arith.constant 0 : index
    %145 = vector.load %arg7[%c1_97, %c0_98, %c0_99, %c0_100] : memref<3x8x1x16xf32, #tpu.memory_space<vmem>>, vector<1x8x1x16xf32>
    %146 = vector.shape_cast %145 : vector<1x8x1x16xf32> to vector<8x1x16xf32>
    %147 = vector.broadcast %146 : vector<8x1x16xf32> to vector<8x8x16xf32>
    %148 = arith.addf %144, %147 : vector<8x8x16xf32>
    %c1_101 = arith.constant 1 : index
    %c0_102 = arith.constant 0 : index
    %c0_103 = arith.constant 0 : index
    %c0_104 = arith.constant 0 : index
    %149 = vector.load %arg8[%c1_101, %c0_102, %c0_103, %c0_104] : memref<3x8x16x128xbf16, #tpu.memory_space<vmem>>, vector<1x8x16x128xbf16>
    %150 = vector.shape_cast %149 : vector<1x8x16x128xbf16> to vector<8x16x128xbf16>
    "tpu.trace_start"() <{level = 10 : i32, message = "hsf,hdf->hsd"}> : () -> ()
    %cst_105 = arith.constant dense<0.000000e+00> : vector<8x8x16xf32>
    %151 = tpu.matmul %134, %150, %cst_105 {dimension_numbers = #tpu.dot_dimension_numbers<[2], [2], [1], [1], [0, 0, 0, 1, 1, 1], [0], [0]>} : vector<8x8x128xbf16>, vector<8x16x128xbf16>, vector<8x8x16xf32> -> vector<8x8x16xf32>
    "tpu.trace_stop"() : () -> ()
    %c1_106 = arith.constant 1 : index
    %c0_107 = arith.constant 0 : index
    %c0_108 = arith.constant 0 : index
    %c0_109 = arith.constant 0 : index
    %152 = vector.load %arg9[%c1_106, %c0_107, %c0_108, %c0_109] : memref<3x8x1x16xf32, #tpu.memory_space<vmem>>, vector<1x8x1x16xf32>
    %153 = vector.shape_cast %152 : vector<1x8x1x16xf32> to vector<8x1x16xf32>
    %154 = vector.broadcast %153 : vector<8x1x16xf32> to vector<8x8x16xf32>
    %155 = arith.addf %151, %154 : vector<8x8x16xf32>
    %156 = arith.truncf %141 : vector<8x8x16xf32> to vector<8x8x16xbf16>
    %157 = arith.truncf %148 : vector<8x8x16xf32> to vector<8x8x16xbf16>
    "tpu.trace_start"() <{level = 10 : i32, message = "hsd,htd->hst"}> : () -> ()
    %cst_110 = arith.constant dense<0.000000e+00> : vector<8x8x8xf32>
    %158 = tpu.matmul %156, %157, %cst_110 {dimension_numbers = #tpu.dot_dimension_numbers<[2], [2], [1], [1], [0, 0, 0, 1, 1, 1], [0], [0]>} : vector<8x8x16xbf16>, vector<8x8x16xbf16>, vector<8x8x8xf32> -> vector<8x8x8xf32>
    "tpu.trace_stop"() : () -> ()
    %cst_111 = arith.constant dense<0xFF800000> : vector<8x8xf32>
    %159 = vector.multi_reduction <maximumf>, %158, %cst_111 [2] : vector<8x8x8xf32> to vector<8x8xf32>
    %160 = vector.shape_cast %159 : vector<8x8xf32> to vector<8x8x1xf32>
    %161 = vector.broadcast %160 : vector<8x8x1xf32> to vector<8x8x8xf32>
    %162 = arith.subf %158, %161 : vector<8x8x8xf32>
    %163 = math.exp %162 : vector<8x8x8xf32>
    %cst_112 = arith.constant dense<0.000000e+00> : vector<8x8xf32>
    %164 = vector.multi_reduction <add>, %163, %cst_112 [2] : vector<8x8x8xf32> to vector<8x8xf32>
    %165 = vector.shape_cast %164 : vector<8x8xf32> to vector<8x8x1xf32>
    %166 = vector.broadcast %165 : vector<8x8x1xf32> to vector<8x8x8xf32>
    %167 = arith.divf %163, %166 : vector<8x8x8xf32>
    %168 = arith.truncf %167 : vector<8x8x8xf32> to vector<8x8x8xbf16>
    %169 = arith.truncf %155 : vector<8x8x16xf32> to vector<8x8x16xbf16>
    "tpu.trace_start"() <{level = 10 : i32, message = "hst,htd->hsd"}> : () -> ()
    %cst_113 = arith.constant dense<0.000000e+00> : vector<8x8x16xf32>
    %170 = tpu.matmul %168, %169, %cst_113 {dimension_numbers = #tpu.dot_dimension_numbers<[2], [1], [1], [2], [0, 0, 0, 1, 1, 2], [0], [0]>} : vector<8x8x8xbf16>, vector<8x8x16xbf16>, vector<8x8x16xf32> -> vector<8x8x16xf32>
    "tpu.trace_stop"() : () -> ()
    %171 = arith.truncf %170 : vector<8x8x16xf32> to vector<8x8x16xbf16>
    %c1_114 = arith.constant 1 : index
    %c0_115 = arith.constant 0 : index
    %c0_116 = arith.constant 0 : index
    %c0_117 = arith.constant 0 : index
    %172 = vector.load %arg10[%c1_114, %c0_115, %c0_116, %c0_117] : memref<3x8x16x128xbf16, #tpu.memory_space<vmem>>, vector<1x8x16x128xbf16>
    %173 = vector.shape_cast %172 : vector<1x8x16x128xbf16> to vector<8x16x128xbf16>
    "tpu.trace_start"() <{level = 10 : i32, message = "hsd,hdf->hsf"}> : () -> ()
    %cst_118 = arith.constant dense<0.000000e+00> : vector<8x8x128xf32>
    %174 = tpu.matmul %171, %173, %cst_118 {dimension_numbers = #tpu.dot_dimension_numbers<[2], [1], [1], [2], [0, 0, 0, 1, 1, 2], [0], [0]>} : vector<8x8x16xbf16>, vector<8x16x128xbf16>, vector<8x8x128xf32> -> vector<8x8x128xf32>
    "tpu.trace_stop"() : () -> ()
    %cst_119 = arith.constant dense<0.000000e+00> : vector<8x128xf32>
    %175 = vector.multi_reduction <add>, %174, %cst_119 [0] : vector<8x8x128xf32> to vector<8x128xf32>
    %c1_120 = arith.constant 1 : index
    %c0_121 = arith.constant 0 : index
    %c0_122 = arith.constant 0 : index
    %176 = vector.load %arg11[%c1_120, %c0_121, %c0_122] : memref<3x1x128xf32, #tpu.memory_space<vmem>>, vector<1x1x128xf32>
    %177 = vector.shape_cast %176 : vector<1x1x128xf32> to vector<1x128xf32>
    %178 = vector.broadcast %177 : vector<1x128xf32> to vector<8x128xf32>
    %179 = arith.addf %175, %178 : vector<8x128xf32>
    %180 = arith.addf %130, %179 : vector<8x128xf32>
    %c1_123 = arith.constant 1 : index
    %c0_124 = arith.constant 0 : index
    %c0_125 = arith.constant 0 : index
    %181 = vector.load %arg16[%c1_123, %c0_124, %c0_125] : memref<3x1x128xf32, #tpu.memory_space<vmem>>, vector<1x1x128xf32>
    %182 = vector.shape_cast %181 : vector<1x1x128xf32> to vector<1x128xf32>
    %c1_126 = arith.constant 1 : index
    %c0_127 = arith.constant 0 : index
    %c0_128 = arith.constant 0 : index
    %183 = vector.load %arg17[%c1_126, %c0_127, %c0_128] : memref<3x1x128xf32, #tpu.memory_space<vmem>>, vector<1x1x128xf32>
    %184 = vector.shape_cast %183 : vector<1x1x128xf32> to vector<1x128xf32>
    %cst_129 = arith.constant dense<0.000000e+00> : vector<8xf32>
    %185 = vector.multi_reduction <add>, %180, %cst_129 [1] : vector<8x128xf32> to vector<8xf32>
    %186 = vector.shape_cast %185 : vector<8xf32> to vector<8x1xf32>
    %cst_130 = arith.constant 1.280000e+02 : f32
    %187 = vector.broadcast %cst_130 : f32 to vector<8x1xf32>
    %188 = arith.divf %186, %187 : vector<8x1xf32>
    %189 = vector.broadcast %188 : vector<8x1xf32> to vector<8x128xf32>
    %190 = arith.subf %180, %189 : vector<8x128xf32>
    %191 = arith.mulf %190, %190 : vector<8x128xf32>
    %cst_131 = arith.constant dense<0.000000e+00> : vector<8xf32>
    %192 = vector.multi_reduction <add>, %191, %cst_131 [1] : vector<8x128xf32> to vector<8xf32>
    %193 = vector.shape_cast %192 : vector<8xf32> to vector<8x1xf32>
    %cst_132 = arith.constant 1.280000e+02 : f32
    %194 = vector.broadcast %cst_132 : f32 to vector<8x1xf32>
    %195 = arith.divf %193, %194 : vector<8x1xf32>
    %196 = vector.broadcast %188 : vector<8x1xf32> to vector<8x128xf32>
    %197 = arith.subf %180, %196 : vector<8x128xf32>
    %cst_133 = arith.constant 9.99999974E-6 : f32
    %198 = vector.broadcast %cst_133 : f32 to vector<8x1xf32>
    %199 = arith.addf %195, %198 : vector<8x1xf32>
    %200 = math.rsqrt %199 : vector<8x1xf32>
    %201 = vector.broadcast %200 : vector<8x1xf32> to vector<8x128xf32>
    %202 = arith.mulf %197, %201 : vector<8x128xf32>
    %203 = vector.broadcast %182 : vector<1x128xf32> to vector<8x128xf32>
    %204 = arith.mulf %202, %203 : vector<8x128xf32>
    %205 = vector.broadcast %184 : vector<1x128xf32> to vector<8x128xf32>
    %206 = arith.addf %204, %205 : vector<8x128xf32>
    %c1_134 = arith.constant 1 : index
    %c0_135 = arith.constant 0 : index
    %c0_136 = arith.constant 0 : index
    %207 = vector.load %arg12[%c1_134, %c0_135, %c0_136] : memref<3x128x2048xbf16, #tpu.memory_space<vmem>>, vector<1x128x2048xbf16>
    %208 = vector.shape_cast %207 : vector<1x128x2048xbf16> to vector<128x2048xbf16>
    %209 = arith.truncf %206 : vector<8x128xf32> to vector<8x128xbf16>
    %cst_137 = arith.constant dense<0.000000e+00> : vector<8x2048xf32>
    %210 = tpu.matmul %209, %208, %cst_137 {dimension_numbers = #tpu.dot_dimension_numbers<[1], [0], [0], [1], [0, 0, 1, 1], [], []>} : vector<8x128xbf16>, vector<128x2048xbf16>, vector<8x2048xf32> -> vector<8x2048xf32>
    %c1_138 = arith.constant 1 : index
    %c0_139 = arith.constant 0 : index
    %c0_140 = arith.constant 0 : index
    %211 = vector.load %arg13[%c1_138, %c0_139, %c0_140] : memref<3x1x2048xf32, #tpu.memory_space<vmem>>, vector<1x1x2048xf32>
    %212 = vector.shape_cast %211 : vector<1x1x2048xf32> to vector<1x2048xf32>
    %213 = vector.broadcast %212 : vector<1x2048xf32> to vector<8x2048xf32>
    %214 = arith.addf %210, %213 : vector<8x2048xf32>
    %cst_141 = arith.constant 0.000000e+00 : f32
    %215 = vector.broadcast %cst_141 : f32 to vector<8x2048xf32>
    %216 = arith.maximumf %214, %215 : vector<8x2048xf32>
    %c1_142 = arith.constant 1 : index
    %c0_143 = arith.constant 0 : index
    %c0_144 = arith.constant 0 : index
    %217 = vector.load %arg14[%c1_142, %c0_143, %c0_144] : memref<3x2048x128xbf16, #tpu.memory_space<vmem>>, vector<1x2048x128xbf16>
    %218 = vector.shape_cast %217 : vector<1x2048x128xbf16> to vector<2048x128xbf16>
    %219 = arith.truncf %216 : vector<8x2048xf32> to vector<8x2048xbf16>
    %cst_145 = arith.constant dense<0.000000e+00> : vector<8x128xf32>
    %220 = tpu.matmul %219, %218, %cst_145 {dimension_numbers = #tpu.dot_dimension_numbers<[1], [0], [0], [1], [0, 0, 1, 1], [], []>} : vector<8x2048xbf16>, vector<2048x128xbf16>, vector<8x128xf32> -> vector<8x128xf32>
    %c1_146 = arith.constant 1 : index
    %c0_147 = arith.constant 0 : index
    %c0_148 = arith.constant 0 : index
    %221 = vector.load %arg15[%c1_146, %c0_147, %c0_148] : memref<3x1x128xf32, #tpu.memory_space<vmem>>, vector<1x1x128xf32>
    %222 = vector.shape_cast %221 : vector<1x1x128xf32> to vector<1x128xf32>
    %223 = vector.broadcast %222 : vector<1x128xf32> to vector<8x128xf32>
    %224 = arith.addf %220, %223 : vector<8x128xf32>
    %225 = arith.addf %206, %224 : vector<8x128xf32>
    %c1_149 = arith.constant 1 : index
    %c0_150 = arith.constant 0 : index
    %c0_151 = arith.constant 0 : index
    %226 = vector.load %arg18[%c1_149, %c0_150, %c0_151] : memref<3x1x128xf32, #tpu.memory_space<vmem>>, vector<1x1x128xf32>
    %227 = vector.shape_cast %226 : vector<1x1x128xf32> to vector<1x128xf32>
    %c1_152 = arith.constant 1 : index
    %c0_153 = arith.constant 0 : index
    %c0_154 = arith.constant 0 : index
    %228 = vector.load %arg19[%c1_152, %c0_153, %c0_154] : memref<3x1x128xf32, #tpu.memory_space<vmem>>, vector<1x1x128xf32>
    %229 = vector.shape_cast %228 : vector<1x1x128xf32> to vector<1x128xf32>
    %cst_155 = arith.constant dense<0.000000e+00> : vector<8xf32>
    %230 = vector.multi_reduction <add>, %225, %cst_155 [1] : vector<8x128xf32> to vector<8xf32>
    %231 = vector.shape_cast %230 : vector<8xf32> to vector<8x1xf32>
    %cst_156 = arith.constant 1.280000e+02 : f32
    %232 = vector.broadcast %cst_156 : f32 to vector<8x1xf32>
    %233 = arith.divf %231, %232 : vector<8x1xf32>
    %234 = vector.broadcast %233 : vector<8x1xf32> to vector<8x128xf32>
    %235 = arith.subf %225, %234 : vector<8x128xf32>
    %236 = arith.mulf %235, %235 : vector<8x128xf32>
    %cst_157 = arith.constant dense<0.000000e+00> : vector<8xf32>
    %237 = vector.multi_reduction <add>, %236, %cst_157 [1] : vector<8x128xf32> to vector<8xf32>
    %238 = vector.shape_cast %237 : vector<8xf32> to vector<8x1xf32>
    %cst_158 = arith.constant 1.280000e+02 : f32
    %239 = vector.broadcast %cst_158 : f32 to vector<8x1xf32>
    %240 = arith.divf %238, %239 : vector<8x1xf32>
    %241 = vector.broadcast %233 : vector<8x1xf32> to vector<8x128xf32>
    %242 = arith.subf %225, %241 : vector<8x128xf32>
    %cst_159 = arith.constant 9.99999974E-6 : f32
    %243 = vector.broadcast %cst_159 : f32 to vector<8x1xf32>
    %244 = arith.addf %240, %243 : vector<8x1xf32>
    %245 = math.rsqrt %244 : vector<8x1xf32>
    %246 = vector.broadcast %245 : vector<8x1xf32> to vector<8x128xf32>
    %247 = arith.mulf %242, %246 : vector<8x128xf32>
    %248 = vector.broadcast %227 : vector<1x128xf32> to vector<8x128xf32>
    %249 = arith.mulf %247, %248 : vector<8x128xf32>
    %250 = vector.broadcast %229 : vector<1x128xf32> to vector<8x128xf32>
    %251 = arith.addf %249, %250 : vector<8x128xf32>
    %252 = arith.truncf %251 : vector<8x128xf32> to vector<8x128xbf16>
    %253 = vector.shape_cast %252 : vector<8x128xbf16> to vector<1x8x128xbf16>
    %254 = vector.shape_cast %253 : vector<1x8x128xbf16> to vector<1x8x128xbf16>
    %255 = vector.broadcast %254 : vector<1x8x128xbf16> to vector<8x8x128xbf16>
    %c2 = arith.constant 2 : index
    %c0_160 = arith.constant 0 : index
    %c0_161 = arith.constant 0 : index
    %c0_162 = arith.constant 0 : index
    %256 = vector.load %arg4[%c2, %c0_160, %c0_161, %c0_162] : memref<3x8x16x128xbf16, #tpu.memory_space<vmem>>, vector<1x8x16x128xbf16>
    %257 = vector.shape_cast %256 : vector<1x8x16x128xbf16> to vector<8x16x128xbf16>
    "tpu.trace_start"() <{level = 10 : i32, message = "hsf,hdf->hsd"}> : () -> ()
    %cst_163 = arith.constant dense<0.000000e+00> : vector<8x8x16xf32>
    %258 = tpu.matmul %255, %257, %cst_163 {dimension_numbers = #tpu.dot_dimension_numbers<[2], [2], [1], [1], [0, 0, 0, 1, 1, 1], [0], [0]>} : vector<8x8x128xbf16>, vector<8x16x128xbf16>, vector<8x8x16xf32> -> vector<8x8x16xf32>
    "tpu.trace_stop"() : () -> ()
    %c2_164 = arith.constant 2 : index
    %c0_165 = arith.constant 0 : index
    %c0_166 = arith.constant 0 : index
    %c0_167 = arith.constant 0 : index
    %259 = vector.load %arg5[%c2_164, %c0_165, %c0_166, %c0_167] : memref<3x8x1x16xf32, #tpu.memory_space<vmem>>, vector<1x8x1x16xf32>
    %260 = vector.shape_cast %259 : vector<1x8x1x16xf32> to vector<8x1x16xf32>
    %261 = vector.broadcast %260 : vector<8x1x16xf32> to vector<8x8x16xf32>
    %262 = arith.addf %258, %261 : vector<8x8x16xf32>
    %c2_168 = arith.constant 2 : index
    %c0_169 = arith.constant 0 : index
    %c0_170 = arith.constant 0 : index
    %c0_171 = arith.constant 0 : index
    %263 = vector.load %arg6[%c2_168, %c0_169, %c0_170, %c0_171] : memref<3x8x16x128xbf16, #tpu.memory_space<vmem>>, vector<1x8x16x128xbf16>
    %264 = vector.shape_cast %263 : vector<1x8x16x128xbf16> to vector<8x16x128xbf16>
    "tpu.trace_start"() <{level = 10 : i32, message = "hsf,hdf->hsd"}> : () -> ()
    %cst_172 = arith.constant dense<0.000000e+00> : vector<8x8x16xf32>
    %265 = tpu.matmul %255, %264, %cst_172 {dimension_numbers = #tpu.dot_dimension_numbers<[2], [2], [1], [1], [0, 0, 0, 1, 1, 1], [0], [0]>} : vector<8x8x128xbf16>, vector<8x16x128xbf16>, vector<8x8x16xf32> -> vector<8x8x16xf32>
    "tpu.trace_stop"() : () -> ()
    %c2_173 = arith.constant 2 : index
    %c0_174 = arith.constant 0 : index
    %c0_175 = arith.constant 0 : index
    %c0_176 = arith.constant 0 : index
    %266 = vector.load %arg7[%c2_173, %c0_174, %c0_175, %c0_176] : memref<3x8x1x16xf32, #tpu.memory_space<vmem>>, vector<1x8x1x16xf32>
    %267 = vector.shape_cast %266 : vector<1x8x1x16xf32> to vector<8x1x16xf32>
    %268 = vector.broadcast %267 : vector<8x1x16xf32> to vector<8x8x16xf32>
    %269 = arith.addf %265, %268 : vector<8x8x16xf32>
    %c2_177 = arith.constant 2 : index
    %c0_178 = arith.constant 0 : index
    %c0_179 = arith.constant 0 : index
    %c0_180 = arith.constant 0 : index
    %270 = vector.load %arg8[%c2_177, %c0_178, %c0_179, %c0_180] : memref<3x8x16x128xbf16, #tpu.memory_space<vmem>>, vector<1x8x16x128xbf16>
    %271 = vector.shape_cast %270 : vector<1x8x16x128xbf16> to vector<8x16x128xbf16>
    "tpu.trace_start"() <{level = 10 : i32, message = "hsf,hdf->hsd"}> : () -> ()
    %cst_181 = arith.constant dense<0.000000e+00> : vector<8x8x16xf32>
    %272 = tpu.matmul %255, %271, %cst_181 {dimension_numbers = #tpu.dot_dimension_numbers<[2], [2], [1], [1], [0, 0, 0, 1, 1, 1], [0], [0]>} : vector<8x8x128xbf16>, vector<8x16x128xbf16>, vector<8x8x16xf32> -> vector<8x8x16xf32>
    "tpu.trace_stop"() : () -> ()
    %c2_182 = arith.constant 2 : index
    %c0_183 = arith.constant 0 : index
    %c0_184 = arith.constant 0 : index
    %c0_185 = arith.constant 0 : index
    %273 = vector.load %arg9[%c2_182, %c0_183, %c0_184, %c0_185] : memref<3x8x1x16xf32, #tpu.memory_space<vmem>>, vector<1x8x1x16xf32>
    %274 = vector.shape_cast %273 : vector<1x8x1x16xf32> to vector<8x1x16xf32>
    %275 = vector.broadcast %274 : vector<8x1x16xf32> to vector<8x8x16xf32>
    %276 = arith.addf %272, %275 : vector<8x8x16xf32>
    %277 = arith.truncf %262 : vector<8x8x16xf32> to vector<8x8x16xbf16>
    %278 = arith.truncf %269 : vector<8x8x16xf32> to vector<8x8x16xbf16>
    "tpu.trace_start"() <{level = 10 : i32, message = "hsd,htd->hst"}> : () -> ()
    %cst_186 = arith.constant dense<0.000000e+00> : vector<8x8x8xf32>
    %279 = tpu.matmul %277, %278, %cst_186 {dimension_numbers = #tpu.dot_dimension_numbers<[2], [2], [1], [1], [0, 0, 0, 1, 1, 1], [0], [0]>} : vector<8x8x16xbf16>, vector<8x8x16xbf16>, vector<8x8x8xf32> -> vector<8x8x8xf32>
    "tpu.trace_stop"() : () -> ()
    %cst_187 = arith.constant dense<0xFF800000> : vector<8x8xf32>
    %280 = vector.multi_reduction <maximumf>, %279, %cst_187 [2] : vector<8x8x8xf32> to vector<8x8xf32>
    %281 = vector.shape_cast %280 : vector<8x8xf32> to vector<8x8x1xf32>
    %282 = vector.broadcast %281 : vector<8x8x1xf32> to vector<8x8x8xf32>
    %283 = arith.subf %279, %282 : vector<8x8x8xf32>
    %284 = math.exp %283 : vector<8x8x8xf32>
    %cst_188 = arith.constant dense<0.000000e+00> : vector<8x8xf32>
    %285 = vector.multi_reduction <add>, %284, %cst_188 [2] : vector<8x8x8xf32> to vector<8x8xf32>
    %286 = vector.shape_cast %285 : vector<8x8xf32> to vector<8x8x1xf32>
    %287 = vector.broadcast %286 : vector<8x8x1xf32> to vector<8x8x8xf32>
    %288 = arith.divf %284, %287 : vector<8x8x8xf32>
    %289 = arith.truncf %288 : vector<8x8x8xf32> to vector<8x8x8xbf16>
    %290 = arith.truncf %276 : vector<8x8x16xf32> to vector<8x8x16xbf16>
    "tpu.trace_start"() <{level = 10 : i32, message = "hst,htd->hsd"}> : () -> ()
    %cst_189 = arith.constant dense<0.000000e+00> : vector<8x8x16xf32>
    %291 = tpu.matmul %289, %290, %cst_189 {dimension_numbers = #tpu.dot_dimension_numbers<[2], [1], [1], [2], [0, 0, 0, 1, 1, 2], [0], [0]>} : vector<8x8x8xbf16>, vector<8x8x16xbf16>, vector<8x8x16xf32> -> vector<8x8x16xf32>
    "tpu.trace_stop"() : () -> ()
    %292 = arith.truncf %291 : vector<8x8x16xf32> to vector<8x8x16xbf16>
    %c2_190 = arith.constant 2 : index
    %c0_191 = arith.constant 0 : index
    %c0_192 = arith.constant 0 : index
    %c0_193 = arith.constant 0 : index
    %293 = vector.load %arg10[%c2_190, %c0_191, %c0_192, %c0_193] : memref<3x8x16x128xbf16, #tpu.memory_space<vmem>>, vector<1x8x16x128xbf16>
    %294 = vector.shape_cast %293 : vector<1x8x16x128xbf16> to vector<8x16x128xbf16>
    "tpu.trace_start"() <{level = 10 : i32, message = "hsd,hdf->hsf"}> : () -> ()
    %cst_194 = arith.constant dense<0.000000e+00> : vector<8x8x128xf32>
    %295 = tpu.matmul %292, %294, %cst_194 {dimension_numbers = #tpu.dot_dimension_numbers<[2], [1], [1], [2], [0, 0, 0, 1, 1, 2], [0], [0]>} : vector<8x8x16xbf16>, vector<8x16x128xbf16>, vector<8x8x128xf32> -> vector<8x8x128xf32>
    "tpu.trace_stop"() : () -> ()
    %cst_195 = arith.constant dense<0.000000e+00> : vector<8x128xf32>
    %296 = vector.multi_reduction <add>, %295, %cst_195 [0] : vector<8x8x128xf32> to vector<8x128xf32>
    %c2_196 = arith.constant 2 : index
    %c0_197 = arith.constant 0 : index
    %c0_198 = arith.constant 0 : index
    %297 = vector.load %arg11[%c2_196, %c0_197, %c0_198] : memref<3x1x128xf32, #tpu.memory_space<vmem>>, vector<1x1x128xf32>
    %298 = vector.shape_cast %297 : vector<1x1x128xf32> to vector<1x128xf32>
    %299 = vector.broadcast %298 : vector<1x128xf32> to vector<8x128xf32>
    %300 = arith.addf %296, %299 : vector<8x128xf32>
    %301 = arith.addf %251, %300 : vector<8x128xf32>
    %c2_199 = arith.constant 2 : index
    %c0_200 = arith.constant 0 : index
    %c0_201 = arith.constant 0 : index
    %302 = vector.load %arg16[%c2_199, %c0_200, %c0_201] : memref<3x1x128xf32, #tpu.memory_space<vmem>>, vector<1x1x128xf32>
    %303 = vector.shape_cast %302 : vector<1x1x128xf32> to vector<1x128xf32>
    %c2_202 = arith.constant 2 : index
    %c0_203 = arith.constant 0 : index
    %c0_204 = arith.constant 0 : index
    %304 = vector.load %arg17[%c2_202, %c0_203, %c0_204] : memref<3x1x128xf32, #tpu.memory_space<vmem>>, vector<1x1x128xf32>
    %305 = vector.shape_cast %304 : vector<1x1x128xf32> to vector<1x128xf32>
    %cst_205 = arith.constant dense<0.000000e+00> : vector<8xf32>
    %306 = vector.multi_reduction <add>, %301, %cst_205 [1] : vector<8x128xf32> to vector<8xf32>
    %307 = vector.shape_cast %306 : vector<8xf32> to vector<8x1xf32>
    %cst_206 = arith.constant 1.280000e+02 : f32
    %308 = vector.broadcast %cst_206 : f32 to vector<8x1xf32>
    %309 = arith.divf %307, %308 : vector<8x1xf32>
    %310 = vector.broadcast %309 : vector<8x1xf32> to vector<8x128xf32>
    %311 = arith.subf %301, %310 : vector<8x128xf32>
    %312 = arith.mulf %311, %311 : vector<8x128xf32>
    %cst_207 = arith.constant dense<0.000000e+00> : vector<8xf32>
    %313 = vector.multi_reduction <add>, %312, %cst_207 [1] : vector<8x128xf32> to vector<8xf32>
    %314 = vector.shape_cast %313 : vector<8xf32> to vector<8x1xf32>
    %cst_208 = arith.constant 1.280000e+02 : f32
    %315 = vector.broadcast %cst_208 : f32 to vector<8x1xf32>
    %316 = arith.divf %314, %315 : vector<8x1xf32>
    %317 = vector.broadcast %309 : vector<8x1xf32> to vector<8x128xf32>
    %318 = arith.subf %301, %317 : vector<8x128xf32>
    %cst_209 = arith.constant 9.99999974E-6 : f32
    %319 = vector.broadcast %cst_209 : f32 to vector<8x1xf32>
    %320 = arith.addf %316, %319 : vector<8x1xf32>
    %321 = math.rsqrt %320 : vector<8x1xf32>
    %322 = vector.broadcast %321 : vector<8x1xf32> to vector<8x128xf32>
    %323 = arith.mulf %318, %322 : vector<8x128xf32>
    %324 = vector.broadcast %303 : vector<1x128xf32> to vector<8x128xf32>
    %325 = arith.mulf %323, %324 : vector<8x128xf32>
    %326 = vector.broadcast %305 : vector<1x128xf32> to vector<8x128xf32>
    %327 = arith.addf %325, %326 : vector<8x128xf32>
    %c2_210 = arith.constant 2 : index
    %c0_211 = arith.constant 0 : index
    %c0_212 = arith.constant 0 : index
    %328 = vector.load %arg12[%c2_210, %c0_211, %c0_212] : memref<3x128x2048xbf16, #tpu.memory_space<vmem>>, vector<1x128x2048xbf16>
    %329 = vector.shape_cast %328 : vector<1x128x2048xbf16> to vector<128x2048xbf16>
    %330 = arith.truncf %327 : vector<8x128xf32> to vector<8x128xbf16>
    %cst_213 = arith.constant dense<0.000000e+00> : vector<8x2048xf32>
    %331 = tpu.matmul %330, %329, %cst_213 {dimension_numbers = #tpu.dot_dimension_numbers<[1], [0], [0], [1], [0, 0, 1, 1], [], []>} : vector<8x128xbf16>, vector<128x2048xbf16>, vector<8x2048xf32> -> vector<8x2048xf32>
    %c2_214 = arith.constant 2 : index
    %c0_215 = arith.constant 0 : index
    %c0_216 = arith.constant 0 : index
    %332 = vector.load %arg13[%c2_214, %c0_215, %c0_216] : memref<3x1x2048xf32, #tpu.memory_space<vmem>>, vector<1x1x2048xf32>
    %333 = vector.shape_cast %332 : vector<1x1x2048xf32> to vector<1x2048xf32>
    %334 = vector.broadcast %333 : vector<1x2048xf32> to vector<8x2048xf32>
    %335 = arith.addf %331, %334 : vector<8x2048xf32>
    %cst_217 = arith.constant 0.000000e+00 : f32
    %336 = vector.broadcast %cst_217 : f32 to vector<8x2048xf32>
    %337 = arith.maximumf %335, %336 : vector<8x2048xf32>
    %c2_218 = arith.constant 2 : index
    %c0_219 = arith.constant 0 : index
    %c0_220 = arith.constant 0 : index
    %338 = vector.load %arg14[%c2_218, %c0_219, %c0_220] : memref<3x2048x128xbf16, #tpu.memory_space<vmem>>, vector<1x2048x128xbf16>
    %339 = vector.shape_cast %338 : vector<1x2048x128xbf16> to vector<2048x128xbf16>
    %340 = arith.truncf %337 : vector<8x2048xf32> to vector<8x2048xbf16>
    %cst_221 = arith.constant dense<0.000000e+00> : vector<8x128xf32>
    %341 = tpu.matmul %340, %339, %cst_221 {dimension_numbers = #tpu.dot_dimension_numbers<[1], [0], [0], [1], [0, 0, 1, 1], [], []>} : vector<8x2048xbf16>, vector<2048x128xbf16>, vector<8x128xf32> -> vector<8x128xf32>
    %c2_222 = arith.constant 2 : index
    %c0_223 = arith.constant 0 : index
    %c0_224 = arith.constant 0 : index
    %342 = vector.load %arg15[%c2_222, %c0_223, %c0_224] : memref<3x1x128xf32, #tpu.memory_space<vmem>>, vector<1x1x128xf32>
    %343 = vector.shape_cast %342 : vector<1x1x128xf32> to vector<1x128xf32>
    %344 = vector.broadcast %343 : vector<1x128xf32> to vector<8x128xf32>
    %345 = arith.addf %341, %344 : vector<8x128xf32>
    %346 = arith.addf %327, %345 : vector<8x128xf32>
    %c2_225 = arith.constant 2 : index
    %c0_226 = arith.constant 0 : index
    %c0_227 = arith.constant 0 : index
    %347 = vector.load %arg18[%c2_225, %c0_226, %c0_227] : memref<3x1x128xf32, #tpu.memory_space<vmem>>, vector<1x1x128xf32>
    %348 = vector.shape_cast %347 : vector<1x1x128xf32> to vector<1x128xf32>
    %c2_228 = arith.constant 2 : index
    %c0_229 = arith.constant 0 : index
    %c0_230 = arith.constant 0 : index
    %349 = vector.load %arg19[%c2_228, %c0_229, %c0_230] : memref<3x1x128xf32, #tpu.memory_space<vmem>>, vector<1x1x128xf32>
    %350 = vector.shape_cast %349 : vector<1x1x128xf32> to vector<1x128xf32>
    %cst_231 = arith.constant dense<0.000000e+00> : vector<8xf32>
    %351 = vector.multi_reduction <add>, %346, %cst_231 [1] : vector<8x128xf32> to vector<8xf32>
    %352 = vector.shape_cast %351 : vector<8xf32> to vector<8x1xf32>
    %cst_232 = arith.constant 1.280000e+02 : f32
    %353 = vector.broadcast %cst_232 : f32 to vector<8x1xf32>
    %354 = arith.divf %352, %353 : vector<8x1xf32>
    %355 = vector.broadcast %354 : vector<8x1xf32> to vector<8x128xf32>
    %356 = arith.subf %346, %355 : vector<8x128xf32>
    %357 = arith.mulf %356, %356 : vector<8x128xf32>
    %cst_233 = arith.constant dense<0.000000e+00> : vector<8xf32>
    %358 = vector.multi_reduction <add>, %357, %cst_233 [1] : vector<8x128xf32> to vector<8xf32>
    %359 = vector.shape_cast %358 : vector<8xf32> to vector<8x1xf32>
    %cst_234 = arith.constant 1.280000e+02 : f32
    %360 = vector.broadcast %cst_234 : f32 to vector<8x1xf32>
    %361 = arith.divf %359, %360 : vector<8x1xf32>
    %362 = vector.broadcast %354 : vector<8x1xf32> to vector<8x128xf32>
    %363 = arith.subf %346, %362 : vector<8x128xf32>
    %cst_235 = arith.constant 9.99999974E-6 : f32
    %364 = vector.broadcast %cst_235 : f32 to vector<8x1xf32>
    %365 = arith.addf %361, %364 : vector<8x1xf32>
    %366 = math.rsqrt %365 : vector<8x1xf32>
    %367 = vector.broadcast %366 : vector<8x1xf32> to vector<8x128xf32>
    %368 = arith.mulf %363, %367 : vector<8x128xf32>
    %369 = vector.broadcast %348 : vector<1x128xf32> to vector<8x128xf32>
    %370 = arith.mulf %368, %369 : vector<8x128xf32>
    %371 = vector.broadcast %350 : vector<1x128xf32> to vector<8x128xf32>
    %372 = arith.addf %370, %371 : vector<8x128xf32>
    %cst_236 = arith.constant dense<0.000000e+00> : vector<128xf32>
    %373 = vector.multi_reduction <add>, %372, %cst_236 [0] : vector<8x128xf32> to vector<128xf32>
    %374 = vector.shape_cast %373 : vector<128xf32> to vector<1x128xf32>
    %cst_237 = arith.constant 8.000000e+00 : f32
    %375 = vector.broadcast %cst_237 : f32 to vector<1x128xf32>
    %376 = arith.divf %374, %375 : vector<1x128xf32>
    %c0_238 = arith.constant 0 : index
    %c0_239 = arith.constant 0 : index
    %c0_240 = arith.constant 0 : index
    %377 = vector.load %arg24[%c0_238, %c0_239, %c0_240] : memref<1x1x128xf32, #tpu.memory_space<vmem>>, vector<1x1x128xf32>
    %378 = vector.shape_cast %377 : vector<1x1x128xf32> to vector<1x128xf32>
    %379 = vector.shape_cast %376 : vector<1x128xf32> to vector<1x1x128xf32>
    tpu.vector_store %arg24[%c0_238, %c0_239, %c0_240], %379 {strides = array<i32>} : memref<1x1x128xf32, #tpu.memory_space<vmem>>, vector<1x1x128xf32>,
    %c0_241 = arith.constant 0 : index
    %c0_242 = arith.constant 0 : index
    %380 = vector.load %arg20[%c0_241, %c0_242] : memref<128x64xbf16, #tpu.memory_space<vmem>>, vector<128x64xbf16>
    %381 = arith.truncf %376 : vector<1x128xf32> to vector<1x128xbf16>
    %cst_243 = arith.constant dense<0.000000e+00> : vector<1x64xf32>
    %382 = tpu.matmul %381, %380, %cst_243 {dimension_numbers = #tpu.dot_dimension_numbers<[1], [0], [0], [1], [0, 0, 1, 1], [], []>} : vector<1x128xbf16>, vector<128x64xbf16>, vector<1x64xf32> -> vector<1x64xf32>
    %c0_244 = arith.constant 0 : index
    %c0_245 = arith.constant 0 : index
    %383 = vector.load %arg21[%c0_244, %c0_245] : memref<1x64xf32, #tpu.memory_space<vmem>>, vector<1x64xf32>
    %384 = arith.addf %382, %383 : vector<1x64xf32>
    %cst_246 = arith.constant 0.000000e+00 : f32
    %385 = vector.broadcast %cst_246 : f32 to vector<1x64xf32>
    %386 = arith.maximumf %384, %385 : vector<1x64xf32>
    %c0_247 = arith.constant 0 : index
    %c0_248 = arith.constant 0 : index
    %387 = vector.load %arg22[%c0_247, %c0_248] : memref<64x10xbf16, #tpu.memory_space<vmem>>, vector<64x10xbf16>
    %388 = arith.truncf %386 : vector<1x64xf32> to vector<1x64xbf16>
    %cst_249 = arith.constant dense<0.000000e+00> : vector<1x10xf32>
    %389 = tpu.matmul %388, %387, %cst_249 {dimension_numbers = #tpu.dot_dimension_numbers<[1], [0], [0], [1], [0, 0, 1, 1], [], []>} : vector<1x64xbf16>, vector<64x10xbf16>, vector<1x10xf32> -> vector<1x10xf32>
    %c0_250 = arith.constant 0 : index
    %c0_251 = arith.constant 0 : index
    %390 = vector.load %arg23[%c0_250, %c0_251] : memref<1x10xf32, #tpu.memory_space<vmem>>, vector<1x10xf32>
    %391 = arith.addf %389, %390 : vector<1x10xf32>
    %c0_252 = arith.constant 0 : index
    %c0_253 = arith.constant 0 : index
    %c0_254 = arith.constant 0 : index
    %392 = vector.load %arg25[%c0_252, %c0_253, %c0_254] : memref<1x1x10xf32, #tpu.memory_space<vmem>>, vector<1x1x10xf32>
    %393 = vector.shape_cast %392 : vector<1x1x10xf32> to vector<1x10xf32>
    %394 = vector.shape_cast %391 : vector<1x10xf32> to vector<1x1x10xf32>
    tpu.vector_store %arg25[%c0_252, %c0_253, %c0_254], %394 {strides = array<i32>} : memref<1x1x10xf32, #tpu.memory_space<vmem>>, vector<1x1x10xf32>,
    return
  }
  func.func @transform_0(%arg0: i32) -> (i32, i32, i32) {
    %c0_i32 = arith.constant 0 : i32
    %c0_i32_0 = arith.constant 0 : i32
    %c0_i32_1 = arith.constant 0 : i32
    return %arg0, %c0_i32, %c0_i32_0 : i32, i32, i32
  }
  func.func @transform_1(%arg0: i32) -> (i32, i32) {
    %c0_i32 = arith.constant 0 : i32
    %c0_i32_0 = arith.constant 0 : i32
    %c0_i32_1 = arith.constant 0 : i32
    return %c0_i32, %c0_i32_0 : i32, i32
  }
  func.func @transform_2(%arg0: i32) -> (i32, i32) {
    %c0_i32 = arith.constant 0 : i32
    %c0_i32_0 = arith.constant 0 : i32
    %c0_i32_1 = arith.constant 0 : i32
    return %c0_i32, %c0_i32_0 : i32, i32
  }
  func.func @transform_3(%arg0: i32) -> (i32, i32, i32, i32) {
    %c0_i32 = arith.constant 0 : i32
    %c0_i32_0 = arith.constant 0 : i32
    %c0_i32_1 = arith.constant 0 : i32
    %c0_i32_2 = arith.constant 0 : i32
    %c0_i32_3 = arith.constant 0 : i32
    return %c0_i32, %c0_i32_0, %c0_i32_1, %c0_i32_2 : i32, i32, i32, i32
  }
  func.func @transform_4(%arg0: i32) -> (i32, i32, i32, i32) {
    %c0_i32 = arith.constant 0 : i32
    %c0_i32_0 = arith.constant 0 : i32
    %c0_i32_1 = arith.constant 0 : i32
    %c0_i32_2 = arith.constant 0 : i32
    %c0_i32_3 = arith.constant 0 : i32
    return %c0_i32, %c0_i32_0, %c0_i32_1, %c0_i32_2 : i32, i32, i32, i32
  }
  func.func @transform_5(%arg0: i32) -> (i32, i32, i32, i32) {
    %c0_i32 = arith.constant 0 : i32
    %c0_i32_0 = arith.constant 0 : i32
    %c0_i32_1 = arith.constant 0 : i32
    %c0_i32_2 = arith.constant 0 : i32
    %c0_i32_3 = arith.constant 0 : i32
    return %c0_i32, %c0_i32_0, %c0_i32_1, %c0_i32_2 : i32, i32, i32, i32
  }
  func.func @transform_6(%arg0: i32) -> (i32, i32, i32, i32) {
    %c0_i32 = arith.constant 0 : i32
    %c0_i32_0 = arith.constant 0 : i32
    %c0_i32_1 = arith.constant 0 : i32
    %c0_i32_2 = arith.constant 0 : i32
    %c0_i32_3 = arith.constant 0 : i32
    return %c0_i32, %c0_i32_0, %c0_i32_1, %c0_i32_2 : i32, i32, i32, i32
  }
  func.func @transform_7(%arg0: i32) -> (i32, i32, i32, i32) {
    %c0_i32 = arith.constant 0 : i32
    %c0_i32_0 = arith.constant 0 : i32
    %c0_i32_1 = arith.constant 0 : i32
    %c0_i32_2 = arith.constant 0 : i32
    %c0_i32_3 = arith.constant 0 : i32
    return %c0_i32, %c0_i32_0, %c0_i32_1, %c0_i32_2 : i32, i32, i32, i32
  }
  func.func @transform_8(%arg0: i32) -> (i32, i32, i32, i32) {
    %c0_i32 = arith.constant 0 : i32
    %c0_i32_0 = arith.constant 0 : i32
    %c0_i32_1 = arith.constant 0 : i32
    %c0_i32_2 = arith.constant 0 : i32
    %c0_i32_3 = arith.constant 0 : i32
    return %c0_i32, %c0_i32_0, %c0_i32_1, %c0_i32_2 : i32, i32, i32, i32
  }
  func.func @transform_9(%arg0: i32) -> (i32, i32, i32, i32) {
    %c0_i32 = arith.constant 0 : i32
    %c0_i32_0 = arith.constant 0 : i32
    %c0_i32_1 = arith.constant 0 : i32
    %c0_i32_2 = arith.constant 0 : i32
    %c0_i32_3 = arith.constant 0 : i32
    return %c0_i32, %c0_i32_0, %c0_i32_1, %c0_i32_2 : i32, i32, i32, i32
  }
  func.func @transform_10(%arg0: i32) -> (i32, i32, i32) {
    %c0_i32 = arith.constant 0 : i32
    %c0_i32_0 = arith.constant 0 : i32
    %c0_i32_1 = arith.constant 0 : i32
    %c0_i32_2 = arith.constant 0 : i32
    return %c0_i32, %c0_i32_0, %c0_i32_1 : i32, i32, i32
  }
  func.func @transform_11(%arg0: i32) -> (i32, i32, i32) {
    %c0_i32 = arith.constant 0 : i32
    %c0_i32_0 = arith.constant 0 : i32
    %c0_i32_1 = arith.constant 0 : i32
    %c0_i32_2 = arith.constant 0 : i32
    return %c0_i32, %c0_i32_0, %c0_i32_1 : i32, i32, i32
  }
  func.func @transform_12(%arg0: i32) -> (i32, i32, i32) {
    %c0_i32 = arith.constant 0 : i32
    %c0_i32_0 = arith.constant 0 : i32
    %c0_i32_1 = arith.constant 0 : i32
    %c0_i32_2 = arith.constant 0 : i32
    return %c0_i32, %c0_i32_0, %c0_i32_1 : i32, i32, i32
  }
  func.func @transform_13(%arg0: i32) -> (i32, i32, i32) {
    %c0_i32 = arith.constant 0 : i32
    %c0_i32_0 = arith.constant 0 : i32
    %c0_i32_1 = arith.constant 0 : i32
    %c0_i32_2 = arith.constant 0 : i32
    return %c0_i32, %c0_i32_0, %c0_i32_1 : i32, i32, i32
  }
  func.func @transform_14(%arg0: i32) -> (i32, i32, i32) {
    %c0_i32 = arith.constant 0 : i32
    %c0_i32_0 = arith.constant 0 : i32
    %c0_i32_1 = arith.constant 0 : i32
    %c0_i32_2 = arith.constant 0 : i32
    return %c0_i32, %c0_i32_0, %c0_i32_1 : i32, i32, i32
  }
  func.func @transform_15(%arg0: i32) -> (i32, i32, i32) {
    %c0_i32 = arith.constant 0 : i32
    %c0_i32_0 = arith.constant 0 : i32
    %c0_i32_1 = arith.constant 0 : i32
    %c0_i32_2 = arith.constant 0 : i32
    return %c0_i32, %c0_i32_0, %c0_i32_1 : i32, i32, i32
  }
  func.func @transform_16(%arg0: i32) -> (i32, i32, i32) {
    %c0_i32 = arith.constant 0 : i32
    %c0_i32_0 = arith.constant 0 : i32
    %c0_i32_1 = arith.constant 0 : i32
    %c0_i32_2 = arith.constant 0 : i32
    return %c0_i32, %c0_i32_0, %c0_i32_1 : i32, i32, i32
  }
  func.func @transform_17(%arg0: i32) -> (i32, i32, i32) {
    %c0_i32 = arith.constant 0 : i32
    %c0_i32_0 = arith.constant 0 : i32
    %c0_i32_1 = arith.constant 0 : i32
    %c0_i32_2 = arith.constant 0 : i32
    return %c0_i32, %c0_i32_0, %c0_i32_1 : i32, i32, i32
  }
  func.func @transform_18(%arg0: i32) -> (i32, i32, i32) {
    %c0_i32 = arith.constant 0 : i32
    %c0_i32_0 = arith.constant 0 : i32
    %c0_i32_1 = arith.constant 0 : i32
    %c0_i32_2 = arith.constant 0 : i32
    return %c0_i32, %c0_i32_0, %c0_i32_1 : i32, i32, i32
  }
  func.func @transform_19(%arg0: i32) -> (i32, i32) {
    %c0_i32 = arith.constant 0 : i32
    %c0_i32_0 = arith.constant 0 : i32
    %c0_i32_1 = arith.constant 0 : i32
    return %c0_i32, %c0_i32_0 : i32, i32
  }
  func.func @transform_20(%arg0: i32) -> (i32, i32) {
    %c0_i32 = arith.constant 0 : i32
    %c0_i32_0 = arith.constant 0 : i32
    %c0_i32_1 = arith.constant 0 : i32
    return %c0_i32, %c0_i32_0 : i32, i32
  }
  func.func @transform_21(%arg0: i32) -> (i32, i32) {
    %c0_i32 = arith.constant 0 : i32
    %c0_i32_0 = arith.constant 0 : i32
    %c0_i32_1 = arith.constant 0 : i32
    return %c0_i32, %c0_i32_0 : i32, i32
  }
  func.func @transform_22(%arg0: i32) -> (i32, i32) {
    %c0_i32 = arith.constant 0 : i32
    %c0_i32_0 = arith.constant 0 : i32
    %c0_i32_1 = arith.constant 0 : i32
    return %c0_i32, %c0_i32_0 : i32, i32
  }
  func.func @transform_23(%arg0: i32) -> (i32, i32, i32) {
    %c0_i32 = arith.constant 0 : i32
    %c0_i32_0 = arith.constant 0 : i32
    %c0_i32_1 = arith.constant 0 : i32
    return %arg0, %c0_i32, %c0_i32_0 : i32, i32, i32
  }
  func.func @transform_24(%arg0: i32) -> (i32, i32, i32) {
    %c0_i32 = arith.constant 0 : i32
    %c0_i32_0 = arith.constant 0 : i32
    %c0_i32_1 = arith.constant 0 : i32
    return %arg0, %c0_i32, %c0_i32_0 : i32, i32, i32
  }
}

</mosaic_0001>

<bundles_post_ra>
// kernel: tpu_custom_call.1
= control target key start
LH: loop header
LB: loop body
LE: loop exit
PB: predicated region body
PF: predicated region fallthrough
CT: control target
= control target key end

     0   :  { %s23934_s0 = inlined_call_operand.hbm [shape: f32[2,8,256], index: 0, kind: input, shape index: {}]   ;;  %s23935_s1 = inlined_call_operand.hbm [shape: bf16[256,128], index: 1, kind: input, shape index: {}]   ;;  %s23936_s2 = inlined_call_operand.hbm [shape: f32[1,128], index: 2, kind: input, shape index: {}]   ;;  %s23937_s3 = inlined_call_operand.hbm [shape: bf16[3,8,16,128], index: 3, kind: input, shape index: {}]   ;;  %s23938_s4 = inlined_call_operand.hbm [shape: f32[3,8,1,16], index: 4, kind: input, shape index: {}]   ;;  %s23939_s5 = inlined_call_operand.hbm [shape: bf16[3,8,16,128], index: 5, kind: input, shape index: {}]   ;;  %s23940_s6 = inlined_call_operand.hbm [shape: f32[3,8,1,16], index: 6, kind: input, shape index: {}]   ;;  %s23941_s7 = inlined_call_operand.hbm [shape: bf16[3,8,16,128], index: 7, kind: input, shape index: {}]   ;;  %s23942_s8 = inlined_call_operand.hbm [shape: f32[3,8,1,16], index: 8, kind: input, shape index: {}]   ;;  %s23943_s9 = inlined_call_operand.hbm [shape: bf16[3,8,16,128], index: 9, kind: input, shape index: {}]   ;;  %s23944_s10 = inlined_call_operand.hbm [shape: f32[3,1,128], index: 10, kind: input, shape index: {}]   ;;  %s23945_s11 = inlined_call_operand.hbm [shape: bf16[3,128,2048], index: 11, kind: input, shape index: {}]   ;;  %s23946_s12 = inlined_call_operand.hbm [shape: f32[3,1,2048], index: 12, kind: input, shape index: {}]   ;;  %s23947_s13 = inlined_call_operand.hbm [shape: bf16[3,2048,128], index: 13, kind: input, shape index: {}]   ;;  %s23948_s14 = inlined_call_operand.hbm [shape: f32[3,1,128], index: 14, kind: input, shape index: {}]   ;;  %s23949_s15 = inlined_call_operand.hbm [shape: f32[3,1,128], index: 15, kind: input, shape index: {}]   ;;  %s23950_s16 = inlined_call_operand.hbm [shape: f32[3,1,128], index: 16, kind: input, shape index: {}]   ;;  %s23951_s17 = inlined_call_operand.hbm [shape: f32[3,1,128], index: 17, kind: input, shape index: {}]   ;;  %s23952_s18 = inlined_call_operand.hbm [shape: f32[3,1,128], index: 18, kind: input, shape index: {}]   ;;  %s23953_s19 = inlined_call_operand.vmem [shape: bf16[128,64], index: 19, kind: input, shape index: {}]   ;;  %s23954_s20 = inlined_call_operand.hbm [shape: f32[1,64], index: 20, kind: input, shape index: {}]   ;;  %s23955_s21 = inlined_call_operand.vmem [shape: bf16[64,10], index: 21, kind: input, shape index: {}]   ;;  %s23956_s22 = inlined_call_operand.hbm [shape: f32[1,10], index: 22, kind: input, shape index: {}]   ;;  %s23957_s23 = inlined_call_operand.hbm [shape: f32[2,1,128], index: 23, kind: output, shape index: {0}]   ;;  %s23958_s24 = inlined_call_operand.hbm [shape: f32[2,1,10], index: 24, kind: output, shape index: {1}]  }
   0x1   :  { %23994 = sst [smem:[#allocation57_spill]] %s23934_s0 }
   0x2   :  { %23995 = sst [smem:[#allocation58_spill]] %s23935_s1 }
   0x3   :  { %23996 = sst [smem:[#allocation59_spill]] %s23936_s2 }
   0x4   :  { %23997 = sst [smem:[#allocation60_spill]] %s23937_s3 }
   0x5   :  { %23998 = sst [smem:[#allocation61_spill]] %s23938_s4 }
   0x6   :  { %23999 = sst [smem:[#allocation62_spill]] %s23939_s5 }
   0x7   :  { %24000 = sst [smem:[#allocation63_spill]] %s23940_s6 }
   0x8   :  { %24001 = sst [smem:[#allocation64_spill]] %s23941_s7 }
   0x9   :  { %24002 = sst [smem:[#allocation65_spill]] %s23942_s8 }
   0xa   :  { %24003 = sst [smem:[#allocation66_spill]] %s23943_s9 }
   0xb   :  { %24004 = sst [smem:[#allocation67_spill]] %s23944_s10 }
   0xc   :  { %24005 = sst [smem:[#allocation68_spill]] %s23953_s19 }
   0xd   :  { %24006 = sst [smem:[#allocation69_spill]] %s23955_s21 }
   0xe   :  { %24007 = sst [smem:[#allocation70_spill]] %s23957_s23 }
   0xf   :  { %24008 = sst [smem:[#allocation71_spill]] %s23958_s24 }
  0x10   :  { %30 = vsyncpa [#allocation3], 0 }
  0x11   :  { %32 = vsyncpa [#allocation3 + $0x1], 0 }
  0x12   :  { %33 = vsyncpa [#allocation6], 0 }
  0x13   :  { %34 = vsyncpa [#allocation9], 0 }
  0x14   :  { %35 = vsyncpa [#allocation12], 0 }
  0x15   :  { %36 = vsyncpa [#allocation15], 0 }
  0x16   :  { %37 = vsyncpa [#allocation18], 0 }
  0x17   :  { %38 = vsyncpa [#allocation21], 0 }
  0x18   :  { %39 = vsyncpa [#allocation24], 0 }
  0x19   :  { %40 = vsyncpa [#allocation27], 0 }
  0x1a   :  { %41 = vsyncpa [#allocation30], 0 }
  0x1b   :  { %42 = vsyncpa [#allocation33], 0 }
  0x1c   :  { %43 = vsyncpa [#allocation4], 0 }
  0x1d   :  { %45 = vsyncpa [#allocation4 + $0x1], 0 }
  0x1e   :  { %46 = vsyncpa [#allocation37], 0 }
  0x1f   :  { %48 = vsyncpa [#allocation37 + $0x1], 0  ;;  %s22079_s5 = smov 0   ;;  %s22081_s26 = smov 0  }
  0x20   :  { %s22083_s27 = smov 0   ;;  %s22085_s28 = smov 0  }
  0x21 LB: > { %24009 = sst [smem:[#allocation51_spill]] %s21908_s5  ;;  %s21922_s6 = smov [#allocation5]   ;;  %s21920_s28 = sphi %s22085_s28, %s22585_s28   ;;  %s21916_s27 = sphi %s22083_s27, %s24077_s27   ;;  %s21912_s26 = sphi %s22081_s26, %s24076_s26   ;;  %s21908_s5 = sphi %s22079_s5, %s24075_s5  }
  0x22   : > { %24010 = sst [smem:[#allocation52_spill]] %s21912_s26  ;;  %s611_s2 = sshll.u32 %s21922_s6, 4  ;;  %s22105_s2 = int_to_ptr.vmem [resolvable:$true] %s611_s2 }
  0x23   : > { %24011 = sst [smem:[#allocation53_spill]] %s21916_s27  ;;  %s22100_s29 = sadd.s32 4294967295, %s21920_s28  }
  0x24   : > { %24012 = sst [smem:[#allocation54_spill]] %s21920_s28  ;;  %p17459_p0 = scmp.ge.s32.totalorder %s21920_s28, 1 }
  0x25   : > { %24013 = sst [smem:[#allocation55_spill]] %s22100_s29  ;;  %p23982_p1 = scmp.eq.s32.totalorder %s22100_s29, 0 }
  0x26   : > { %p599_p2 = scmp.lt.s32.totalorder %s21920_s28, 3  ;;  %s21923_s7 = smov [#allocation8]  }
  0x27   : > { %s635_s30 = sshll.u32 %s21923_s7, 4  ;;  %s21924_s25 = smov [#allocation11]   ;;  %s22120_s30 = int_to_ptr.vmem [resolvable:$true] %s635_s30 }
  0x28   : > { %p22107_p3 = pnand %p17459_p0, %p599_p2  ;;  %s661_s8 = sshll.u32 %s21924_s25, 4  ;;  %s22122_s8 = int_to_ptr.vmem [resolvable:$true] %s661_s8 }
  0x29   : > { %s24017_s6 = sld [smem:[#allocation58_spill]] }
  0x2a   : > { %s24014_s0 = scalar_select %p22107_p3, 1, 0 }
  0x2b   : > { %p20401_p5 = pneg %p22107_p3 }
  0x2c   : > { %24015 = sst [smem:[#allocation56_spill]] %s24014_s0 }
  0x2d   : > { %p22116_p6 = pnand %p20401_p5, %p23982_p1 }
  0x2f   : > { %s21192_s24 = scalar_lea.hbm %s24017_s6, 2048  ;;  %p22132_p8 = pneg %p22116_p6 }
  0x30   : > { %p21193_p7 = scmp.ne.s32.totalorder %s24017_s6, %s21192_s24  ;;  %p21199_p11 = scmp.lt.u32.totalorder %s21192_s24, %s24017_s6 }
  0x32   : > { %p21195_p9 = pnand %p22132_p8, %p21193_p7 }
  0x34   : > { %p21196_p10 = pneg %p21195_p9 }
  0x36   : > { %p21201_p12 = pnand %p21199_p11, %p21196_p10 }
  0x38   : > { %21204 = shalt.err (!%p21201_p12)
}
  0x39   : > { %s21205_s21 = scalar_lea.vmem %s22105_s2, 2048  ;;  %p21213_p5 = scmp.lt.s32.totalorder %s22105_s2, %s22105_s2 }
  0x3a   : > { %p21206_p13 = scmp.ne.s32.totalorder %s22105_s2, %s21205_s21  ;;  %p21214_p4 = scmp.lt.s32.totalorder %s21205_s21, %s21205_s21 }
  0x3c   : > { %p21208_p0 = pnand %p21206_p13, %p22132_p8  ;;  %p21215_p7 = por %p21214_p4, %p21213_p5 }
  0x3e   : > { %p21209_p2 = pneg %p21208_p0 }
  0x40   : > { %p21216_p9 = pnand %p21215_p7, %p21209_p2 }
  0x42   : > { %21219 = shalt.err (!%p21216_p9)
}
  0x43   : > { %s21925_s23 = smov 64   ;;  %s21926_s19 = smov 4  }
  0x44   : > { %20404 = dma.hbm_to_vmem [thread:$0]  (!%p22116_p6), %s24017_s6, 2048, %s22105_s2, [#allocation6], %s21925_s23, %s21925_s23, %s21926_s19  }
  0x45   : > { %s24019_s0 = sld [smem:[#allocation60_spill]] }
  0x4b   : > { %s21220_s21 = scalar_lea.hbm %s24019_s0, 3072 }
  0x4c   : > { %p21221_p4 = scmp.ne.s32.totalorder %s24019_s0, %s21220_s21  ;;  %p21227_p12 = scmp.lt.u32.totalorder %s21220_s21, %s24019_s0 }
  0x4e   : > { %p21223_p10 = pnand %p21221_p4, %p22132_p8 }
  0x50   : > { %p21224_p11 = pneg %p21223_p10 }
  0x52   : > { %p21229_p13 = pnand %p21227_p12, %p21224_p11 }
  0x54   : > { %21232 = shalt.err (!%p21229_p13)
}
  0x55   : > { %s21233_s2 = scalar_lea.vmem %s22120_s30, 3072  ;;  %p21241_p7 = scmp.lt.s32.totalorder %s22120_s30, %s22120_s30 }
  0x56   : > { %p21234_p0 = scmp.ne.s32.totalorder %s22120_s30, %s21233_s2  ;;  %p21242_p9 = scmp.lt.s32.totalorder %s21233_s2, %s21233_s2 }
  0x58   : > { %p21236_p2 = pnand %p21234_p0, %p22132_p8  ;;  %p21243_p4 = por %p21242_p9, %p21241_p7 }
  0x5a   : > { %p21237_p5 = pneg %p21236_p2 }
  0x5c   : > { %p21244_p10 = pnand %p21243_p4, %p21237_p5 }
  0x5e   : > { %21247 = shalt.err (!%p21244_p10)
}
  0x5f   : > { %20410 = dma.hbm_to_vmem [thread:$0]  (!%p22116_p6), %s24019_s0, 3072, %s22120_s30, [#allocation9], %s21925_s23, %s21925_s23, %s21926_s19  }
  0x60   : > { %s24020_s24 = sld [smem:[#allocation62_spill]] }
  0x66   : > { %s21248_s4 = scalar_lea.hbm %s24020_s24, 3072 }
  0x67   : > { %p21249_p11 = scmp.ne.s32.totalorder %s24020_s24, %s21248_s4  ;;  %p21255_p0 = scmp.lt.u32.totalorder %s21248_s4, %s24020_s24 }
  0x69   : > { %p21251_p12 = pnand %p21249_p11, %p22132_p8 }
  0x6b   : > { %p21252_p13 = pneg %p21251_p12 }
  0x6d   : > { %p21257_p2 = pnand %p21255_p0, %p21252_p13 }
  0x6f   : > { %21260 = shalt.err (!%p21257_p2)
}
  0x70   : > { %s21261_s30 = scalar_lea.vmem %s22122_s8, 3072  ;;  %p21269_p4 = scmp.lt.s32.totalorder %s22122_s8, %s22122_s8 }
  0x71   : > { %p21262_p5 = scmp.ne.s32.totalorder %s22122_s8, %s21261_s30  ;;  %p21270_p10 = scmp.lt.s32.totalorder %s21261_s30, %s21261_s30 }
  0x73   : > { %p21264_p7 = pnand %p21262_p5, %p22132_p8  ;;  %p21271_p11 = por %p21270_p10, %p21269_p4 }
  0x75   : > { %p21265_p9 = pneg %p21264_p7 }
  0x77   : > { %p21272_p12 = pnand %p21271_p11, %p21265_p9 }
  0x79   : > { %21275 = shalt.err (!%p21272_p12)
}
  0x7a   : > { %20416 = dma.hbm_to_vmem [thread:$0]  (!%p22116_p6), %s24020_s24, 3072, %s22122_s8, [#allocation12], %s21925_s23, %s21925_s23, %s21926_s19  }
  0x7b   : > { %s21927_s27 = smov [#allocation14]   ;;  %s21928_s4 = smov [#allocation17]  }
  0x7c   : > { %s687_s29 = sshll.u32 %s21927_s27, 4  ;;  %s713_s1 = sshll.u32 %s21928_s4, 4  ;;  %s688_s29 = int_to_ptr.vmem [resolvable:$true] %s687_s29  ;;  %s714_s1 = int_to_ptr.vmem [resolvable:$true] %s713_s1 }
  0x7d   : > { %s24021_s2 = sld [smem:[#allocation64_spill]] }
  0x83   : > { %s21276_s30 = scalar_lea.hbm %s24021_s2, 3072 }
  0x84   : > { %p21277_p13 = scmp.ne.s32.totalorder %s24021_s2, %s21276_s30  ;;  %p21283_p5 = scmp.lt.u32.totalorder %s21276_s30, %s24021_s2 }
  0x86   : > { %p21279_p0 = pnand %p21277_p13, %p22132_p8 }
  0x88   : > { %p21280_p2 = pneg %p21279_p0 }
  0x8a   : > { %p21285_p7 = pnand %p21283_p5, %p21280_p2 }
  0x8c   : > { %21288 = shalt.err (!%p21285_p7)
}
  0x8d   : > { %s21289_s8 = scalar_lea.vmem %s688_s29, 3072  ;;  %p21297_p11 = scmp.lt.s32.totalorder %s688_s29, %s688_s29 }
  0x8e   : > { %p21290_p9 = scmp.ne.s32.totalorder %s688_s29, %s21289_s8  ;;  %p21298_p12 = scmp.lt.s32.totalorder %s21289_s8, %s21289_s8 }
  0x90   : > { %p21292_p4 = pnand %p21290_p9, %p22132_p8  ;;  %p21299_p1 = por %p21298_p12, %p21297_p11 }
  0x92   : > { %p21293_p10 = pneg %p21292_p4 }
  0x94   : > { %p21300_p3 = pnand %p21299_p1, %p21293_p10 }
  0x96   : > { %21303 = shalt.err (!%p21300_p3)
}
  0x97   : > { %20422 = dma.hbm_to_vmem [thread:$0]  (!%p22116_p6), %s24021_s2, 3072, %s688_s29, [#allocation15], %s21925_s23, %s21925_s23, %s21926_s19  }
  0x98   : > { %s24022_s9 = sld [smem:[#allocation66_spill]] }
  0x9e   : > { %s21304_s27 = scalar_lea.hbm %s24022_s9, 3072 }
  0x9f   : > { %p21305_p1 = scmp.ne.s32.totalorder %s24022_s9, %s21304_s27  ;;  %p21311_p0 = scmp.lt.u32.totalorder %s21304_s27, %s24022_s9 }
  0xa1   : > { %p21307_p3 = pnand %p21305_p1, %p22132_p8 }
  0xa3   : > { %p21308_p13 = pneg %p21307_p3 }
  0xa5   : > { %p21313_p2 = pnand %p21311_p0, %p21308_p13 }
  0xa7   : > { %21316 = shalt.err (!%p21313_p2)
}
  0xa8   : > { %s21317_s5 = scalar_lea.vmem %s714_s1, 3072  ;;  %p21325_p4 = scmp.lt.s32.totalorder %s714_s1, %s714_s1 }
  0xa9   : > { %p21318_p5 = scmp.ne.s32.totalorder %s714_s1, %s21317_s5  ;;  %p21326_p10 = scmp.lt.s32.totalorder %s21317_s5, %s21317_s5 }
  0xab   : > { %p21320_p7 = pnand %p21318_p5, %p22132_p8  ;;  %p21327_p11 = por %p21326_p10, %p21325_p4 }
  0xad   : > { %p21321_p9 = pneg %p21320_p7 }
  0xaf   : > { %p21328_p12 = pnand %p21327_p11, %p21321_p9 }
  0xb1   : > { %21331 = shalt.err (!%p21328_p12)
}
  0xb2   : > { %20428 = dma.hbm_to_vmem [thread:$0]  (!%p22116_p6), %s24022_s9, 3072, %s714_s1, [#allocation18], %s21925_s23, %s21925_s23, %s21926_s19  }
  0xb3   : > { %s21929_s28 = smov [#allocation20]   ;;  %s21332_s27 = scalar_lea.hbm %s23945_s11, 49152 }
  0xb4   : > { %s739_s0 = sshll.u32 %s21929_s28, 4  ;;  %p21333_p1 = scmp.ne.s32.totalorder %s23945_s11, %s21332_s27  ;;  %s740_s0 = int_to_ptr.vmem [resolvable:$true] %s739_s0 }
  0xb5   : > { %p21339_p0 = scmp.lt.u32.totalorder %s21332_s27, %s23945_s11 }
  0xb6   : > { %p21335_p3 = pnand %p21333_p1, %p22132_p8 }
  0xb8   : > { %p21336_p13 = pneg %p21335_p3 }
  0xba   : > { %p21341_p2 = pnand %p21339_p0, %p21336_p13 }
  0xbc   : > { %21344 = shalt.err (!%p21341_p2)
}
  0xbd   : > { %s21345_s1 = scalar_lea.vmem %s740_s0, 49152  ;;  %p21353_p4 = scmp.lt.s32.totalorder %s740_s0, %s740_s0 }
  0xbe   : > { %p21346_p5 = scmp.ne.s32.totalorder %s740_s0, %s21345_s1  ;;  %p21354_p10 = scmp.lt.s32.totalorder %s21345_s1, %s21345_s1 }
  0xc0   : > { %p21348_p7 = pnand %p21346_p5, %p22132_p8  ;;  %p21355_p11 = por %p21354_p10, %p21353_p4 }
  0xc2   : > { %p21349_p9 = pneg %p21348_p7 }
  0xc4   : > { %p21356_p12 = pnand %p21355_p11, %p21349_p9 }
  0xc6   : > { %21359 = shalt.err (!%p21356_p12)
}
  0xc7   : > { %s21930_s5 = smov 1024   ;;  %s21931_s28 = smov [#allocation23]  }
  0xc8   : > { %20434 = dma.hbm_to_vmem [thread:$0]  (!%p22116_p6), %s23945_s11, 49152, %s740_s0, [#allocation21], %s21930_s5, %s21930_s5, %s21925_s23  }
  0xc9   : > { %s765_s6 = sshll.u32 %s21931_s28, 4  ;;  %s21360_s4 = scalar_lea.hbm %s23947_s13, 49152  ;;  %s766_s6 = int_to_ptr.vmem [resolvable:$true] %s765_s6 }
  0xca   : > { %p21361_p1 = scmp.ne.s32.totalorder %s23947_s13, %s21360_s4  ;;  %p21367_p0 = scmp.lt.u32.totalorder %s21360_s4, %s23947_s13 }
  0xcc   : > { %p21363_p3 = pnand %p21361_p1, %p22132_p8 }
  0xce   : > { %p21364_p13 = pneg %p21363_p3 }
  0xd0   : > { %p21369_p2 = pnand %p21367_p0, %p21364_p13 }
  0xd2   : > { %21372 = shalt.err (!%p21369_p2)
}
  0xd3   : > { %s21373_s0 = scalar_lea.vmem %s766_s6, 49152  ;;  %p21381_p4 = scmp.lt.s32.totalorder %s766_s6, %s766_s6 }
  0xd4   : > { %p21374_p5 = scmp.ne.s32.totalorder %s766_s6, %s21373_s0  ;;  %p21382_p10 = scmp.lt.s32.totalorder %s21373_s0, %s21373_s0 }
  0xd6   : > { %p21376_p7 = pnand %p21374_p5, %p22132_p8  ;;  %p21383_p11 = por %p21382_p10, %p21381_p4 }
  0xd8   : > { %p21377_p9 = pneg %p21376_p7 }
  0xda   : > { %p21384_p12 = pnand %p21383_p11, %p21377_p9 }
  0xdc   : > { %21387 = shalt.err (!%p21384_p12)
}
  0xdd   : > { %20440 = dma.hbm_to_vmem [thread:$0]  (!%p22116_p6), %s23947_s13, 49152, %s766_s6, [#allocation24], %s21925_s23, %s21925_s23, %s21926_s19  }
  0xde   : > { %s21932_s8 = smov [#allocation26]   ;;  %s21933_s26 = smov [#allocation29]  }
  0xdf   : > { %s791_s28 = sshll.u32 %s21932_s8, 4  ;;  %s817_s27 = sshll.u32 %s21933_s26, 4  ;;  %s792_s28 = int_to_ptr.vmem [resolvable:$true] %s791_s28  ;;  %s22290_s27 = int_to_ptr.vmem [resolvable:$true] %s817_s27 }
  0xe0   : > { %s21388_s21 = scalar_lea.hbm %s23949_s15, 48 }
  0xe1   : > { %p21389_p1 = scmp.ne.s32.totalorder %s23949_s15, %s21388_s21  ;;  %p21395_p0 = scmp.lt.u32.totalorder %s21388_s21, %s23949_s15 }
  0xe3   : > { %p21391_p3 = pnand %p21389_p1, %p22132_p8 }
  0xe5   : > { %p21392_p13 = pneg %p21391_p3 }
  0xe7   : > { %p21397_p2 = pnand %p21395_p0, %p21392_p13 }
  0xe9   : > { %21400 = shalt.err (!%p21397_p2)
}
  0xea   : > { %s21401_s19 = scalar_lea.vmem %s792_s28, 48  ;;  %s21408_s6 = scalar_lea.vmem %s792_s28, 64 }
  0xeb   : > { %p21402_p5 = scmp.ne.s32.totalorder %s792_s28, %s21401_s19  ;;  %p21409_p4 = scmp.lt.s32.totalorder %s792_s28, %s792_s28 }
  0xec   : > { %p21410_p10 = scmp.lt.s32.totalorder %s21408_s6, %s21401_s19 }
  0xed   : > { %p21404_p7 = pnand %p21402_p5, %p22132_p8 }
  0xee   : > { %p21411_p11 = por %p21410_p10, %p21409_p4 }
  0xef   : > { %p21405_p9 = pneg %p21404_p7 }
  0xf1   : > { %p21412_p12 = pnand %p21411_p11, %p21405_p9 }
  0xf3   : > { %21415 = shalt.err (!%p21412_p12)
}
  0xf4   : > { %s23984_s5 = smov 16   ;;  %s21935_s29 = smov 1  }
  0xf5   : > { %20446 = dma.hbm_to_vmem [thread:$0]  (!%p22116_p6), %s23949_s15, 48, %s792_s28, [#allocation27], %s23984_s5, %s23984_s5, %s21935_s29  }
  0xf6   : > { %s21416_s21 = scalar_lea.hbm %s23951_s17, 48 }
  0xf7   : > { %p21417_p1 = scmp.ne.s32.totalorder %s23951_s17, %s21416_s21  ;;  %p21423_p0 = scmp.lt.u32.totalorder %s21416_s21, %s23951_s17 }
  0xf9   : > { %p21419_p3 = pnand %p21417_p1, %p22132_p8 }
  0xfb   : > { %p21420_p13 = pneg %p21419_p3 }
  0xfd   : > { %p21425_p2 = pnand %p21423_p0, %p21420_p13 }
  0xff   : > { %21428 = shalt.err (!%p21425_p2)
}
 0x100   : > { %s21429_s28 = scalar_lea.vmem %s22290_s27, 48  ;;  %s21436_s19 = scalar_lea.vmem %s22290_s27, 64 }
 0x101   : > { %p21430_p5 = scmp.ne.s32.totalorder %s22290_s27, %s21429_s28  ;;  %p21437_p4 = scmp.lt.s32.totalorder %s22290_s27, %s22290_s27 }
 0x102   : > { %p21438_p10 = scmp.lt.s32.totalorder %s21436_s19, %s21429_s28 }
 0x103   : > { %p21432_p7 = pnand %p21430_p5, %p22132_p8 }
 0x104   : > { %p21439_p11 = por %p21438_p10, %p21437_p4 }
 0x105   : > { %p21433_p9 = pneg %p21432_p7 }
 0x107   : > { %p21440_p12 = pnand %p21439_p11, %p21433_p9 }
 0x109   : > { %21443 = shalt.err (!%p21440_p12)
}
 0x10a   : > { %20452 = dma.hbm_to_vmem [thread:$0]  (!%p22116_p6), %s23951_s17, 48, %s22290_s27, [#allocation30], %s23984_s5, %s23984_s5, %s21935_s29  }
 0x10b   : > { %s21936_s26 = smov [#allocation32]   ;;  %s21937_s25 = smov [#allocation7]  }
 0x10c   : > { %s847_s4 = sshll.u32 %s21936_s26, 4  ;;  %s625_s21 = sshll.u32 %s21937_s25, 4  ;;  %s848_s4 = int_to_ptr.vmem [resolvable:$true] %s847_s4  ;;  %s22340_s21 = int_to_ptr.vmem [resolvable:$true] %s625_s21 }
 0x10d   : > { %s21444_s0 = scalar_lea.hbm %s23954_s20, 16 }
 0x10e   : > { %p21445_p1 = scmp.ne.s32.totalorder %s23954_s20, %s21444_s0  ;;  %p21451_p0 = scmp.lt.u32.totalorder %s21444_s0, %s23954_s20 }
 0x110   : > { %p21447_p3 = pnand %p21445_p1, %p22132_p8 }
 0x112   : > { %p21448_p13 = pneg %p21447_p3 }
 0x114   : > { %p21453_p2 = pnand %p21451_p0, %p21448_p13 }
 0x116   : > { %21456 = shalt.err (!%p21453_p2)
}
 0x117   : > { %s21457_s6 = scalar_lea.vmem %s848_s4, 16  ;;  %s21464_s8 = scalar_lea.vmem %s848_s4, 32 }
 0x118   : > { %p21458_p5 = scmp.ne.s32.totalorder %s848_s4, %s21457_s6  ;;  %p21465_p4 = scmp.lt.s32.totalorder %s848_s4, %s848_s4 }
 0x119   : > { %p21466_p10 = scmp.lt.s32.totalorder %s21464_s8, %s21457_s6 }
 0x11a   : > { %p21460_p7 = pnand %p21458_p5, %p22132_p8 }
 0x11b   : > { %p21467_p11 = por %p21466_p10, %p21465_p4 }
 0x11c   : > { %p21461_p9 = pneg %p21460_p7 }
 0x11e   : > { %p21468_p12 = pnand %p21467_p11, %p21461_p9 }
 0x120   : > { %21471 = shalt.err (!%p21468_p12)
}
 0x121   : > { %20458 = dma.hbm_to_vmem [thread:$0]  (!%p22116_p6), %s23954_s20, 16, %s848_s4, [#allocation33]  }
 0x122   : > { %s24023_s0 = sld [smem:[#allocation59_spill]] }
 0x128   : > { %s21472_s23 = scalar_lea.hbm %s24023_s0, 16 }
 0x129   : > { %p21473_p1 = scmp.ne.s32.totalorder %s24023_s0, %s21472_s23  ;;  %p21479_p0 = scmp.lt.u32.totalorder %s21472_s23, %s24023_s0 }
 0x12b   : > { %p21475_p3 = pnand %p21473_p1, %p22132_p8 }
 0x12d   : > { %p21476_p13 = pneg %p21475_p3 }
 0x12f   : > { %p21481_p2 = pnand %p21479_p0, %p21476_p13 }
 0x131   : > { %21484 = shalt.err (!%p21481_p2)
}
 0x132   : > { %s21485_s4 = scalar_lea.vmem %s22340_s21, 16  ;;  %s21492_s8 = scalar_lea.vmem %s22340_s21, 32 }
 0x133   : > { %p21486_p5 = scmp.ne.s32.totalorder %s22340_s21, %s21485_s4  ;;  %p21493_p4 = scmp.lt.s32.totalorder %s22340_s21, %s22340_s21 }
 0x134   : > { %p21494_p10 = scmp.lt.s32.totalorder %s21492_s8, %s21485_s4 }
 0x135   : > { %p21488_p7 = pnand %p21486_p5, %p22132_p8 }
 0x136   : > { %p21495_p11 = por %p21494_p10, %p21493_p4 }
 0x137   : > { %p21489_p9 = pneg %p21488_p7 }
 0x139   : > { %p21496_p12 = pnand %p21495_p11, %p21489_p9 }
 0x13b   : > { %21499 = shalt.err (!%p21496_p12)
}
 0x13c   : > { %20407 = dma.hbm_to_vmem [thread:$0]  (!%p22116_p6), %s24023_s0, 16, %s22340_s21, [#allocation6]  }
 0x13d   : > { %s21938_s30 = smov [#allocation10]   ;;  %s21939_s23 = smov [#allocation13]  }
 0x13e   : > { %s648_s1 = sshll.u32 %s21938_s30, 4  ;;  %s674_s28 = sshll.u32 %s21939_s23, 4  ;;  %s649_s1 = int_to_ptr.vmem [resolvable:$true] %s648_s1  ;;  %s22384_s28 = int_to_ptr.vmem [resolvable:$true] %s674_s28 }
 0x13f   : > { %s24024_s6 = sld [smem:[#allocation61_spill]] }
 0x145   : > { %s21500_s4 = scalar_lea.hbm %s24024_s6, 384 }
 0x146   : > { %p21501_p1 = scmp.ne.s32.totalorder %s24024_s6, %s21500_s4  ;;  %p21507_p0 = scmp.lt.u32.totalorder %s21500_s4, %s24024_s6 }
 0x148   : > { %p21503_p3 = pnand %p21501_p1, %p22132_p8 }
 0x14a   : > { %p21504_p13 = pneg %p21503_p3 }
 0x14c   : > { %p21509_p2 = pnand %p21507_p0, %p21504_p13 }
 0x14e   : > { %21512 = shalt.err (!%p21509_p2)
}
 0x14f   : > { %s21513_s25 = scalar_lea.vmem %s649_s1, 384  ;;  %p21521_p4 = scmp.lt.s32.totalorder %s649_s1, %s649_s1 }
 0x150   : > { %p21514_p5 = scmp.ne.s32.totalorder %s649_s1, %s21513_s25  ;;  %p21522_p10 = scmp.lt.s32.totalorder %s21513_s25, %s21513_s25 }
 0x152   : > { %p21516_p7 = pnand %p21514_p5, %p22132_p8  ;;  %p21523_p11 = por %p21522_p10, %p21521_p4 }
 0x154   : > { %p21517_p9 = pneg %p21516_p7 }
 0x156   : > { %p21524_p12 = pnand %p21523_p11, %p21517_p9 }
 0x158   : > { %21527 = shalt.err (!%p21524_p12)
}
 0x159   : > { %s24025_s5 = smov 16   ;;  %s24026_s4 = sld [smem:[#allocation63_spill]] }
 0x15a   : > { %20413 = dma.hbm_to_vmem [thread:$0]  (!%p22116_p6), %s24024_s6, 384, %s649_s1, [#allocation9], %s24025_s5, %s24025_s5, %s21935_s29  }
 0x15f   : > { %s21528_s8 = scalar_lea.hbm %s24026_s4, 384 }
 0x160   : > { %p21529_p1 = scmp.ne.s32.totalorder %s24026_s4, %s21528_s8  ;;  %p21535_p0 = scmp.lt.u32.totalorder %s21528_s8, %s24026_s4 }
 0x162   : > { %p21531_p3 = pnand %p21529_p1, %p22132_p8 }
 0x164   : > { %p21532_p13 = pneg %p21531_p3 }
 0x166   : > { %p21537_p2 = pnand %p21535_p0, %p21532_p13 }
 0x168   : > { %21540 = shalt.err (!%p21537_p2)
}
 0x169   : > { %s21541_s1 = scalar_lea.vmem %s22384_s28, 384  ;;  %p21549_p4 = scmp.lt.s32.totalorder %s22384_s28, %s22384_s28 }
 0x16a   : > { %p21542_p5 = scmp.ne.s32.totalorder %s22384_s28, %s21541_s1  ;;  %p21550_p10 = scmp.lt.s32.totalorder %s21541_s1, %s21541_s1 }
 0x16c   : > { %p21544_p7 = pnand %p21542_p5, %p22132_p8  ;;  %p21551_p11 = por %p21550_p10, %p21549_p4 }
 0x16e   : > { %p21545_p9 = pneg %p21544_p7 }
 0x170   : > { %p21552_p12 = pnand %p21551_p11, %p21545_p9 }
 0x172   : > { %21555 = shalt.err (!%p21552_p12)
}
 0x173   : > { %20419 = dma.hbm_to_vmem [thread:$0]  (!%p22116_p6), %s24026_s4, 384, %s22384_s28, [#allocation12], %s24025_s5, %s24025_s5, %s21935_s29  }
 0x174   : > { %s21940_s23 = smov [#allocation16]   ;;  %s21941_s27 = smov [#allocation19]  }
 0x175   : > { %s700_s19 = sshll.u32 %s21940_s23, 4  ;;  %s726_s8 = sshll.u32 %s21941_s27, 4  ;;  %s701_s19 = int_to_ptr.vmem [resolvable:$true] %s700_s19  ;;  %s22433_s8 = int_to_ptr.vmem [resolvable:$true] %s726_s8 }
 0x176   : > { %s24027_s25 = sld [smem:[#allocation65_spill]] }
 0x17c   : > { %s21556_s1 = scalar_lea.hbm %s24027_s25, 384 }
 0x17d   : > { %p21557_p1 = scmp.ne.s32.totalorder %s24027_s25, %s21556_s1  ;;  %p21563_p0 = scmp.lt.u32.totalorder %s21556_s1, %s24027_s25 }
 0x17f   : > { %p21559_p3 = pnand %p21557_p1, %p22132_p8 }
 0x181   : > { %p21560_p13 = pneg %p21559_p3 }
 0x183   : > { %p21565_p2 = pnand %p21563_p0, %p21560_p13 }
 0x185   : > { %21568 = shalt.err (!%p21565_p2)
}
 0x186   : > { %s21569_s30 = scalar_lea.vmem %s701_s19, 384  ;;  %p21577_p4 = scmp.lt.s32.totalorder %s701_s19, %s701_s19 }
 0x187   : > { %p21570_p5 = scmp.ne.s32.totalorder %s701_s19, %s21569_s30  ;;  %p21578_p10 = scmp.lt.s32.totalorder %s21569_s30, %s21569_s30 }
 0x189   : > { %p21572_p7 = pnand %p21570_p5, %p22132_p8  ;;  %p21579_p11 = por %p21578_p10, %p21577_p4 }
 0x18b   : > { %p21573_p9 = pneg %p21572_p7 }
 0x18d   : > { %p21580_p12 = pnand %p21579_p11, %p21573_p9 }
 0x18f   : > { %21583 = shalt.err (!%p21580_p12)
}
 0x190   : > { %20425 = dma.hbm_to_vmem [thread:$0]  (!%p22116_p6), %s24027_s25, 384, %s701_s19, [#allocation15], %s24025_s5, %s24025_s5, %s21935_s29  }
 0x191   : > { %s24028_s10 = sld [smem:[#allocation67_spill]] }
 0x197   : > { %s21584_s26 = scalar_lea.hbm %s24028_s10, 48 }
 0x198   : > { %p21585_p1 = scmp.ne.s32.totalorder %s24028_s10, %s21584_s26  ;;  %p21591_p0 = scmp.lt.u32.totalorder %s21584_s26, %s24028_s10 }
 0x19a   : > { %p21587_p3 = pnand %p21585_p1, %p22132_p8 }
 0x19c   : > { %p21588_p13 = pneg %p21587_p3 }
 0x19e   : > { %p21593_p2 = pnand %p21591_p0, %p21588_p13 }
 0x1a0   : > { %21596 = shalt.err (!%p21593_p2)
}
 0x1a1   : > { %s21597_s19 = scalar_lea.vmem %s22433_s8, 48  ;;  %s21604_s30 = scalar_lea.vmem %s22433_s8, 64 }
 0x1a2   : > { %p21598_p5 = scmp.ne.s32.totalorder %s22433_s8, %s21597_s19  ;;  %p21605_p4 = scmp.lt.s32.totalorder %s22433_s8, %s22433_s8 }
 0x1a3   : > { %p21606_p10 = scmp.lt.s32.totalorder %s21604_s30, %s21597_s19 }
 0x1a4   : > { %p21600_p7 = pnand %p21598_p5, %p22132_p8 }
 0x1a5   : > { %p21607_p11 = por %p21606_p10, %p21605_p4 }
 0x1a6   : > { %p21601_p9 = pneg %p21600_p7 }
 0x1a8   : > { %p21608_p12 = pnand %p21607_p11, %p21601_p9 }
 0x1aa   : > { %21611 = shalt.err (!%p21608_p12)
}
 0x1ab   : > { %20431 = dma.hbm_to_vmem [thread:$0]  (!%p22116_p6), %s24028_s10, 48, %s22433_s8, [#allocation18], %s24025_s5, %s24025_s5, %s21935_s29  }
 0x1ac   : > { %s21942_s23 = smov [#allocation22]   ;;  %s21943_s26 = smov [#allocation25]  }
 0x1ad   : > { %s752_s27 = sshll.u32 %s21942_s23, 4  ;;  %s778_s21 = sshll.u32 %s21943_s26, 4  ;;  %s753_s27 = int_to_ptr.vmem [resolvable:$true] %s752_s27  ;;  %s779_s21 = int_to_ptr.vmem [resolvable:$true] %s778_s21 }
 0x1ae   : > { %s21612_s28 = scalar_lea.hbm %s23946_s12, 768 }
 0x1af   : > { %p21613_p1 = scmp.ne.s32.totalorder %s23946_s12, %s21612_s28  ;;  %p21619_p0 = scmp.lt.u32.totalorder %s21612_s28, %s23946_s12 }
 0x1b1   : > { %p21615_p3 = pnand %p21613_p1, %p22132_p8 }
 0x1b3   : > { %p21616_p13 = pneg %p21615_p3 }
 0x1b5   : > { %p21621_p2 = pnand %p21619_p0, %p21616_p13 }
 0x1b7   : > { %21624 = shalt.err (!%p21621_p2)
}
 0x1b8   : > { %s21625_s8 = scalar_lea.vmem %s753_s27, 768  ;;  %p21633_p4 = scmp.lt.s32.totalorder %s753_s27, %s753_s27 }
 0x1b9   : > { %p21626_p5 = scmp.ne.s32.totalorder %s753_s27, %s21625_s8  ;;  %p21634_p10 = scmp.lt.s32.totalorder %s21625_s8, %s21625_s8 }
 0x1bb   : > { %p21628_p7 = pnand %p21626_p5, %p22132_p8  ;;  %p21635_p11 = por %p21634_p10, %p21633_p4 }
 0x1bd   : > { %p21629_p9 = pneg %p21628_p7 }
 0x1bf   : > { %p21636_p12 = pnand %p21635_p11, %p21629_p9 }
 0x1c1   : > { %21639 = shalt.err (!%p21636_p12)
}
 0x1c2   : > { %s21944_s6 = smov 256   ;;  %s21640_s0 = scalar_lea.hbm %s23948_s14, 48 }
 0x1c3   : > { %20437 = dma.hbm_to_vmem [thread:$0]  (!%p22116_p6), %s23946_s12, 768, %s753_s27, [#allocation21], %s21944_s6, %s21944_s6, %s24025_s5  }
 0x1c4   : > { %p21641_p1 = scmp.ne.s32.totalorder %s23948_s14, %s21640_s0  ;;  %p21647_p0 = scmp.lt.u32.totalorder %s21640_s0, %s23948_s14 }
 0x1c6   : > { %p21643_p3 = pnand %p21641_p1, %p22132_p8 }
 0x1c8   : > { %p21644_p13 = pneg %p21643_p3 }
 0x1ca   : > { %p21649_p2 = pnand %p21647_p0, %p21644_p13 }
 0x1cc   : > { %21652 = shalt.err (!%p21649_p2)
}
 0x1cd   : > { %s21653_s8 = scalar_lea.vmem %s779_s21, 48  ;;  %s21660_s27 = scalar_lea.vmem %s779_s21, 64 }
 0x1ce   : > { %p21654_p5 = scmp.ne.s32.totalorder %s779_s21, %s21653_s8  ;;  %p21661_p4 = scmp.lt.s32.totalorder %s779_s21, %s779_s21 }
 0x1cf   : > { %p21662_p10 = scmp.lt.s32.totalorder %s21660_s27, %s21653_s8 }
 0x1d0   : > { %p21656_p7 = pnand %p21654_p5, %p22132_p8 }
 0x1d1   : > { %p21663_p11 = por %p21662_p10, %p21661_p4 }
 0x1d2   : > { %p21657_p9 = pneg %p21656_p7 }
 0x1d4   : > { %p21664_p12 = pnand %p21663_p11, %p21657_p9 }
 0x1d6   : > { %21667 = shalt.err (!%p21664_p12)
}
 0x1d7   : > { %20443 = dma.hbm_to_vmem [thread:$0]  (!%p22116_p6), %s23948_s14, 48, %s779_s21, [#allocation24], %s24025_s5, %s24025_s5, %s21935_s29  }
 0x1d8   : > { %s21945_s4 = smov [#allocation28]   ;;  %s21946_s1 = smov [#allocation31]  }
 0x1d9   : > { %s804_s26 = sshll.u32 %s21945_s4, 4  ;;  %s830_s0 = sshll.u32 %s21946_s1, 4  ;;  %s805_s26 = int_to_ptr.vmem [resolvable:$true] %s804_s26  ;;  %s831_s0 = int_to_ptr.vmem [resolvable:$true] %s830_s0 }
 0x1da   : > { %s21668_s30 = scalar_lea.hbm %s23950_s16, 48 }
 0x1db   : > { %p21669_p1 = scmp.ne.s32.totalorder %s23950_s16, %s21668_s30  ;;  %p21675_p0 = scmp.lt.u32.totalorder %s21668_s30, %s23950_s16 }
 0x1dd   : > { %p21671_p3 = pnand %p21669_p1, %p22132_p8 }
 0x1df   : > { %p21672_p13 = pneg %p21671_p3 }
 0x1e1   : > { %p21677_p2 = pnand %p21675_p0, %p21672_p13 }
 0x1e3   : > { %21680 = shalt.err (!%p21677_p2)
}
 0x1e4   : > { %s21681_s21 = scalar_lea.vmem %s805_s26, 48  ;;  %s21688_s23 = scalar_lea.vmem %s805_s26, 64 }
 0x1e5   : > { %p21682_p5 = scmp.ne.s32.totalorder %s805_s26, %s21681_s21  ;;  %p21689_p4 = scmp.lt.s32.totalorder %s805_s26, %s805_s26 }
 0x1e6   : > { %p21690_p10 = scmp.lt.s32.totalorder %s21688_s23, %s21681_s21 }
 0x1e7   : > { %p21684_p7 = pnand %p21682_p5, %p22132_p8 }
 0x1e8   : > { %p21691_p11 = por %p21690_p10, %p21689_p4 }
 0x1e9   : > { %p21685_p9 = pneg %p21684_p7 }
 0x1eb   : > { %p21692_p12 = pnand %p21691_p11, %p21685_p9 }
 0x1ed   : > { %21695 = shalt.err (!%p21692_p12)
}
 0x1ee   : > { %20449 = dma.hbm_to_vmem [thread:$0]  (!%p22116_p6), %s23950_s16, 48, %s805_s26, [#allocation27], %s24025_s5, %s24025_s5, %s21935_s29  }
 0x1ef   : > { %s21696_s30 = scalar_lea.hbm %s23952_s18, 48 }
 0x1f0   : > { %p21697_p1 = scmp.ne.s32.totalorder %s23952_s18, %s21696_s30  ;;  %p21703_p0 = scmp.lt.u32.totalorder %s21696_s30, %s23952_s18 }
 0x1f2   : > { %p21699_p3 = pnand %p21697_p1, %p22132_p8 }
 0x1f4   : > { %p21700_p13 = pneg %p21699_p3 }
 0x1f6   : > { %p21705_p2 = pnand %p21703_p0, %p21700_p13 }
 0x1f8   : > { %21708 = shalt.err (!%p21705_p2)
}
 0x1f9   : > { %s21709_s21 = scalar_lea.vmem %s831_s0, 48  ;;  %s21716_s26 = scalar_lea.vmem %s831_s0, 64 }
 0x1fa   : > { %p21710_p5 = scmp.ne.s32.totalorder %s831_s0, %s21709_s21  ;;  %p21717_p4 = scmp.lt.s32.totalorder %s831_s0, %s831_s0 }
 0x1fb   : > { %p21718_p10 = scmp.lt.s32.totalorder %s21716_s26, %s21709_s21 }
 0x1fc   : > { %p21712_p7 = pnand %p21710_p5, %p22132_p8 }
 0x1fd   : > { %p21719_p11 = por %p21718_p10, %p21717_p4 }
 0x1fe   : > { %p21713_p9 = pneg %p21712_p7 }
 0x200   : > { %p21720_p12 = pnand %p21719_p11, %p21713_p9 }
 0x202   : > { %21723 = shalt.err (!%p21720_p12)
}
 0x203   : > { %20455 = dma.hbm_to_vmem [thread:$0]  (!%p22116_p6), %s23952_s18, 48, %s831_s0, [#allocation30], %s24025_s5, %s24025_s5, %s21935_s29  }
 0x204   : > { %s21947_s1 = smov [#allocation34]   ;;  %s21724_s2 = scalar_lea.hbm %s23956_s22, 16 }
 0x205   : > { %s861_s28 = sshll.u32 %s21947_s1, 4  ;;  %p21725_p1 = scmp.ne.s32.totalorder %s23956_s22, %s21724_s2  ;;  %s862_s28 = int_to_ptr.vmem [resolvable:$true] %s861_s28 }
 0x206   : > { %p21731_p0 = scmp.lt.u32.totalorder %s21724_s2, %s23956_s22 }
 0x207   : > { %p21727_p3 = pnand %p21725_p1, %p22132_p8 }
 0x209   : > { %p21728_p13 = pneg %p21727_p3 }
 0x20b   : > { %p21733_p2 = pnand %p21731_p0, %p21728_p13 }
 0x20d   : > { %21736 = shalt.err (!%p21733_p2)
}
 0x20e   : > { %s21737_s29 = scalar_lea.vmem %s862_s28, 16  ;;  %s21744_s5 = scalar_lea.vmem %s862_s28, 32 }
 0x20f   : > { %p21738_p5 = scmp.ne.s32.totalorder %s862_s28, %s21737_s29  ;;  %p21745_p4 = scmp.lt.s32.totalorder %s862_s28, %s862_s28 }
 0x210   : > { %p21746_p10 = scmp.lt.s32.totalorder %s21744_s5, %s21737_s29 }
 0x211   : > { %p21740_p7 = pnand %p21738_p5, %p22132_p8 }
 0x212   : > { %p21747_p11 = por %p21746_p10, %p21745_p4 }
 0x213   : > { %p21741_p9 = pneg %p21740_p7 }
 0x215   : > { %p21748_p12 = pnand %p21747_p11, %p21741_p9 }
 0x217   : > { %21751 = shalt.err (!%p21748_p12)
}
 0x218   : > { %s24029_s23 = sld [smem:[#allocation54_spill]]  ;;  %s24030_s4 = sld [smem:[#allocation53_spill]] }
 0x219   : > { %s24031_s1 = sld [smem:[#allocation52_spill]]  ;;  %s24032_s7 = sld [smem:[#allocation51_spill]] }
 0x21a   : > { %s24033_s19 = sld [smem:[#allocation55_spill]] }
 0x21b   : > { %20461 = dma.hbm_to_vmem [thread:$0]  (!%p22116_p6), %s23956_s22, 16, %s862_s28, [#allocation33]  }
 0x21e   : > { %s17458_s30 = sadd.s32 4294967294, %s24029_s23   ;;  %s22585_s28 = sadd.s32 1, %s24029_s23  }
 0x21f   : > { %s58_s3 = ssub.s32 %s24029_s23, %s22585_s28  ;;  %s61_s2 = sadd.s32 1, %s24030_s4 }
 0x220   : > { %p59_p8 = scmp.eq.s32.totalorder %s58_s3, 0  ;;  %p68_p1 = scmp.ne.s32.totalorder %s24030_s4, %s24031_s1 }
 0x221   : > { %p69_p3 = scmp.eq.s32.totalorder %s24029_s23, 0  ;;  %p74_p13 = scmp.ne.s32.totalorder %s24031_s1, %s24032_s7 }
 0x222   : > { %s22596_s8 = scalar_select %p59_p8, %s24030_s4, %s61_s2  }
 0x223   : > { %p22598_p0 = por %p69_p3, %p68_p1  ;;  %p24035_p2 = scmp.eq.s32.totalorder %s24033_s19, 0 }
 0x224   : > { %p560_p5 = scmp.eq.s32.totalorder %s24033_s19, 1  ;;  %p566_p7 = scmp.eq.s32.totalorder %s17458_s30, 1 }
 0x225   : > { %p22604_p6 = por %p24035_p2, %p74_p13  ;;  %p20493_p9 = scmp.lt.s32.totalorder %s24029_s23, 2 }
 0x226   : > { %s872_s21 = sand.u32 1, %s24030_s4   ;;  %p22611_p4 = por %p560_p5, %p68_p1 }
 0x227   : > { %p22615_p10 = por %p566_p7, %p74_p13  ;;  %s17481_s0 = sshll.u32 %s872_s21, 4 }
 0x228   : > { %s24037_s29 = scalar_select %p22611_p4, 1, 0 }
 0x229   : > { %s24038_s5 = scalar_select %p22615_p10, 1, 0 }
 0x22a   : > { %s18566_s26 = sshll.u32 %s24029_s23, 8  ;;  %s24039_s3 = sld [smem:[#allocation57_spill]] }
 0x22b   : > { %s876_s4 = scalar_lea.vmem [#allocation2], %s17481_s0  ;;  %p22629_p11 = pnand %p20493_p9, %p22598_p0 }
 0x22c   : > { %s884_s19 = sshll.u32 %s876_s4, 4  ;;  %s873_s23 = scalar_lea.sflag [#allocation3], %s872_s21  ;;  %s22625_s19 = int_to_ptr.vmem [resolvable:$true] %s884_s19 }
 0x22d   : > { %p21754_p8 = pneg %p22629_p11 }
 0x230   : > { %s22623_s2 = scalar_lea.hbm %s24039_s3, %s18566_s26  ;;  %s21757_s1 = scalar_lea.hbm %s24039_s3, 512 }
 0x231   : > { %s21752_s9 = scalar_lea.hbm %s22623_s2, 256  ;;  %p21758_p13 = scmp.lt.u32.totalorder %s22623_s2, %s24039_s3 }
 0x232   : > { %p21753_p12 = scmp.ne.s32.totalorder %s22623_s2, %s21752_s9  ;;  %p21759_p0 = scmp.lt.u32.totalorder %s21757_s1, %s21752_s9 }
 0x233   : > { %p21761_p5 = scmp.lt.u32.totalorder %s21752_s9, %s22623_s2 }
 0x234   : > { %p21755_p1 = pnand %p21754_p8, %p21753_p12  ;;  %p21760_p2 = por %p21759_p0, %p21758_p13 }
 0x236   : > { %p21756_p3 = pneg %p21755_p1  ;;  %p21762_p7 = por %p21761_p5, %p21760_p2 }
 0x238   : > { %p21763_p9 = pnand %p21762_p7, %p21756_p3 }
 0x23a   : > { %21766 = shalt.err (!%p21763_p9)
}
 0x23b   : > { %s21767_s21 = scalar_lea.vmem %s22625_s19, 256  ;;  %s21948_s4 = smov [#allocation2]  }
 0x23c   : > { %p21768_p12 = scmp.ne.s32.totalorder %s22625_s19, %s21767_s21  ;;  %s21772_s0 = sshll.u32 %s21948_s4, 4  ;;  %s21773_s0 = int_to_ptr.vmem [resolvable:$false] %s21772_s0 }
 0x23d   : > { %s21774_s26 = scalar_lea.vmem %s21773_s0, 512  ;;  %p21775_p4 = scmp.lt.s32.totalorder %s22625_s19, %s21773_s0 }
 0x23e   : > { %p21770_p1 = pnand %p21768_p12, %p21754_p8  ;;  %p21776_p13 = scmp.lt.s32.totalorder %s21774_s26, %s21767_s21 }
 0x240   : > { %p21771_p10 = pneg %p21770_p1  ;;  %p21777_p0 = por %p21776_p13, %p21775_p4 }
 0x242   : > { %p21778_p2 = pnand %p21777_p0, %p21771_p10 }
 0x244   : > { %21781 = shalt.err (!%p21778_p2)
}
 0x245   : > { %20465 = dma.hbm_to_vmem [thread:$0]  (!%p22629_p11), %s22623_s2, 256, %s22625_s19, %s873_s23  }
 0x246   : > { %s24041_s9 = sld [smem:[#allocation56_spill]] }
 0x24c   : > { %p24042_p3 = scmp.ne.s32.totalorder %s24041_s9, 0 }
 0x24d   : > { %s24043_s1 = sld [smem:[#allocation52_spill]] (!%p24042_p3) }
 0x24e   : > { %893 = sbr.rel (%p24042_p3) target bundleno = 8590 (0x218e), region = 112 }
 0x253   : > { %s22661_s27 = sand.u32 (!%p24042_p3), 1, %s24043_s1  }
 0x254   : > { %s17485_s7 = sshll.u32 (!%p24042_p3), %s22661_s27, 4  ;;  %s896_s4 = scalar_lea.sflag (!%p24042_p3), [#allocation3], %s22661_s27 }
 0x255   : > { %s22665_s21 = scalar_lea.vmem [#allocation2], %s17485_s7 }
 0x256   : > { %21855 = dma.done.wait (%p22604_p6), %s896_s4, 256  }
 0x257   : > { %21857 = vsyncadd (%p22604_p6), %s896_s4, 4294967040  ;;  %s24044_s30 = sld [smem:[#allocation55_spill]] }
 0x25d   : > { %p24045_p4 = scmp.eq.s32.totalorder %s24044_s30, 0 }
 0x25f   : > { %21859 = dma.done.wait (%p24045_p4), [#allocation6], 2064   ;;  %p24046_p10 = pmov %p24045_p4 }
 0x260   : > { %p24047_p11 = pmov %p24045_p4 }
 0x261   : > { %21861 = vsyncadd (%p24046_p10), [#allocation6], 4294965232 }
 0x262   : > { %21863 = dma.done.wait (%p24047_p11), [#allocation9], 3456   ;;  %p24048_p8 = pmov %p24045_p4 }
 0x263   : > { %p24049_p5 = pmov %p24045_p4 }
 0x264   : > { %21865 = vsyncadd (%p24048_p8), [#allocation9], 4294963840 }
 0x265   : > { %21867 = dma.done.wait (%p24049_p5), [#allocation12], 3456   ;;  %p24050_p7 = pmov %p24045_p4 }
 0x266   : > { %p24051_p6 = pmov %p24045_p4 }
 0x267   : > { %21869 = vsyncadd (%p24050_p7), [#allocation12], 4294963840 }
 0x268   : > { %21871 = dma.done.wait (%p24051_p6), [#allocation15], 3456   ;;  %p24052_p9 = pmov %p24045_p4 }
 0x269   : > { %p24053_p12 = pmov %p24045_p4 }
 0x26a   : > { %21873 = vsyncadd (%p24052_p9), [#allocation15], 4294963840 }
 0x26b   : > { %21875 = dma.done.wait (%p24053_p12), [#allocation18], 3120   ;;  %p24054_p1 = pmov %p24045_p4 }
 0x26d   : > { %21877 = vsyncadd (%p24054_p1), [#allocation18], 4294964176  ;;  %p24055_p13 = pmov %p24054_p1 }
 0x26e   : > { %p24056_p0 = pmov %p24054_p1 }
 0x26f   : > { %21879 = dma.done.wait (%p24055_p13), [#allocation21], 49920  }
 0x270   : > { %21881 = vsyncadd (%p24056_p0), [#allocation21], 4294917376  ;;  %p24057_p2 = pmov %p24056_p0 }
 0x271   : > { %p24058_p3 = pmov %p24056_p0 }
 0x272   : > { %21883 = dma.done.wait (%p24057_p2), [#allocation24], 49200  }
 0x273   : > { %21885 = vsyncadd (%p24058_p3), [#allocation24], 4294918096  ;;  %p24059_p4 = pmov %p24056_p0 }
 0x274   : > { %p24060_p10 = pmov %p24056_p0 }
 0x275   : > { %21887 = dma.done.wait (%p24059_p4), [#allocation27], 96  }
 0x276   : > { %21889 = vsyncadd (%p24060_p10), [#allocation27], 4294967200  ;;  %p24061_p11 = pmov %p24056_p0 }
 0x277   : > { %p24062_p8 = pmov %p24056_p0 }
 0x278   : > { %21891 = dma.done.wait (%p24061_p11), [#allocation30], 96  }
 0x279   : > { %21893 = vsyncadd (%p24062_p8), [#allocation30], 4294967200  ;;  %p24063_p5 = pmov %p24056_p0 }
 0x27a   : > { %p24064_p7 = pmov %p24056_p0 }
 0x27b   : > { %21895 = dma.done.wait (%p24063_p5), [#allocation33], 32  }
 0x27c   : > { %21897 = vsyncadd (%p24064_p7), [#allocation33], 4294967264  ;;  %v20576_v0 = vld [vmem:[#allocation5 + $0x40] sm:$0xff]   ;;  %v20578_v2 = vld [vmem:[#allocation5 + $0x48] sm:$0xff]   ;;  %v21949_v22 = vmov 0.0   ;;  %vm21950_vm0 = vmmov 0  }
 0x27d   : > { %v20577_v1 = vld [vmem:[#allocation5] sm:$0xff]   ;;  %18567 = vmatprep.subr.bf16.mxu0 %v20576_v0  ;;  %v20579_v3 = vld [vmem:[#allocation5 + $0x8] sm:$0xff]   ;;  %v20580_v4 = vld [vmem:[#allocation5 + $0x50] sm:$0xff]   ;;  %19419 = vmatprep.subr.bf16.mxu1 %v21949_v22  ;;  %vm2565_vm1 = vcmask 130048   ;;  %vm3042_vm2 = vcmask 1043456   ;;  %vm2934_vm3 = vcmask 64512  }
 0x27e   : > { %18568 = vmatpush3.bf16.msra.mxu0 %v20577_v1  ;;  %v20581_v5 = vld [vmem:[#allocation5 + $0x10] sm:$0xff]   ;;  %v20582_v6 = vld [vmem:[#allocation5 + $0x58] sm:$0xff]   ;;  %v20584_v8 = vld [vmem:[#allocation5 + $0x60] sm:$0xff]   ;;  %19421 = vmatprep.mubr.msk.bf16.mxu1 %vm21950_vm0, %v21949_v22  ;;  %s24065_s19 = sld [smem:[#allocation68_spill]]  ;;  %s24066_s4 = sld [smem:[#allocation69_spill]]  ;;  %vm17098_vm4 = vcmask 523264  }
 0x27f   : > { %18569 = vmatprep.subr.bf16.mxu0 %v20578_v2  ;;  %v20583_v7 = vld [vmem:[#allocation5 + $0x18] sm:$0xff]   ;;  %v20585_v9 = vld [vmem:[#allocation5 + $0x20] sm:$0xff]   ;;  %v20586_v10 = vld [vmem:[#allocation5 + $0x68] sm:$0xff]   ;;  %s1040_s2 = scalar_lea.vmem [#allocation35], %s22661_s27  ;;  %s23993_s1 = sshll.u32 %s24044_s30, 4 }
 0x280   : > { %v1049_v11 = vld [vmem:[%s22665_s21 + $0x8] sm:$0xff]  ;;  %v20588_v14 = vld [vmem:[#allocation5 + $0x70] sm:$0xff]   ;;  %v17506_v23 = vld [vmem:[#allocation7] ss:$0 sm:$0xff]  ;;  %s17161_s7 = sshll.u32 %s1040_s2, 4  ;;  %s24067_s23 = sld [smem:[#allocation70_spill]]  ;;  %s17162_s7 = int_to_ptr.vmem [resolvable:$true] %s17161_s7 }
 0x281   : > { %v20587_v12 = vld [vmem:[#allocation5 + $0x28] sm:$0xff]   ;;  %v1083_v13 = vpack.c.bf16 %v1049_v11, %v1049_v11  ;;  %v20589_v15 = vld [vmem:[#allocation5 + $0x30] sm:$0xff]   ;;  %v20590_v16 = vld [vmem:[#allocation5 + $0x78] sm:$0xff]   ;;  %s17145_s26 = scalar_lea.sflag [#allocation4], %s22661_s27  ;;  %s21782_s9 = scalar_lea.vmem %s17162_s7, 16 }
 0x282   : > { %18570 = vmatpush3.bf16.msra.mxu0 %v20579_v3  ;;  %v20591_v17 = vld [vmem:[#allocation5 + $0x38] sm:$0xff]   ;;  %v1048_v18 = vld [vmem:[%s22665_s21] sm:$0xff]  ;;  %p21783_p6 = scmp.ne.s32.totalorder %s17162_s7, %s21782_s9  ;;  %p24068_p9 = scmp.ne.s32.totalorder %s24037_s29, 0 }
 0x283   : > { %18571 = vmatprep.subr.bf16.mxu0 %v20580_v4  ;;  %1219 = vmatprep.mubr.bf16.mxu0 %v1083_v13  ;;  %v1082_v19 = vpack.c.bf16 %v1048_v18, %v1048_v18  ;;  %v20592_v20 = vld [vmem:[#allocation8] sm:$0xff]   ;;  %v20593_v21 = vld [vmem:[#allocation8 + $0x30] sm:$0xff]   ;;  %v20594_v30 = vld [vmem:[#allocation8 + $0x8] sm:$0xff]   ;;  %s21952_s3 = smov [#allocation35]  }
 0x284   : > { %19420 = vmatpush3.bf16.xpose.msra.mxu1 %v20592_v20  ;;  %v20595_v32 = vld [vmem:[#allocation11] sm:$0xff]   ;;  %v20596_v34 = vld [vmem:[#allocation8 + $0x10] sm:$0xff]   ;;  %v20597_v35 = vld [vmem:[#allocation11 + $0x10] sm:$0xff]   ;;  %p21784_p12 = pnand %p21783_p6, %p24068_p9 }
 0x285   : > { %19425 = vmatprep.subr.bf16.mxu1 %v21949_v22  ;;  %v20598_v36 = vld [vmem:[#allocation8 + $0x18] sm:$0xff]   ;;  %v20600_v38 = vld [vmem:[#allocation8 + $0x20] sm:$0xff]   ;;  %v20601_v39 = vld [vmem:[#allocation11 + $0x30] sm:$0xff]  }
 0x286   : > { %18572 = vmatpush3.bf16.msra.mxu0 %v20581_v5  ;;  %v20599_v37 = vld [vmem:[#allocation11 + $0x20] sm:$0xff]   ;;  %v20602_v40 = vld [vmem:[#allocation8 + $0x28] sm:$0xff]   ;;  %v20603_v41 = vld [vmem:[#allocation14] sm:$0xff]   ;;  %s23864_s0 = scalar_lea.hbm %s24067_s23, %s23993_s1  ;;  %p21785_p1 = pneg %p21784_p12 }
 0x287   : > { %18573 = vmatprep.subr.bf16.mxu0 %v20582_v6  ;;  %v20604_v42 = vld [vmem:[#allocation8 + $0x38] sm:$0xff]   ;;  %v20605_v43 = vld [vmem:[#allocation14 + $0x10] sm:$0xff]   ;;  %v20607_v45 = vld [vmem:[#allocation14 + $0x20] sm:$0xff]  }
 0x288   : > { %v20606_v44 = vld [vmem:[#allocation11 + $0x8] sm:$0xff]   ;;  %v20608_v46 = vld [vmem:[#allocation11 + $0x18] sm:$0xff]   ;;  %v20612_v50 = vld [vmem:[#allocation14 + $0x8] sm:$0xff]  }
 0x289   : > { %v20609_v47 = vld [vmem:[#allocation14 + $0x30] sm:$0xff]   ;;  %v20611_v49 = vld [vmem:[#allocation11 + $0x38] sm:$0xff]   ;;  %v20613_v51 = vld [vmem:[#allocation14 + $0x18] sm:$0xff]  }
 0x28a   : > { %18574 = vmatpush3.bf16.msra.mxu0 %v20583_v7  ;;  %v20610_v48 = vld [vmem:[#allocation11 + $0x28] sm:$0xff]   ;;  %v20614_v52 = vld [vmem:[#allocation14 + $0x28] sm:$0xff]   ;;  %v20615_v53 = vld [vmem:[#allocation14 + $0x38] sm:$0xff]  }
 0x28b   : > { %18575 = vmatprep.subr.bf16.mxu0 %v20584_v8  ;;  %v17539_v62 = vld [vmem:[#allocation13] ss:$0 sm:$0xff]  ;;  %v17541_v11 = vld [vmem:[#allocation13 + $0x2] ss:$0 sm:$0xff] }
 0x28e   : > { %18576 = vmatpush3.bf16.msra.mxu0 %v20585_v9  ;;  %v17523_v9 = vld [vmem:[#allocation10] ss:$0 sm:$0xff] }
 0x28f   : > { %18577 = vmatprep.subr.bf16.mxu0 %v20586_v10 }
 0x292   : > { %18578 = vmatpush3.bf16.msra.mxu0 %v20587_v12 }
 0x293   : > { %18579 = vmatprep.subr.bf16.mxu0 %v20588_v14 }
 0x296   : > { %18580 = vmatpush3.bf16.msra.mxu0 %v20589_v15 }
 0x297   : > { %18581 = vmatprep.subr.bf16.mxu0 %v20590_v16 }
 0x29a   : > { %18582 = vmatpush3.bf16.msra.mxu0 %v20591_v17 }
 0x29b   : > { %19455 = vmatprep.subr.bf16.mxu0 %v21949_v22 }
 0x29d   : > { %1220 = vmatmul.mubr.bf16.vlgmr.msra.gmra.mrb[0].mxu0 %v1082_v19 }
 0x29e   : > { %19457 = vmatprep.mubr.msk.bf16.mxu0 %vm21950_vm0, %v21949_v22 }
 0x2a3   : > { %19456 = vmatpush3.bf16.xpose.msra.mxu0 %v20593_v21 }
 0x2a4   : > { %19467 = vmatprep.subr.bf16.mxu0 %v21949_v22 }
 0x370   : > { %v18583_v24 = vpop.f32.mrb[0].mxu0 }
 0x371   : > { %v18584_v25 = vpop.f32.mrb[1].mxu0 }
 0x372   : > { %v18585_v26 = vadd.f32 %v18584_v25, %v18583_v24  ;;  %v18586_v27 = vpop.f32.mrb[2].mxu0  ;;  %v17525_v25 = vld [vmem:[#allocation10 + $0x2] ss:$0 sm:$0xff] }
 0x373   : > { %v18587_v28 = vpop.f32.mrb[3].mxu0  ;;  %v17543_v27 = vld [vmem:[#allocation13 + $0x4] ss:$0 sm:$0xff] }
 0x374   : > { %v1222_v29 = vadd.f32 %v18585_v26, %v17506_v23 }
 0x376   : > { %v22721_v31 = vmax.f32 %v1222_v29, 0.0 }
 0x378   : > { %v22725_v33 = vpack.c.bf16 %v22721_v31, %v22721_v31 }
 0x37a   : > { %19422 = vmatmul.mubr.bf16.vlgmr.msra.gmra.mrb[0].mxu1 %v22725_v33  ;;  %19458 = vmatmul.mubr.bf16.vlgmr.msra.gmra.mrb[4].mxu0 %v22725_v33 }
 0x37b   : > { %19426 = vmatpush3.bf16.xpose.msra.mxu1 %v20594_v30  ;;  %19468 = vmatpush3.bf16.xpose.msra.mxu0 %v20595_v32 }
 0x37c   : > { %19427 = vmatprep.mubr.msk.bf16.mxu1 %vm21950_vm0, %v21949_v22  ;;  %19469 = vmatprep.mubr.msk.bf16.mxu0 %vm21950_vm0, %v21949_v22 }
 0x37d   : > { %19431 = vmatprep.subr.bf16.mxu1 %v21949_v22  ;;  %19479 = vmatprep.subr.bf16.mxu0 %v21949_v22 }
 0x382   : > { %19428 = vmatmul.mubr.bf16.vlgmr.msra.gmra.mrb[4].mxu1 %v22725_v33  ;;  %19470 = vmatmul.mubr.bf16.vlgmr.msra.gmra.mrb[8].mxu0 %v22725_v33 }
 0x383   : > { %19432 = vmatpush3.bf16.xpose.msra.mxu1 %v20596_v34  ;;  %19480 = vmatpush3.bf16.xpose.msra.mxu0 %v20597_v35 }
 0x384   : > { %19433 = vmatprep.mubr.msk.bf16.mxu1 %vm21950_vm0, %v21949_v22  ;;  %19481 = vmatprep.mubr.msk.bf16.mxu0 %vm21950_vm0, %v21949_v22 }
 0x385   : > { %19437 = vmatprep.subr.bf16.mxu1 %v21949_v22  ;;  %19491 = vmatprep.subr.bf16.mxu0 %v21949_v22 }
 0x38a   : > { %19434 = vmatmul.mubr.bf16.vlgmr.msra.gmra.mrb[8].mxu1 %v22725_v33  ;;  %19482 = vmatmul.mubr.bf16.vlgmr.msra.gmra.mrb[12].mxu0 %v22725_v33 }
 0x38b   : > { %19438 = vmatpush3.bf16.xpose.msra.mxu1 %v20598_v36  ;;  %19492 = vmatpush3.bf16.xpose.msra.mxu0 %v20599_v37 }
 0x38c   : > { %19439 = vmatprep.mubr.msk.bf16.mxu1 %vm21950_vm0, %v21949_v22  ;;  %19493 = vmatprep.mubr.msk.bf16.mxu0 %vm21950_vm0, %v21949_v22 }
 0x38d   : > { %19443 = vmatprep.subr.bf16.mxu1 %v21949_v22  ;;  %19503 = vmatprep.subr.bf16.mxu0 %v21949_v22 }
 0x392   : > { %19440 = vmatmul.mubr.bf16.vlgmr.msra.gmra.mrb[12].mxu1 %v22725_v33  ;;  %19494 = vmatmul.mubr.bf16.vlgmr.msra.gmra.mrb[16].mxu0 %v22725_v33 }
 0x393   : > { %19444 = vmatpush3.bf16.xpose.msra.mxu1 %v20600_v38  ;;  %19504 = vmatpush3.bf16.xpose.msra.mxu0 %v20601_v39 }
 0x394   : > { %19445 = vmatprep.mubr.msk.bf16.mxu1 %vm21950_vm0, %v21949_v22  ;;  %19505 = vmatprep.mubr.msk.bf16.mxu0 %vm21950_vm0, %v21949_v22 }
 0x395   : > { %19449 = vmatprep.subr.bf16.mxu1 %v21949_v22  ;;  %19515 = vmatprep.subr.bf16.mxu0 %v21949_v22 }
 0x39a   : > { %19446 = vmatmul.mubr.bf16.vlgmr.msra.gmra.mrb[16].mxu1 %v22725_v33  ;;  %19506 = vmatmul.mubr.bf16.vlgmr.msra.gmra.mrb[20].mxu0 %v22725_v33 }
 0x39b   : > { %19450 = vmatpush3.bf16.xpose.msra.mxu1 %v20602_v40  ;;  %19516 = vmatpush3.bf16.xpose.msra.mxu0 %v20603_v41 }
 0x39c   : > { %19451 = vmatprep.mubr.msk.bf16.mxu1 %vm21950_vm0, %v21949_v22  ;;  %19517 = vmatprep.mubr.msk.bf16.mxu0 %vm21950_vm0, %v21949_v22 }
 0x39d   : > { %19461 = vmatprep.subr.bf16.mxu1 %v21949_v22  ;;  %19527 = vmatprep.subr.bf16.mxu0 %v21949_v22 }
 0x3a2   : > { %19452 = vmatmul.mubr.bf16.vlgmr.msra.gmra.mrb[20].mxu1 %v22725_v33  ;;  %19518 = vmatmul.mubr.bf16.vlgmr.msra.gmra.mrb[24].mxu0 %v22725_v33 }
 0x3a3   : > { %19462 = vmatpush3.bf16.xpose.msra.mxu1 %v20604_v42  ;;  %19528 = vmatpush3.bf16.xpose.msra.mxu0 %v20605_v43  ;;  %v17527_v42 = vld [vmem:[#allocation10 + $0x4] ss:$0 sm:$0xff]  ;;  %v17545_v43 = vld [vmem:[#allocation13 + $0x6] ss:$0 sm:$0xff] }
 0x3a4   : > { %19463 = vmatprep.mubr.msk.bf16.mxu1 %vm21950_vm0, %v21949_v22  ;;  %19529 = vmatprep.mubr.msk.bf16.mxu0 %vm21950_vm0, %v21949_v22 }
 0x3a5   : > { %19473 = vmatprep.subr.bf16.mxu1 %v21949_v22  ;;  %19539 = vmatprep.subr.bf16.mxu0 %v21949_v22 }
 0x3aa   : > { %19464 = vmatmul.mubr.bf16.vlgmr.msra.gmra.mrb[24].mxu1 %v22725_v33  ;;  %19530 = vmatmul.mubr.bf16.vlgmr.msra.gmra.mrb[28].mxu0 %v22725_v33 }
 0x3ab   : > { %19474 = vmatpush3.bf16.xpose.msra.mxu1 %v20606_v44  ;;  %19540 = vmatpush3.bf16.xpose.msra.mxu0 %v20607_v45 }
 0x3ac   : > { %19475 = vmatprep.mubr.msk.bf16.mxu1 %vm21950_vm0, %v21949_v22  ;;  %19541 = vmatprep.mubr.msk.bf16.mxu0 %vm21950_vm0, %v21949_v22 }
 0x3ad   : > { %19485 = vmatprep.subr.bf16.mxu1 %v21949_v22  ;;  %19551 = vmatprep.subr.bf16.mxu0 %v21949_v22 }
 0x3b2   : > { %19476 = vmatmul.mubr.bf16.vlgmr.msra.gmra.mrb[28].mxu1 %v22725_v33  ;;  %19542 = vmatmul.mubr.bf16.vlgmr.msra.gmra.mrb[32].mxu0 %v22725_v33 }
 0x3b3   : > { %19486 = vmatpush3.bf16.xpose.msra.mxu1 %v20608_v46  ;;  %19552 = vmatpush3.bf16.xpose.msra.mxu0 %v20609_v47 }
 0x3b4   : > { %19487 = vmatprep.mubr.msk.bf16.mxu1 %vm21950_vm0, %v21949_v22  ;;  %19553 = vmatprep.mubr.msk.bf16.mxu0 %vm21950_vm0, %v21949_v22 }
 0x3b5   : > { %19497 = vmatprep.subr.bf16.mxu1 %v21949_v22  ;;  %19563 = vmatprep.subr.bf16.mxu0 %v21949_v22 }
 0x3ba   : > { %19488 = vmatmul.mubr.bf16.vlgmr.msra.gmra.mrb[32].mxu1 %v22725_v33  ;;  %19554 = vmatmul.mubr.bf16.vlgmr.msra.gmra.mrb[36].mxu0 %v22725_v33 }
 0x3bb   : > { %19498 = vmatpush3.bf16.xpose.msra.mxu1 %v20610_v48  ;;  %19499 = vmatprep.mubr.msk.bf16.mxu1 %vm21950_vm0, %v21949_v22 }
 0x3bc   : > { %19509 = vmatprep.subr.bf16.mxu1 %v21949_v22  ;;  %19565 = vmatprep.mubr.msk.bf16.mxu0 %vm21950_vm0, %v21949_v22 }
 0x3c2   : > { %19500 = vmatmul.mubr.bf16.vlgmr.msra.gmra.mrb[36].mxu1 %v22725_v33 }
 0x3c3   : > { %19510 = vmatpush3.bf16.xpose.msra.mxu1 %v20611_v49  ;;  %19511 = vmatprep.mubr.msk.bf16.mxu1 %vm21950_vm0, %v21949_v22 }
 0x3c4   : > { %19521 = vmatprep.subr.bf16.mxu1 %v21949_v22 }
 0x3ca   : > { %19512 = vmatmul.mubr.bf16.vlgmr.msra.gmra.mrb[40].mxu1 %v22725_v33 }
 0x3cb   : > { %19522 = vmatpush3.bf16.xpose.msra.mxu1 %v20612_v50  ;;  %19523 = vmatprep.mubr.msk.bf16.mxu1 %vm21950_vm0, %v21949_v22 }
 0x3cc   : > { %19533 = vmatprep.subr.bf16.mxu1 %v21949_v22 }
 0x3d2   : > { %19524 = vmatmul.mubr.bf16.vlgmr.msra.gmra.mrb[44].mxu1 %v22725_v33 }
 0x3d3   : > { %19534 = vmatpush3.bf16.xpose.msra.mxu1 %v20613_v51  ;;  %19535 = vmatprep.mubr.msk.bf16.mxu1 %vm21950_vm0, %v21949_v22 }
 0x3d4   : > { %19545 = vmatprep.subr.bf16.mxu1 %v21949_v22 }
 0x3da   : > { %19536 = vmatmul.mubr.bf16.vlgmr.msra.gmra.mrb[48].mxu1 %v22725_v33 }
 0x3db   : > { %19546 = vmatpush3.bf16.xpose.msra.mxu1 %v20614_v52  ;;  %19547 = vmatprep.mubr.msk.bf16.mxu1 %vm21950_vm0, %v21949_v22 }
 0x3dc   : > { %19557 = vmatprep.subr.bf16.mxu1 %v21949_v22 }
 0x3e2   : > { %19548 = vmatmul.mubr.bf16.vlgmr.msra.gmra.mrb[52].mxu1 %v22725_v33 }
 0x3e3   : > { %19558 = vmatpush3.bf16.xpose.msra.mxu1 %v20615_v53  ;;  %19559 = vmatprep.mubr.msk.bf16.mxu1 %vm21950_vm0, %v21949_v22 }
 0x3e4   : > { %19569 = vmatprep.subr.bf16.mxu1 %v21949_v22 }
 0x3ea   : > { %19560 = vmatmul.mubr.bf16.vlgmr.msra.gmra.mrb[56].mxu1 %v22725_v33 }
 0x3eb   : > { %19571 = vmatprep.mubr.msk.bf16.mxu1 %vm21950_vm0, %v21949_v22 }
 0x44d   : > { %v1341_v54 = vpop.f32.mrb[0].mxu1  ;;  %v22821_v55 = vpop.f32.mrb[4].mxu0 }
 0x44e   : > { %v19423_v56 = vpop.f32.mrb[1].mxu1  ;;  %v19459_v57 = vpop.f32.mrb[5].mxu0  ;;  %v1342_v12 = vadd.f32 %v17523_v9, %v1341_v54 }
 0x44f   : > { %v1344_v58 = vpop.f32.mrb[2].mxu1  ;;  %v1620_v59 = vpop.f32.mrb[6].mxu0  ;;  %v17529_v57 = vld [vmem:[#allocation10 + $0x6] ss:$0 sm:$0xff] }
 0x450   : > { %v19424_v60 = vpop.f32.mrb[3].mxu1  ;;  %v19460_v61 = vpop.f32.mrb[7].mxu0  ;;  %v2549_v20 = vpack.c.bf16 %v1342_v12, %v1342_v12  ;;  %v17555_v59 = vld [vmem:[#allocation16] ss:$0 sm:$0xff] }
 0x451   : > { %v1618_v60 = vadd.f32 %v17529_v57, %v22821_v55  ;;  %v17528_v57 = vld [vmem:[#allocation10 + $0x5] ss:$0 sm:$0xff] }
 0x455   : > { %v22823_v63 = vpop.f32.mrb[4].mxu1  ;;  %v1781_v0 = vpop.f32.mrb[8].mxu0 }
 0x456   : > { %v1782_v1 = vadd.f32 %v17539_v62, %v1781_v0  ;;  %v19429_v2 = vpop.f32.mrb[5].mxu1  ;;  %v19471_v3 = vpop.f32.mrb[9].mxu0 }
 0x457   : > { %v1390_v4 = vpop.f32.mrb[6].mxu1  ;;  %v1784_v5 = vpop.f32.mrb[10].mxu0 }
 0x458   : > { %v2557_v6 = vpack.c.bf16 %v1782_v1, %v1782_v1  ;;  %v19430_v7 = vpop.f32.mrb[7].mxu1  ;;  %v19472_v8 = vpop.f32.mrb[11].mxu0  ;;  %v2555_v5 = vpack.c.bf16 %v1618_v60, %v1618_v60 }
 0x45a   : > { %v2570_v10 = vsel %vm2565_vm1, %v2557_v6, 0 }
 0x45b   : > { %19564 = vmatpush3.bf16.xpose.msra.mxu0 %v2570_v10 }
 0x45c   : > { %19575 = vmatprep.subr.bf16.mxu0 %v21949_v22 }
 0x45d   : > { %v1433_v13 = vpop.f32.mrb[8].mxu1  ;;  %v1873_v14 = vpop.f32.mrb[12].mxu0 }
 0x45e   : > { %v1874_v15 = vadd.f32 %v17541_v11, %v1873_v14  ;;  %v19435_v16 = vpop.f32.mrb[9].mxu1  ;;  %v19483_v17 = vpop.f32.mrb[13].mxu0  ;;  %v1434_v28 = vadd.f32 %v17525_v25, %v1433_v13 }
 0x45f   : > { %v1436_v18 = vpop.f32.mrb[10].mxu1  ;;  %v1876_v19 = vpop.f32.mrb[14].mxu0  ;;  %v17540_v17 = vld [vmem:[#allocation13 + $0x1] ss:$0 sm:$0xff] }
 0x460   : > { %v2559_v21 = vpack.c.bf16 %v1874_v15, %v1874_v15  ;;  %v19436_v23 = vpop.f32.mrb[11].mxu1  ;;  %v19484_v24 = vpop.f32.mrb[15].mxu0  ;;  %v2551_v37 = vpack.c.bf16 %v1434_v28, %v1434_v28 }
 0x462   : > { %19566 = vmatmul.mubr.msk.bf16.vlgmr.msra.gmra.mrb[40].mxu0 %vm2565_vm1, %v2549_v20  ;;  %v2662_v26 = vsel %vm2565_vm1, %v2559_v21, 0 }
 0x463   : > { %19576 = vmatpush3.bf16.xpose.msra.mxu0 %v2662_v26  ;;  %19577 = vmatprep.mubr.msk.bf16.mxu0 %vm21950_vm0, %v21949_v22 }
 0x464   : > { %19587 = vmatprep.subr.bf16.mxu0 %v21949_v22 }
 0x465   : > { %v22832_v29 = vpop.f32.mrb[12].mxu1  ;;  %v1965_v30 = vpop.f32.mrb[16].mxu0 }
 0x466   : > { %v1966_v32 = vadd.f32 %v17543_v27, %v1965_v30  ;;  %v19441_v33 = vpop.f32.mrb[13].mxu1  ;;  %v19495_v34 = vpop.f32.mrb[17].mxu0  ;;  %v17524_v30 = vld [vmem:[#allocation10 + $0x1] ss:$0 sm:$0xff] }
 0x467   : > { %v1482_v35 = vpop.f32.mrb[14].mxu1  ;;  %v1968_v36 = vpop.f32.mrb[18].mxu0  ;;  %v17542_v33 = vld [vmem:[#allocation13 + $0x3] ss:$0 sm:$0xff]  ;;  %v1388_v34 = vadd.f32 %v17524_v30, %v22823_v63  ;;  %v17544_v63 = vld [vmem:[#allocation13 + $0x5] ss:$0 sm:$0xff] }
 0x468   : > { %v2561_v38 = vpack.c.bf16 %v1966_v32, %v1966_v32  ;;  %v19442_v39 = vpop.f32.mrb[15].mxu1  ;;  %v19496_v40 = vpop.f32.mrb[19].mxu0 }
 0x46a   : > { %19578 = vmatmul.mubr.msk.bf16.vlgmr.msra.gmra.mrb[44].mxu0 %vm2565_vm1, %v2551_v37  ;;  %v2754_v41 = vsel %vm2565_vm1, %v2561_v38, 0 }
 0x46b   : > { %19588 = vmatpush3.bf16.xpose.msra.mxu0 %v2754_v41  ;;  %19589 = vmatprep.mubr.msk.bf16.mxu0 %vm21950_vm0, %v21949_v22 }
 0x46c   : > { %19599 = vmatprep.subr.bf16.mxu0 %v21949_v22 }
 0x46d   : > { %v1525_v44 = vpop.f32.mrb[16].mxu1  ;;  %v2057_v45 = vpop.f32.mrb[20].mxu0 }
 0x46e   : > { %v1526_v46 = vadd.f32 %v17527_v42, %v1525_v44  ;;  %v2058_v47 = vadd.f32 %v17545_v43, %v2057_v45  ;;  %v19447_v48 = vpop.f32.mrb[17].mxu1  ;;  %v19507_v49 = vpop.f32.mrb[21].mxu0  ;;  %v2550_v42 = vpack.c.bf16 %v1388_v34, %v1388_v34 }
 0x46f   : > { %v1528_v50 = vpop.f32.mrb[18].mxu1  ;;  %v2060_v51 = vpop.f32.mrb[22].mxu0 }
 0x470   : > { %v2553_v52 = vpack.c.bf16 %v1526_v46, %v1526_v46  ;;  %v2563_v53 = vpack.c.bf16 %v2058_v47, %v2058_v47  ;;  %v19448_v54 = vpop.f32.mrb[19].mxu1  ;;  %v19508_v56 = vpop.f32.mrb[23].mxu0  ;;  %v17526_v46 = vld [vmem:[#allocation10 + $0x3] ss:$0 sm:$0xff] }
 0x471   : > { %v1480_v48 = vadd.f32 %v17526_v46, %v22832_v29 }
 0x472   : > { %19590 = vmatmul.mubr.msk.bf16.vlgmr.msra.gmra.mrb[48].mxu0 %vm2565_vm1, %v2553_v52  ;;  %v2846_v58 = vsel %vm2565_vm1, %v2563_v53, 0 }
 0x473   : > { %19600 = vmatpush3.bf16.xpose.msra.mxu0 %v2846_v58  ;;  %19601 = vmatprep.mubr.msk.bf16.mxu0 %vm21950_vm0, %v21949_v22  ;;  %v2552_v53 = vpack.c.bf16 %v1480_v48, %v1480_v48 }
 0x474   : > { %19611 = vmatprep.subr.bf16.mxu0 %v21949_v22 }
 0x475   : > { %v22845_v61 = vpop.f32.mrb[20].mxu1  ;;  %v2221_v62 = vpop.f32.mrb[24].mxu0 }
 0x476   : > { %v2222_v0 = vadd.f32 %v17555_v59, %v2221_v62  ;;  %v19453_v1 = vpop.f32.mrb[21].mxu1  ;;  %v19519_v2 = vpop.f32.mrb[25].mxu0  ;;  %v17546_v59 = vld [vmem:[#allocation13 + $0x7] ss:$0 sm:$0xff]  ;;  %v1572_v29 = vadd.f32 %v17528_v57, %v22845_v61 }
 0x477   : > { %v1574_v3 = vpop.f32.mrb[22].mxu1  ;;  %v2224_v4 = vpop.f32.mrb[26].mxu0 }
 0x478   : > { %v3031_v6 = vpack.c.bf16 %v2222_v0, %v2222_v0  ;;  %v19454_v7 = vpop.f32.mrb[23].mxu1  ;;  %v19520_v8 = vpop.f32.mrb[27].mxu0  ;;  %v2554_v2 = vpack.c.bf16 %v1572_v29, %v1572_v29 }
 0x479   : > { %v17556_v7 = vld [vmem:[#allocation16 + $0x1] ss:$0 sm:$0xff] }
 0x47a   : > { %19602 = vmatmul.mubr.msk.bf16.vlgmr.msra.gmra.mrb[52].mxu0 %vm2565_vm1, %v2555_v5  ;;  %v3044_v9 = vsel %vm3042_vm2, %v3031_v6, 0  ;;  %v17530_v5 = vld [vmem:[#allocation10 + $0x7] ss:$0 sm:$0xff] }
 0x47b   : > { %19612 = vmatpush3.bf16.msra.mxu0 %v3044_v9  ;;  %19613 = vmatprep.mubr.msk.bf16.mxu0 %vm21950_vm0, %v21949_v22 }
 0x47c   : > { %19623 = vmatprep.subr.bf16.mxu0 %v21949_v22 }
 0x47d   : > { %v22852_v55 = vpop.f32.mrb[24].mxu1  ;;  %v22854_v10 = vpop.f32.mrb[28].mxu0 }
 0x47e   : > { %v19465_v11 = vpop.f32.mrb[25].mxu1  ;;  %v19531_v12 = vpop.f32.mrb[29].mxu0  ;;  %v1664_v61 = vadd.f32 %v17530_v5, %v22852_v55 }
 0x47f   : > { %v1666_v13 = vpop.f32.mrb[26].mxu1  ;;  %v2316_v14 = vpop.f32.mrb[30].mxu0 }
 0x480   : > { %v19466_v15 = vpop.f32.mrb[27].mxu1  ;;  %v19532_v16 = vpop.f32.mrb[31].mxu0  ;;  %v2556_v13 = vpack.c.bf16 %v1664_v61, %v1664_v61 }
 0x485   : > { %v1827_v18 = vpop.f32.mrb[28].mxu1  ;;  %v22856_v19 = vpop.f32.mrb[32].mxu0 }
 0x486   : > { %v1828_v20 = vadd.f32 %v17540_v17, %v1827_v18  ;;  %v19477_v21 = vpop.f32.mrb[29].mxu1  ;;  %v19543_v23 = vpop.f32.mrb[33].mxu0 }
 0x487   : > { %v1830_v24 = vpop.f32.mrb[30].mxu1  ;;  %v2408_v25 = vpop.f32.mrb[34].mxu0 }
 0x488   : > { %v2558_v26 = vpack.c.bf16 %v1828_v20, %v1828_v20  ;;  %v19478_v27 = vpop.f32.mrb[31].mxu1  ;;  %v19544_v28 = vpop.f32.mrb[35].mxu0 }
 0x48a   : > { %v2616_v32 = vsel %vm2565_vm1, %v2558_v26, 0 }
 0x48b   : > { %19570 = vmatpush3.bf16.xpose.msra.mxu1 %v2616_v32 }
 0x48c   : > { %19581 = vmatprep.subr.bf16.mxu1 %v21949_v22 }
 0x48d   : > { %v1919_v35 = vpop.f32.mrb[32].mxu1  ;;  %v22861_v36 = vpop.f32.mrb[36].mxu0 }
 0x48e   : > { %v1920_v37 = vadd.f32 %v17542_v33, %v1919_v35  ;;  %v19489_v38 = vpop.f32.mrb[33].mxu1  ;;  %v19555_v39 = vpop.f32.mrb[37].mxu0 }
 0x48f   : > { %v1922_v40 = vpop.f32.mrb[34].mxu1  ;;  %v2500_v41 = vpop.f32.mrb[38].mxu0 }
 0x490   : > { %v2560_v43 = vpack.c.bf16 %v1920_v37, %v1920_v37  ;;  %v19490_v44 = vpop.f32.mrb[35].mxu1  ;;  %v19556_v45 = vpop.f32.mrb[39].mxu0 }
 0x492   : > { %19572 = vmatmul.mubr.msk.bf16.vlgmr.msra.gmra.mrb[60].mxu1 %vm2565_vm1, %v2550_v42  ;;  %v2708_v47 = vsel %vm2565_vm1, %v2560_v43, 0 }
 0x493   : > { %19582 = vmatpush3.bf16.xpose.msra.mxu1 %v2708_v47  ;;  %19583 = vmatprep.mubr.msk.bf16.mxu1 %vm21950_vm0, %v21949_v22 }
 0x494   : > { %19593 = vmatprep.subr.bf16.mxu1 %v21949_v22 }
 0x495   : > { %v2011_v49 = vpop.f32.mrb[36].mxu1 }
 0x496   : > { %v2012_v50 = vadd.f32 %v17544_v63, %v2011_v49  ;;  %v19501_v51 = vpop.f32.mrb[37].mxu1 }
 0x497   : > { %v2014_v52 = vpop.f32.mrb[38].mxu1 }
 0x498   : > { %v2562_v54 = vpack.c.bf16 %v2012_v50, %v2012_v50  ;;  %v19502_v56 = vpop.f32.mrb[39].mxu1 }
 0x49a   : > { %19584 = vmatmul.mubr.msk.bf16.vlgmr.msra.gmra.mrb[64].mxu1 %vm2565_vm1, %v2552_v53  ;;  %v2800_v58 = vsel %vm2565_vm1, %v2562_v54, 0 }
 0x49b   : > { %19594 = vmatpush3.bf16.xpose.msra.mxu1 %v2800_v58  ;;  %19595 = vmatprep.mubr.msk.bf16.mxu1 %vm21950_vm0, %v21949_v22 }
 0x49c   : > { %19605 = vmatprep.subr.bf16.mxu1 %v21949_v22 }
 0x49d   : > { %v2103_v60 = vpop.f32.mrb[40].mxu1 }
 0x49e   : > { %v2104_v62 = vadd.f32 %v17546_v59, %v2103_v60  ;;  %v19513_v0 = vpop.f32.mrb[41].mxu1 }
 0x49f   : > { %v2106_v1 = vpop.f32.mrb[42].mxu1 }
 0x4a0   : > { %v2564_v3 = vpack.c.bf16 %v2104_v62, %v2104_v62  ;;  %v19514_v4 = vpop.f32.mrb[43].mxu1 }
 0x4a2   : > { %19596 = vmatmul.mubr.msk.bf16.vlgmr.msra.gmra.mrb[68].mxu1 %vm2565_vm1, %v2554_v2  ;;  %v2892_v6 = vsel %vm2565_vm1, %v2564_v3, 0 }
 0x4a3   : > { %19606 = vmatpush3.bf16.xpose.msra.mxu1 %v2892_v6  ;;  %19607 = vmatprep.mubr.msk.bf16.mxu1 %vm21950_vm0, %v21949_v22 }
 0x4a4   : > { %19617 = vmatprep.subr.bf16.mxu1 %v21949_v22 }
 0x4a5   : > { %v2267_v8 = vpop.f32.mrb[44].mxu1 }
 0x4a6   : > { %v2268_v9 = vadd.f32 %v17556_v7, %v2267_v8  ;;  %v19525_v11 = vpop.f32.mrb[45].mxu1 }
 0x4a7   : > { %v2270_v12 = vpop.f32.mrb[46].mxu1 }
 0x4a8   : > { %v3032_v14 = vpack.c.bf16 %v2268_v9, %v2268_v9  ;;  %v19526_v15 = vpop.f32.mrb[47].mxu1 }
 0x4aa   : > { %19608 = vmatmul.mubr.msk.bf16.vlgmr.msra.gmra.mrb[72].mxu1 %vm2565_vm1, %v2556_v13  ;;  %v3090_v16 = vsel %vm3042_vm2, %v3032_v14, 0 }
 0x4ab   : > { %19618 = vmatpush3.bf16.msra.mxu1 %v3090_v16  ;;  %19619 = vmatprep.mubr.msk.bf16.mxu1 %vm21950_vm0, %v21949_v22 }
 0x4ac   : > { %19629 = vmatprep.subr.bf16.mxu1 %v21949_v22 }
 0x4ad   : > { %v22886_v55 = vpop.f32.mrb[48].mxu1 }
 0x4ae   : > { %v19537_v17 = vpop.f32.mrb[49].mxu1 }
 0x4af   : > { %v2362_v18 = vpop.f32.mrb[50].mxu1 }
 0x4b0   : > { %v19538_v20 = vpop.f32.mrb[51].mxu1 }
 0x4b5   : > { %v22888_v21 = vpop.f32.mrb[52].mxu1 }
 0x4b6   : > { %v19549_v23 = vpop.f32.mrb[53].mxu1 }
 0x4b7   : > { %v2454_v24 = vpop.f32.mrb[54].mxu1 }
 0x4b8   : > { %v19550_v25 = vpop.f32.mrb[55].mxu1 }
 0x4bd   : > { %v22890_v26 = vpop.f32.mrb[56].mxu1 }
 0x4be   : > { %v19561_v27 = vpop.f32.mrb[57].mxu1 }
 0x4bf   : > { %v2546_v28 = vpop.f32.mrb[58].mxu1 }
 0x4c0   : > { %v19562_v30 = vpop.f32.mrb[59].mxu1 }
 0x535   : > { %v2606_v32 = vpop.f32.mrb[40].mxu0 }
 0x536   : > { %v19567_v33 = vpop.f32.mrb[41].mxu0  ;;  %v2935_v34 = vsel %vm2934_vm3, %v2606_v32, -inf }
 0x537   : > { %2936 = vmax.xlane.f32.xlu0 %v2935_v34  ;;  %v2609_v35 = vpop.f32.mrb[42].mxu0 }
 0x538   : > { %v19568_v37 = vpop.f32.mrb[43].mxu0 }
 0x53d   : > { %v2698_v38 = vpop.f32.mrb[44].mxu0 }
 0x53e   : > { %v19579_v39 = vpop.f32.mrb[45].mxu0  ;;  %v2941_v40 = vsel %vm2934_vm3, %v2698_v38, -inf }
 0x53f   : > { %2942 = vmax.xlane.f32.xlu1 %v2941_v40  ;;  %v2701_v41 = vpop.f32.mrb[46].mxu0 }
 0x540   : > { %v19580_v42 = vpop.f32.mrb[47].mxu0 }
 0x545   : > { %v2790_v43 = vpop.f32.mrb[48].mxu0 }
 0x546   : > { %v19591_v44 = vpop.f32.mrb[49].mxu0  ;;  %v2947_v56 = vsel %vm2934_vm3, %v2790_v43, -inf }
 0x547   : > { %v2793_v45 = vpop.f32.mrb[50].mxu0 }
 0x548   : > { %v19592_v46 = vpop.f32.mrb[51].mxu0 }
 0x54d   : > { %v2882_v47 = vpop.f32.mrb[52].mxu0 }
 0x54e   : > { %v19603_v63 = vpop.f32.mrb[53].mxu0  ;;  %v2953_v59 = vsel %vm2934_vm3, %v2882_v47, -inf }
 0x54f   : > { %v2885_v48 = vpop.f32.mrb[54].mxu0 }
 0x550   : > { %v19604_v49 = vpop.f32.mrb[55].mxu0 }
 0x565   : > { %v2652_v50 = vpop.f32.mrb[60].mxu1 }
 0x566   : > { %v19573_v51 = vpop.f32.mrb[61].mxu1  ;;  %v2938_v52 = vsel %vm2934_vm3, %v2652_v50, -inf }
 0x567   : > { %2939 = vmax.xlane.f32.xlu0 %v2938_v52  ;;  %v2655_v53 = vpop.f32.mrb[62].mxu1 }
 0x568   : > { %v19574_v54 = vpop.f32.mrb[63].mxu1 }
 0x56b   : > { %2948 = vmax.xlane.f32.xlu0 %v2947_v56 }
 0x56d   : > { %v2744_v57 = vpop.f32.mrb[64].mxu1 }
 0x56e   : > { %v19585_v58 = vpop.f32.mrb[65].mxu1  ;;  %v2944_v29 = vsel %vm2934_vm3, %v2744_v57, -inf }
 0x56f   : > { %2954 = vmax.xlane.f32.xlu0 %v2953_v59  ;;  %2945 = vmax.xlane.f32.xlu1 %v2944_v29  ;;  %v2747_v60 = vpop.f32.mrb[66].mxu1  ;;  %v17557_v58 = vld [vmem:[#allocation16 + $0x2] ss:$0 sm:$0xff] }
 0x570   : > { %v19586_v62 = vpop.f32.mrb[67].mxu1  ;;  %v2314_v59 = vadd.f32 %v17557_v58, %v22854_v10 }
 0x572   : > { %v3033_v62 = vpack.c.bf16 %v2314_v59, %v2314_v59 }
 0x575   : > { %v2836_v0 = vpop.f32.mrb[68].mxu1 }
 0x576   : > { %v19597_v1 = vpop.f32.mrb[69].mxu1  ;;  %v2950_v2 = vsel %vm2934_vm3, %v2836_v0, -inf }
 0x577   : > { %2951 = vmax.xlane.f32.xlu1 %v2950_v2  ;;  %v2839_v3 = vpop.f32.mrb[70].mxu1  ;;  %v17559_v1 = vld [vmem:[#allocation16 + $0x4] ss:$0 sm:$0xff] }
 0x578   : > { %v19598_v4 = vpop.f32.mrb[71].mxu1  ;;  %v2406_v3 = vadd.f32 %v17559_v1, %v22856_v19 }
 0x579   : > { %v3136_v4 = vsel %vm3042_vm2, %v3033_v62, 0 }
 0x57d   : > { %v2928_v5 = vpop.f32.mrb[72].mxu1 }
 0x57e   : > { %v19609_v6 = vpop.f32.mrb[73].mxu1  ;;  %v2956_v7 = vsel %vm2934_vm3, %v2928_v5, -inf }
 0x57f   : > { %2957 = vmax.xlane.f32.xlu1 %v2956_v7  ;;  %v2931_v61 = vpop.f32.mrb[74].mxu1 }
 0x580   : > { %v19610_v8 = vpop.f32.mrb[75].mxu1 }
 0x5c4   : > { %v2937_v9 = vpop.xlane.xlu0 %2936 }
 0x5c5   : > { %v2959_v11 = vsub.f32 %v2606_v32, %v2937_v9  ;;  %v17558_v9 = vld [vmem:[#allocation16 + $0x3] ss:$0 sm:$0xff] }
 0x5c7   : > { %v2967_v12 = vmul.f32 1.442695, %v2959_v11  ;;  %v2360_v11 = vadd.f32 %v17558_v9, %v22886_v55 }
 0x5c9   : > { %21084 = vpow2.f32 %v2967_v12 }
 0x5cc   : > { %v2943_v13 = vpop.xlane.xlu1 %2942 }
 0x5cd   : > { %v2961_v14 = vsub.f32 %v2698_v38, %v2943_v13  ;;  %v17561_v13 = vld [vmem:[#allocation16 + $0x6] ss:$0 sm:$0xff] }
 0x5cf   : > { %v2971_v15 = vmul.f32 1.442695, %v2961_v14 }
 0x5d1   : > { %21086 = vpow2.f32 %v2971_v15 }
 0x5d3   : > { %v21085_v16 = vpop.eup %21084 }
 0x5d4   : > { %v2983_v17 = vsel %vm2934_vm3, %v21085_v16, 0.0 }
 0x5d5   : > { %2984 = vadd.xlane.f32.xlu0 %v2983_v17  ;;  %v3034_v17 = vpack.c.bf16 %v2360_v11, %v2360_v11 }
 0x5d7   : > { %v3182_v55 = vsel %vm3042_vm2, %v3034_v17, 0 }
 0x5db   : > { %v22901_v18 = vpop.eup %21086 }
 0x5dc   : > { %v2989_v20 = vsel %vm2934_vm3, %v22901_v18, 0.0 }
 0x5dd   : > { %2990 = vadd.xlane.f32.xlu0 %v2989_v20  ;;  %v17560_v20 = vld [vmem:[#allocation16 + $0x5] ss:$0 sm:$0xff] }
 0x5f4   : > { %v2940_v23 = vpop.xlane.xlu0 %2939 }
 0x5f5   : > { %v2960_v24 = vsub.f32 %v2652_v50, %v2940_v23 }
 0x5f7   : > { %v2969_v25 = vmul.f32 1.442695, %v2960_v24 }
 0x5f8   : > { %v2949_v27 = vpop.xlane.xlu0 %2948 }
 0x5f9   : > { %21088 = vpow2.f32 %v2969_v25  ;;  %v2963_v28 = vsub.f32 %v2790_v43, %v2949_v27 }
 0x5fb   : > { %v2975_v30 = vmul.f32 1.442695, %v2963_v28 }
 0x5fc   : > { %v2955_v32 = vpop.xlane.xlu0 %2954  ;;  %v2946_v33 = vpop.xlane.xlu1 %2945 }
 0x5fd   : > { %21090 = vpow2.f32 %v2975_v30  ;;  %v2965_v34 = vsub.f32 %v2882_v47, %v2955_v32  ;;  %v2962_v35 = vsub.f32 %v2744_v57, %v2946_v33  ;;  %v2452_v30 = vadd.f32 %v17560_v20, %v22888_v21  ;;  %v17562_v21 = vld [vmem:[#allocation16 + $0x7] ss:$0 sm:$0xff] }
 0x5ff   : > { %v2979_v37 = vmul.f32 1.442695, %v2965_v34  ;;  %v2973_v38 = vmul.f32 1.442695, %v2962_v35  ;;  %v3036_v35 = vpack.c.bf16 %v2452_v30, %v2452_v30 }
 0x601   : > { %21092 = vpow2.f32 %v2979_v37 }
 0x602   : > { %21094 = vpow2.f32 %v2973_v38 }
 0x603   : > { %v22905_v39 = vpop.eup %21088 }
 0x604   : > { %v2952_v40 = vpop.xlane.xlu1 %2951  ;;  %v2986_v41 = vsel %vm2934_vm3, %v22905_v39, 0.0 }
 0x605   : > { %v2964_v42 = vsub.f32 %v2836_v0, %v2952_v40  ;;  %2987 = vadd.xlane.f32.xlu1 %v2986_v41  ;;  %v2544_v41 = vadd.f32 %v17562_v21, %v22890_v26 }
 0x607   : > { %v22909_v44 = vpop.eup %21090  ;;  %v2977_v43 = vmul.f32 1.442695, %v2964_v42  ;;  %v3274_v42 = vsel %vm3042_vm2, %v3036_v35, 0 }
 0x608   : > { %v2995_v45 = vsel %vm2934_vm3, %v22909_v44, 0.0 }
 0x609   : > { %21096 = vpow2.f32 %v2977_v43  ;;  %2996 = vadd.xlane.f32.xlu0 %v2995_v45 }
 0x60b   : > { %v22913_v46 = vpop.eup %21092 }
 0x60c   : > { %v22915_v47 = vpop.eup %21094  ;;  %v2958_v63 = vpop.xlane.xlu1 %2957  ;;  %v3001_v48 = vsel %vm2934_vm3, %v22913_v46, 0.0 }
 0x60d   : > { %v2966_v49 = vsub.f32 %v2928_v5, %v2958_v63  ;;  %3002 = vadd.xlane.f32.xlu0 %v3001_v48  ;;  %v2992_v50 = vsel %vm2934_vm3, %v22915_v47, 0.0  ;;  %v3035_v5 = vpack.c.bf16 %v2406_v3, %v2406_v3  ;;  %v20619_v3 = vld [vmem:[#allocation17 + $0x18] sm:$0xff]  }
 0x60e   : > { %2993 = vadd.xlane.f32.xlu1 %v2992_v50  ;;  %v20616_v50 = vld [vmem:[#allocation17] sm:$0xff]  }
 0x60f   : > { %v2981_v51 = vmul.f32 1.442695, %v2966_v49  ;;  %v3228_v61 = vsel %vm3042_vm2, %v3035_v5, 0 }
 0x611   : > { %21098 = vpow2.f32 %v2981_v51  ;;  %v20618_v51 = vld [vmem:[#allocation17 + $0x8] sm:$0xff]  }
 0x613   : > { %v22921_v52 = vpop.eup %21096 }
 0x614   : > { %v2998_v53 = vsel %vm2934_vm3, %v22921_v52, 0.0 }
 0x615   : > { %2999 = vadd.xlane.f32.xlu1 %v2998_v53  ;;  %v20617_v53 = vld [vmem:[#allocation17 + $0x10] sm:$0xff]  }
 0x61b   : > { %v22925_v54 = vpop.eup %21098 }
 0x61c   : > { %v3004_v56 = vsel %vm2934_vm3, %v22925_v54, 0.0 }
 0x61d   : > { %3005 = vadd.xlane.f32.xlu1 %v3004_v56 }
 0x662   : > { %v2985_v57 = vpop.xlane.xlu0 %2984 }
 0x663   : > { %21100 = vrcp.f32 %v2985_v57 }
 0x66a   : > { %v2991_v29 = vpop.xlane.xlu0 %2990 }
 0x66b   : > { %21102 = vrcp.f32 %v2991_v29  ;;  %v20620_v29 = vld [vmem:[#allocation17 + $0x20] sm:$0xff]  }
 0x66d   : > { %v21101_v60 = vpop.eup %21100 }
 0x66e   : > { %v3008_v0 = vmul.f32 %v21101_v60, %v21085_v16  ;;  %v2498_v16 = vadd.f32 %v17561_v13, %v22861_v36  ;;  %v20621_v13 = vld [vmem:[#allocation17 + $0x28] sm:$0xff]  }
 0x670   : > { %v3023_v2 = vpack.c.bf16 %v3008_v0, %v3008_v0  ;;  %v3037_v25 = vpack.c.bf16 %v2498_v16, %v2498_v16 }
 0x672   : > { %19614 = vmatmul.mubr.msk.bf16.vlgmr.msra.gmra.mrb[56].mxu0 %vm2934_vm3, %v3023_v2  ;;  %v3320_v34 = vsel %vm3042_vm2, %v3037_v25, 0 }
 0x673   : > { %19624 = vmatpush3.bf16.msra.mxu0 %v3136_v4  ;;  %19625 = vmatprep.mubr.msk.bf16.mxu0 %vm21950_vm0, %v21949_v22 }
 0x674   : > { %19635 = vmatprep.subr.bf16.mxu0 %v21949_v22 }
 0x675   : > { %v21103_v10 = vpop.eup %21102 }
 0x676   : > { %v3012_v6 = vmul.f32 %v21103_v10, %v22901_v18 }
 0x678   : > { %v3025_v7 = vpack.c.bf16 %v3012_v6, %v3012_v6 }
 0x67a   : > { %19626 = vmatmul.mubr.msk.bf16.vlgmr.msra.gmra.mrb[60].mxu0 %vm2934_vm3, %v3025_v7 }
 0x67b   : > { %19636 = vmatpush3.bf16.msra.mxu0 %v3228_v61  ;;  %19637 = vmatprep.mubr.msk.bf16.mxu0 %vm21950_vm0, %v21949_v22  ;;  %v20622_v61 = vld [vmem:[#allocation17 + $0x30] sm:$0xff]  }
 0x67c   : > { %19647 = vmatprep.subr.bf16.mxu0 %v21949_v22 }
 0x692   : > { %v2988_v19 = vpop.xlane.xlu1 %2987 }
 0x693   : > { %21104 = vrcp.f32 %v2988_v19 }
 0x696   : > { %v2997_v8 = vpop.xlane.xlu0 %2996 }
 0x697   : > { %21106 = vrcp.f32 %v2997_v8 }
 0x69a   : > { %v3003_v12 = vpop.xlane.xlu0 %3002 }
 0x69b   : > { %21108 = vrcp.f32 %v3003_v12  ;;  %v2994_v14 = vpop.xlane.xlu1 %2993 }
 0x69c   : > { %21110 = vrcp.f32 %v2994_v14 }
 0x69d   : > { %v21105_v15 = vpop.eup %21104 }
 0x69e   : > { %v3010_v18 = vmul.f32 %v21105_v15, %v22905_v39 }
 0x6a0   : > { %v3024_v23 = vpack.c.bf16 %v3010_v18, %v3010_v18 }
 0x6a1   : > { %v21107_v24 = vpop.eup %21106 }
 0x6a2   : > { %v3016_v27 = vmul.f32 %v21107_v24, %v22909_v44  ;;  %19620 = vmatmul.mubr.msk.bf16.vlgmr.msra.gmra.mrb[76].mxu1 %vm2934_vm3, %v3024_v23  ;;  %v3000_v28 = vpop.xlane.xlu1 %2999 }
 0x6a3   : > { %19630 = vmatpush3.bf16.msra.mxu1 %v3182_v55  ;;  %21112 = vrcp.f32 %v3000_v28  ;;  %19631 = vmatprep.mubr.msk.bf16.mxu1 %vm21950_vm0, %v21949_v22  ;;  %v20623_v55 = vld [vmem:[#allocation17 + $0x38] sm:$0xff]  }
 0x6a4   : > { %v3027_v36 = vpack.c.bf16 %v3016_v27, %v3016_v27  ;;  %19641 = vmatprep.subr.bf16.mxu1 %v21949_v22 }
 0x6a5   : > { %v21109_v32 = vpop.eup %21108 }
 0x6a6   : > { %v21111_v33 = vpop.eup %21110  ;;  %19638 = vmatmul.mubr.msk.bf16.vlgmr.msra.gmra.mrb[64].mxu0 %vm2934_vm3, %v3027_v36  ;;  %v3020_v38 = vmul.f32 %v21109_v32, %v22913_v46  ;;  %v3038_v46 = vpack.c.bf16 %v2544_v41, %v2544_v41 }
 0x6a7   : > { %v3014_v37 = vmul.f32 %v21111_v33, %v22915_v47  ;;  %19648 = vmatpush3.bf16.msra.mxu0 %v3320_v34  ;;  %19649 = vmatprep.mubr.msk.bf16.mxu0 %vm21950_vm0, %v21949_v22 }
 0x6a8   : > { %19659 = vmatprep.subr.bf16.mxu0 %v21949_v22  ;;  %v3029_v44 = vpack.c.bf16 %v3020_v38, %v3020_v38  ;;  %v3366_v47 = vsel %vm3042_vm2, %v3038_v46, 0 }
 0x6a9   : > { %v3026_v39 = vpack.c.bf16 %v3014_v37, %v3014_v37 }
 0x6aa   : > { %v3006_v40 = vpop.xlane.xlu1 %3005 }
 0x6ab   : > { %19632 = vmatmul.mubr.msk.bf16.vlgmr.msra.gmra.mrb[80].mxu1 %vm2934_vm3, %v3026_v39  ;;  %21114 = vrcp.f32 %v3006_v40 }
 0x6ac   : > { %19642 = vmatpush3.bf16.msra.mxu1 %v3274_v42  ;;  %19643 = vmatprep.mubr.msk.bf16.mxu1 %vm21950_vm0, %v21949_v22 }
 0x6ad   : > { %v21113_v43 = vpop.eup %21112  ;;  %19653 = vmatprep.subr.bf16.mxu1 %v21949_v22 }
 0x6ae   : > { %v3018_v45 = vmul.f32 %v21113_v43, %v22921_v52  ;;  %19650 = vmatmul.mubr.msk.bf16.vlgmr.msra.gmra.mrb[68].mxu0 %vm2934_vm3, %v3029_v44 }
 0x6af   : > { %19661 = vmatprep.mubr.msk.bf16.mxu0 %vm21950_vm0, %v21949_v22  ;;  %19660 = vmatpush3.bf16.msra.mxu0 %v20616_v50 }
 0x6b0   : > { %v3028_v26 = vpack.c.bf16 %v3018_v45, %v3018_v45  ;;  %19671 = vmatprep.subr.bf16.mxu0 %v21949_v22 }
 0x6b3   : > { %19644 = vmatmul.mubr.msk.bf16.vlgmr.msra.gmra.mrb[84].mxu1 %vm2934_vm3, %v3028_v26 }
 0x6b4   : > { %19654 = vmatpush3.bf16.msra.mxu1 %v3366_v47  ;;  %19655 = vmatprep.mubr.msk.bf16.mxu1 %vm21950_vm0, %v21949_v22 }
 0x6b5   : > { %v21115_v63 = vpop.eup %21114  ;;  %19665 = vmatprep.subr.bf16.mxu1 %v21949_v22 }
 0x6b6   : > { %v3022_v48 = vmul.f32 %v21115_v63, %v22925_v54 }
 0x6b8   : > { %v3030_v49 = vpack.c.bf16 %v3022_v48, %v3022_v48 }
 0x6bb   : > { %19656 = vmatmul.mubr.msk.bf16.vlgmr.msra.gmra.mrb[88].mxu1 %vm2934_vm3, %v3030_v49 }
 0x6bc   : > { %19667 = vmatprep.mubr.msk.bf16.mxu1 %vm21950_vm0, %v21949_v22  ;;  %19666 = vmatpush3.bf16.msra.mxu1 %v20618_v51 }
 0x6bd   : > { %19677 = vmatprep.subr.bf16.mxu1 %v21949_v22 }
 0x745   : > { %v3080_v52 = vpop.f32.mrb[56].mxu0 }
 0x746   : > { %v3408_v56 = vpack.c.bf16 %v3080_v52, %v3080_v52  ;;  %v19615_v57 = vpop.f32.mrb[57].mxu0 }
 0x747   : > { %v3083_v58 = vpop.f32.mrb[58].mxu0 }
 0x748   : > { %v19616_v54 = vpop.f32.mrb[59].mxu0  ;;  %19662 = vmatmul.mubr.msk.bf16.vlgmr.msra.gmra.mrb[72].mxu0 %vm2565_vm1, %v3408_v56 }
 0x749   : > { %19672 = vmatpush3.bf16.msra.mxu0 %v20617_v53  ;;  %19673 = vmatprep.mubr.msk.bf16.mxu0 %vm21950_vm0, %v21949_v22 }
 0x74a   : > { %19683 = vmatprep.subr.bf16.mxu0 %v21949_v22 }
 0x74d   : > { %v3172_v59 = vpop.f32.mrb[60].mxu0 }
 0x74e   : > { %v3410_v60 = vpack.c.bf16 %v3172_v59, %v3172_v59  ;;  %v19627_v62 = vpop.f32.mrb[61].mxu0 }
 0x74f   : > { %v3175_v0 = vpop.f32.mrb[62].mxu0 }
 0x750   : > { %v19628_v1 = vpop.f32.mrb[63].mxu0  ;;  %19674 = vmatmul.mubr.msk.bf16.vlgmr.msra.gmra.mrb[76].mxu0 %vm2565_vm1, %v3410_v60 }
 0x751   : > { %19684 = vmatpush3.bf16.msra.mxu0 %v20620_v29  ;;  %19685 = vmatprep.mubr.msk.bf16.mxu0 %vm21950_vm0, %v21949_v22 }
 0x752   : > { %19695 = vmatprep.subr.bf16.mxu0 %v21949_v22 }
 0x775   : > { %v3126_v2 = vpop.f32.mrb[76].mxu1 }
 0x776   : > { %v3409_v4 = vpack.c.bf16 %v3126_v2, %v3126_v2  ;;  %v19621_v10 = vpop.f32.mrb[77].mxu1 }
 0x777   : > { %v3129_v5 = vpop.f32.mrb[78].mxu1 }
 0x778   : > { %v19622_v6 = vpop.f32.mrb[79].mxu1  ;;  %19668 = vmatmul.mubr.msk.bf16.vlgmr.msra.gmra.mrb[92].mxu1 %vm2565_vm1, %v3409_v4 }
 0x779   : > { %v3264_v7 = vpop.f32.mrb[64].mxu0  ;;  %19678 = vmatpush3.bf16.msra.mxu1 %v20619_v3  ;;  %19679 = vmatprep.mubr.msk.bf16.mxu1 %vm21950_vm0, %v21949_v22 }
 0x77a   : > { %v3412_v19 = vpack.c.bf16 %v3264_v7, %v3264_v7  ;;  %v19639_v8 = vpop.f32.mrb[65].mxu0  ;;  %19689 = vmatprep.subr.bf16.mxu1 %v21949_v22 }
 0x77b   : > { %v3267_v9 = vpop.f32.mrb[66].mxu0 }
 0x77c   : > { %v19640_v11 = vpop.f32.mrb[67].mxu0  ;;  %19686 = vmatmul.mubr.msk.bf16.vlgmr.msra.gmra.mrb[80].mxu0 %vm2565_vm1, %v3412_v19 }
 0x77d   : > { %19696 = vmatpush3.bf16.msra.mxu0 %v20622_v61  ;;  %19697 = vmatprep.mubr.msk.bf16.mxu0 %vm21950_vm0, %v21949_v22  ;;  %v17603_v61 = vld [vmem:[#allocation19] ss:$0 sm:$0xff] }
 0x77e   : > { %v3218_v12 = vpop.f32.mrb[80].mxu1 }
 0x77f   : > { %v3411_v14 = vpack.c.bf16 %v3218_v12, %v3218_v12  ;;  %v19633_v15 = vpop.f32.mrb[81].mxu1 }
 0x780   : > { %v3221_v16 = vpop.f32.mrb[82].mxu1  ;;  %v3876_v15 = vld [vmem:[#allocation20 + $0x40] sm:$0xff] }
 0x781   : > { %v19634_v17 = vpop.f32.mrb[83].mxu1  ;;  %19680 = vmatmul.mubr.msk.bf16.vlgmr.msra.gmra.mrb[96].mxu1 %vm2565_vm1, %v3411_v14  ;;  %v3356_v18 = vpop.f32.mrb[68].mxu0  ;;  %v3868_v14 = vld [vmem:[#allocation20] sm:$0xff]  ;;  %v3869_v16 = vld [vmem:[#allocation20 + $0x8] sm:$0xff] }
 0x782   : > { %v3414_v20 = vpack.c.bf16 %v3356_v18, %v3356_v18  ;;  %19690 = vmatpush3.bf16.msra.mxu1 %v20621_v13  ;;  %v19651_v23 = vpop.f32.mrb[69].mxu0  ;;  %19691 = vmatprep.mubr.msk.bf16.mxu1 %vm21950_vm0, %v21949_v22  ;;  %v17606_v17 = vcombine.low %v3868_v14, %v3876_v15  ;;  %v17607_v18 = vcombine.high %v3868_v14, %v3876_v15  ;;  %v3989_v15 = vld [vmem:[#allocation20 + $0x3c8] sm:$0xff] }
 0x783   : > { %v3359_v24 = vpop.f32.mrb[70].mxu0  ;;  %19701 = vmatprep.subr.bf16.mxu1 %v21949_v22  ;;  %v3884_v23 = vld [vmem:[#allocation20 + $0x80] sm:$0xff] }
 0x784   : > { %v19652_v25 = vpop.f32.mrb[71].mxu0  ;;  %19698 = vmatmul.mubr.msk.bf16.vlgmr.msra.gmra.mrb[84].mxu0 %vm2565_vm1, %v3414_v20  ;;  %v3877_v20 = vld [vmem:[#allocation20 + $0x48] sm:$0xff]  ;;  %v3892_v24 = vld [vmem:[#allocation20 + $0xc0] sm:$0xff]  ;;  %4721 = vmatprep.subr.bf16.mxu0 %v17607_v18 }
 0x785   : > { %v17608_v25 = vcombine.low %v3869_v16, %v3877_v20  ;;  %4722 = vmatpush1.bf16.msra.mxu0 %v17606_v17 }
 0x786   : > { %v3310_v27 = vpop.f32.mrb[84].mxu1 }
 0x787   : > { %v3413_v28 = vpack.c.bf16 %v3310_v27, %v3310_v27  ;;  %v19645_v30 = vpop.f32.mrb[85].mxu1  ;;  %v17609_v27 = vcombine.high %v3869_v16, %v3877_v20  ;;  %v3870_v20 = vld [vmem:[#allocation20 + $0x10] sm:$0xff] }
 0x788   : > { %v3313_v36 = vpop.f32.mrb[86].mxu1  ;;  %v3893_v30 = vld [vmem:[#allocation20 + $0xc8] sm:$0xff] }
 0x789   : > { %v19646_v32 = vpop.f32.mrb[87].mxu1  ;;  %19692 = vmatmul.mubr.msk.bf16.vlgmr.msra.gmra.mrb[100].mxu1 %vm2565_vm1, %v3413_v28  ;;  %v3885_v28 = vld [vmem:[#allocation20 + $0x88] sm:$0xff]  ;;  %v3900_v36 = vld [vmem:[#allocation20 + $0x100] sm:$0xff] }
 0x78a   : > { %19702 = vmatpush3.bf16.msra.mxu1 %v20623_v55  ;;  %19703 = vmatprep.mubr.msk.bf16.mxu1 %vm21950_vm0, %v21949_v22  ;;  %v17623_v55 = vcombine.high %v3884_v23, %v3892_v24  ;;  %v17625_v32 = vcombine.high %v3885_v28, %v3893_v30 }
 0x78b   : > { %4762 = vmatprep.subr.bf16.mxu1 %v17609_v27 }
 0x78c   : > { %4723 = vmatprep.subr.bf16.mxu0 %v17623_v55  ;;  %v3879_v55 = vld [vmem:[#allocation20 + $0x58] sm:$0xff] }
 0x78e   : > { %v3402_v33 = vpop.f32.mrb[88].mxu1 }
 0x78f   : > { %v3415_v34 = vpack.c.bf16 %v3402_v33, %v3402_v33  ;;  %v19657_v35 = vpop.f32.mrb[89].mxu1  ;;  %v3908_v33 = vld [vmem:[#allocation20 + $0x140] sm:$0xff] }
 0x790   : > { %v3405_v37 = vpop.f32.mrb[90].mxu1  ;;  %v17622_v35 = vcombine.low %v3884_v23, %v3892_v24  ;;  %v3878_v23 = vld [vmem:[#allocation20 + $0x50] sm:$0xff]  ;;  %v3871_v24 = vld [vmem:[#allocation20 + $0x18] sm:$0xff] }
 0x791   : > { %v19658_v21 = vpop.f32.mrb[91].mxu1  ;;  %19704 = vmatmul.mubr.msk.bf16.vlgmr.msra.gmra.mrb[104].mxu1 %vm2565_vm1, %v3415_v34  ;;  %v3901_v34 = vld [vmem:[#allocation20 + $0x108] sm:$0xff]  ;;  %v17624_v37 = vcombine.low %v3885_v28, %v3893_v30  ;;  %v17611_v27 = vcombine.high %v3870_v20, %v3878_v23  ;;  %v21951_v28 = vmov 0   ;;  %v17612_v30 = vcombine.low %v3871_v24, %v3879_v55 }
 0x792   : > { %4763 = vmatpush1.bf16.msra.mxu1 %v17608_v25  ;;  %v17639_v21 = vcombine.high %v3900_v36, %v3908_v33  ;;  %4724 = vmatpush1.bf16.msra.mxu0 %v17622_v35  ;;  %v17610_v25 = vcombine.low %v3870_v20, %v3878_v23  ;;  %v17604_v35 = vld [vmem:[#allocation26] ss:$0 sm:$0xff] }
 0x793   : > { %4764 = vmatprep.subr.bf16.mxu1 %v17625_v32  ;;  %4753 = vmatprep.mubr.bf16.mxu0 %v21951_v28 }
 0x794   : > { %4725 = vmatprep.subr.bf16.mxu0 %v17639_v21  ;;  %4794 = vmatprep.mubr.bf16.mxu1 %v21951_v28  ;;  %v17605_v21 = vld [vmem:[#allocation28] ss:$0 sm:$0xff] }
 0x796   : > { %4765 = vmatpush1.bf16.msra.mxu1 %v17624_v37 }
 0x81b   : > { %v3475_v38 = vpop.f32.mrb[72].mxu0 }
 0x81c   : > { %v19663_v39 = vpop.f32.mrb[73].mxu0 }
 0x81d   : > { %v3478_v40 = vpop.f32.mrb[74].mxu0  ;;  %v17638_v39 = vcombine.low %v3900_v36, %v3908_v33  ;;  %v17613_v36 = vcombine.high %v3871_v24, %v3879_v55  ;;  %v3982_v24 = vld [vmem:[#allocation20 + $0x390] sm:$0xff]  ;;  %v3991_v55 = vld [vmem:[#allocation20 + $0x3d8] sm:$0xff] }
 0x81e   : > { %v19664_v41 = vpop.f32.mrb[75].mxu0 }
 0x81f   : > { %4726 = vmatpush1.bf16.msra.mxu0 %v17638_v39  ;;  %v3886_v39 = vld [vmem:[#allocation20 + $0x90] sm:$0xff] }
 0x823   : > { %v3573_v42 = vpop.f32.mrb[76].mxu0 }
 0x824   : > { %v19675_v44 = vpop.f32.mrb[77].mxu0 }
 0x825   : > { %v3576_v43 = vpop.f32.mrb[78].mxu0 }
 0x826   : > { %v19676_v45 = vpop.f32.mrb[79].mxu0 }
 0x827   : > { %v3916_v45 = vld [vmem:[#allocation20 + $0x180] sm:$0xff] }
 0x84b   : > { %v3524_v46 = vpop.f32.mrb[92].mxu1 }
 0x84c   : > { %v3824_v26 = vadd.f32 %v3524_v46, %v3475_v38  ;;  %v19669_v47 = vpop.f32.mrb[93].mxu1  ;;  %v3924_v46 = vld [vmem:[#allocation20 + $0x1c0] sm:$0xff] }
 0x84d   : > { %v3527_v63 = vpop.f32.mrb[94].mxu1  ;;  %v17655_v47 = vcombine.high %v3916_v45, %v3924_v46 }
 0x84e   : > { %v19670_v48 = vpop.f32.mrb[95].mxu1  ;;  %v3825_v49 = vadd.f32 %v3824_v26, %v3573_v42  ;;  %v3917_v26 = vld [vmem:[#allocation20 + $0x188] sm:$0xff] }
 0x84f   : > { %v3671_v50 = vpop.f32.mrb[80].mxu0  ;;  %v3925_v63 = vld [vmem:[#allocation20 + $0x1c8] sm:$0xff]  ;;  %v17654_v48 = vcombine.low %v3916_v45, %v3924_v46  ;;  %4727 = vmatprep.subr.bf16.mxu0 %v17655_v47  ;;  %v3902_v47 = vld [vmem:[#allocation20 + $0x110] sm:$0xff] }
 0x850   : > { %v19687_v51 = vpop.f32.mrb[81].mxu0 }
 0x851   : > { %v3674_v52 = vpop.f32.mrb[82].mxu0  ;;  %4728 = vmatpush1.bf16.msra.mxu0 %v17654_v48  ;;  %v3932_v51 = vld [vmem:[#allocation20 + $0x200] sm:$0xff]  ;;  %v3903_v48 = vld [vmem:[#allocation20 + $0x118] sm:$0xff] }
 0x852   : > { %v19688_v53 = vpop.f32.mrb[83].mxu0  ;;  %v3940_v52 = vld [vmem:[#allocation20 + $0x240] sm:$0xff] }
 0x853   : > { %v3933_v53 = vld [vmem:[#allocation20 + $0x208] sm:$0xff] }
 0x854   : > { %v3622_v56 = vpop.f32.mrb[96].mxu1 }
 0x855   : > { %v3826_v57 = vadd.f32 %v3825_v49, %v3622_v56  ;;  %v19681_v58 = vpop.f32.mrb[97].mxu1  ;;  %v17656_v49 = vcombine.low %v3917_v26, %v3925_v63  ;;  %v17671_v56 = vcombine.high %v3932_v51, %v3940_v52 }
 0x856   : > { %v3625_v54 = vpop.f32.mrb[98].mxu1  ;;  %v17670_v58 = vcombine.low %v3932_v51, %v3940_v52 }
 0x857   : > { %v19682_v59 = vpop.f32.mrb[99].mxu1  ;;  %v3769_v29 = vpop.f32.mrb[84].mxu0  ;;  %v3827_v60 = vadd.f32 %v3826_v57, %v3671_v50  ;;  %v17657_v50 = vcombine.high %v3917_v26, %v3925_v63  ;;  %v3941_v57 = vld [vmem:[#allocation20 + $0x248] sm:$0xff]  ;;  %4729 = vmatprep.subr.bf16.mxu0 %v17671_v56  ;;  %v3910_v63 = vld [vmem:[#allocation20 + $0x150] sm:$0xff] }
 0x858   : > { %v19699_v62 = vpop.f32.mrb[85].mxu0  ;;  %v17672_v54 = vcombine.low %v3933_v53, %v3941_v57  ;;  %v17673_v59 = vcombine.high %v3933_v53, %v3941_v57  ;;  %4730 = vmatpush1.bf16.msra.mxu0 %v17670_v58  ;;  %v17643_v51 = vcombine.high %v3902_v47, %v3910_v63  ;;  %v3918_v53 = vld [vmem:[#allocation20 + $0x190] sm:$0xff]  ;;  %v3919_v57 = vld [vmem:[#allocation20 + $0x198] sm:$0xff] }
 0x859   : > { %v3772_v0 = vpop.f32.mrb[86].mxu0  ;;  %v3949_v62 = vld [vmem:[#allocation20 + $0x288] sm:$0xff]  ;;  %v3926_v56 = vld [vmem:[#allocation20 + $0x1d0] sm:$0xff]  ;;  %v3927_v58 = vld [vmem:[#allocation20 + $0x1d8] sm:$0xff] }
 0x85a   : > { %v19700_v1 = vpop.f32.mrb[87].mxu0 }
 0x85b   : > { %v3957_v1 = vld [vmem:[#allocation20 + $0x2c8] sm:$0xff] }
 0x85c   : > { %v3720_v2 = vpop.f32.mrb[100].mxu1 }
 0x85d   : > { %v3828_v3 = vadd.f32 %v3827_v60, %v3720_v2  ;;  %v19693_v4 = vpop.f32.mrb[101].mxu1  ;;  %v3956_v60 = vld [vmem:[#allocation20 + $0x2c0] sm:$0xff] }
 0x85e   : > { %v3723_v10 = vpop.f32.mrb[102].mxu1  ;;  %v17689_v4 = vcombine.high %v3949_v62, %v3957_v1 }
 0x85f   : > { %v19694_v5 = vpop.f32.mrb[103].mxu1  ;;  %v3829_v6 = vadd.f32 %v3828_v3, %v3769_v29  ;;  %v3948_v29 = vld [vmem:[#allocation20 + $0x280] sm:$0xff]  ;;  %v17688_v3 = vcombine.low %v3949_v62, %v3957_v1  ;;  %v3934_v62 = vld [vmem:[#allocation20 + $0x210] sm:$0xff]  ;;  %v3935_v1 = vld [vmem:[#allocation20 + $0x218] sm:$0xff] }
 0x860   : > { %v17687_v0 = vcombine.high %v3948_v29, %v3956_v60  ;;  %v17686_v2 = vcombine.low %v3948_v29, %v3956_v60  ;;  %v3964_v10 = vld [vmem:[#allocation20 + $0x300] sm:$0xff]  ;;  %v17659_v29 = vcombine.high %v3918_v53, %v3926_v56  ;;  %v17661_v60 = vcombine.high %v3919_v57, %v3927_v58 }
 0x861   : > { %v3972_v5 = vld [vmem:[#allocation20 + $0x340] sm:$0xff] }
 0x862   : > { %4731 = vmatprep.subr.bf16.mxu0 %v17687_v0  ;;  %v3942_v0 = vld [vmem:[#allocation20 + $0x250] sm:$0xff] }
 0x863   : > { %4732 = vmatpush1.bf16.msra.mxu0 %v17686_v2  ;;  %v3943_v2 = vld [vmem:[#allocation20 + $0x258] sm:$0xff] }
 0x864   : > { %v3818_v7 = vpop.f32.mrb[104].mxu1 }
 0x865   : > { %v3830_v19 = vadd.f32 %v3829_v6, %v3818_v7  ;;  %v19705_v8 = vpop.f32.mrb[105].mxu1  ;;  %v3965_v6 = vld [vmem:[#allocation20 + $0x308] sm:$0xff]  ;;  %v17703_v7 = vcombine.high %v3964_v10, %v3972_v5 }
 0x866   : > { %v3821_v9 = vpop.f32.mrb[106].mxu1 }
 0x867   : > { %v19706_v11 = vpop.f32.mrb[107].mxu1  ;;  %v3838_v12 = vadd.f32 %v17603_v61, %v3830_v19  ;;  %v3973_v61 = vld [vmem:[#allocation20 + $0x348] sm:$0xff]  ;;  %v17702_v19 = vcombine.low %v3964_v10, %v3972_v5  ;;  %4733 = vmatprep.subr.bf16.mxu0 %v17703_v7  ;;  %v17675_v10 = vcombine.high %v3934_v62, %v3942_v0  ;;  %v17677_v5 = vcombine.high %v3935_v1, %v3943_v2  ;;  %v3958_v7 = vld [vmem:[#allocation20 + $0x2d0] sm:$0xff] }
 0x868   : > { %v17704_v8 = vcombine.low %v3965_v6, %v3973_v61  ;;  %v17705_v9 = vcombine.high %v3965_v6, %v3973_v61  ;;  %v3980_v11 = vld [vmem:[#allocation20 + $0x380] sm:$0xff]  ;;  %v3950_v6 = vld [vmem:[#allocation20 + $0x290] sm:$0xff]  ;;  %v3951_v61 = vld [vmem:[#allocation20 + $0x298] sm:$0xff] }
 0x869   : > { %v3839_v13 = vadd.f32 %v3838_v12, %v22721_v31  ;;  %v3909_v31 = vld [vmem:[#allocation20 + $0x148] sm:$0xff]  ;;  %4734 = vmatpush1.bf16.msra.mxu0 %v17702_v19  ;;  %v3988_v12 = vld [vmem:[#allocation20 + $0x3c0] sm:$0xff]  ;;  %v3959_v19 = vld [vmem:[#allocation20 + $0x2d8] sm:$0xff] }
 0x86a   : > { %v17641_v38 = vcombine.high %v3901_v34, %v3909_v31  ;;  %v17640_v40 = vcombine.low %v3901_v34, %v3909_v31  ;;  %v17719_v14 = vcombine.high %v3980_v11, %v3988_v12  ;;  %v17718_v16 = vcombine.low %v3980_v11, %v3988_v12 }
 0x86b   : > { %3842 = vadd.xlane.f32.xlu0 %v3839_v13  ;;  %v17691_v11 = vcombine.high %v3950_v6, %v3958_v7  ;;  %v17693_v12 = vcombine.high %v3951_v61, %v3959_v19 }
 0x86c   : > { %4766 = vmatprep.subr.bf16.mxu1 %v17641_v38  ;;  %4735 = vmatprep.subr.bf16.mxu0 %v17719_v14  ;;  %v3974_v14 = vld [vmem:[#allocation20 + $0x350] sm:$0xff] }
 0x86d   : > { %4767 = vmatpush1.bf16.msra.mxu1 %v17640_v40  ;;  %4736 = vmatpush1.bf16.msra.mxu0 %v17718_v16  ;;  %v3894_v40 = vld [vmem:[#allocation20 + $0xd0] sm:$0xff]  ;;  %v3975_v16 = vld [vmem:[#allocation20 + $0x358] sm:$0xff] }
 0x86e   : > { %4768 = vmatprep.subr.bf16.mxu1 %v17657_v50  ;;  %4803 = vmatprep.subr.bf16.mxu0 %v17611_v27  ;;  %v17627_v46 = vcombine.high %v3886_v39, %v3894_v40  ;;  %v3983_v27 = vld [vmem:[#allocation20 + $0x398] sm:$0xff] }
 0x871   : > { %4769 = vmatpush1.bf16.msra.mxu1 %v17656_v49  ;;  %v3911_v49 = vld [vmem:[#allocation20 + $0x158] sm:$0xff] }
 0x872   : > { %4770 = vmatprep.subr.bf16.mxu1 %v17673_v59  ;;  %v17645_v52 = vcombine.high %v3903_v48, %v3911_v49  ;;  %v17644_v59 = vcombine.low %v3903_v48, %v3911_v49 }
 0x875   : > { %4771 = vmatpush1.bf16.msra.mxu1 %v17672_v54  ;;  %v17642_v54 = vcombine.low %v3902_v47, %v3910_v63 }
 0x876   : > { %4772 = vmatprep.subr.bf16.mxu1 %v17689_v4  ;;  %v17660_v4 = vcombine.low %v3919_v57, %v3927_v58 }
 0x879   : > { %4773 = vmatpush1.bf16.msra.mxu1 %v17688_v3  ;;  %v17658_v3 = vcombine.low %v3918_v53, %v3926_v56 }
 0x87a   : > { %4774 = vmatprep.subr.bf16.mxu1 %v17705_v9  ;;  %v17676_v9 = vcombine.low %v3935_v1, %v3943_v2 }
 0x87d   : > { %4775 = vmatpush1.bf16.msra.mxu1 %v17704_v8  ;;  %v17674_v8 = vcombine.low %v3934_v62, %v3942_v0 }
 0x8f8   : > { %v3843_v41 = vpop.xlane.xlu0 %3842 }
 0x8f9   : > { %v3845_v42 = vmul.f32 0.0078125, %v3843_v41  ;;  %v3887_v41 = vld [vmem:[#allocation20 + $0x98] sm:$0xff] }
 0x8fb   : > { %v23005_v44 = vsub.f32 %v3839_v13, %v3845_v42  ;;  %v3981_v13 = vld [vmem:[#allocation20 + $0x388] sm:$0xff]  ;;  %v3895_v42 = vld [vmem:[#allocation20 + $0xd8] sm:$0xff] }
 0x8fc   : > { %v17720_v17 = vcombine.low %v3981_v13, %v3989_v15  ;;  %v17721_v18 = vcombine.high %v3981_v13, %v3989_v15  ;;  %v17629_v26 = vcombine.high %v3887_v41, %v3895_v42  ;;  %v17628_v50 = vcombine.low %v3887_v41, %v3895_v42  ;;  %v3966_v13 = vld [vmem:[#allocation20 + $0x310] sm:$0xff]  ;;  %v3967_v15 = vld [vmem:[#allocation20 + $0x318] sm:$0xff]  ;;  %v3888_v41 = vld [vmem:[#allocation20 + $0xa0] sm:$0xff] }
 0x8fd   : > { %v3847_v43 = vmul.f32 %v23005_v44, %v23005_v44  ;;  %v17707_v20 = vcombine.high %v3966_v13, %v3974_v14  ;;  %v17709_v23 = vcombine.high %v3967_v15, %v3975_v16  ;;  %v3896_v42 = vld [vmem:[#allocation20 + $0xe0] sm:$0xff] }
 0x8fe   : > { %4776 = vmatprep.subr.bf16.mxu1 %v17721_v18  ;;  %v17692_v18 = vcombine.low %v3951_v61, %v3959_v19  ;;  %v17631_v48 = vcombine.high %v3888_v41, %v3896_v42  ;;  %v17630_v53 = vcombine.low %v3888_v41, %v3896_v42 }
 0x8ff   : > { %3848 = vadd.xlane.f32.xlu1 %v3847_v43  ;;  %4777 = vmatpush1.bf16.msra.mxu1 %v17720_v17  ;;  %v17690_v17 = vcombine.low %v3950_v6, %v3958_v7 }
 0x900   : > { %4844 = vmatprep.subr.bf16.mxu1 %v17613_v36  ;;  %v17708_v36 = vcombine.low %v3967_v15, %v3975_v16 }
 0x98c   : > { %v3849_v32 = vpop.xlane.xlu1 %3848 }
 0x98d   : > { %v3850_v33 = vmul.f32 0.0078125, %v3849_v32 }
 0x98f   : > { %v3851_v34 = vadd.f32 1e-05, %v3850_v33  ;;  %v17725_v33 = vcombine.high %v3983_v27, %v3991_v55 }
 0x991   : > { %21116 = vrsqrt.f32 %v3851_v34  ;;  %v3872_v34 = vld [vmem:[#allocation20 + $0x20] sm:$0xff] }
 0x99b   : > { %v21117_v31 = vpop.eup %21116 }
 0x99c   : > { %v3853_v37 = vmul.f32 %v21117_v31, %v23005_v44  ;;  %v17626_v44 = vcombine.low %v3886_v39, %v3894_v40  ;;  %v3880_v31 = vld [vmem:[#allocation20 + $0x60] sm:$0xff] }
 0x99d   : > { %v17615_v39 = vcombine.high %v3872_v34, %v3880_v31  ;;  %v17614_v47 = vcombine.low %v3872_v34, %v3880_v31 }
 0x99e   : > { %v3860_v38 = vmul.f32 %v17604_v35, %v3853_v37  ;;  %v3873_v35 = vld [vmem:[#allocation20 + $0x28] sm:$0xff] }
 0x99f   : > { %v3881_v37 = vld [vmem:[#allocation20 + $0x68] sm:$0xff] }
 0x9a0   : > { %v23012_v43 = vadd.f32 %v17605_v21, %v3860_v38  ;;  %v17724_v38 = vcombine.low %v3983_v27, %v3991_v55  ;;  %v17617_v40 = vcombine.high %v3873_v35, %v3881_v37  ;;  %v17616_v63 = vcombine.low %v3873_v35, %v3881_v37 }
 0x9a2   : > { %v23016_v45 = vpack.c.bf16 %v23012_v43, %v23012_v43 }
 0x9a4   : > { %4754 = vmatmul.mubr.bf16.vlgmr.msra.gmra.mrb[88].mxu0 %v23016_v45  ;;  %4795 = vmatmul.mubr.bf16.vlgmr.msra.gmra.mrb[108].mxu1 %v23016_v45 }
 0x9a5   : > { %4804 = vmatpush1.bf16.msra.mxu0 %v17610_v25  ;;  %4845 = vmatpush1.bf16.msra.mxu1 %v17612_v30  ;;  %v3990_v25 = vld [vmem:[#allocation20 + $0x3d0] sm:$0xff]  ;;  %v17706_v30 = vcombine.low %v3966_v13, %v3974_v14 }
 0x9a6   : > { %4805 = vmatprep.subr.bf16.mxu0 %v17627_v46  ;;  %4846 = vmatprep.subr.bf16.mxu1 %v17629_v26  ;;  %v17723_v32 = vcombine.high %v3982_v24, %v3990_v25  ;;  %v17722_v21 = vcombine.low %v3982_v24, %v3990_v25  ;;  %v3889_v46 = vld [vmem:[#allocation20 + $0xa8] sm:$0xff] }
 0x9a7   : > { %4835 = vmatprep.mubr.bf16.mxu0 %v21951_v28  ;;  %4876 = vmatprep.mubr.bf16.mxu1 %v21951_v28  ;;  %v3897_v26 = vld [vmem:[#allocation20 + $0xe8] sm:$0xff] }
 0x9a8   : > { %v17633_v49 = vcombine.high %v3889_v46, %v3897_v26  ;;  %v17632_v56 = vcombine.low %v3889_v46, %v3897_v26 }
 0x9a9   : > { %4806 = vmatpush1.bf16.msra.mxu0 %v17626_v44  ;;  %4847 = vmatpush1.bf16.msra.mxu1 %v17628_v50  ;;  %v3904_v44 = vld [vmem:[#allocation20 + $0x120] sm:$0xff] }
 0x9aa   : > { %4807 = vmatprep.subr.bf16.mxu0 %v17643_v51  ;;  %4848 = vmatprep.subr.bf16.mxu1 %v17645_v52  ;;  %v3912_v50 = vld [vmem:[#allocation20 + $0x160] sm:$0xff]  ;;  %v3905_v51 = vld [vmem:[#allocation20 + $0x128] sm:$0xff] }
 0x9ab   : > { %v3913_v52 = vld [vmem:[#allocation20 + $0x168] sm:$0xff]  ;;  %v17647_v57 = vcombine.high %v3904_v44, %v3912_v50  ;;  %v17646_v62 = vcombine.low %v3904_v44, %v3912_v50 }
 0x9ac   : > { %v17649_v58 = vcombine.high %v3905_v51, %v3913_v52  ;;  %v17648_v0 = vcombine.low %v3905_v51, %v3913_v52 }
 0x9ad   : > { %4808 = vmatpush1.bf16.msra.mxu0 %v17642_v54  ;;  %4849 = vmatpush1.bf16.msra.mxu1 %v17644_v59  ;;  %v3920_v54 = vld [vmem:[#allocation20 + $0x1a0] sm:$0xff] }
 0x9ae   : > { %4809 = vmatprep.subr.bf16.mxu0 %v17659_v29  ;;  %4850 = vmatprep.subr.bf16.mxu1 %v17661_v60  ;;  %v3928_v59 = vld [vmem:[#allocation20 + $0x1e0] sm:$0xff]  ;;  %v3921_v29 = vld [vmem:[#allocation20 + $0x1a8] sm:$0xff] }
 0x9af   : > { %v3929_v60 = vld [vmem:[#allocation20 + $0x1e8] sm:$0xff]  ;;  %v17663_v1 = vcombine.high %v3920_v54, %v3928_v59  ;;  %v17662_v6 = vcombine.low %v3920_v54, %v3928_v59 }
 0x9b0   : > { %v17665_v2 = vcombine.high %v3921_v29, %v3929_v60  ;;  %v17664_v7 = vcombine.low %v3921_v29, %v3929_v60 }
 0x9b1   : > { %4810 = vmatpush1.bf16.msra.mxu0 %v17658_v3  ;;  %4851 = vmatpush1.bf16.msra.mxu1 %v17660_v4  ;;  %v3936_v3 = vld [vmem:[#allocation20 + $0x220] sm:$0xff] }
 0x9b2   : > { %4811 = vmatprep.subr.bf16.mxu0 %v17675_v10  ;;  %4852 = vmatprep.subr.bf16.mxu1 %v17677_v5  ;;  %v3944_v4 = vld [vmem:[#allocation20 + $0x260] sm:$0xff]  ;;  %v3937_v10 = vld [vmem:[#allocation20 + $0x228] sm:$0xff] }
 0x9b3   : > { %v3945_v5 = vld [vmem:[#allocation20 + $0x268] sm:$0xff]  ;;  %v17679_v61 = vcombine.high %v3936_v3, %v3944_v4  ;;  %v17678_v13 = vcombine.low %v3936_v3, %v3944_v4 }
 0x9b4   : > { %v17681_v19 = vcombine.high %v3937_v10, %v3945_v5  ;;  %v17680_v14 = vcombine.low %v3937_v10, %v3945_v5 }
 0x9b5   : > { %4812 = vmatpush1.bf16.msra.mxu0 %v17674_v8  ;;  %4853 = vmatpush1.bf16.msra.mxu1 %v17676_v9  ;;  %v3952_v8 = vld [vmem:[#allocation20 + $0x2a0] sm:$0xff] }
 0x9b6   : > { %4813 = vmatprep.subr.bf16.mxu0 %v17691_v11  ;;  %4854 = vmatprep.subr.bf16.mxu1 %v17693_v12  ;;  %v3960_v9 = vld [vmem:[#allocation20 + $0x2e0] sm:$0xff]  ;;  %v3953_v11 = vld [vmem:[#allocation20 + $0x2a8] sm:$0xff] }
 0x9b7   : > { %v3961_v12 = vld [vmem:[#allocation20 + $0x2e8] sm:$0xff]  ;;  %v17695_v15 = vcombine.high %v3952_v8, %v3960_v9  ;;  %v17694_v24 = vcombine.low %v3952_v8, %v3960_v9 }
 0x9b8   : > { %v17697_v16 = vcombine.high %v3953_v11, %v3961_v12  ;;  %v17696_v25 = vcombine.low %v3953_v11, %v3961_v12 }
 0x9b9   : > { %4814 = vmatpush1.bf16.msra.mxu0 %v17690_v17  ;;  %4855 = vmatpush1.bf16.msra.mxu1 %v17692_v18  ;;  %v3968_v17 = vld [vmem:[#allocation20 + $0x320] sm:$0xff] }
 0x9ba   : > { %4815 = vmatprep.subr.bf16.mxu0 %v17707_v20  ;;  %4856 = vmatprep.subr.bf16.mxu1 %v17709_v23  ;;  %v3976_v18 = vld [vmem:[#allocation20 + $0x360] sm:$0xff]  ;;  %v3969_v20 = vld [vmem:[#allocation20 + $0x328] sm:$0xff] }
 0x9bb   : > { %v3977_v23 = vld [vmem:[#allocation20 + $0x368] sm:$0xff]  ;;  %v17711_v27 = vcombine.high %v3968_v17, %v3976_v18  ;;  %v17710_v34 = vcombine.low %v3968_v17, %v3976_v18 }
 0x9bc   : > { %v17713_v55 = vcombine.high %v3969_v20, %v3977_v23  ;;  %v17712_v31 = vcombine.low %v3969_v20, %v3977_v23 }
 0x9bd   : > { %4816 = vmatpush1.bf16.msra.mxu0 %v17706_v30  ;;  %4857 = vmatpush1.bf16.msra.mxu1 %v17708_v36  ;;  %v3984_v30 = vld [vmem:[#allocation20 + $0x3a0] sm:$0xff] }
 0x9be   : > { %4817 = vmatprep.subr.bf16.mxu0 %v17723_v32  ;;  %4858 = vmatprep.subr.bf16.mxu1 %v17725_v33  ;;  %v3992_v36 = vld [vmem:[#allocation20 + $0x3e0] sm:$0xff]  ;;  %v3985_v32 = vld [vmem:[#allocation20 + $0x3a8] sm:$0xff] }
 0x9bf   : > { %v3993_v33 = vld [vmem:[#allocation20 + $0x3e8] sm:$0xff]  ;;  %v17727_v35 = vcombine.high %v3984_v30, %v3992_v36  ;;  %v17726_v41 = vcombine.low %v3984_v30, %v3992_v36 }
 0x9c0   : > { %v17729_v37 = vcombine.high %v3985_v32, %v3993_v33  ;;  %v17728_v42 = vcombine.low %v3985_v32, %v3993_v33 }
 0x9c1   : > { %4818 = vmatpush1.bf16.msra.mxu0 %v17722_v21  ;;  %4859 = vmatpush1.bf16.msra.mxu1 %v17724_v38  ;;  %v3874_v21 = vld [vmem:[#allocation20 + $0x30] sm:$0xff] }
 0x9c2   : > { %4885 = vmatprep.subr.bf16.mxu0 %v17615_v39  ;;  %4926 = vmatprep.subr.bf16.mxu1 %v17617_v40  ;;  %v3882_v38 = vld [vmem:[#allocation20 + $0x70] sm:$0xff]  ;;  %v3875_v39 = vld [vmem:[#allocation20 + $0x38] sm:$0xff] }
 0x9c3   : > { %v3883_v40 = vld [vmem:[#allocation20 + $0x78] sm:$0xff]  ;;  %v17619_v46 = vcombine.high %v3874_v21, %v3882_v38  ;;  %v17618_v44 = vcombine.low %v3874_v21, %v3882_v38 }
 0x9c4   : > { %4836 = vmatmul.mubr.bf16.vlgmr.msra.gmra.mrb[92].mxu0 %v23016_v45  ;;  %4877 = vmatmul.mubr.bf16.vlgmr.msra.gmra.mrb[112].mxu1 %v23016_v45  ;;  %v17621_v26 = vcombine.high %v3875_v39, %v3883_v40  ;;  %v17620_v50 = vcombine.low %v3875_v39, %v3883_v40 }
 0x9c5   : > { %4886 = vmatpush1.bf16.msra.mxu0 %v17614_v47  ;;  %4927 = vmatpush1.bf16.msra.mxu1 %v17616_v63  ;;  %v3890_v47 = vld [vmem:[#allocation20 + $0xb0] sm:$0xff] }
 0x9c6   : > { %4887 = vmatprep.subr.bf16.mxu0 %v17631_v48  ;;  %4928 = vmatprep.subr.bf16.mxu1 %v17633_v49  ;;  %v3898_v63 = vld [vmem:[#allocation20 + $0xf0] sm:$0xff]  ;;  %v3891_v48 = vld [vmem:[#allocation20 + $0xb8] sm:$0xff] }
 0x9c7   : > { %4917 = vmatprep.mubr.bf16.mxu0 %v21951_v28  ;;  %4958 = vmatprep.mubr.bf16.mxu1 %v21951_v28  ;;  %v3899_v49 = vld [vmem:[#allocation20 + $0xf8] sm:$0xff]  ;;  %v17635_v51 = vcombine.high %v3890_v47, %v3898_v63  ;;  %v17634_v54 = vcombine.low %v3890_v47, %v3898_v63  ;;  %v20626_v47 = vld [vmem:[#allocation23] sm:$0xff]  }
 0x9c8   : > { %v17637_v52 = vcombine.high %v3891_v48, %v3899_v49  ;;  %v17636_v59 = vcombine.low %v3891_v48, %v3899_v49  ;;  %v20627_v63 = vld [vmem:[#allocation23 + $0x80] sm:$0xff]   ;;  %v20628_v48 = vld [vmem:[#allocation23 + $0x48] sm:$0xff]  }
 0x9c9   : > { %4888 = vmatpush1.bf16.msra.mxu0 %v17630_v53  ;;  %4929 = vmatpush1.bf16.msra.mxu1 %v17632_v56  ;;  %v3906_v53 = vld [vmem:[#allocation20 + $0x130] sm:$0xff]  ;;  %v20629_v49 = vld [vmem:[#allocation23 + $0xc8] sm:$0xff]  }
 0x9ca   : > { %4889 = vmatprep.subr.bf16.mxu0 %v17647_v57  ;;  %4930 = vmatprep.subr.bf16.mxu1 %v17649_v58  ;;  %v3914_v56 = vld [vmem:[#allocation20 + $0x170] sm:$0xff]  ;;  %v3907_v57 = vld [vmem:[#allocation20 + $0x138] sm:$0xff] }
 0x9cb   : > { %v3915_v58 = vld [vmem:[#allocation20 + $0x178] sm:$0xff]  ;;  %v17651_v29 = vcombine.high %v3906_v53, %v3914_v56  ;;  %v17650_v3 = vcombine.low %v3906_v53, %v3914_v56  ;;  %v20634_v53 = vld [vmem:[#allocation23 + $0x10] sm:$0xff]  }
 0x9cc   : > { %v17653_v60 = vcombine.high %v3907_v57, %v3915_v58  ;;  %v17652_v4 = vcombine.low %v3907_v57, %v3915_v58  ;;  %v20635_v56 = vld [vmem:[#allocation23 + $0x90] sm:$0xff]   ;;  %v20636_v57 = vld [vmem:[#allocation23 + $0x58] sm:$0xff]  }
 0x9cd   : > { %4890 = vmatpush1.bf16.msra.mxu0 %v17646_v62  ;;  %4931 = vmatpush1.bf16.msra.mxu1 %v17648_v0  ;;  %v3922_v62 = vld [vmem:[#allocation20 + $0x1b0] sm:$0xff]  ;;  %v20637_v58 = vld [vmem:[#allocation23 + $0xd8] sm:$0xff]  }
 0x9ce   : > { %4891 = vmatprep.subr.bf16.mxu0 %v17663_v1  ;;  %4932 = vmatprep.subr.bf16.mxu1 %v17665_v2  ;;  %v3930_v0 = vld [vmem:[#allocation20 + $0x1f0] sm:$0xff]  ;;  %v3923_v1 = vld [vmem:[#allocation20 + $0x1b8] sm:$0xff] }
 0x9cf   : > { %v3931_v2 = vld [vmem:[#allocation20 + $0x1f8] sm:$0xff]  ;;  %v17667_v10 = vcombine.high %v3922_v62, %v3930_v0  ;;  %v17666_v8 = vcombine.low %v3922_v62, %v3930_v0  ;;  %v20643_v62 = vld [vmem:[#allocation23 + $0xa0] sm:$0xff]  }
 0x9d0   : > { %v17669_v5 = vcombine.high %v3923_v1, %v3931_v2  ;;  %v17668_v9 = vcombine.low %v3923_v1, %v3931_v2  ;;  %v20644_v0 = vld [vmem:[#allocation23 + $0x68] sm:$0xff]  }
 0x9d1   : > { %4892 = vmatpush1.bf16.msra.mxu0 %v17662_v6  ;;  %4933 = vmatpush1.bf16.msra.mxu1 %v17664_v7  ;;  %v3938_v6 = vld [vmem:[#allocation20 + $0x230] sm:$0xff]  ;;  %v20645_v1 = vld [vmem:[#allocation23 + $0xe8] sm:$0xff]  }
 0x9d2   : > { %4893 = vmatprep.subr.bf16.mxu0 %v17679_v61  ;;  %4934 = vmatprep.subr.bf16.mxu1 %v17681_v19  ;;  %v3946_v7 = vld [vmem:[#allocation20 + $0x270] sm:$0xff]  ;;  %v3939_v61 = vld [vmem:[#allocation20 + $0x238] sm:$0xff] }
 0x9d3   : > { %v3947_v19 = vld [vmem:[#allocation20 + $0x278] sm:$0xff]  ;;  %v17683_v11 = vcombine.high %v3938_v6, %v3946_v7  ;;  %v17682_v17 = vcombine.low %v3938_v6, %v3946_v7  ;;  %v20651_v6 = vld [vmem:[#allocation23 + $0xb0] sm:$0xff]   ;;  %v20652_v7 = vld [vmem:[#allocation23 + $0x78] sm:$0xff]  }
 0x9d4   : > { %v17685_v12 = vcombine.high %v3939_v61, %v3947_v19  ;;  %v17684_v18 = vcombine.low %v3939_v61, %v3947_v19  ;;  %v20646_v2 = vld [vmem:[#allocation23 + $0x28] sm:$0xff]   ;;  %v20653_v61 = vld [vmem:[#allocation23 + $0xf8] sm:$0xff]  }
 0x9d5   : > { %4894 = vmatpush1.bf16.msra.mxu0 %v17678_v13  ;;  %4935 = vmatpush1.bf16.msra.mxu1 %v17680_v14  ;;  %v3954_v13 = vld [vmem:[#allocation20 + $0x2b0] sm:$0xff]  ;;  %v20654_v19 = vld [vmem:[#allocation23 + $0x38] sm:$0xff]  }
 0x9d6   : > { %4895 = vmatprep.subr.bf16.mxu0 %v17695_v15  ;;  %4936 = vmatprep.subr.bf16.mxu1 %v17697_v16  ;;  %v3962_v14 = vld [vmem:[#allocation20 + $0x2f0] sm:$0xff]  ;;  %v3955_v15 = vld [vmem:[#allocation20 + $0x2b8] sm:$0xff] }
 0x9d7   : > { %v3963_v16 = vld [vmem:[#allocation20 + $0x2f8] sm:$0xff]  ;;  %v17699_v20 = vcombine.high %v3954_v13, %v3962_v14  ;;  %v17698_v30 = vcombine.low %v3954_v13, %v3962_v14 }
 0x9d8   : > { %v17701_v23 = vcombine.high %v3955_v15, %v3963_v16  ;;  %v17700_v36 = vcombine.low %v3955_v15, %v3963_v16  ;;  %v23040_v16 = vld [vmem:[#allocation22] sm:$0xff] }
 0x9d9   : > { %4896 = vmatpush1.bf16.msra.mxu0 %v17694_v24  ;;  %4937 = vmatpush1.bf16.msra.mxu1 %v17696_v25  ;;  %v3970_v24 = vld [vmem:[#allocation20 + $0x330] sm:$0xff] }
 0x9da   : > { %4897 = vmatprep.subr.bf16.mxu0 %v17711_v27  ;;  %4938 = vmatprep.subr.bf16.mxu1 %v17713_v55  ;;  %v3978_v25 = vld [vmem:[#allocation20 + $0x370] sm:$0xff]  ;;  %v3971_v27 = vld [vmem:[#allocation20 + $0x338] sm:$0xff] }
 0x9db   : > { %v3979_v55 = vld [vmem:[#allocation20 + $0x378] sm:$0xff]  ;;  %v17715_v32 = vcombine.high %v3970_v24, %v3978_v25  ;;  %v17714_v21 = vcombine.low %v3970_v24, %v3978_v25 }
 0x9dc   : > { %v17717_v33 = vcombine.high %v3971_v27, %v3979_v55  ;;  %v17716_v38 = vcombine.low %v3971_v27, %v3979_v55 }
 0x9dd   : > { %4898 = vmatpush1.bf16.msra.mxu0 %v17710_v34  ;;  %4939 = vmatpush1.bf16.msra.mxu1 %v17712_v31  ;;  %v3986_v34 = vld [vmem:[#allocation20 + $0x3b0] sm:$0xff] }
 0x9de   : > { %4899 = vmatprep.subr.bf16.mxu0 %v17727_v35  ;;  %4940 = vmatprep.subr.bf16.mxu1 %v17729_v37  ;;  %v3994_v31 = vld [vmem:[#allocation20 + $0x3f0] sm:$0xff]  ;;  %v3987_v35 = vld [vmem:[#allocation20 + $0x3b8] sm:$0xff] }
 0x9df   : > { %v3995_v37 = vld [vmem:[#allocation20 + $0x3f8] sm:$0xff]  ;;  %v17731_v39 = vcombine.high %v3986_v34, %v3994_v31 }
 0x9e0   : > { %v17733_v40 = vcombine.high %v3987_v35, %v3995_v37 }
 0x9e1   : > { %4900 = vmatpush1.bf16.msra.mxu0 %v17726_v41  ;;  %4941 = vmatpush1.bf16.msra.mxu1 %v17728_v42  ;;  %v17730_v41 = vcombine.low %v3986_v34, %v3994_v31  ;;  %v17732_v42 = vcombine.low %v3987_v35, %v3995_v37 }
 0x9e2   : > { %4967 = vmatprep.subr.bf16.mxu0 %v17619_v46  ;;  %5008 = vmatprep.subr.bf16.mxu1 %v17621_v26  ;;  %v20624_v46 = vld [vmem:[#allocation23 + $0x40] sm:$0xff]  }
 0x9e3   : > { %v20625_v26 = vld [vmem:[#allocation23 + $0xc0] sm:$0xff]  }
 0x9e4   : > { %4918 = vmatmul.mubr.bf16.vlgmr.msra.gmra.mrb[96].mxu0 %v23016_v45  ;;  %4959 = vmatmul.mubr.bf16.vlgmr.msra.gmra.mrb[116].mxu1 %v23016_v45 }
 0x9e5   : > { %4968 = vmatpush1.bf16.msra.mxu0 %v17618_v44  ;;  %5009 = vmatpush1.bf16.msra.mxu1 %v17620_v50  ;;  %v20630_v44 = vld [vmem:[#allocation23 + $0x8] sm:$0xff]  }
 0x9e6   : > { %4969 = vmatprep.subr.bf16.mxu0 %v17635_v51  ;;  %5010 = vmatprep.subr.bf16.mxu1 %v17637_v52  ;;  %v20631_v50 = vld [vmem:[#allocation23 + $0x88] sm:$0xff]   ;;  %v20632_v51 = vld [vmem:[#allocation23 + $0x50] sm:$0xff]  }
 0x9e7   : > { %4999 = vmatprep.mubr.bf16.mxu0 %v21951_v28  ;;  %5040 = vmatprep.mubr.bf16.mxu1 %v21951_v28  ;;  %v20633_v52 = vld [vmem:[#allocation23 + $0xd0] sm:$0xff]  }
 0x9e9   : > { %4970 = vmatpush1.bf16.msra.mxu0 %v17634_v54  ;;  %5011 = vmatpush1.bf16.msra.mxu1 %v17636_v59  ;;  %v20638_v54 = vld [vmem:[#allocation23 + $0x18] sm:$0xff]   ;;  %v20640_v59 = vld [vmem:[#allocation23 + $0x60] sm:$0xff]  }
 0x9ea   : > { %4971 = vmatprep.subr.bf16.mxu0 %v17651_v29  ;;  %5012 = vmatprep.subr.bf16.mxu1 %v17653_v60  ;;  %v20641_v29 = vld [vmem:[#allocation23 + $0xe0] sm:$0xff]  }
 0x9eb   : > { %v20642_v60 = vld [vmem:[#allocation23 + $0x20] sm:$0xff]  }
 0x9ed   : > { %4972 = vmatpush1.bf16.msra.mxu0 %v17650_v3  ;;  %5013 = vmatpush1.bf16.msra.mxu1 %v17652_v4  ;;  %v20647_v3 = vld [vmem:[#allocation23 + $0xa8] sm:$0xff]   ;;  %v20648_v4 = vld [vmem:[#allocation23 + $0x70] sm:$0xff]  }
 0x9ee   : > { %4973 = vmatprep.subr.bf16.mxu0 %v17667_v10  ;;  %5014 = vmatprep.subr.bf16.mxu1 %v17669_v5  ;;  %v20649_v10 = vld [vmem:[#allocation23 + $0xf0] sm:$0xff]  }
 0x9ef   : > { %v20650_v5 = vld [vmem:[#allocation23 + $0x30] sm:$0xff]  }
 0x9f1   : > { %4974 = vmatpush1.bf16.msra.mxu0 %v17666_v8  ;;  %5015 = vmatpush1.bf16.msra.mxu1 %v17668_v9  ;;  %v20655_v8 = vld [vmem:[#allocation23 + $0xb8] sm:$0xff]   ;;  %v20656_v9 = vld [vmem:[#allocation23 + $0x140] sm:$0xff]  }
 0x9f2   : > { %4975 = vmatprep.subr.bf16.mxu0 %v17683_v11  ;;  %5016 = vmatprep.subr.bf16.mxu1 %v17685_v12  ;;  %v20657_v11 = vld [vmem:[#allocation23 + $0x1c0] sm:$0xff]   ;;  %v4001_v12 = vlaneseq }
 0x9f4   : > { %v23032_v13 = vshrl.u32 %v4001_v12, 7 }
 0x9f5   : > { %4976 = vmatpush1.bf16.msra.mxu0 %v17682_v17  ;;  %5017 = vmatpush1.bf16.msra.mxu1 %v17684_v18 }
 0x9f6   : > { %4977 = vmatprep.subr.bf16.mxu0 %v17699_v20  ;;  %5018 = vmatprep.subr.bf16.mxu1 %v17701_v23  ;;  %v23035_v14 = vsub.s32 0, %v23032_v13  ;;  %v23038_v15 = vsub.s32 2, %v23032_v13  ;;  %v23043_v17 = vsub.s32 1, %v23032_v13  ;;  %v23046_v18 = vsub.s32 3, %v23032_v13 }
 0x9f8   : > { %v4004_v20 = vrot.slane %v23040_v16, %v23035_v14  ;;  %v4012_v23 = vrot.slane %v23040_v16, %v23038_v15  ;;  %v4008_v24 = vrot.slane %v23040_v16, %v23043_v17  ;;  %v4016_v25 = vrot.slane %v23040_v16, %v23046_v18 }
 0x9f9   : > { %4978 = vmatpush1.bf16.msra.mxu0 %v17698_v30  ;;  %5019 = vmatpush1.bf16.msra.mxu1 %v17700_v36 }
 0x9fa   : > { %4979 = vmatprep.subr.bf16.mxu0 %v17715_v32  ;;  %5020 = vmatprep.subr.bf16.mxu1 %v17717_v33 }
 0x9fd   : > { %4980 = vmatpush1.bf16.msra.mxu0 %v17714_v21  ;;  %5021 = vmatpush1.bf16.msra.mxu1 %v17716_v38 }
 0x9fe   : > { %4981 = vmatprep.subr.bf16.mxu0 %v17731_v39  ;;  %5022 = vmatprep.subr.bf16.mxu1 %v17733_v40 }
 0xa01   : > { %4982 = vmatpush1.bf16.msra.mxu0 %v17730_v41  ;;  %5023 = vmatpush1.bf16.msra.mxu1 %v17732_v42 }
 0xa02   : > { %18685 = vmatprep.subr.bf16.mxu0 %v20624_v46  ;;  %18707 = vmatprep.subr.bf16.mxu1 %v20625_v26 }
 0xa04   : > { %5000 = vmatmul.mubr.bf16.vlgmr.msra.gmra.mrb[100].mxu0 %v23016_v45  ;;  %5041 = vmatmul.mubr.bf16.vlgmr.msra.gmra.mrb[120].mxu1 %v23016_v45  ;;  %v20639_v45 = vld [vmem:[#allocation23 + $0x98] sm:$0xff]  }
 0xa05   : > { %18686 = vmatpush3.bf16.msra.mxu0 %v20626_v47  ;;  %18708 = vmatpush3.bf16.msra.mxu1 %v20627_v63  ;;  %v20658_v47 = vld [vmem:[#allocation23 + $0x100] sm:$0xff]  }
 0xa06   : > { %18687 = vmatprep.subr.bf16.mxu0 %v20628_v48  ;;  %18709 = vmatprep.subr.bf16.mxu1 %v20629_v49  ;;  %v20659_v63 = vld [vmem:[#allocation23 + $0x180] sm:$0xff]  }
 0xa09   : > { %18688 = vmatpush3.bf16.msra.mxu0 %v20630_v44  ;;  %18710 = vmatpush3.bf16.msra.mxu1 %v20631_v50  ;;  %v20660_v44 = vld [vmem:[#allocation23 + $0x148] sm:$0xff]  }
 0xa0a   : > { %18689 = vmatprep.subr.bf16.mxu0 %v20632_v51  ;;  %18711 = vmatprep.subr.bf16.mxu1 %v20633_v52  ;;  %v20661_v50 = vld [vmem:[#allocation23 + $0x1c8] sm:$0xff]  }
 0xa0b   : > { %v20662_v51 = vld [vmem:[#allocation23 + $0x108] sm:$0xff]  }
 0xa0c   : > { %v20663_v52 = vld [vmem:[#allocation23 + $0x188] sm:$0xff]  }
 0xa0d   : > { %18690 = vmatpush3.bf16.msra.mxu0 %v20634_v53  ;;  %18712 = vmatpush3.bf16.msra.mxu1 %v20635_v56  ;;  %v20664_v53 = vld [vmem:[#allocation23 + $0x150] sm:$0xff]  }
 0xa0e   : > { %18691 = vmatprep.subr.bf16.mxu0 %v20636_v57  ;;  %18713 = vmatprep.subr.bf16.mxu1 %v20637_v58  ;;  %v20665_v56 = vld [vmem:[#allocation23 + $0x1d0] sm:$0xff]  }
 0xa0f   : > { %v20666_v57 = vld [vmem:[#allocation23 + $0x110] sm:$0xff]  }
 0xa10   : > { %v20667_v58 = vld [vmem:[#allocation23 + $0x190] sm:$0xff]  }
 0xa11   : > { %18692 = vmatpush3.bf16.msra.mxu0 %v20638_v54  ;;  %18714 = vmatpush3.bf16.msra.mxu1 %v20639_v45  ;;  %v20668_v54 = vld [vmem:[#allocation23 + $0x158] sm:$0xff]  }
 0xa12   : > { %18693 = vmatprep.subr.bf16.mxu0 %v20640_v59  ;;  %18715 = vmatprep.subr.bf16.mxu1 %v20641_v29  ;;  %v20669_v45 = vld [vmem:[#allocation23 + $0x1d8] sm:$0xff]  }
 0xa13   : > { %v20670_v59 = vld [vmem:[#allocation23 + $0x118] sm:$0xff]  }
 0xa14   : > { %v20671_v29 = vld [vmem:[#allocation23 + $0x198] sm:$0xff]  }
 0xa15   : > { %18694 = vmatpush3.bf16.msra.mxu0 %v20642_v60  ;;  %18716 = vmatpush3.bf16.msra.mxu1 %v20643_v62  ;;  %v20672_v60 = vld [vmem:[#allocation23 + $0x160] sm:$0xff]  }
 0xa16   : > { %18695 = vmatprep.subr.bf16.mxu0 %v20644_v0  ;;  %18717 = vmatprep.subr.bf16.mxu1 %v20645_v1  ;;  %v20673_v62 = vld [vmem:[#allocation23 + $0x1e0] sm:$0xff]  }
 0xa17   : > { %v20674_v0 = vld [vmem:[#allocation23 + $0x120] sm:$0xff]  }
 0xa18   : > { %v20675_v1 = vld [vmem:[#allocation23 + $0x1a0] sm:$0xff]  }
 0xa19   : > { %18696 = vmatpush3.bf16.msra.mxu0 %v20646_v2  ;;  %18718 = vmatpush3.bf16.msra.mxu1 %v20647_v3  ;;  %v20676_v2 = vld [vmem:[#allocation23 + $0x168] sm:$0xff]  }
 0xa1a   : > { %18697 = vmatprep.subr.bf16.mxu0 %v20648_v4  ;;  %18719 = vmatprep.subr.bf16.mxu1 %v20649_v10  ;;  %v20677_v3 = vld [vmem:[#allocation23 + $0x1e8] sm:$0xff]   ;;  %v23057_v4 = vsub.s32 4, %v23032_v13  ;;  %v23060_v10 = vsub.s32 6, %v23032_v13 }
 0xa1d   : > { %18698 = vmatpush3.bf16.msra.mxu0 %v20650_v5  ;;  %18720 = vmatpush3.bf16.msra.mxu1 %v20651_v6  ;;  %v20678_v5 = vld [vmem:[#allocation23 + $0x128] sm:$0xff]  }
 0xa1e   : > { %18699 = vmatprep.subr.bf16.mxu0 %v20652_v7  ;;  %18721 = vmatprep.subr.bf16.mxu1 %v20653_v61  ;;  %v20679_v6 = vld [vmem:[#allocation23 + $0x1a8] sm:$0xff]   ;;  %v23063_v7 = vsub.s32 5, %v23032_v13  ;;  %v23066_v61 = vsub.s32 7, %v23032_v13  ;;  %v20682_v13 = vld [vmem:[#allocation23 + $0x130] sm:$0xff]  }
 0xa20   : > { %v4024_v12 = vrot.slane %v23040_v16, %v23063_v7 }
 0xa21   : > { %18700 = vmatpush3.bf16.msra.mxu0 %v20654_v19  ;;  %18722 = vmatpush3.bf16.msra.mxu1 %v20655_v8  ;;  %v20680_v19 = vld [vmem:[#allocation23 + $0x170] sm:$0xff]  }
 0xa22   : > { %18729 = vmatprep.subr.bf16.mxu0 %v20656_v9  ;;  %18751 = vmatprep.subr.bf16.mxu1 %v20657_v11  ;;  %v20681_v8 = vld [vmem:[#allocation23 + $0x1f0] sm:$0xff]   ;;  %v4020_v9 = vrot.slane %v23040_v16, %v23057_v4  ;;  %v4028_v11 = vrot.slane %v23040_v16, %v23060_v10 }
 0xa77   : > { %v4755_v27 = vpop.f32.mrb[88].mxu0  ;;  %v4796_v55 = vpop.f32.mrb[108].mxu1 }
 0xa78   : > { %v4756_v30 = vadd.f32 %v4755_v27, %v4004_v20  ;;  %v4797_v36 = vadd.f32 %v4796_v55, %v4012_v23  ;;  %v4757_v32 = vpop.f32.mrb[89].mxu0  ;;  %v4798_v33 = vpop.f32.mrb[109].mxu1  ;;  %v4032_v20 = vrot.slane %v23040_v16, %v23066_v61  ;;  %v20683_v23 = vld [vmem:[#allocation23 + $0x1b0] sm:$0xff]   ;;  %v20687_v16 = vld [vmem:[#allocation23 + $0x1b8] sm:$0xff]  }
 0xa79   : > { %v4758_v34 = vadd.f32 %v4757_v32, %v4008_v24  ;;  %v4799_v31 = vadd.f32 %v4798_v33, %v4016_v25  ;;  %v4759_v35 = vpop.f32.mrb[90].mxu0  ;;  %v4800_v37 = vpop.f32.mrb[110].mxu1  ;;  %v20684_v24 = vld [vmem:[#allocation23 + $0x178] sm:$0xff]  }
 0xa7a   : > { %v5049_v21 = vmax.f32 %v4756_v30, 0.0  ;;  %v5051_v38 = vmax.f32 %v4797_v36, 0.0  ;;  %v4760_v39 = vpop.f32.mrb[91].mxu0  ;;  %v4801_v40 = vpop.f32.mrb[111].mxu1  ;;  %v20685_v25 = vld [vmem:[#allocation23 + $0x1f8] sm:$0xff]  }
 0xa7b   : > { %v5050_v41 = vmax.f32 %v4758_v34, 0.0  ;;  %v5052_v42 = vmax.f32 %v4799_v31, 0.0 }
 0xa7c   : > { %v5321_v48 = vpack.c.bf16 %v5049_v21, %v5049_v21  ;;  %v5323_v49 = vpack.c.bf16 %v5051_v38, %v5051_v38  ;;  %v20686_v21 = vld [vmem:[#allocation23 + $0x138] sm:$0xff]  }
 0xa7d   : > { %v5322_v46 = vpack.c.bf16 %v5050_v41, %v5050_v41  ;;  %v5324_v26 = vpack.c.bf16 %v5052_v42, %v5052_v42  ;;  %v20688_v42 = vld [vmem:[#allocation23 + $0x240] sm:$0xff]  }
 0xa7f   : > { %6144 = vmatprep.mubr.bf16.mxu0 %v5322_v46  ;;  %6184 = vmatprep.mubr.bf16.mxu1 %v5324_v26  ;;  %v20689_v46 = vld [vmem:[#allocation23 + $0x2c0] sm:$0xff]  }
 0xa80   : > { %6145 = vmatmul.mubr.bf16.vlgmr.msra.gmra.mrb[104].mxu0 %v5321_v48  ;;  %6185 = vmatmul.mubr.bf16.vlgmr.msra.gmra.mrb[124].mxu1 %v5323_v49  ;;  %v20690_v49 = vld [vmem:[#allocation23 + $0x200] sm:$0xff]  }
 0xa81   : > { %18730 = vmatpush3.bf16.msra.mxu0 %v20658_v47  ;;  %18752 = vmatpush3.bf16.msra.mxu1 %v20659_v63 }
 0xa82   : > { %18731 = vmatprep.subr.bf16.mxu0 %v20660_v44  ;;  %18753 = vmatprep.subr.bf16.mxu1 %v20661_v50  ;;  %v20691_v44 = vld [vmem:[#allocation23 + $0x280] sm:$0xff]  }
 0xa85   : > { %18732 = vmatpush3.bf16.msra.mxu0 %v20662_v51  ;;  %18754 = vmatpush3.bf16.msra.mxu1 %v20663_v52  ;;  %v20692_v52 = vld [vmem:[#allocation23 + $0x248] sm:$0xff]  }
 0xa86   : > { %18733 = vmatprep.subr.bf16.mxu0 %v20664_v53  ;;  %18755 = vmatprep.subr.bf16.mxu1 %v20665_v56  ;;  %v20693_v53 = vld [vmem:[#allocation23 + $0x2c8] sm:$0xff]  }
 0xa87   : > { %v20694_v56 = vld [vmem:[#allocation23 + $0x208] sm:$0xff]  }
 0xa89   : > { %18734 = vmatpush3.bf16.msra.mxu0 %v20666_v57  ;;  %18756 = vmatpush3.bf16.msra.mxu1 %v20667_v58  ;;  %v20695_v57 = vld [vmem:[#allocation23 + $0x288] sm:$0xff]   ;;  %v20696_v58 = vld [vmem:[#allocation23 + $0x250] sm:$0xff]  }
 0xa8a   : > { %18735 = vmatprep.subr.bf16.mxu0 %v20668_v54  ;;  %18757 = vmatprep.subr.bf16.mxu1 %v20669_v45  ;;  %v20697_v54 = vld [vmem:[#allocation23 + $0x2d0] sm:$0xff]  }
 0xa8b   : > { %v20698_v45 = vld [vmem:[#allocation23 + $0x210] sm:$0xff]  }
 0xa8d   : > { %18736 = vmatpush3.bf16.msra.mxu0 %v20670_v59  ;;  %18758 = vmatpush3.bf16.msra.mxu1 %v20671_v29  ;;  %v20699_v59 = vld [vmem:[#allocation23 + $0x290] sm:$0xff]   ;;  %v20700_v29 = vld [vmem:[#allocation23 + $0x258] sm:$0xff]  }
 0xa8e   : > { %18737 = vmatprep.subr.bf16.mxu0 %v20672_v60  ;;  %18759 = vmatprep.subr.bf16.mxu1 %v20673_v62  ;;  %v20701_v60 = vld [vmem:[#allocation23 + $0x2d8] sm:$0xff]  }
 0xa8f   : > { %v20702_v62 = vld [vmem:[#allocation23 + $0x218] sm:$0xff]  }
 0xa91   : > { %18738 = vmatpush3.bf16.msra.mxu0 %v20674_v0  ;;  %18760 = vmatpush3.bf16.msra.mxu1 %v20675_v1  ;;  %v20703_v0 = vld [vmem:[#allocation23 + $0x298] sm:$0xff]   ;;  %v20704_v1 = vld [vmem:[#allocation23 + $0x260] sm:$0xff]  }
 0xa92   : > { %18739 = vmatprep.subr.bf16.mxu0 %v20676_v2  ;;  %18761 = vmatprep.subr.bf16.mxu1 %v20677_v3  ;;  %v20705_v2 = vld [vmem:[#allocation23 + $0x2e0] sm:$0xff]  }
 0xa93   : > { %v20706_v3 = vld [vmem:[#allocation23 + $0x220] sm:$0xff]  }
 0xa95   : > { %18740 = vmatpush3.bf16.msra.mxu0 %v20678_v5  ;;  %18762 = vmatpush3.bf16.msra.mxu1 %v20679_v6  ;;  %v20707_v5 = vld [vmem:[#allocation23 + $0x2a0] sm:$0xff]   ;;  %v20708_v6 = vld [vmem:[#allocation23 + $0x268] sm:$0xff]  }
 0xa96   : > { %18741 = vmatprep.subr.bf16.mxu0 %v20680_v19  ;;  %18763 = vmatprep.subr.bf16.mxu1 %v20681_v8  ;;  %v20709_v19 = vld [vmem:[#allocation23 + $0x2e8] sm:$0xff]  }
 0xa97   : > { %v4837_v27 = vpop.f32.mrb[92].mxu0  ;;  %v4878_v55 = vpop.f32.mrb[112].mxu1  ;;  %v20710_v8 = vld [vmem:[#allocation23 + $0x228] sm:$0xff]  }
 0xa98   : > { %v4838_v30 = vadd.f32 %v4837_v27, %v4020_v9  ;;  %v4879_v36 = vadd.f32 %v4878_v55, %v4028_v11  ;;  %v4839_v32 = vpop.f32.mrb[93].mxu0  ;;  %v4880_v33 = vpop.f32.mrb[113].mxu1  ;;  %v20711_v9 = vld [vmem:[#allocation23 + $0x2a8] sm:$0xff]   ;;  %v23076_v11 = vld [vmem:[#allocation22 + $0x8] sm:$0xff]  ;;  %v20714_v27 = vld [vmem:[#allocation23 + $0x230] sm:$0xff]  }
 0xa99   : > { %v4840_v34 = vadd.f32 %v4839_v32, %v4024_v12  ;;  %v4881_v31 = vadd.f32 %v4880_v33, %v4032_v20  ;;  %v4841_v35 = vpop.f32.mrb[94].mxu0  ;;  %v4882_v37 = vpop.f32.mrb[114].mxu1  ;;  %18742 = vmatpush3.bf16.msra.mxu0 %v20682_v13  ;;  %18764 = vmatpush3.bf16.msra.mxu1 %v20683_v23  ;;  %v20712_v12 = vld [vmem:[#allocation23 + $0x270] sm:$0xff]   ;;  %v4036_v13 = vrot.slane %v23076_v11, %v23035_v14 }
 0xa9a   : > { %v5053_v38 = vmax.f32 %v4838_v30, 0.0  ;;  %v5055_v39 = vmax.f32 %v4879_v36, 0.0  ;;  %v4842_v40 = vpop.f32.mrb[95].mxu0  ;;  %v4883_v41 = vpop.f32.mrb[115].mxu1  ;;  %18743 = vmatprep.subr.bf16.mxu0 %v20684_v24  ;;  %18765 = vmatprep.subr.bf16.mxu1 %v20685_v25  ;;  %v20713_v20 = vld [vmem:[#allocation23 + $0x2f0] sm:$0xff]   ;;  %v4044_v23 = vrot.slane %v23076_v11, %v23038_v15  ;;  %v4040_v24 = vrot.slane %v23076_v11, %v23043_v17  ;;  %v20716_v30 = vld [vmem:[#allocation23 + $0x278] sm:$0xff]  }
 0xa9b   : > { %v5054_v26 = vmax.f32 %v4840_v34, 0.0  ;;  %v5056_v47 = vmax.f32 %v4881_v31, 0.0  ;;  %v4048_v25 = vrot.slane %v23076_v11, %v23046_v18  ;;  %v20715_v55 = vld [vmem:[#allocation23 + $0x2b0] sm:$0xff]   ;;  %v20717_v36 = vld [vmem:[#allocation23 + $0x2f8] sm:$0xff]  }
 0xa9c   : > { %v5325_v50 = vpack.c.bf16 %v5053_v38, %v5053_v38  ;;  %v5327_v51 = vpack.c.bf16 %v5055_v39, %v5055_v39  ;;  %v20718_v40 = vld [vmem:[#allocation23 + $0x238] sm:$0xff]  }
 0xa9d   : > { %18744 = vmatpush3.bf16.msra.mxu0 %v20686_v21  ;;  %18766 = vmatpush3.bf16.msra.mxu1 %v20687_v16  ;;  %v5326_v63 = vpack.c.bf16 %v5054_v26, %v5054_v26  ;;  %v5328_v48 = vpack.c.bf16 %v5056_v47, %v5056_v47  ;;  %v20719_v41 = vld [vmem:[#allocation23 + $0x2b8] sm:$0xff]  }
 0xa9e   : > { %18773 = vmatprep.subr.bf16.mxu0 %v20688_v42  ;;  %18795 = vmatprep.subr.bf16.mxu1 %v20689_v46 }
 0xa9f   : > { %6224 = vmatprep.mubr.bf16.mxu0 %v5326_v63  ;;  %6264 = vmatprep.mubr.bf16.mxu1 %v5328_v48  ;;  %v20720_v63 = vld [vmem:[#allocation23 + $0x340] sm:$0xff]  }
 0xaa0   : > { %6225 = vmatmul.mubr.bf16.vlgmr.msra.gmra.mrb[108].mxu0 %v5325_v50  ;;  %6265 = vmatmul.mubr.bf16.vlgmr.msra.gmra.mrb[128].mxu1 %v5327_v51  ;;  %v20721_v48 = vld [vmem:[#allocation23 + $0x3c0] sm:$0xff]  }
 0xaa1   : > { %18774 = vmatpush3.bf16.msra.mxu0 %v20690_v49  ;;  %18796 = vmatpush3.bf16.msra.mxu1 %v20691_v44 }
 0xaa2   : > { %18775 = vmatprep.subr.bf16.mxu0 %v20692_v52  ;;  %18797 = vmatprep.subr.bf16.mxu1 %v20693_v53  ;;  %v20722_v52 = vld [vmem:[#allocation23 + $0x300] sm:$0xff]  }
 0xaa3   : > { %v20723_v53 = vld [vmem:[#allocation23 + $0x380] sm:$0xff]  }
 0xaa5   : > { %18776 = vmatpush3.bf16.msra.mxu0 %v20694_v56  ;;  %18798 = vmatpush3.bf16.msra.mxu1 %v20695_v57 }
 0xaa6   : > { %18777 = vmatprep.subr.bf16.mxu0 %v20696_v58  ;;  %18799 = vmatprep.subr.bf16.mxu1 %v20697_v54  ;;  %v20724_v58 = vld [vmem:[#allocation23 + $0x348] sm:$0xff]  }
 0xaa7   : > { %v20725_v54 = vld [vmem:[#allocation23 + $0x3c8] sm:$0xff]  }
 0xaa9   : > { %18778 = vmatpush3.bf16.msra.mxu0 %v20698_v45  ;;  %18800 = vmatpush3.bf16.msra.mxu1 %v20699_v59  ;;  %v20726_v45 = vld [vmem:[#allocation23 + $0x308] sm:$0xff]  }
 0xaaa   : > { %18779 = vmatprep.subr.bf16.mxu0 %v20700_v29  ;;  %18801 = vmatprep.subr.bf16.mxu1 %v20701_v60  ;;  %v20727_v59 = vld [vmem:[#allocation23 + $0x388] sm:$0xff]   ;;  %v20728_v29 = vld [vmem:[#allocation23 + $0x350] sm:$0xff]  }
 0xaab   : > { %v20729_v60 = vld [vmem:[#allocation23 + $0x3d0] sm:$0xff]  }
 0xaad   : > { %18780 = vmatpush3.bf16.msra.mxu0 %v20702_v62  ;;  %18802 = vmatpush3.bf16.msra.mxu1 %v20703_v0  ;;  %v20730_v62 = vld [vmem:[#allocation23 + $0x310] sm:$0xff]  }
 0xaae   : > { %18781 = vmatprep.subr.bf16.mxu0 %v20704_v1  ;;  %18803 = vmatprep.subr.bf16.mxu1 %v20705_v2  ;;  %v20731_v0 = vld [vmem:[#allocation23 + $0x390] sm:$0xff]   ;;  %v20732_v1 = vld [vmem:[#allocation23 + $0x358] sm:$0xff]  }
 0xaaf   : > { %v20733_v2 = vld [vmem:[#allocation23 + $0x3d8] sm:$0xff]  }
 0xab1   : > { %18782 = vmatpush3.bf16.msra.mxu0 %v20706_v3  ;;  %18804 = vmatpush3.bf16.msra.mxu1 %v20707_v5  ;;  %v20734_v3 = vld [vmem:[#allocation23 + $0x318] sm:$0xff]  }
 0xab2   : > { %18783 = vmatprep.subr.bf16.mxu0 %v20708_v6  ;;  %18805 = vmatprep.subr.bf16.mxu1 %v20709_v19  ;;  %v20735_v5 = vld [vmem:[#allocation23 + $0x398] sm:$0xff]   ;;  %v20736_v6 = vld [vmem:[#allocation23 + $0x360] sm:$0xff]  }
 0xab3   : > { %v20737_v19 = vld [vmem:[#allocation23 + $0x3e0] sm:$0xff]  }
 0xab5   : > { %18784 = vmatpush3.bf16.msra.mxu0 %v20710_v8  ;;  %18806 = vmatpush3.bf16.msra.mxu1 %v20711_v9  ;;  %v20738_v8 = vld [vmem:[#allocation23 + $0x320] sm:$0xff]  }
 0xab6   : > { %18785 = vmatprep.subr.bf16.mxu0 %v20712_v12  ;;  %18807 = vmatprep.subr.bf16.mxu1 %v20713_v20  ;;  %v20739_v9 = vld [vmem:[#allocation23 + $0x3a0] sm:$0xff]   ;;  %v20740_v12 = vld [vmem:[#allocation23 + $0x368] sm:$0xff]  }
 0xab7   : > { %v4919_v32 = vpop.f32.mrb[96].mxu0  ;;  %v4960_v33 = vpop.f32.mrb[116].mxu1  ;;  %v20741_v20 = vld [vmem:[#allocation23 + $0x3e8] sm:$0xff]  }
 0xab8   : > { %v4920_v34 = vadd.f32 %v4919_v32, %v4036_v13  ;;  %v4961_v31 = vadd.f32 %v4960_v33, %v4044_v23  ;;  %v4921_v35 = vpop.f32.mrb[97].mxu0  ;;  %v4962_v37 = vpop.f32.mrb[117].mxu1  ;;  %v20742_v13 = vld [vmem:[#allocation23 + $0x328] sm:$0xff]   ;;  %v20746_v32 = vld [vmem:[#allocation23 + $0x330] sm:$0xff]  }
 0xab9   : > { %v4922_v21 = vadd.f32 %v4921_v35, %v4040_v24  ;;  %v4963_v16 = vadd.f32 %v4962_v37, %v4048_v25  ;;  %v4923_v38 = vpop.f32.mrb[98].mxu0  ;;  %v4964_v39 = vpop.f32.mrb[118].mxu1  ;;  %18786 = vmatpush3.bf16.msra.mxu0 %v20714_v27  ;;  %18808 = vmatpush3.bf16.msra.mxu1 %v20715_v55  ;;  %v20743_v23 = vld [vmem:[#allocation23 + $0x3a8] sm:$0xff]   ;;  %v20744_v24 = vld [vmem:[#allocation23 + $0x370] sm:$0xff]   ;;  %v4052_v27 = vrot.slane %v23076_v11, %v23057_v4 }
 0xaba   : > { %v5057_v42 = vmax.f32 %v4920_v34, 0.0  ;;  %v5059_v46 = vmax.f32 %v4961_v31, 0.0  ;;  %v4924_v26 = vpop.f32.mrb[99].mxu0  ;;  %v4965_v47 = vpop.f32.mrb[119].mxu1  ;;  %18787 = vmatprep.subr.bf16.mxu0 %v20716_v30  ;;  %18809 = vmatprep.subr.bf16.mxu1 %v20717_v36  ;;  %v20745_v25 = vld [vmem:[#allocation23 + $0x3f0] sm:$0xff]   ;;  %v4060_v55 = vrot.slane %v23076_v11, %v23060_v10  ;;  %v4056_v30 = vrot.slane %v23076_v11, %v23063_v7  ;;  %v20748_v34 = vld [vmem:[#allocation23 + $0x378] sm:$0xff]  }
 0xabb   : > { %v5058_v49 = vmax.f32 %v4922_v21, 0.0  ;;  %v5060_v44 = vmax.f32 %v4963_v16, 0.0  ;;  %v4064_v36 = vrot.slane %v23076_v11, %v23066_v61  ;;  %v20747_v33 = vld [vmem:[#allocation23 + $0x3b0] sm:$0xff]   ;;  %v20749_v31 = vld [vmem:[#allocation23 + $0x3f8] sm:$0xff]  }
 0xabc   : > { %v5329_v56 = vpack.c.bf16 %v5057_v42, %v5057_v42  ;;  %v5331_v57 = vpack.c.bf16 %v5059_v46, %v5059_v46  ;;  %v20750_v26 = vld [vmem:[#allocation23 + $0x338] sm:$0xff]  }
 0xabd   : > { %18788 = vmatpush3.bf16.msra.mxu0 %v20718_v40  ;;  %18810 = vmatpush3.bf16.msra.mxu1 %v20719_v41  ;;  %v5330_v50 = vpack.c.bf16 %v5058_v49, %v5058_v49  ;;  %v5332_v51 = vpack.c.bf16 %v5060_v44, %v5060_v44  ;;  %v20751_v11 = vld [vmem:[#allocation23 + $0x3b8] sm:$0xff]  }
 0xabe   : > { %18817 = vmatprep.subr.bf16.mxu0 %v20720_v63  ;;  %18839 = vmatprep.subr.bf16.mxu1 %v20721_v48 }
 0xabf   : > { %6304 = vmatprep.mubr.bf16.mxu0 %v5330_v50  ;;  %6344 = vmatprep.mubr.bf16.mxu1 %v5332_v51 }
 0xac0   : > { %6305 = vmatmul.mubr.bf16.vlgmr.msra.gmra.mrb[112].mxu0 %v5329_v56  ;;  %6345 = vmatmul.mubr.bf16.vlgmr.msra.gmra.mrb[132].mxu1 %v5331_v57 }
 0xac1   : > { %18818 = vmatpush3.bf16.msra.mxu0 %v20722_v52  ;;  %18840 = vmatpush3.bf16.msra.mxu1 %v20723_v53 }
 0xac2   : > { %18819 = vmatprep.subr.bf16.mxu0 %v20724_v58  ;;  %18841 = vmatprep.subr.bf16.mxu1 %v20725_v54  ;;  %v17734_v54 = vld [vmem:[#allocation25] ss:$0 sm:$0xff] }
 0xac5   : > { %18820 = vmatpush3.bf16.msra.mxu0 %v20726_v45  ;;  %18842 = vmatpush3.bf16.msra.mxu1 %v20727_v59 }
 0xac6   : > { %18821 = vmatprep.subr.bf16.mxu0 %v20728_v29  ;;  %18843 = vmatprep.subr.bf16.mxu1 %v20729_v60 }
 0xac9   : > { %18822 = vmatpush3.bf16.msra.mxu0 %v20730_v62  ;;  %18844 = vmatpush3.bf16.msra.mxu1 %v20731_v0 }
 0xaca   : > { %18823 = vmatprep.subr.bf16.mxu0 %v20732_v1  ;;  %18845 = vmatprep.subr.bf16.mxu1 %v20733_v2 }
 0xacd   : > { %18824 = vmatpush3.bf16.msra.mxu0 %v20734_v3  ;;  %18846 = vmatpush3.bf16.msra.mxu1 %v20735_v5 }
 0xace   : > { %18825 = vmatprep.subr.bf16.mxu0 %v20736_v6  ;;  %18847 = vmatprep.subr.bf16.mxu1 %v20737_v19 }
 0xad1   : > { %18826 = vmatpush3.bf16.msra.mxu0 %v20738_v8  ;;  %18848 = vmatpush3.bf16.msra.mxu1 %v20739_v9 }
 0xad2   : > { %18827 = vmatprep.subr.bf16.mxu0 %v20740_v12  ;;  %18849 = vmatprep.subr.bf16.mxu1 %v20741_v20 }
 0xad5   : > { %18828 = vmatpush3.bf16.msra.mxu0 %v20742_v13  ;;  %18850 = vmatpush3.bf16.msra.mxu1 %v20743_v23 }
 0xad6   : > { %18829 = vmatprep.subr.bf16.mxu0 %v20744_v24  ;;  %18851 = vmatprep.subr.bf16.mxu1 %v20745_v25 }
 0xad7   : > { %v5001_v35 = vpop.f32.mrb[100].mxu0  ;;  %v5042_v37 = vpop.f32.mrb[120].mxu1 }
 0xad8   : > { %v5002_v21 = vadd.f32 %v5001_v35, %v4052_v27  ;;  %v5043_v16 = vadd.f32 %v5042_v37, %v4060_v55  ;;  %v5003_v38 = vpop.f32.mrb[101].mxu0  ;;  %v5044_v39 = vpop.f32.mrb[121].mxu1 }
 0xad9   : > { %v5004_v40 = vadd.f32 %v5003_v38, %v4056_v30  ;;  %v5045_v41 = vadd.f32 %v5044_v39, %v4064_v36  ;;  %v5005_v42 = vpop.f32.mrb[102].mxu0  ;;  %v5046_v46 = vpop.f32.mrb[122].mxu1  ;;  %18830 = vmatpush3.bf16.msra.mxu0 %v20746_v32  ;;  %18852 = vmatpush3.bf16.msra.mxu1 %v20747_v33 }
 0xada   : > { %v5061_v47 = vmax.f32 %v5002_v21, 0.0  ;;  %v5063_v63 = vmax.f32 %v5043_v16, 0.0  ;;  %v5006_v48 = vpop.f32.mrb[103].mxu0  ;;  %v5047_v49 = vpop.f32.mrb[123].mxu1  ;;  %18831 = vmatprep.subr.bf16.mxu0 %v20748_v34  ;;  %18853 = vmatprep.subr.bf16.mxu1 %v20749_v31 }
 0xadb   : > { %v5062_v44 = vmax.f32 %v5004_v40, 0.0  ;;  %v5064_v50 = vmax.f32 %v5045_v41, 0.0 }
 0xadc   : > { %v5333_v53 = vpack.c.bf16 %v5061_v47, %v5061_v47  ;;  %v5335_v56 = vpack.c.bf16 %v5063_v63, %v5063_v63 }
 0xadd   : > { %18832 = vmatpush3.bf16.msra.mxu0 %v20750_v26  ;;  %18854 = vmatpush3.bf16.msra.mxu1 %v20751_v11  ;;  %v5334_v51 = vpack.c.bf16 %v5062_v44, %v5062_v44  ;;  %v5336_v52 = vpack.c.bf16 %v5064_v50, %v5064_v50 }
 0xade   : > { %19707 = vmatprep.subr.bf16.mxu0 %v21949_v22  ;;  %19713 = vmatprep.subr.bf16.mxu1 %v21949_v22 }
 0xadf   : > { %6384 = vmatprep.mubr.bf16.mxu0 %v5334_v51  ;;  %6424 = vmatprep.mubr.bf16.mxu1 %v5336_v52 }
 0xae0   : > { %6385 = vmatmul.mubr.bf16.vlgmr.msra.gmra.mrb[116].mxu0 %v5333_v53  ;;  %6425 = vmatmul.mubr.bf16.vlgmr.msra.gmra.mrb[136].mxu1 %v5335_v56 }
 0xae1   : > { %19709 = vmatprep.mubr.msk.bf16.mxu0 %vm21950_vm0, %v21949_v22  ;;  %19715 = vmatprep.mubr.msk.bf16.mxu1 %vm21950_vm0, %v21949_v22 }
 0xb53   : > { %v18701_v57 = vpop.f32.mrb[104].mxu0  ;;  %v18723_v58 = vpop.f32.mrb[124].mxu1 }
 0xb54   : > { %v18702_v45 = vpop.f32.mrb[105].mxu0  ;;  %v18724_v59 = vpop.f32.mrb[125].mxu1 }
 0xb55   : > { %v18703_v29 = vadd.f32 %v18702_v45, %v18701_v57  ;;  %v18725_v60 = vadd.f32 %v18724_v59, %v18723_v58  ;;  %v18704_v62 = vpop.f32.mrb[106].mxu0  ;;  %v18726_v0 = vpop.f32.mrb[126].mxu1  ;;  %v20752_v58 = vld [vmem:[#allocation8 + $0x40] sm:$0xff]  }
 0xb56   : > { %v18705_v1 = vpop.f32.mrb[107].mxu0  ;;  %v18727_v2 = vpop.f32.mrb[127].mxu1  ;;  %19708 = vmatpush3.bf16.xpose.msra.mxu0 %v20752_v58  ;;  %v17864_v0 = vld [vmem:[#allocation31] ss:$0 sm:$0xff] }
 0xb57   : > { %v6147_v3 = vadd.f32 %v18703_v29, %v17734_v54  ;;  %v20753_v54 = vld [vmem:[#allocation8 + $0x48] sm:$0xff]   ;;  %19719 = vmatprep.subr.bf16.mxu0 %v21949_v22 }
 0xb58   : > { %19714 = vmatpush3.bf16.xpose.msra.mxu1 %v20753_v54 }
 0xb59   : > { %v6187_v5 = vadd.f32 %v18725_v60, %v6147_v3  ;;  %19725 = vmatprep.subr.bf16.mxu1 %v21949_v22  ;;  %v20754_v3 = vld [vmem:[#allocation8 + $0x50] sm:$0xff]  }
 0xb73   : > { %v18745_v6 = vpop.f32.mrb[108].mxu0  ;;  %v18767_v19 = vpop.f32.mrb[128].mxu1 }
 0xb74   : > { %v18746_v8 = vpop.f32.mrb[109].mxu0  ;;  %v18768_v9 = vpop.f32.mrb[129].mxu1 }
 0xb75   : > { %v18747_v12 = vadd.f32 %v18746_v8, %v18745_v6  ;;  %v18769_v20 = vadd.f32 %v18768_v9, %v18767_v19  ;;  %v18748_v13 = vpop.f32.mrb[110].mxu0  ;;  %v18770_v23 = vpop.f32.mrb[130].mxu1  ;;  %v20756_v19 = vld [vmem:[#allocation8 + $0x60] sm:$0xff]   ;;  %v20757_v8 = vld [vmem:[#allocation8 + $0x68] sm:$0xff]   ;;  %v20758_v9 = vld [vmem:[#allocation8 + $0x70] sm:$0xff]  }
 0xb76   : > { %v18749_v24 = vpop.f32.mrb[111].mxu0  ;;  %v18771_v25 = vpop.f32.mrb[131].mxu1  ;;  %v20761_v13 = vld [vmem:[#allocation11 + $0x48] sm:$0xff]   ;;  %v20762_v23 = vld [vmem:[#allocation11 + $0x50] sm:$0xff]  }
 0xb77   : > { %v6227_v27 = vadd.f32 %v18747_v12, %v6187_v5  ;;  %v20755_v5 = vld [vmem:[#allocation8 + $0x58] sm:$0xff]   ;;  %v20763_v24 = vld [vmem:[#allocation11 + $0x58] sm:$0xff]  }
 0xb78   : > { %v20759_v12 = vld [vmem:[#allocation8 + $0x78] sm:$0xff]  }
 0xb79   : > { %v6267_v55 = vadd.f32 %v18769_v20, %v6227_v27  ;;  %v20760_v20 = vld [vmem:[#allocation11 + $0x40] sm:$0xff]   ;;  %v20765_v27 = vld [vmem:[#allocation11 + $0x68] sm:$0xff]  }
 0xb7a   : > { %v20764_v25 = vld [vmem:[#allocation11 + $0x60] sm:$0xff]  }
 0xb93   : > { %v18789_v30 = vpop.f32.mrb[112].mxu0  ;;  %v18811_v36 = vpop.f32.mrb[132].mxu1 }
 0xb94   : > { %v18790_v32 = vpop.f32.mrb[113].mxu0  ;;  %v18812_v33 = vpop.f32.mrb[133].mxu1 }
 0xb95   : > { %v18791_v34 = vadd.f32 %v18790_v32, %v18789_v30  ;;  %v18813_v31 = vadd.f32 %v18812_v33, %v18811_v36  ;;  %v18792_v35 = vpop.f32.mrb[114].mxu0  ;;  %v18814_v37 = vpop.f32.mrb[134].mxu1  ;;  %v20767_v30 = vld [vmem:[#allocation11 + $0x78] sm:$0xff]   ;;  %v20769_v32 = vld [vmem:[#allocation14 + $0x48] sm:$0xff]   ;;  %v20770_v33 = vld [vmem:[#allocation14 + $0x50] sm:$0xff]  }
 0xb96   : > { %v18793_v21 = vpop.f32.mrb[115].mxu0  ;;  %v18815_v16 = vpop.f32.mrb[135].mxu1  ;;  %v20768_v36 = vld [vmem:[#allocation14 + $0x40] sm:$0xff]   ;;  %v20773_v35 = vld [vmem:[#allocation14 + $0x68] sm:$0xff]   ;;  %v20774_v37 = vld [vmem:[#allocation14 + $0x70] sm:$0xff]  }
 0xb97   : > { %v6307_v38 = vadd.f32 %v18791_v34, %v6267_v55  ;;  %v20766_v55 = vld [vmem:[#allocation11 + $0x70] sm:$0xff]  }
 0xb98   : > { %v20771_v34 = vld [vmem:[#allocation14 + $0x58] sm:$0xff]  }
 0xb99   : > { %v6347_v39 = vadd.f32 %v18813_v31, %v6307_v38  ;;  %v20772_v31 = vld [vmem:[#allocation14 + $0x60] sm:$0xff]   ;;  %v20775_v21 = vld [vmem:[#allocation14 + $0x78] sm:$0xff]  }
 0xbb3   : > { %v18833_v40 = vpop.f32.mrb[116].mxu0  ;;  %v18855_v41 = vpop.f32.mrb[136].mxu1 }
 0xbb4   : > { %v18834_v42 = vpop.f32.mrb[117].mxu0  ;;  %v18856_v46 = vpop.f32.mrb[137].mxu1 }
 0xbb5   : > { %v18835_v26 = vadd.f32 %v18834_v42, %v18833_v40  ;;  %v18857_v11 = vadd.f32 %v18856_v46, %v18855_v41  ;;  %v18836_v47 = vpop.f32.mrb[118].mxu0  ;;  %v18858_v63 = vpop.f32.mrb[138].mxu1 }
 0xbb6   : > { %v18837_v48 = vpop.f32.mrb[119].mxu0  ;;  %v18859_v49 = vpop.f32.mrb[139].mxu1 }
 0xbb7   : > { %v6387_v44 = vadd.f32 %v18835_v26, %v6347_v39 }
 0xbb9   : > { %v6427_v50 = vadd.f32 %v18857_v11, %v6387_v44 }
 0xbbb   : > { %v6432_v51 = vadd.f32 %v6427_v50, %v23012_v43  ;;  %v17863_v43 = vld [vmem:[#allocation29] ss:$0 sm:$0xff] }
 0xbbd   : > { %6435 = vadd.xlane.f32.xlu0 %v6432_v51 }
 0xc4a   : > { %v6436_v52 = vpop.xlane.xlu0 %6435 }
 0xc4b   : > { %v6437_v53 = vmul.f32 0.0078125, %v6436_v52 }
 0xc4d   : > { %v6438_v56 = vsub.f32 %v6432_v51, %v6437_v53 }
 0xc4f   : > { %v6439_v57 = vmul.f32 %v6438_v56, %v6438_v56 }
 0xc51   : > { %6440 = vadd.xlane.f32.xlu1 %v6439_v57 }
 0xcde   : > { %v6441_v45 = vpop.xlane.xlu1 %6440 }
 0xcdf   : > { %v6442_v59 = vmul.f32 0.0078125, %v6441_v45 }
 0xce1   : > { %v6443_v29 = vadd.f32 1e-05, %v6442_v59 }
 0xce3   : > { %21118 = vrsqrt.f32 %v6443_v29 }
 0xced   : > { %v21119_v60 = vpop.eup %21118 }
 0xcee   : > { %v6445_v62 = vmul.f32 %v21119_v60, %v6438_v56 }
 0xcf0   : > { %v6452_v1 = vmul.f32 %v17863_v43, %v6445_v62 }
 0xcf2   : > { %v23103_v2 = vadd.f32 %v17864_v0, %v6452_v1 }
 0xcf4   : > { %v23107_v6 = vpack.c.bf16 %v23103_v2, %v23103_v2 }
 0xcf6   : > { %19710 = vmatmul.mubr.bf16.vlgmr.msra.gmra.mrb[120].mxu0 %v23107_v6  ;;  %19716 = vmatmul.mubr.bf16.vlgmr.msra.gmra.mrb[140].mxu1 %v23107_v6 }
 0xcf7   : > { %19720 = vmatpush3.bf16.xpose.msra.mxu0 %v20754_v3  ;;  %19726 = vmatpush3.bf16.xpose.msra.mxu1 %v20755_v5 }
 0xcf8   : > { %19721 = vmatprep.mubr.msk.bf16.mxu0 %vm21950_vm0, %v21949_v22  ;;  %19727 = vmatprep.mubr.msk.bf16.mxu1 %vm21950_vm0, %v21949_v22 }
 0xcf9   : > { %19731 = vmatprep.subr.bf16.mxu0 %v21949_v22  ;;  %19737 = vmatprep.subr.bf16.mxu1 %v21949_v22 }
 0xcfe   : > { %19722 = vmatmul.mubr.bf16.vlgmr.msra.gmra.mrb[124].mxu0 %v23107_v6  ;;  %19728 = vmatmul.mubr.bf16.vlgmr.msra.gmra.mrb[144].mxu1 %v23107_v6 }
 0xcff   : > { %19732 = vmatpush3.bf16.xpose.msra.mxu0 %v20756_v19  ;;  %19738 = vmatpush3.bf16.xpose.msra.mxu1 %v20757_v8  ;;  %v17882_v19 = vld [vmem:[#allocation13 + $0x9] ss:$0 sm:$0xff] }
 0xd00   : > { %19733 = vmatprep.mubr.msk.bf16.mxu0 %vm21950_vm0, %v21949_v22  ;;  %19739 = vmatprep.mubr.msk.bf16.mxu1 %vm21950_vm0, %v21949_v22 }
 0xd01   : > { %19743 = vmatprep.subr.bf16.mxu0 %v21949_v22  ;;  %19749 = vmatprep.subr.bf16.mxu1 %v21949_v22 }
 0xd06   : > { %19734 = vmatmul.mubr.bf16.vlgmr.msra.gmra.mrb[128].mxu0 %v23107_v6  ;;  %19740 = vmatmul.mubr.bf16.vlgmr.msra.gmra.mrb[148].mxu1 %v23107_v6 }
 0xd07   : > { %19744 = vmatpush3.bf16.xpose.msra.mxu0 %v20758_v9  ;;  %19750 = vmatpush3.bf16.xpose.msra.mxu1 %v20759_v12 }
 0xd08   : > { %19745 = vmatprep.mubr.msk.bf16.mxu0 %vm21950_vm0, %v21949_v22  ;;  %19751 = vmatprep.mubr.msk.bf16.mxu1 %vm21950_vm0, %v21949_v22 }
 0xd09   : > { %19755 = vmatprep.subr.bf16.mxu0 %v21949_v22  ;;  %19761 = vmatprep.subr.bf16.mxu1 %v21949_v22 }
 0xd0e   : > { %19746 = vmatmul.mubr.bf16.vlgmr.msra.gmra.mrb[132].mxu0 %v23107_v6  ;;  %19752 = vmatmul.mubr.bf16.vlgmr.msra.gmra.mrb[152].mxu1 %v23107_v6 }
 0xd0f   : > { %19756 = vmatpush3.bf16.xpose.msra.mxu0 %v20760_v20  ;;  %19762 = vmatpush3.bf16.xpose.msra.mxu1 %v20761_v13 }
 0xd10   : > { %19757 = vmatprep.mubr.msk.bf16.mxu0 %vm21950_vm0, %v21949_v22  ;;  %19763 = vmatprep.mubr.msk.bf16.mxu1 %vm21950_vm0, %v21949_v22 }
 0xd11   : > { %19767 = vmatprep.subr.bf16.mxu0 %v21949_v22  ;;  %19773 = vmatprep.subr.bf16.mxu1 %v21949_v22 }
 0xd16   : > { %19758 = vmatmul.mubr.bf16.vlgmr.msra.gmra.mrb[136].mxu0 %v23107_v6  ;;  %19764 = vmatmul.mubr.bf16.vlgmr.msra.gmra.mrb[156].mxu1 %v23107_v6 }
 0xd17   : > { %19768 = vmatpush3.bf16.xpose.msra.mxu0 %v20762_v23  ;;  %19774 = vmatpush3.bf16.xpose.msra.mxu1 %v20763_v24 }
 0xd18   : > { %19769 = vmatprep.mubr.msk.bf16.mxu0 %vm21950_vm0, %v21949_v22  ;;  %19775 = vmatprep.mubr.msk.bf16.mxu1 %vm21950_vm0, %v21949_v22 }
 0xd19   : > { %19779 = vmatprep.subr.bf16.mxu0 %v21949_v22  ;;  %19785 = vmatprep.subr.bf16.mxu1 %v21949_v22 }
 0xd1e   : > { %19770 = vmatmul.mubr.bf16.vlgmr.msra.gmra.mrb[140].mxu0 %v23107_v6  ;;  %19776 = vmatmul.mubr.bf16.vlgmr.msra.gmra.mrb[160].mxu1 %v23107_v6 }
 0xd1f   : > { %19780 = vmatpush3.bf16.xpose.msra.mxu0 %v20764_v25  ;;  %19786 = vmatpush3.bf16.xpose.msra.mxu1 %v20765_v27 }
 0xd20   : > { %19781 = vmatprep.mubr.msk.bf16.mxu0 %vm21950_vm0, %v21949_v22  ;;  %19787 = vmatprep.mubr.msk.bf16.mxu1 %vm21950_vm0, %v21949_v22 }
 0xd21   : > { %19791 = vmatprep.subr.bf16.mxu0 %v21949_v22  ;;  %19797 = vmatprep.subr.bf16.mxu1 %v21949_v22 }
 0xd26   : > { %19782 = vmatmul.mubr.bf16.vlgmr.msra.gmra.mrb[144].mxu0 %v23107_v6  ;;  %19788 = vmatmul.mubr.bf16.vlgmr.msra.gmra.mrb[164].mxu1 %v23107_v6 }
 0xd27   : > { %19792 = vmatpush3.bf16.xpose.msra.mxu0 %v20766_v55  ;;  %19798 = vmatpush3.bf16.xpose.msra.mxu1 %v20767_v30 }
 0xd28   : > { %19793 = vmatprep.mubr.msk.bf16.mxu0 %vm21950_vm0, %v21949_v22  ;;  %19799 = vmatprep.mubr.msk.bf16.mxu1 %vm21950_vm0, %v21949_v22 }
 0xd29   : > { %19803 = vmatprep.subr.bf16.mxu0 %v21949_v22  ;;  %19809 = vmatprep.subr.bf16.mxu1 %v21949_v22 }
 0xd2e   : > { %19794 = vmatmul.mubr.bf16.vlgmr.msra.gmra.mrb[148].mxu0 %v23107_v6  ;;  %19800 = vmatmul.mubr.bf16.vlgmr.msra.gmra.mrb[168].mxu1 %v23107_v6 }
 0xd2f   : > { %19804 = vmatpush3.bf16.xpose.msra.mxu0 %v20768_v36  ;;  %19810 = vmatpush3.bf16.xpose.msra.mxu1 %v20769_v32  ;;  %v17865_v32 = vld [vmem:[#allocation10 + $0x8] ss:$0 sm:$0xff] }
 0xd30   : > { %19805 = vmatprep.mubr.msk.bf16.mxu0 %vm21950_vm0, %v21949_v22  ;;  %19811 = vmatprep.mubr.msk.bf16.mxu1 %vm21950_vm0, %v21949_v22 }
 0xd31   : > { %19815 = vmatprep.subr.bf16.mxu0 %v21949_v22  ;;  %19821 = vmatprep.subr.bf16.mxu1 %v21949_v22 }
 0xd36   : > { %19806 = vmatmul.mubr.bf16.vlgmr.msra.gmra.mrb[152].mxu0 %v23107_v6  ;;  %19812 = vmatmul.mubr.bf16.vlgmr.msra.gmra.mrb[172].mxu1 %v23107_v6 }
 0xd37   : > { %19816 = vmatpush3.bf16.xpose.msra.mxu0 %v20770_v33  ;;  %19822 = vmatpush3.bf16.xpose.msra.mxu1 %v20771_v34  ;;  %v17866_v33 = vld [vmem:[#allocation10 + $0x9] ss:$0 sm:$0xff] }
 0xd38   : > { %19817 = vmatprep.mubr.msk.bf16.mxu0 %vm21950_vm0, %v21949_v22  ;;  %19823 = vmatprep.mubr.msk.bf16.mxu1 %vm21950_vm0, %v21949_v22 }
 0xd39   : > { %19827 = vmatprep.subr.bf16.mxu0 %v21949_v22  ;;  %19833 = vmatprep.subr.bf16.mxu1 %v21949_v22 }
 0xd3e   : > { %19818 = vmatmul.mubr.bf16.vlgmr.msra.gmra.mrb[156].mxu0 %v23107_v6  ;;  %19824 = vmatmul.mubr.bf16.vlgmr.msra.gmra.mrb[176].mxu1 %v23107_v6 }
 0xd3f   : > { %19828 = vmatpush3.bf16.xpose.msra.mxu0 %v20772_v31  ;;  %19834 = vmatpush3.bf16.xpose.msra.mxu1 %v20773_v35  ;;  %v17883_v35 = vld [vmem:[#allocation13 + $0xa] ss:$0 sm:$0xff] }
 0xd40   : > { %19829 = vmatprep.mubr.msk.bf16.mxu0 %vm21950_vm0, %v21949_v22  ;;  %19835 = vmatprep.mubr.msk.bf16.mxu1 %vm21950_vm0, %v21949_v22 }
 0xd41   : > { %19839 = vmatprep.subr.bf16.mxu0 %v21949_v22  ;;  %19845 = vmatprep.subr.bf16.mxu1 %v21949_v22 }
 0xd46   : > { %19830 = vmatmul.mubr.bf16.vlgmr.msra.gmra.mrb[160].mxu0 %v23107_v6  ;;  %19836 = vmatmul.mubr.bf16.vlgmr.msra.gmra.mrb[180].mxu1 %v23107_v6 }
 0xd47   : > { %19840 = vmatpush3.bf16.xpose.msra.mxu0 %v20774_v37  ;;  %19846 = vmatpush3.bf16.xpose.msra.mxu1 %v20775_v21  ;;  %v17884_v37 = vld [vmem:[#allocation13 + $0xb] ss:$0 sm:$0xff] }
 0xd48   : > { %19841 = vmatprep.mubr.msk.bf16.mxu0 %vm21950_vm0, %v21949_v22  ;;  %19847 = vmatprep.mubr.msk.bf16.mxu1 %vm21950_vm0, %v21949_v22 }
 0xd49   : > { %19851 = vmatprep.subr.bf16.mxu0 %v21949_v22  ;;  %19857 = vmatprep.subr.bf16.mxu1 %v21949_v22 }
 0xd4e   : > { %19842 = vmatmul.mubr.bf16.vlgmr.msra.gmra.mrb[164].mxu0 %v23107_v6  ;;  %19848 = vmatmul.mubr.bf16.vlgmr.msra.gmra.mrb[184].mxu1 %v23107_v6  ;;  %v17881_v6 = vld [vmem:[#allocation13 + $0x8] ss:$0 sm:$0xff] }
 0xd4f   : > { %19853 = vmatprep.mubr.msk.bf16.mxu0 %vm21950_vm0, %v21949_v22  ;;  %19859 = vmatprep.mubr.msk.bf16.mxu1 %vm21950_vm0, %v21949_v22 }
 0xdc9   : > { %v6575_v16 = vpop.f32.mrb[120].mxu0  ;;  %v6621_v38 = vpop.f32.mrb[140].mxu1 }
 0xdca   : > { %v19711_v39 = vpop.f32.mrb[121].mxu0  ;;  %v19717_v40 = vpop.f32.mrb[141].mxu1  ;;  %v6576_v21 = vadd.f32 %v17865_v32, %v6575_v16  ;;  %v17867_v16 = vld [vmem:[#allocation10 + $0xa] ss:$0 sm:$0xff]  ;;  %v17888_v32 = vld [vmem:[#allocation13 + $0xf] ss:$0 sm:$0xff] }
 0xdcb   : > { %v6578_v41 = vpop.f32.mrb[122].mxu0  ;;  %v6624_v42 = vpop.f32.mrb[142].mxu1  ;;  %v6622_v39 = vadd.f32 %v17866_v33, %v6621_v38  ;;  %v17868_v38 = vld [vmem:[#allocation10 + $0xb] ss:$0 sm:$0xff] }
 0xdcc   : > { %v19712_v46 = vpop.f32.mrb[123].mxu0  ;;  %v19718_v26 = vpop.f32.mrb[143].mxu1 }
 0xdd1   : > { %v23203_v11 = vpop.f32.mrb[124].mxu0  ;;  %v23205_v47 = vpop.f32.mrb[144].mxu1 }
 0xdd2   : > { %v19723_v63 = vpop.f32.mrb[125].mxu0  ;;  %v19729_v48 = vpop.f32.mrb[145].mxu1 }
 0xdd3   : > { %v6670_v49 = vpop.f32.mrb[126].mxu0  ;;  %v6716_v44 = vpop.f32.mrb[146].mxu1 }
 0xdd4   : > { %v19724_v50 = vpop.f32.mrb[127].mxu0  ;;  %v19730_v51 = vpop.f32.mrb[147].mxu1  ;;  %v7787_v44 = vpack.c.bf16 %v6576_v21, %v6576_v21 }
 0xdd5   : > { %v7788_v50 = vpack.c.bf16 %v6622_v39, %v6622_v39 }
 0xdd9   : > { %v23207_v52 = vpop.f32.mrb[128].mxu0  ;;  %v23209_v53 = vpop.f32.mrb[148].mxu1 }
 0xdda   : > { %v19735_v56 = vpop.f32.mrb[129].mxu0  ;;  %v19741_v57 = vpop.f32.mrb[149].mxu1 }
 0xddb   : > { %v6762_v58 = vpop.f32.mrb[130].mxu0  ;;  %v6808_v54 = vpop.f32.mrb[150].mxu1 }
 0xddc   : > { %v19736_v45 = vpop.f32.mrb[131].mxu0  ;;  %v19742_v59 = vpop.f32.mrb[151].mxu1 }
 0xddd   : > { %v17885_v59 = vld [vmem:[#allocation13 + $0xc] ss:$0 sm:$0xff] }
 0xde1   : > { %v23211_v29 = vpop.f32.mrb[132].mxu0  ;;  %v23213_v60 = vpop.f32.mrb[152].mxu1 }
 0xde2   : > { %v19747_v43 = vpop.f32.mrb[133].mxu0  ;;  %v19753_v62 = vpop.f32.mrb[153].mxu1 }
 0xde3   : > { %v6854_v0 = vpop.f32.mrb[134].mxu0  ;;  %v6900_v1 = vpop.f32.mrb[154].mxu1  ;;  %v17886_v43 = vld [vmem:[#allocation13 + $0xd] ss:$0 sm:$0xff]  ;;  %v6668_v62 = vadd.f32 %v17867_v16, %v23203_v11 }
 0xde4   : > { %v19748_v3 = vpop.f32.mrb[135].mxu0  ;;  %v19754_v5 = vpop.f32.mrb[155].mxu1  ;;  %v6714_v0 = vadd.f32 %v17868_v38, %v23205_v47 }
 0xde6   : > { %v7790_v47 = vpack.c.bf16 %v6714_v0, %v6714_v0 }
 0xde9   : > { %v7017_v8 = vpop.f32.mrb[136].mxu0  ;;  %v7063_v9 = vpop.f32.mrb[156].mxu1 }
 0xdea   : > { %v7018_v12 = vadd.f32 %v17881_v6, %v7017_v8  ;;  %v7064_v20 = vadd.f32 %v17882_v19, %v7063_v9  ;;  %v19759_v13 = vpop.f32.mrb[137].mxu0  ;;  %v19765_v23 = vpop.f32.mrb[157].mxu1 }
 0xdeb   : > { %v7020_v24 = vpop.f32.mrb[138].mxu0  ;;  %v7066_v25 = vpop.f32.mrb[158].mxu1 }
 0xdec   : > { %v7795_v27 = vpack.c.bf16 %v7018_v12, %v7018_v12  ;;  %v7796_v55 = vpack.c.bf16 %v7064_v20, %v7064_v20  ;;  %v19760_v30 = vpop.f32.mrb[139].mxu0  ;;  %v19766_v36 = vpop.f32.mrb[159].mxu1  ;;  %v7789_v12 = vpack.c.bf16 %v6668_v62, %v6668_v62  ;;  %v17869_v25 = vld [vmem:[#allocation10 + $0xc] ss:$0 sm:$0xff] }
 0xded   : > { %v17887_v36 = vld [vmem:[#allocation13 + $0xe] ss:$0 sm:$0xff]  ;;  %v6760_v33 = vadd.f32 %v17869_v25, %v23207_v52 }
 0xdee   : > { %v7807_v34 = vsel %vm2565_vm1, %v7795_v27, 0  ;;  %v7853_v31 = vsel %vm2565_vm1, %v7796_v55, 0  ;;  %v17870_v27 = vld [vmem:[#allocation10 + $0xd] ss:$0 sm:$0xff] }
 0xdef   : > { %19852 = vmatpush3.bf16.xpose.msra.mxu0 %v7807_v34  ;;  %19858 = vmatpush3.bf16.xpose.msra.mxu1 %v7853_v31  ;;  %v6806_v34 = vadd.f32 %v17870_v27, %v23209_v53 }
 0xdf0   : > { %19863 = vmatprep.subr.bf16.mxu0 %v21949_v22  ;;  %19869 = vmatprep.subr.bf16.mxu1 %v21949_v22 }
 0xdf1   : > { %v7109_v40 = vpop.f32.mrb[140].mxu0  ;;  %v7155_v41 = vpop.f32.mrb[160].mxu1  ;;  %v7792_v53 = vpack.c.bf16 %v6806_v34, %v6806_v34 }
 0xdf2   : > { %v7110_v42 = vadd.f32 %v17883_v35, %v7109_v40  ;;  %v7156_v46 = vadd.f32 %v17884_v37, %v7155_v41  ;;  %v19771_v26 = vpop.f32.mrb[141].mxu0  ;;  %v19777_v63 = vpop.f32.mrb[161].mxu1 }
 0xdf3   : > { %v7112_v48 = vpop.f32.mrb[142].mxu0  ;;  %v7158_v49 = vpop.f32.mrb[162].mxu1 }
 0xdf4   : > { %v7797_v51 = vpack.c.bf16 %v7110_v42, %v7110_v42  ;;  %v7798_v56 = vpack.c.bf16 %v7156_v46, %v7156_v46  ;;  %v19772_v57 = vpop.f32.mrb[143].mxu0  ;;  %v19778_v58 = vpop.f32.mrb[163].mxu1  ;;  %v7791_v42 = vpack.c.bf16 %v6760_v33, %v6760_v33  ;;  %v17871_v49 = vld [vmem:[#allocation10 + $0xe] ss:$0 sm:$0xff] }
 0xdf5   : > { %v17898_v57 = vld [vmem:[#allocation16 + $0x9] ss:$0 sm:$0xff]  ;;  %v6852_v58 = vadd.f32 %v17871_v49, %v23211_v29 }
 0xdf6   : > { %v7899_v54 = vsel %vm2565_vm1, %v7797_v51, 0  ;;  %v7945_v45 = vsel %vm2565_vm1, %v7798_v56, 0  ;;  %19854 = vmatmul.mubr.msk.bf16.vlgmr.msra.gmra.mrb[168].mxu0 %vm2565_vm1, %v7787_v44  ;;  %19860 = vmatmul.mubr.msk.bf16.vlgmr.msra.gmra.mrb[188].mxu1 %vm2565_vm1, %v7788_v50  ;;  %v17872_v44 = vld [vmem:[#allocation10 + $0xf] ss:$0 sm:$0xff]  ;;  %v17897_v56 = vld [vmem:[#allocation16 + $0x8] ss:$0 sm:$0xff] }
 0xdf7   : > { %19864 = vmatpush3.bf16.xpose.msra.mxu0 %v7899_v54  ;;  %19870 = vmatpush3.bf16.xpose.msra.mxu1 %v7945_v45  ;;  %v6898_v16 = vadd.f32 %v17872_v44, %v23213_v60 }
 0xdf8   : > { %19865 = vmatprep.mubr.msk.bf16.mxu0 %vm21950_vm0, %v21949_v22  ;;  %19871 = vmatprep.mubr.msk.bf16.mxu1 %vm21950_vm0, %v21949_v22 }
 0xdf9   : > { %v7201_v1 = vpop.f32.mrb[144].mxu0  ;;  %v7247_v3 = vpop.f32.mrb[164].mxu1  ;;  %19875 = vmatprep.subr.bf16.mxu0 %v21949_v22  ;;  %19881 = vmatprep.subr.bf16.mxu1 %v21949_v22  ;;  %v7794_v60 = vpack.c.bf16 %v6898_v16, %v6898_v16 }
 0xdfa   : > { %v7202_v5 = vadd.f32 %v17885_v59, %v7201_v1  ;;  %v7248_v6 = vadd.f32 %v17886_v43, %v7247_v3  ;;  %v19783_v19 = vpop.f32.mrb[145].mxu0  ;;  %v19789_v8 = vpop.f32.mrb[165].mxu1  ;;  %v7793_v1 = vpack.c.bf16 %v6852_v58, %v6852_v58 }
 0xdfb   : > { %v7204_v9 = vpop.f32.mrb[146].mxu0  ;;  %v7250_v11 = vpop.f32.mrb[166].mxu1 }
 0xdfc   : > { %v7799_v20 = vpack.c.bf16 %v7202_v5, %v7202_v5  ;;  %v7800_v13 = vpack.c.bf16 %v7248_v6, %v7248_v6  ;;  %v19784_v23 = vpop.f32.mrb[147].mxu0  ;;  %v19790_v24 = vpop.f32.mrb[167].mxu1 }
 0xdfe   : > { %v7991_v55 = vsel %vm2565_vm1, %v7799_v20, 0  ;;  %v8037_v30 = vsel %vm2565_vm1, %v7800_v13, 0  ;;  %19866 = vmatmul.mubr.msk.bf16.vlgmr.msra.gmra.mrb[172].mxu0 %vm2565_vm1, %v7789_v12  ;;  %19872 = vmatmul.mubr.msk.bf16.vlgmr.msra.gmra.mrb[192].mxu1 %vm2565_vm1, %v7790_v47 }
 0xdff   : > { %19876 = vmatpush3.bf16.xpose.msra.mxu0 %v7991_v55  ;;  %19882 = vmatpush3.bf16.xpose.msra.mxu1 %v8037_v30 }
 0xe00   : > { %19877 = vmatprep.mubr.msk.bf16.mxu0 %vm21950_vm0, %v21949_v22  ;;  %19883 = vmatprep.mubr.msk.bf16.mxu1 %vm21950_vm0, %v21949_v22 }
 0xe01   : > { %v7293_v31 = vpop.f32.mrb[148].mxu0  ;;  %v7339_v35 = vpop.f32.mrb[168].mxu1  ;;  %19887 = vmatprep.subr.bf16.mxu0 %v21949_v22  ;;  %19893 = vmatprep.subr.bf16.mxu1 %v21949_v22 }
 0xe02   : > { %v7294_v37 = vadd.f32 %v17887_v36, %v7293_v31  ;;  %v7340_v21 = vadd.f32 %v17888_v32, %v7339_v35  ;;  %v19795_v39 = vpop.f32.mrb[149].mxu0  ;;  %v19801_v40 = vpop.f32.mrb[169].mxu1 }
 0xe03   : > { %v7296_v41 = vpop.f32.mrb[150].mxu0  ;;  %v7342_v52 = vpop.f32.mrb[170].mxu1 }
 0xe04   : > { %v7801_v46 = vpack.c.bf16 %v7294_v37, %v7294_v37  ;;  %v7802_v26 = vpack.c.bf16 %v7340_v21, %v7340_v21  ;;  %v19796_v63 = vpop.f32.mrb[151].mxu0  ;;  %v19802_v48 = vpop.f32.mrb[171].mxu1 }
 0xe06   : > { %v8083_v50 = vsel %vm2565_vm1, %v7801_v46, 0  ;;  %v8129_v51 = vsel %vm2565_vm1, %v7802_v26, 0  ;;  %19878 = vmatmul.mubr.msk.bf16.vlgmr.msra.gmra.mrb[176].mxu0 %vm2565_vm1, %v7791_v42  ;;  %19884 = vmatmul.mubr.msk.bf16.vlgmr.msra.gmra.mrb[196].mxu1 %vm2565_vm1, %v7792_v53 }
 0xe07   : > { %19888 = vmatpush3.bf16.xpose.msra.mxu0 %v8083_v50  ;;  %19894 = vmatpush3.bf16.xpose.msra.mxu1 %v8129_v51 }
 0xe08   : > { %19889 = vmatprep.mubr.msk.bf16.mxu0 %vm21950_vm0, %v21949_v22  ;;  %19895 = vmatprep.mubr.msk.bf16.mxu1 %vm21950_vm0, %v21949_v22 }
 0xe09   : > { %v7459_v38 = vpop.f32.mrb[152].mxu0  ;;  %v7505_v54 = vpop.f32.mrb[172].mxu1  ;;  %19899 = vmatprep.subr.bf16.mxu0 %v21949_v22  ;;  %19905 = vmatprep.subr.bf16.mxu1 %v21949_v22 }
 0xe0a   : > { %v7460_v45 = vadd.f32 %v17897_v56, %v7459_v38  ;;  %v7506_v59 = vadd.f32 %v17898_v57, %v7505_v54  ;;  %v19807_v43 = vpop.f32.mrb[153].mxu0  ;;  %v19813_v62 = vpop.f32.mrb[173].mxu1 }
 0xe0b   : > { %v7462_v0 = vpop.f32.mrb[154].mxu0  ;;  %v7508_v29 = vpop.f32.mrb[174].mxu1 }
 0xe0c   : > { %v8267_v3 = vpack.c.bf16 %v7460_v45, %v7460_v45  ;;  %v8268_v5 = vpack.c.bf16 %v7506_v59, %v7506_v59  ;;  %v19808_v6 = vpop.f32.mrb[155].mxu0  ;;  %v19814_v19 = vpop.f32.mrb[175].mxu1 }
 0xe0e   : > { %v8279_v8 = vsel %vm3042_vm2, %v8267_v3, 0  ;;  %v8325_v9 = vsel %vm3042_vm2, %v8268_v5, 0  ;;  %19890 = vmatmul.mubr.msk.bf16.vlgmr.msra.gmra.mrb[180].mxu0 %vm2565_vm1, %v7793_v1  ;;  %19896 = vmatmul.mubr.msk.bf16.vlgmr.msra.gmra.mrb[200].mxu1 %vm2565_vm1, %v7794_v60 }
 0xe0f   : > { %19900 = vmatpush3.bf16.msra.mxu0 %v8279_v8  ;;  %19906 = vmatpush3.bf16.msra.mxu1 %v8325_v9 }
 0xe10   : > { %19901 = vmatprep.mubr.msk.bf16.mxu0 %vm21950_vm0, %v21949_v22  ;;  %19907 = vmatprep.mubr.msk.bf16.mxu1 %vm21950_vm0, %v21949_v22 }
 0xe11   : > { %v23263_v11 = vpop.f32.mrb[156].mxu0  ;;  %v23265_v12 = vpop.f32.mrb[176].mxu1  ;;  %19911 = vmatprep.subr.bf16.mxu0 %v21949_v22  ;;  %19917 = vmatprep.subr.bf16.mxu1 %v21949_v22 }
 0xe12   : > { %v19819_v47 = vpop.f32.mrb[157].mxu0  ;;  %v19825_v20 = vpop.f32.mrb[177].mxu1 }
 0xe13   : > { %v7554_v13 = vpop.f32.mrb[158].mxu0  ;;  %v7600_v23 = vpop.f32.mrb[178].mxu1 }
 0xe14   : > { %v19820_v24 = vpop.f32.mrb[159].mxu0  ;;  %v19826_v25 = vpop.f32.mrb[179].mxu1 }
 0xe19   : > { %v23269_v27 = vpop.f32.mrb[160].mxu0  ;;  %v23271_v55 = vpop.f32.mrb[180].mxu1 }
 0xe1a   : > { %v19831_v30 = vpop.f32.mrb[161].mxu0  ;;  %v19837_v36 = vpop.f32.mrb[181].mxu1 }
 0xe1b   : > { %v7646_v32 = vpop.f32.mrb[162].mxu0  ;;  %v7692_v33 = vpop.f32.mrb[182].mxu1 }
 0xe1c   : > { %v19832_v34 = vpop.f32.mrb[163].mxu0  ;;  %v19838_v31 = vpop.f32.mrb[183].mxu1 }
 0xe21   : > { %v23273_v35 = vpop.f32.mrb[164].mxu0  ;;  %v23275_v37 = vpop.f32.mrb[184].mxu1 }
 0xe22   : > { %v19843_v21 = vpop.f32.mrb[165].mxu0  ;;  %v19849_v39 = vpop.f32.mrb[185].mxu1 }
 0xe23   : > { %v7738_v40 = vpop.f32.mrb[166].mxu0  ;;  %v7784_v41 = vpop.f32.mrb[186].mxu1 }
 0xe24   : > { %v19844_v52 = vpop.f32.mrb[167].mxu0  ;;  %v19850_v42 = vpop.f32.mrb[187].mxu1 }
 0xec9   : > { %v7843_v53 = vpop.f32.mrb[168].mxu0  ;;  %v7889_v46 = vpop.f32.mrb[188].mxu1 }
 0xeca   : > { %v19855_v26 = vpop.f32.mrb[169].mxu0  ;;  %v19861_v63 = vpop.f32.mrb[189].mxu1  ;;  %v8174_v48 = vsel %vm2934_vm3, %v7889_v46, -inf  ;;  %v8171_v49 = vsel %vm2934_vm3, %v7843_v53, -inf }
 0xecb   : > { %8175 = vmax.xlane.f32.xlu1 %v8174_v48  ;;  %v7892_v44 = vpop.f32.mrb[190].mxu1  ;;  %8172 = vmax.xlane.f32.xlu0 %v8171_v49  ;;  %v7846_v50 = vpop.f32.mrb[170].mxu0 }
 0xecc   : > { %v19856_v51 = vpop.f32.mrb[171].mxu0  ;;  %v19862_v56 = vpop.f32.mrb[191].mxu1 }
 0xed1   : > { %v7935_v57 = vpop.f32.mrb[172].mxu0  ;;  %v7981_v58 = vpop.f32.mrb[192].mxu1 }
 0xed2   : > { %v19867_v16 = vpop.f32.mrb[173].mxu0  ;;  %v19873_v38 = vpop.f32.mrb[193].mxu1  ;;  %v8180_v54 = vsel %vm2934_vm3, %v7981_v58, -inf  ;;  %v8177_v45 = vsel %vm2934_vm3, %v7935_v57, -inf }
 0xed3   : > { %8181 = vmax.xlane.f32.xlu1 %v8180_v54  ;;  %v7984_v59 = vpop.f32.mrb[194].mxu1  ;;  %8178 = vmax.xlane.f32.xlu0 %v8177_v45  ;;  %v7938_v43 = vpop.f32.mrb[174].mxu0 }
 0xed4   : > { %v19868_v62 = vpop.f32.mrb[175].mxu0  ;;  %v19874_v0 = vpop.f32.mrb[195].mxu1 }
 0xed9   : > { %v8027_v29 = vpop.f32.mrb[176].mxu0  ;;  %v8073_v1 = vpop.f32.mrb[196].mxu1 }
 0xeda   : > { %v19879_v60 = vpop.f32.mrb[177].mxu0  ;;  %v19885_v3 = vpop.f32.mrb[197].mxu1  ;;  %v8186_v5 = vsel %vm2934_vm3, %v8073_v1, -inf  ;;  %v8183_v6 = vsel %vm2934_vm3, %v8027_v29, -inf }
 0xedb   : > { %8187 = vmax.xlane.f32.xlu1 %v8186_v5  ;;  %v8076_v19 = vpop.f32.mrb[198].mxu1  ;;  %8184 = vmax.xlane.f32.xlu0 %v8183_v6  ;;  %v8030_v8 = vpop.f32.mrb[178].mxu0 }
 0xedc   : > { %v19880_v9 = vpop.f32.mrb[179].mxu0  ;;  %v19886_v47 = vpop.f32.mrb[199].mxu1 }
 0xee1   : > { %v8119_v20 = vpop.f32.mrb[180].mxu0  ;;  %v8165_v13 = vpop.f32.mrb[200].mxu1 }
 0xee2   : > { %v19891_v23 = vpop.f32.mrb[181].mxu0  ;;  %v19897_v24 = vpop.f32.mrb[201].mxu1  ;;  %v8192_v25 = vsel %vm2934_vm3, %v8165_v13, -inf  ;;  %v8189_v30 = vsel %vm2934_vm3, %v8119_v20, -inf }
 0xee3   : > { %8193 = vmax.xlane.f32.xlu1 %v8192_v25  ;;  %v8168_v36 = vpop.f32.mrb[202].mxu1  ;;  %8190 = vmax.xlane.f32.xlu0 %v8189_v30  ;;  %v8122_v32 = vpop.f32.mrb[182].mxu0  ;;  %v17900_v30 = vld [vmem:[#allocation16 + $0xb] ss:$0 sm:$0xff] }
 0xee4   : > { %v19892_v33 = vpop.f32.mrb[183].mxu0  ;;  %v19898_v34 = vpop.f32.mrb[203].mxu1  ;;  %v17899_v36 = vld [vmem:[#allocation16 + $0xa] ss:$0 sm:$0xff]  ;;  %v7598_v32 = vadd.f32 %v17900_v30, %v23265_v12 }
 0xee5   : > { %v7552_v34 = vadd.f32 %v17899_v36, %v23263_v11  ;;  %v20777_v36 = vld [vmem:[#allocation17 + $0x48] sm:$0xff]  }
 0xf58   : > { %v8176_v31 = vpop.xlane.xlu1 %8175  ;;  %v8173_v21 = vpop.xlane.xlu0 %8172 }
 0xf59   : > { %v8196_v39 = vsub.f32 %v7889_v46, %v8176_v31  ;;  %v8195_v40 = vsub.f32 %v7843_v53, %v8173_v21 }
 0xf5b   : > { %v8205_v41 = vmul.f32 1.442695, %v8196_v39  ;;  %v8203_v52 = vmul.f32 1.442695, %v8195_v40  ;;  %v8270_v40 = vpack.c.bf16 %v7598_v32, %v7598_v32 }
 0xf5d   : > { %21120 = vpow2.f32 %v8205_v41 }
 0xf5e   : > { %21122 = vpow2.f32 %v8203_v52  ;;  %v8269_v52 = vpack.c.bf16 %v7552_v34, %v7552_v34 }
 0xf60   : > { %v8182_v42 = vpop.xlane.xlu1 %8181  ;;  %v8179_v26 = vpop.xlane.xlu0 %8178 }
 0xf61   : > { %v8198_v63 = vsub.f32 %v7981_v58, %v8182_v42  ;;  %v8197_v48 = vsub.f32 %v7935_v57, %v8179_v26  ;;  %v17902_v42 = vld [vmem:[#allocation16 + $0xd] ss:$0 sm:$0xff] }
 0xf62   : > { %v7690_v12 = vadd.f32 %v17902_v42, %v23271_v55 }
 0xf63   : > { %v8209_v49 = vmul.f32 1.442695, %v8198_v63  ;;  %v8207_v44 = vmul.f32 1.442695, %v8197_v48  ;;  %v17901_v63 = vld [vmem:[#allocation16 + $0xc] ss:$0 sm:$0xff] }
 0xf65   : > { %21124 = vpow2.f32 %v8209_v49 }
 0xf66   : > { %21126 = vpow2.f32 %v8207_v44  ;;  %v8417_v44 = vsel %vm3042_vm2, %v8270_v40, 0  ;;  %v20778_v40 = vld [vmem:[#allocation17 + $0x50] sm:$0xff]  }
 0xf67   : > { %v21121_v50 = vpop.eup %21120 }
 0xf68   : > { %v21123_v51 = vpop.eup %21122  ;;  %v8188_v56 = vpop.xlane.xlu1 %8187  ;;  %v8222_v38 = vsel %vm2934_vm3, %v21121_v50, 0.0 }
 0xf69   : > { %v8185_v16 = vpop.xlane.xlu0 %8184  ;;  %v8200_v46 = vsub.f32 %v8073_v1, %v8188_v56  ;;  %8223 = vadd.xlane.f32.xlu1 %v8222_v38  ;;  %v8219_v54 = vsel %vm2934_vm3, %v21123_v51, 0.0  ;;  %v8371_v56 = vsel %vm3042_vm2, %v8269_v52, 0  ;;  %v8272_v38 = vpack.c.bf16 %v7690_v12, %v7690_v12 }
 0xf6a   : > { %v8199_v53 = vsub.f32 %v8027_v29, %v8185_v16  ;;  %8220 = vadd.xlane.f32.xlu0 %v8219_v54  ;;  %v7644_v16 = vadd.f32 %v17901_v63, %v23269_v27 }
 0xf6b   : > { %v8213_v45 = vmul.f32 1.442695, %v8200_v46 }
 0xf6c   : > { %v8211_v59 = vmul.f32 1.442695, %v8199_v53  ;;  %v8271_v46 = vpack.c.bf16 %v7644_v16, %v7644_v16  ;;  %v17904_v53 = vld [vmem:[#allocation16 + $0xf] ss:$0 sm:$0xff]  ;;  %v20780_v16 = vld [vmem:[#allocation17 + $0x60] sm:$0xff]  }
 0xf6d   : > { %21128 = vpow2.f32 %v8213_v45  ;;  %v17903_v45 = vld [vmem:[#allocation16 + $0xe] ss:$0 sm:$0xff] }
 0xf6e   : > { %21130 = vpow2.f32 %v8211_v59 }
 0xf6f   : > { %v23287_v57 = vpop.eup %21124 }
 0xf70   : > { %v23289_v58 = vpop.eup %21126  ;;  %v8194_v43 = vpop.xlane.xlu1 %8193  ;;  %v8228_v0 = vsel %vm2934_vm3, %v23287_v57, 0.0 }
 0xf71   : > { %v8191_v62 = vpop.xlane.xlu0 %8190  ;;  %v8202_v60 = vsub.f32 %v8165_v13, %v8194_v43  ;;  %8229 = vadd.xlane.f32.xlu1 %v8228_v0  ;;  %v8225_v29 = vsel %vm2934_vm3, %v23289_v58, 0.0  ;;  %v7782_v0 = vadd.f32 %v17904_v53, %v23275_v37 }
 0xf72   : > { %v8201_v1 = vsub.f32 %v8119_v20, %v8191_v62  ;;  %8226 = vadd.xlane.f32.xlu0 %v8225_v29  ;;  %v8509_v62 = vsel %vm3042_vm2, %v8272_v38, 0 }
 0xf73   : > { %v8217_v3 = vmul.f32 1.442695, %v8202_v60 }
 0xf74   : > { %v8215_v5 = vmul.f32 1.442695, %v8201_v1  ;;  %v8463_v1 = vsel %vm3042_vm2, %v8271_v46, 0 }
 0xf75   : > { %21132 = vpow2.f32 %v8217_v3  ;;  %v8274_v3 = vpack.c.bf16 %v7782_v0, %v7782_v0 }
 0xf76   : > { %21134 = vpow2.f32 %v8215_v5 }
 0xf77   : > { %v23295_v6 = vpop.eup %21128 }
 0xf78   : > { %v23297_v19 = vpop.eup %21130  ;;  %v8234_v8 = vsel %vm2934_vm3, %v23295_v6, 0.0 }
 0xf79   : > { %8235 = vadd.xlane.f32.xlu1 %v8234_v8  ;;  %v8231_v9 = vsel %vm2934_vm3, %v23297_v19, 0.0 }
 0xf7a   : > { %8232 = vadd.xlane.f32.xlu0 %v8231_v9 }
 0xf7f   : > { %v23303_v47 = vpop.eup %21132 }
 0xf80   : > { %v23305_v20 = vpop.eup %21134  ;;  %v8240_v13 = vsel %vm2934_vm3, %v23303_v47, 0.0 }
 0xf81   : > { %8241 = vadd.xlane.f32.xlu1 %v8240_v13  ;;  %v8237_v23 = vsel %vm2934_vm3, %v23305_v20, 0.0 }
 0xf82   : > { %8238 = vadd.xlane.f32.xlu0 %v8237_v23  ;;  %v8601_v23 = vsel %vm3042_vm2, %v8274_v3, 0 }
 0xff6   : > { %v8224_v24 = vpop.xlane.xlu1 %8223 }
 0xff7   : > { %21136 = vrcp.f32 %v8224_v24  ;;  %v8221_v25 = vpop.xlane.xlu0 %8220 }
 0xff8   : > { %21138 = vrcp.f32 %v8221_v25 }
 0xffe   : > { %v8230_v33 = vpop.xlane.xlu1 %8229 }
 0xfff   : > { %21140 = vrcp.f32 %v8230_v33  ;;  %v8227_v31 = vpop.xlane.xlu0 %8226  ;;  %v20776_v33 = vld [vmem:[#allocation17 + $0x40] sm:$0xff]  }
0x1000   : > { %21142 = vrcp.f32 %v8227_v31 }
0x1001   : > { %v21137_v21 = vpop.eup %21136 }
0x1002   : > { %v21139_v39 = vpop.eup %21138  ;;  %v8246_v41 = vmul.f32 %v21137_v21, %v21121_v50 }
0x1003   : > { %v8244_v26 = vmul.f32 %v21139_v39, %v21123_v51 }
0x1004   : > { %v8260_v48 = vpack.c.bf16 %v8246_v41, %v8246_v41 }
0x1005   : > { %v8259_v49 = vpack.c.bf16 %v8244_v26, %v8244_v26 }
0x1006   : > { %19908 = vmatmul.mubr.msk.bf16.vlgmr.msra.gmra.mrb[204].mxu1 %vm2934_vm3, %v8260_v48  ;;  %v8236_v11 = vpop.xlane.xlu1 %8235 }
0x1007   : > { %19918 = vmatpush3.bf16.msra.mxu1 %v8417_v44  ;;  %21144 = vrcp.f32 %v8236_v11  ;;  %19902 = vmatmul.mubr.msk.bf16.vlgmr.msra.gmra.mrb[184].mxu0 %vm2934_vm3, %v8259_v49  ;;  %v8233_v50 = vpop.xlane.xlu0 %8232  ;;  %v20781_v44 = vld [vmem:[#allocation17 + $0x68] sm:$0xff]  }
0x1008   : > { %19912 = vmatpush3.bf16.msra.mxu0 %v8371_v56  ;;  %21146 = vrcp.f32 %v8233_v50  ;;  %19913 = vmatprep.mubr.msk.bf16.mxu0 %vm21950_vm0, %v21949_v22 }
0x1009   : > { %v21141_v51 = vpop.eup %21140  ;;  %19919 = vmatprep.mubr.msk.bf16.mxu1 %vm21950_vm0, %v21949_v22  ;;  %19923 = vmatprep.subr.bf16.mxu0 %v21949_v22 }
0x100a   : > { %v21143_v55 = vpop.eup %21142  ;;  %v8250_v27 = vmul.f32 %v21141_v51, %v23287_v57  ;;  %19929 = vmatprep.subr.bf16.mxu1 %v21949_v22  ;;  %v7736_v57 = vadd.f32 %v17903_v45, %v23273_v35 }
0x100b   : > { %v8248_v54 = vmul.f32 %v21143_v55, %v23289_v58 }
0x100c   : > { %v8262_v59 = vpack.c.bf16 %v8250_v27, %v8250_v27  ;;  %v8273_v5 = vpack.c.bf16 %v7736_v57, %v7736_v57 }
0x100d   : > { %v8261_v43 = vpack.c.bf16 %v8248_v54, %v8248_v54  ;;  %v20783_v54 = vld [vmem:[#allocation17 + $0x78] sm:$0xff]  }
0x100e   : > { %19920 = vmatmul.mubr.msk.bf16.vlgmr.msra.gmra.mrb[208].mxu1 %vm2934_vm3, %v8262_v59  ;;  %v8242_v60 = vpop.xlane.xlu1 %8241  ;;  %v8555_v24 = vsel %vm3042_vm2, %v8273_v5, 0 }
0x100f   : > { %19930 = vmatpush3.bf16.msra.mxu1 %v8509_v62  ;;  %21148 = vrcp.f32 %v8242_v60  ;;  %19914 = vmatmul.mubr.msk.bf16.vlgmr.msra.gmra.mrb[188].mxu0 %vm2934_vm3, %v8261_v43  ;;  %v8239_v29 = vpop.xlane.xlu0 %8238  ;;  %v20782_v62 = vld [vmem:[#allocation17 + $0x70] sm:$0xff]  }
0x1010   : > { %19924 = vmatpush3.bf16.msra.mxu0 %v8463_v1  ;;  %21150 = vrcp.f32 %v8239_v29  ;;  %19925 = vmatprep.mubr.msk.bf16.mxu0 %vm21950_vm0, %v21949_v22 }
0x1011   : > { %v21145_v58 = vpop.eup %21144  ;;  %19931 = vmatprep.mubr.msk.bf16.mxu1 %vm21950_vm0, %v21949_v22  ;;  %19935 = vmatprep.subr.bf16.mxu0 %v21949_v22 }
0x1012   : > { %v21147_v37 = vpop.eup %21146  ;;  %v8254_v35 = vmul.f32 %v21145_v58, %v23295_v6  ;;  %19941 = vmatprep.subr.bf16.mxu1 %v21949_v22 }
0x1013   : > { %v8252_v8 = vmul.f32 %v21147_v37, %v23297_v19 }
0x1014   : > { %v8264_v9 = vpack.c.bf16 %v8254_v35, %v8254_v35 }
0x1015   : > { %v8263_v13 = vpack.c.bf16 %v8252_v8, %v8252_v8 }
0x1016   : > { %19932 = vmatmul.mubr.msk.bf16.vlgmr.msra.gmra.mrb[212].mxu1 %vm2934_vm3, %v8264_v9 }
0x1017   : > { %19926 = vmatmul.mubr.msk.bf16.vlgmr.msra.gmra.mrb[192].mxu0 %vm2934_vm3, %v8263_v13  ;;  %19942 = vmatpush3.bf16.msra.mxu1 %v8601_v23 }
0x1018   : > { %19936 = vmatpush3.bf16.msra.mxu0 %v8555_v24  ;;  %19937 = vmatprep.mubr.msk.bf16.mxu0 %vm21950_vm0, %v21949_v22 }
0x1019   : > { %v21149_v6 = vpop.eup %21148  ;;  %19943 = vmatprep.mubr.msk.bf16.mxu1 %vm21950_vm0, %v21949_v22  ;;  %19947 = vmatprep.subr.bf16.mxu0 %v21949_v22 }
0x101a   : > { %v21151_v19 = vpop.eup %21150  ;;  %v8258_v25 = vmul.f32 %v21149_v6, %v23303_v47  ;;  %19953 = vmatprep.subr.bf16.mxu1 %v21949_v22 }
0x101b   : > { %v8256_v30 = vmul.f32 %v21151_v19, %v23305_v20  ;;  %v20779_v20 = vld [vmem:[#allocation17 + $0x58] sm:$0xff]  }
0x101c   : > { %v8266_v32 = vpack.c.bf16 %v8258_v25, %v8258_v25 }
0x101d   : > { %v8265_v34 = vpack.c.bf16 %v8256_v30, %v8256_v30 }
0x101e   : > { %19944 = vmatmul.mubr.msk.bf16.vlgmr.msra.gmra.mrb[216].mxu1 %vm2934_vm3, %v8266_v32 }
0x101f   : > { %19938 = vmatmul.mubr.msk.bf16.vlgmr.msra.gmra.mrb[196].mxu0 %vm2934_vm3, %v8265_v34  ;;  %19954 = vmatpush3.bf16.msra.mxu1 %v20777_v36 }
0x1020   : > { %19948 = vmatpush3.bf16.msra.mxu0 %v20776_v33  ;;  %19949 = vmatprep.mubr.msk.bf16.mxu0 %vm21950_vm0, %v21949_v22 }
0x1021   : > { %19955 = vmatprep.mubr.msk.bf16.mxu1 %vm21950_vm0, %v21949_v22  ;;  %19959 = vmatprep.subr.bf16.mxu0 %v21949_v22 }
0x1022   : > { %19965 = vmatprep.subr.bf16.mxu1 %v21949_v22 }
0x10d9   : > { %v8361_v47 = vpop.f32.mrb[204].mxu1 }
0x10da   : > { %v8315_v31 = vpop.f32.mrb[184].mxu0  ;;  %v8644_v21 = vpack.c.bf16 %v8361_v47, %v8361_v47  ;;  %v19909_v39 = vpop.f32.mrb[205].mxu1 }
0x10db   : > { %v8643_v41 = vpack.c.bf16 %v8315_v31, %v8315_v31  ;;  %v19903_v52 = vpop.f32.mrb[185].mxu0  ;;  %v8364_v42 = vpop.f32.mrb[206].mxu1 }
0x10dc   : > { %v8318_v26 = vpop.f32.mrb[186].mxu0  ;;  %v19910_v63 = vpop.f32.mrb[207].mxu1  ;;  %19956 = vmatmul.mubr.msk.bf16.vlgmr.msra.gmra.mrb[220].mxu1 %vm2565_vm1, %v8644_v21 }
0x10dd   : > { %v19904_v48 = vpop.f32.mrb[187].mxu0  ;;  %19950 = vmatmul.mubr.msk.bf16.vlgmr.msra.gmra.mrb[200].mxu0 %vm2565_vm1, %v8643_v41  ;;  %19966 = vmatpush3.bf16.msra.mxu1 %v20779_v20 }
0x10de   : > { %19960 = vmatpush3.bf16.msra.mxu0 %v20778_v40  ;;  %19961 = vmatprep.mubr.msk.bf16.mxu0 %vm21950_vm0, %v21949_v22 }
0x10df   : > { %19967 = vmatprep.mubr.msk.bf16.mxu1 %vm21950_vm0, %v21949_v22  ;;  %19971 = vmatprep.subr.bf16.mxu0 %v21949_v22 }
0x10e0   : > { %19977 = vmatprep.subr.bf16.mxu1 %v21949_v22 }
0x10e1   : > { %v8453_v49 = vpop.f32.mrb[208].mxu1 }
0x10e2   : > { %v8407_v12 = vpop.f32.mrb[188].mxu0  ;;  %v8646_v11 = vpack.c.bf16 %v8453_v49, %v8453_v49  ;;  %v19921_v56 = vpop.f32.mrb[209].mxu1 }
0x10e3   : > { %v8645_v50 = vpack.c.bf16 %v8407_v12, %v8407_v12  ;;  %v19915_v51 = vpop.f32.mrb[189].mxu0  ;;  %v8456_v55 = vpop.f32.mrb[210].mxu1 }
0x10e4   : > { %v8410_v38 = vpop.f32.mrb[190].mxu0  ;;  %v19922_v27 = vpop.f32.mrb[211].mxu1  ;;  %19968 = vmatmul.mubr.msk.bf16.vlgmr.msra.gmra.mrb[224].mxu1 %vm2565_vm1, %v8646_v11 }
0x10e5   : > { %v19916_v46 = vpop.f32.mrb[191].mxu0  ;;  %19962 = vmatmul.mubr.msk.bf16.vlgmr.msra.gmra.mrb[204].mxu0 %vm2565_vm1, %v8645_v50  ;;  %19978 = vmatpush3.bf16.msra.mxu1 %v20781_v44 }
0x10e6   : > { %19972 = vmatpush3.bf16.msra.mxu0 %v20780_v16  ;;  %19973 = vmatprep.mubr.msk.bf16.mxu0 %vm21950_vm0, %v21949_v22 }
0x10e7   : > { %19979 = vmatprep.mubr.msk.bf16.mxu1 %vm21950_vm0, %v21949_v22  ;;  %19983 = vmatprep.subr.bf16.mxu0 %v21949_v22 }
0x10e8   : > { %19989 = vmatprep.subr.bf16.mxu1 %v21949_v22 }
0x10e9   : > { %v8545_v53 = vpop.f32.mrb[212].mxu1 }
0x10ea   : > { %v8499_v45 = vpop.f32.mrb[192].mxu0  ;;  %v8648_v59 = vpack.c.bf16 %v8545_v53, %v8545_v53  ;;  %v19933_v43 = vpop.f32.mrb[213].mxu1 }
0x10eb   : > { %v8647_v0 = vpack.c.bf16 %v8499_v45, %v8499_v45  ;;  %v19927_v60 = vpop.f32.mrb[193].mxu0  ;;  %v8548_v1 = vpop.f32.mrb[214].mxu1  ;;  %v17945_v43 = vld [vmem:[#allocation19 + $0x1] ss:$0 sm:$0xff] }
0x10ec   : > { %v8502_v57 = vpop.f32.mrb[194].mxu0  ;;  %v19934_v29 = vpop.f32.mrb[215].mxu1  ;;  %19980 = vmatmul.mubr.msk.bf16.vlgmr.msra.gmra.mrb[228].mxu1 %vm2565_vm1, %v8648_v59 }
0x10ed   : > { %v19928_v58 = vpop.f32.mrb[195].mxu0  ;;  %19974 = vmatmul.mubr.msk.bf16.vlgmr.msra.gmra.mrb[208].mxu0 %vm2565_vm1, %v8647_v0  ;;  %19990 = vmatpush3.bf16.msra.mxu1 %v20783_v54 }
0x10ee   : > { %19984 = vmatpush3.bf16.msra.mxu0 %v20782_v62  ;;  %19985 = vmatprep.mubr.msk.bf16.mxu0 %vm21950_vm0, %v21949_v22  ;;  %v9107_v58 = vld [vmem:[#allocation20 + $0x400] sm:$0xff] }
0x10ef   : > { %19991 = vmatprep.mubr.msk.bf16.mxu1 %vm21950_vm0, %v21949_v22 }
0x10f1   : > { %v8637_v37 = vpop.f32.mrb[216].mxu1 }
0x10f2   : > { %v8591_v3 = vpop.f32.mrb[196].mxu0  ;;  %v8650_v35 = vpack.c.bf16 %v8637_v37, %v8637_v37  ;;  %v19945_v5 = vpop.f32.mrb[217].mxu1  ;;  %v9115_v37 = vld [vmem:[#allocation20 + $0x440] sm:$0xff] }
0x10f3   : > { %v8649_v8 = vpack.c.bf16 %v8591_v3, %v8591_v3  ;;  %v19939_v9 = vpop.f32.mrb[197].mxu0  ;;  %v8640_v13 = vpop.f32.mrb[218].mxu1  ;;  %v9108_v3 = vld [vmem:[#allocation20 + $0x408] sm:$0xff]  ;;  %v17949_v5 = vcombine.high %v9107_v58, %v9115_v37 }
0x10f4   : > { %v8594_v23 = vpop.f32.mrb[198].mxu0  ;;  %v19946_v24 = vpop.f32.mrb[219].mxu1  ;;  %19992 = vmatmul.mubr.msk.bf16.vlgmr.msra.gmra.mrb[232].mxu1 %vm2565_vm1, %v8650_v35  ;;  %v17948_v35 = vcombine.low %v9107_v58, %v9115_v37  ;;  %v9123_v9 = vld [vmem:[#allocation20 + $0x480] sm:$0xff]  ;;  %v9204_v58 = vld [vmem:[#allocation20 + $0x708] sm:$0xff] }
0x10f5   : > { %v19940_v6 = vpop.f32.mrb[199].mxu0  ;;  %19986 = vmatmul.mubr.msk.bf16.vlgmr.msra.gmra.mrb[212].mxu0 %vm2565_vm1, %v8649_v8  ;;  %10034 = vmatprep.mubr.bf16.mxu1 %v21951_v28  ;;  %v9116_v8 = vld [vmem:[#allocation20 + $0x448] sm:$0xff]  ;;  %v9131_v13 = vld [vmem:[#allocation20 + $0x4c0] sm:$0xff] }
0x10f6   : > { %9993 = vmatprep.mubr.bf16.mxu0 %v21951_v28  ;;  %v17950_v23 = vcombine.low %v9108_v3, %v9116_v8  ;;  %v17951_v24 = vcombine.high %v9108_v3, %v9116_v8  ;;  %v17965_v6 = vcombine.high %v9123_v9, %v9131_v13  ;;  %9961 = vmatprep.subr.bf16.mxu0 %v17949_v5  ;;  %v9212_v3 = vld [vmem:[#allocation20 + $0x748] sm:$0xff] }
0x10f7   : > { %9962 = vmatpush1.bf16.msra.mxu0 %v17948_v35  ;;  %v18046_v5 = vcombine.low %v9204_v58, %v9212_v3  ;;  %v18047_v8 = vcombine.high %v9204_v58, %v9212_v3  ;;  %v9173_v58 = vld [vmem:[#allocation20 + $0x610] sm:$0xff]  ;;  %v9174_v3 = vld [vmem:[#allocation20 + $0x618] sm:$0xff] }
0x10f8   : > { %10002 = vmatprep.subr.bf16.mxu1 %v17951_v24  ;;  %9963 = vmatprep.subr.bf16.mxu0 %v17965_v6  ;;  %v9228_v6 = vld [vmem:[#allocation20 + $0x7c8] sm:$0xff] }
0x10f9   : > { %10003 = vmatpush1.bf16.msra.mxu1 %v17950_v23  ;;  %v9220_v23 = vld [vmem:[#allocation20 + $0x788] sm:$0xff] }
0x11af   : > { %v8760_v19 = vpop.f32.mrb[220].mxu1 }
0x11b0   : > { %v8711_v25 = vpop.f32.mrb[200].mxu0  ;;  %v19957_v30 = vpop.f32.mrb[221].mxu1 }
0x11b1   : > { %v9060_v36 = vadd.f32 %v8760_v19, %v8711_v25  ;;  %v19951_v32 = vpop.f32.mrb[201].mxu0  ;;  %v8763_v33 = vpop.f32.mrb[222].mxu1  ;;  %v9124_v19 = vld [vmem:[#allocation20 + $0x488] sm:$0xff]  ;;  %v9139_v30 = vld [vmem:[#allocation20 + $0x500] sm:$0xff] }
0x11b2   : > { %v8714_v34 = vpop.f32.mrb[202].mxu0  ;;  %v19958_v47 = vpop.f32.mrb[223].mxu1  ;;  %v9132_v25 = vld [vmem:[#allocation20 + $0x4c8] sm:$0xff]  ;;  %v9147_v32 = vld [vmem:[#allocation20 + $0x540] sm:$0xff] }
0x11b3   : > { %v19952_v20 = vpop.f32.mrb[203].mxu0  ;;  %v9140_v33 = vld [vmem:[#allocation20 + $0x508] sm:$0xff]  ;;  %v17964_v34 = vcombine.low %v9123_v9, %v9131_v13  ;;  %v17966_v47 = vcombine.low %v9124_v19, %v9132_v25  ;;  %v9219_v9 = vld [vmem:[#allocation20 + $0x780] sm:$0xff] }
0x11b4   : > { %v17981_v20 = vcombine.high %v9139_v30, %v9147_v32  ;;  %v9227_v13 = vld [vmem:[#allocation20 + $0x7c0] sm:$0xff] }
0x11b5   : > { %9964 = vmatpush1.bf16.msra.mxu0 %v17964_v34  ;;  %v18061_v24 = vcombine.high %v9219_v9, %v9227_v13 }
0x11b6   : > { %9965 = vmatprep.subr.bf16.mxu0 %v17981_v20 }
0x11b7   : > { %v8858_v31 = vpop.f32.mrb[224].mxu1 }
0x11b8   : > { %v8809_v21 = vpop.f32.mrb[204].mxu0  ;;  %v19969_v39 = vpop.f32.mrb[225].mxu1 }
0x11b9   : > { %v9061_v40 = vadd.f32 %v9060_v36, %v8809_v21  ;;  %v19963_v41 = vpop.f32.mrb[205].mxu0  ;;  %v8861_v52 = vpop.f32.mrb[226].mxu1  ;;  %v17967_v36 = vcombine.high %v9124_v19, %v9132_v25  ;;  %v17980_v21 = vcombine.low %v9139_v30, %v9147_v32  ;;  %v18060_v19 = vcombine.low %v9219_v9, %v9227_v13  ;;  %v9117_v32 = vld [vmem:[#allocation20 + $0x450] sm:$0xff] }
0x11ba   : > { %v8812_v42 = vpop.f32.mrb[206].mxu0  ;;  %v19970_v26 = vpop.f32.mrb[227].mxu1  ;;  %v18062_v25 = vcombine.low %v9220_v23, %v9228_v6  ;;  %v18063_v30 = vcombine.high %v9220_v23, %v9228_v6  ;;  %v9189_v23 = vld [vmem:[#allocation20 + $0x690] sm:$0xff]  ;;  %v9190_v6 = vld [vmem:[#allocation20 + $0x698] sm:$0xff] }
0x11bb   : > { %v9062_v63 = vadd.f32 %v9061_v40, %v8858_v31  ;;  %v19964_v48 = vpop.f32.mrb[207].mxu0  ;;  %10004 = vmatprep.subr.bf16.mxu1 %v17967_v36  ;;  %9966 = vmatpush1.bf16.msra.mxu0 %v17980_v21  ;;  %v9155_v26 = vld [vmem:[#allocation20 + $0x580] sm:$0xff]  ;;  %v9109_v36 = vld [vmem:[#allocation20 + $0x410] sm:$0xff] }
0x11bc   : > { %10005 = vmatpush1.bf16.msra.mxu1 %v17966_v47  ;;  %v9156_v48 = vld [vmem:[#allocation20 + $0x588] sm:$0xff]  ;;  %v17953_v34 = vcombine.high %v9109_v36, %v9117_v32  ;;  %v9118_v47 = vld [vmem:[#allocation20 + $0x458] sm:$0xff] }
0x11bf   : > { %v8956_v49 = vpop.f32.mrb[228].mxu1 }
0x11c0   : > { %v8907_v44 = vpop.f32.mrb[208].mxu0  ;;  %v19981_v12 = vpop.f32.mrb[229].mxu1 }
0x11c1   : > { %v9063_v11 = vadd.f32 %v9062_v63, %v8907_v44  ;;  %v19975_v56 = vpop.f32.mrb[209].mxu0  ;;  %v8959_v16 = vpop.f32.mrb[230].mxu1  ;;  %v9163_v63 = vld [vmem:[#allocation20 + $0x5c0] sm:$0xff]  ;;  %v9164_v44 = vld [vmem:[#allocation20 + $0x5c8] sm:$0xff] }
0x11c2   : > { %v8910_v50 = vpop.f32.mrb[210].mxu0  ;;  %v19982_v51 = vpop.f32.mrb[231].mxu1  ;;  %v17996_v12 = vcombine.low %v9155_v26, %v9163_v63  ;;  %v17999_v56 = vcombine.high %v9156_v48, %v9164_v44  ;;  %v9171_v16 = vld [vmem:[#allocation20 + $0x600] sm:$0xff] }
0x11c3   : > { %v9064_v55 = vadd.f32 %v9063_v11, %v8956_v49  ;;  %v19976_v38 = vpop.f32.mrb[211].mxu0  ;;  %v17997_v49 = vcombine.high %v9155_v26, %v9163_v63  ;;  %v17998_v11 = vcombine.low %v9156_v48, %v9164_v44  ;;  %v9179_v50 = vld [vmem:[#allocation20 + $0x640] sm:$0xff]  ;;  %v9172_v51 = vld [vmem:[#allocation20 + $0x608] sm:$0xff]  ;;  %v17947_v63 = vld [vmem:[#allocation28 + $0x1] ss:$0 sm:$0xff] }
0x11c4   : > { %v9180_v38 = vld [vmem:[#allocation20 + $0x648] sm:$0xff]  ;;  %v9133_v44 = vld [vmem:[#allocation20 + $0x4d0] sm:$0xff] }
0x11c5   : > { %9967 = vmatprep.subr.bf16.mxu0 %v17997_v49  ;;  %v9125_v49 = vld [vmem:[#allocation20 + $0x490] sm:$0xff] }
0x11c6   : > { %9968 = vmatpush1.bf16.msra.mxu0 %v17996_v12  ;;  %v9126_v12 = vld [vmem:[#allocation20 + $0x498] sm:$0xff] }
0x11c7   : > { %v9054_v27 = vpop.f32.mrb[232].mxu1 }
0x11c8   : > { %v9005_v46 = vpop.f32.mrb[212].mxu0  ;;  %v19993_v53 = vpop.f32.mrb[233].mxu1 }
0x11c9   : > { %v9065_v54 = vadd.f32 %v9064_v55, %v9005_v46  ;;  %v19987_v45 = vpop.f32.mrb[213].mxu0  ;;  %v9057_v59 = vpop.f32.mrb[234].mxu1  ;;  %v18013_v55 = vcombine.high %v9171_v16, %v9179_v50  ;;  %v18014_v46 = vcombine.low %v9172_v51, %v9180_v38  ;;  %v18015_v53 = vcombine.high %v9172_v51, %v9180_v38  ;;  %v9149_v38 = vld [vmem:[#allocation20 + $0x550] sm:$0xff] }
0x11ca   : > { %v9008_v62 = vpop.f32.mrb[214].mxu0  ;;  %v19994_v0 = vpop.f32.mrb[235].mxu1  ;;  %v9195_v45 = vld [vmem:[#allocation20 + $0x6c0] sm:$0xff]  ;;  %v9188_v59 = vld [vmem:[#allocation20 + $0x688] sm:$0xff] }
0x11cb   : > { %v9066_v60 = vadd.f32 %v9065_v54, %v9054_v27  ;;  %v19988_v1 = vpop.f32.mrb[215].mxu0  ;;  %v18012_v27 = vcombine.low %v9171_v16, %v9179_v50  ;;  %9969 = vmatprep.subr.bf16.mxu0 %v18013_v55  ;;  %v9187_v54 = vld [vmem:[#allocation20 + $0x680] sm:$0xff]  ;;  %v9196_v62 = vld [vmem:[#allocation20 + $0x6c8] sm:$0xff]  ;;  %v17969_v50 = vcombine.high %v9125_v49, %v9133_v44  ;;  %v9141_v55 = vld [vmem:[#allocation20 + $0x510] sm:$0xff] }
0x11cc   : > { %v18028_v0 = vcombine.low %v9187_v54, %v9195_v45  ;;  %v18031_v1 = vcombine.high %v9188_v59, %v9196_v62 }
0x11cd   : > { %v9075_v57 = vadd.f32 %v17945_v43, %v9066_v60  ;;  %9970 = vmatpush1.bf16.msra.mxu0 %v18012_v27  ;;  %v18029_v43 = vcombine.high %v9187_v54, %v9195_v45  ;;  %v18030_v60 = vcombine.low %v9188_v59, %v9196_v62  ;;  %v9142_v27 = vld [vmem:[#allocation20 + $0x518] sm:$0xff]  ;;  %v17985_v54 = vcombine.high %v9141_v55, %v9149_v38  ;;  %v9157_v59 = vld [vmem:[#allocation20 + $0x590] sm:$0xff] }
0x11ce   : > { %v9158_v62 = vld [vmem:[#allocation20 + $0x598] sm:$0xff] }
0x11cf   : > { %v9076_v29 = vadd.f32 %v9075_v57, %v23103_v2  ;;  %v9148_v2 = vld [vmem:[#allocation20 + $0x548] sm:$0xff]  ;;  %9971 = vmatprep.subr.bf16.mxu0 %v18029_v43  ;;  %v9203_v57 = vld [vmem:[#allocation20 + $0x700] sm:$0xff]  ;;  %v9165_v43 = vld [vmem:[#allocation20 + $0x5d0] sm:$0xff] }
0x11d0   : > { %v17983_v31 = vcombine.high %v9140_v33, %v9148_v2  ;;  %v17982_v39 = vcombine.low %v9140_v33, %v9148_v2  ;;  %v9110_v33 = vld [vmem:[#allocation20 + $0x418] sm:$0xff]  ;;  %v17952_v2 = vcombine.low %v9109_v36, %v9117_v32 }
0x11d1   : > { %9081 = vadd.xlane.f32.xlu0 %v9076_v29  ;;  %9972 = vmatpush1.bf16.msra.mxu0 %v18028_v0  ;;  %v17954_v20 = vcombine.low %v9110_v33, %v9118_v47  ;;  %v9166_v0 = vld [vmem:[#allocation20 + $0x5d8] sm:$0xff] }
0x11d2   : > { %10006 = vmatprep.subr.bf16.mxu1 %v17983_v31  ;;  %v17955_v31 = vcombine.high %v9110_v33, %v9118_v47  ;;  %v9205_v33 = vld [vmem:[#allocation20 + $0x710] sm:$0xff]  ;;  %v9214_v47 = vld [vmem:[#allocation20 + $0x758] sm:$0xff] }
0x11d3   : > { %10007 = vmatpush1.bf16.msra.mxu1 %v17982_v39 }
0x11d4   : > { %10008 = vmatprep.subr.bf16.mxu1 %v17999_v56 }
0x11d7   : > { %10009 = vmatpush1.bf16.msra.mxu1 %v17998_v11  ;;  %v9134_v11 = vld [vmem:[#allocation20 + $0x4d8] sm:$0xff] }
0x11d8   : > { %10010 = vmatprep.subr.bf16.mxu1 %v18015_v53  ;;  %v17971_v51 = vcombine.high %v9126_v12, %v9134_v11  ;;  %v17970_v53 = vcombine.low %v9126_v12, %v9134_v11  ;;  %v9111_v12 = vld [vmem:[#allocation20 + $0x420] sm:$0xff] }
0x11d9   : > { %v9119_v11 = vld [vmem:[#allocation20 + $0x460] sm:$0xff] }
0x11db   : > { %10011 = vmatpush1.bf16.msra.mxu1 %v18014_v46  ;;  %v9150_v46 = vld [vmem:[#allocation20 + $0x558] sm:$0xff] }
0x11dc   : > { %10012 = vmatprep.subr.bf16.mxu1 %v18031_v1  ;;  %v17987_v45 = vcombine.high %v9142_v27, %v9150_v46  ;;  %v17986_v1 = vcombine.low %v9142_v27, %v9150_v46  ;;  %v17957_v27 = vcombine.high %v9111_v12, %v9119_v11 }
0x11df   : > { %10013 = vmatpush1.bf16.msra.mxu1 %v18030_v60  ;;  %v17984_v60 = vcombine.low %v9141_v55, %v9149_v38 }
0x11e0   : > { %10014 = vmatprep.subr.bf16.mxu1 %v18047_v8  ;;  %v18002_v8 = vcombine.low %v9158_v62, %v9166_v0 }
0x11e3   : > { %10015 = vmatpush1.bf16.msra.mxu1 %v18046_v5  ;;  %v18000_v5 = vcombine.low %v9157_v59, %v9165_v43 }
0x11e4   : > { %10016 = vmatprep.subr.bf16.mxu1 %v18063_v30 }
0x11e7   : > { %10017 = vmatpush1.bf16.msra.mxu1 %v18062_v25 }
0x11e8   : > { %10084 = vmatprep.subr.bf16.mxu1 %v17955_v31 }
0x125e   : > { %v9082_v40 = vpop.xlane.xlu0 %9081 }
0x125f   : > { %v9083_v41 = vmul.f32 0.0078125, %v9082_v40 }
0x1261   : > { %v23388_v52 = vsub.f32 %v9076_v29, %v9083_v41  ;;  %v9211_v29 = vld [vmem:[#allocation20 + $0x740] sm:$0xff] }
0x1262   : > { %v18045_v37 = vcombine.high %v9203_v57, %v9211_v29  ;;  %v18044_v35 = vcombine.low %v9203_v57, %v9211_v29  ;;  %v18001_v57 = vcombine.high %v9157_v59, %v9165_v43  ;;  %v18003_v29 = vcombine.high %v9158_v62, %v9166_v0 }
0x1263   : > { %v9085_v42 = vmul.f32 %v23388_v52, %v23388_v52  ;;  %v17956_v59 = vcombine.low %v9111_v12, %v9119_v11 }
0x1264   : > { %9973 = vmatprep.subr.bf16.mxu0 %v18045_v37  ;;  %v9181_v37 = vld [vmem:[#allocation20 + $0x650] sm:$0xff] }
0x1265   : > { %9086 = vadd.xlane.f32.xlu1 %v9085_v42  ;;  %9974 = vmatpush1.bf16.msra.mxu0 %v18044_v35  ;;  %v17946_v42 = vld [vmem:[#allocation26 + $0x1] ss:$0 sm:$0xff]  ;;  %v9182_v35 = vld [vmem:[#allocation20 + $0x658] sm:$0xff]  ;;  %v18017_v9 = vcombine.high %v9173_v58, %v9181_v37  ;;  %v18016_v25 = vcombine.low %v9173_v58, %v9181_v37 }
0x1266   : > { %9975 = vmatprep.subr.bf16.mxu0 %v18061_v24  ;;  %v18019_v13 = vcombine.high %v9174_v3, %v9182_v35  ;;  %v9197_v24 = vld [vmem:[#allocation20 + $0x6d0] sm:$0xff]  ;;  %v18018_v30 = vcombine.low %v9174_v3, %v9182_v35 }
0x1267   : > { %v18033_v36 = vcombine.high %v9189_v23, %v9197_v24 }
0x1269   : > { %9976 = vmatpush1.bf16.msra.mxu0 %v18060_v19  ;;  %v9198_v19 = vld [vmem:[#allocation20 + $0x6d8] sm:$0xff] }
0x126a   : > { %10043 = vmatprep.subr.bf16.mxu0 %v17953_v34  ;;  %v18035_v32 = vcombine.high %v9190_v6, %v9198_v19  ;;  %v9206_v34 = vld [vmem:[#allocation20 + $0x718] sm:$0xff]  ;;  %v18034_v31 = vcombine.low %v9190_v6, %v9198_v19 }
0x12f2   : > { %v9087_v21 = vpop.xlane.xlu1 %9086 }
0x12f3   : > { %v9088_v39 = vmul.f32 0.0078125, %v9087_v21 }
0x12f5   : > { %v9089_v40 = vadd.f32 1e-05, %v9088_v39  ;;  %v18051_v39 = vcombine.high %v9206_v34, %v9214_v47 }
0x12f7   : > { %21152 = vrsqrt.f32 %v9089_v40  ;;  %v9221_v40 = vld [vmem:[#allocation20 + $0x790] sm:$0xff] }
0x1301   : > { %v21153_v41 = vpop.eup %21152 }
0x1302   : > { %v9091_v26 = vmul.f32 %v21153_v41, %v23388_v52  ;;  %v17968_v52 = vcombine.low %v9125_v49, %v9133_v44  ;;  %v9229_v41 = vld [vmem:[#allocation20 + $0x7d0] sm:$0xff] }
0x1303   : > { %v18065_v49 = vcombine.high %v9221_v40, %v9229_v41  ;;  %v18064_v55 = vcombine.low %v9221_v40, %v9229_v41 }
0x1304   : > { %v9098_v48 = vmul.f32 %v17946_v42, %v9091_v26  ;;  %v9222_v42 = vld [vmem:[#allocation20 + $0x798] sm:$0xff] }
0x1305   : > { %v9230_v26 = vld [vmem:[#allocation20 + $0x7d8] sm:$0xff] }
0x1306   : > { %v23393_v56 = vadd.f32 %v17947_v63, %v9098_v48  ;;  %v18050_v48 = vcombine.low %v9206_v34, %v9214_v47  ;;  %v18067_v44 = vcombine.high %v9222_v42, %v9230_v26  ;;  %v18066_v38 = vcombine.low %v9222_v42, %v9230_v26 }
0x1308   : > { %v23397_v16 = vpack.c.bf16 %v23393_v56, %v23393_v56 }
0x130a   : > { %9994 = vmatmul.mubr.bf16.vlgmr.msra.gmra.mrb[216].mxu0 %v23397_v16  ;;  %10035 = vmatmul.mubr.bf16.vlgmr.msra.gmra.mrb[236].mxu1 %v23397_v16 }
0x130b   : > { %10044 = vmatpush1.bf16.msra.mxu0 %v17952_v2  ;;  %10085 = vmatpush1.bf16.msra.mxu1 %v17954_v20  ;;  %v9213_v2 = vld [vmem:[#allocation20 + $0x750] sm:$0xff]  ;;  %v18032_v20 = vcombine.low %v9189_v23, %v9197_v24 }
0x130c   : > { %10045 = vmatprep.subr.bf16.mxu0 %v17969_v50  ;;  %10086 = vmatprep.subr.bf16.mxu1 %v17971_v51  ;;  %v18049_v21 = vcombine.high %v9205_v33, %v9213_v2  ;;  %v18048_v63 = vcombine.low %v9205_v33, %v9213_v2  ;;  %v9112_v50 = vld [vmem:[#allocation20 + $0x428] sm:$0xff] }
0x130d   : > { %10075 = vmatprep.mubr.bf16.mxu0 %v21951_v28  ;;  %10116 = vmatprep.mubr.bf16.mxu1 %v21951_v28  ;;  %v9120_v51 = vld [vmem:[#allocation20 + $0x468] sm:$0xff] }
0x130e   : > { %v17959_v46 = vcombine.high %v9112_v50, %v9120_v51  ;;  %v17958_v43 = vcombine.low %v9112_v50, %v9120_v51 }
0x130f   : > { %10046 = vmatpush1.bf16.msra.mxu0 %v17968_v52  ;;  %10087 = vmatpush1.bf16.msra.mxu1 %v17970_v53  ;;  %v9127_v52 = vld [vmem:[#allocation20 + $0x4a0] sm:$0xff] }
0x1310   : > { %10047 = vmatprep.subr.bf16.mxu0 %v17985_v54  ;;  %10088 = vmatprep.subr.bf16.mxu1 %v17987_v45  ;;  %v9135_v53 = vld [vmem:[#allocation20 + $0x4e0] sm:$0xff]  ;;  %v9128_v54 = vld [vmem:[#allocation20 + $0x4a8] sm:$0xff] }
0x1311   : > { %v9136_v45 = vld [vmem:[#allocation20 + $0x4e8] sm:$0xff]  ;;  %v17973_v62 = vcombine.high %v9127_v52, %v9135_v53  ;;  %v17972_v58 = vcombine.low %v9127_v52, %v9135_v53 }
0x1312   : > { %v17975_v0 = vcombine.high %v9128_v54, %v9136_v45  ;;  %v17974_v37 = vcombine.low %v9128_v54, %v9136_v45 }
0x1313   : > { %10048 = vmatpush1.bf16.msra.mxu0 %v17984_v60  ;;  %10089 = vmatpush1.bf16.msra.mxu1 %v17986_v1  ;;  %v9143_v60 = vld [vmem:[#allocation20 + $0x520] sm:$0xff] }
0x1314   : > { %10049 = vmatprep.subr.bf16.mxu0 %v18001_v57  ;;  %10090 = vmatprep.subr.bf16.mxu1 %v18003_v29  ;;  %v9151_v1 = vld [vmem:[#allocation20 + $0x560] sm:$0xff]  ;;  %v9144_v57 = vld [vmem:[#allocation20 + $0x528] sm:$0xff] }
0x1315   : > { %v9152_v29 = vld [vmem:[#allocation20 + $0x568] sm:$0xff]  ;;  %v17989_v3 = vcombine.high %v9143_v60, %v9151_v1  ;;  %v17988_v23 = vcombine.low %v9143_v60, %v9151_v1 }
0x1316   : > { %v17991_v35 = vcombine.high %v9144_v57, %v9152_v29  ;;  %v17990_v24 = vcombine.low %v9144_v57, %v9152_v29 }
0x1317   : > { %10050 = vmatpush1.bf16.msra.mxu0 %v18000_v5  ;;  %10091 = vmatpush1.bf16.msra.mxu1 %v18002_v8  ;;  %v9159_v5 = vld [vmem:[#allocation20 + $0x5a0] sm:$0xff] }
0x1318   : > { %10051 = vmatprep.subr.bf16.mxu0 %v18017_v9  ;;  %10092 = vmatprep.subr.bf16.mxu1 %v18019_v13  ;;  %v9167_v8 = vld [vmem:[#allocation20 + $0x5e0] sm:$0xff]  ;;  %v9160_v9 = vld [vmem:[#allocation20 + $0x5a8] sm:$0xff] }
0x1319   : > { %v9168_v13 = vld [vmem:[#allocation20 + $0x5e8] sm:$0xff]  ;;  %v18005_v6 = vcombine.high %v9159_v5, %v9167_v8  ;;  %v18004_v33 = vcombine.low %v9159_v5, %v9167_v8 }
0x131a   : > { %v18007_v19 = vcombine.high %v9160_v9, %v9168_v13  ;;  %v18006_v2 = vcombine.low %v9160_v9, %v9168_v13 }
0x131b   : > { %10052 = vmatpush1.bf16.msra.mxu0 %v18016_v25  ;;  %10093 = vmatpush1.bf16.msra.mxu1 %v18018_v30  ;;  %v9175_v25 = vld [vmem:[#allocation20 + $0x620] sm:$0xff] }
0x131c   : > { %10053 = vmatprep.subr.bf16.mxu0 %v18033_v36  ;;  %10094 = vmatprep.subr.bf16.mxu1 %v18035_v32  ;;  %v9183_v30 = vld [vmem:[#allocation20 + $0x660] sm:$0xff]  ;;  %v9176_v36 = vld [vmem:[#allocation20 + $0x628] sm:$0xff] }
0x131d   : > { %v9184_v32 = vld [vmem:[#allocation20 + $0x668] sm:$0xff]  ;;  %v18021_v34 = vcombine.high %v9175_v25, %v9183_v30  ;;  %v18020_v40 = vcombine.low %v9175_v25, %v9183_v30 }
0x131e   : > { %v18023_v47 = vcombine.high %v9176_v36, %v9184_v32  ;;  %v18022_v41 = vcombine.low %v9176_v36, %v9184_v32 }
0x131f   : > { %10054 = vmatpush1.bf16.msra.mxu0 %v18032_v20  ;;  %10095 = vmatpush1.bf16.msra.mxu1 %v18034_v31  ;;  %v9191_v20 = vld [vmem:[#allocation20 + $0x6a0] sm:$0xff] }
0x1320   : > { %10055 = vmatprep.subr.bf16.mxu0 %v18049_v21  ;;  %10096 = vmatprep.subr.bf16.mxu1 %v18051_v39  ;;  %v9199_v31 = vld [vmem:[#allocation20 + $0x6e0] sm:$0xff]  ;;  %v9192_v21 = vld [vmem:[#allocation20 + $0x6a8] sm:$0xff] }
0x1321   : > { %v9200_v39 = vld [vmem:[#allocation20 + $0x6e8] sm:$0xff]  ;;  %v18037_v42 = vcombine.high %v9191_v20, %v9199_v31  ;;  %v18036_v12 = vcombine.low %v9191_v20, %v9199_v31 }
0x1322   : > { %v18039_v26 = vcombine.high %v9192_v21, %v9200_v39  ;;  %v18038_v11 = vcombine.low %v9192_v21, %v9200_v39 }
0x1323   : > { %10056 = vmatpush1.bf16.msra.mxu0 %v18048_v63  ;;  %10097 = vmatpush1.bf16.msra.mxu1 %v18050_v48  ;;  %v9207_v63 = vld [vmem:[#allocation20 + $0x720] sm:$0xff] }
0x1324   : > { %10057 = vmatprep.subr.bf16.mxu0 %v18065_v49  ;;  %10098 = vmatprep.subr.bf16.mxu1 %v18067_v44  ;;  %v9215_v48 = vld [vmem:[#allocation20 + $0x760] sm:$0xff]  ;;  %v9208_v49 = vld [vmem:[#allocation20 + $0x728] sm:$0xff] }
0x1325   : > { %v9216_v44 = vld [vmem:[#allocation20 + $0x768] sm:$0xff]  ;;  %v18053_v50 = vcombine.high %v9207_v63, %v9215_v48  ;;  %v18052_v52 = vcombine.low %v9207_v63, %v9215_v48 }
0x1326   : > { %v18055_v51 = vcombine.high %v9208_v49, %v9216_v44  ;;  %v18054_v53 = vcombine.low %v9208_v49, %v9216_v44 }
0x1327   : > { %10058 = vmatpush1.bf16.msra.mxu0 %v18064_v55  ;;  %10099 = vmatpush1.bf16.msra.mxu1 %v18066_v38  ;;  %v9223_v55 = vld [vmem:[#allocation20 + $0x7a0] sm:$0xff] }
0x1328   : > { %10125 = vmatprep.subr.bf16.mxu0 %v17957_v27  ;;  %10166 = vmatprep.subr.bf16.mxu1 %v17959_v46  ;;  %v9231_v38 = vld [vmem:[#allocation20 + $0x7e0] sm:$0xff]  ;;  %v9224_v27 = vld [vmem:[#allocation20 + $0x7a8] sm:$0xff] }
0x1329   : > { %v9232_v46 = vld [vmem:[#allocation20 + $0x7e8] sm:$0xff]  ;;  %v18069_v54 = vcombine.high %v9223_v55, %v9231_v38  ;;  %v18068_v60 = vcombine.low %v9223_v55, %v9231_v38 }
0x132a   : > { %10076 = vmatmul.mubr.bf16.vlgmr.msra.gmra.mrb[220].mxu0 %v23397_v16  ;;  %10117 = vmatmul.mubr.bf16.vlgmr.msra.gmra.mrb[240].mxu1 %v23397_v16  ;;  %v18071_v45 = vcombine.high %v9224_v27, %v9232_v46  ;;  %v18070_v1 = vcombine.low %v9224_v27, %v9232_v46 }
0x132b   : > { %10126 = vmatpush1.bf16.msra.mxu0 %v17956_v59  ;;  %10167 = vmatpush1.bf16.msra.mxu1 %v17958_v43  ;;  %v9113_v59 = vld [vmem:[#allocation20 + $0x430] sm:$0xff] }
0x132c   : > { %10127 = vmatprep.subr.bf16.mxu0 %v17973_v62  ;;  %10168 = vmatprep.subr.bf16.mxu1 %v17975_v0  ;;  %v9121_v43 = vld [vmem:[#allocation20 + $0x470] sm:$0xff]  ;;  %v9114_v62 = vld [vmem:[#allocation20 + $0x438] sm:$0xff] }
0x132d   : > { %10157 = vmatprep.mubr.bf16.mxu0 %v21951_v28  ;;  %10198 = vmatprep.mubr.bf16.mxu1 %v21951_v28  ;;  %v9122_v0 = vld [vmem:[#allocation20 + $0x478] sm:$0xff]  ;;  %v17961_v57 = vcombine.high %v9113_v59, %v9121_v43  ;;  %v17960_v5 = vcombine.low %v9113_v59, %v9121_v43 }
0x132e   : > { %v17963_v29 = vcombine.high %v9114_v62, %v9122_v0  ;;  %v17962_v8 = vcombine.low %v9114_v62, %v9122_v0 }
0x132f   : > { %10128 = vmatpush1.bf16.msra.mxu0 %v17972_v58  ;;  %10169 = vmatpush1.bf16.msra.mxu1 %v17974_v37  ;;  %v9129_v58 = vld [vmem:[#allocation20 + $0x4b0] sm:$0xff] }
0x1330   : > { %10129 = vmatprep.subr.bf16.mxu0 %v17989_v3  ;;  %10170 = vmatprep.subr.bf16.mxu1 %v17991_v35  ;;  %v9137_v37 = vld [vmem:[#allocation20 + $0x4f0] sm:$0xff]  ;;  %v9130_v3 = vld [vmem:[#allocation20 + $0x4b8] sm:$0xff] }
0x1331   : > { %v9138_v35 = vld [vmem:[#allocation20 + $0x4f8] sm:$0xff]  ;;  %v17977_v9 = vcombine.high %v9129_v58, %v9137_v37  ;;  %v17976_v25 = vcombine.low %v9129_v58, %v9137_v37 }
0x1332   : > { %v17979_v13 = vcombine.high %v9130_v3, %v9138_v35  ;;  %v17978_v30 = vcombine.low %v9130_v3, %v9138_v35 }
0x1333   : > { %10130 = vmatpush1.bf16.msra.mxu0 %v17988_v23  ;;  %10171 = vmatpush1.bf16.msra.mxu1 %v17990_v24  ;;  %v9145_v23 = vld [vmem:[#allocation20 + $0x530] sm:$0xff] }
0x1334   : > { %10131 = vmatprep.subr.bf16.mxu0 %v18005_v6  ;;  %10172 = vmatprep.subr.bf16.mxu1 %v18007_v19  ;;  %v9153_v24 = vld [vmem:[#allocation20 + $0x570] sm:$0xff]  ;;  %v9146_v6 = vld [vmem:[#allocation20 + $0x538] sm:$0xff] }
0x1335   : > { %v9154_v19 = vld [vmem:[#allocation20 + $0x578] sm:$0xff]  ;;  %v17993_v36 = vcombine.high %v9145_v23, %v9153_v24  ;;  %v17992_v20 = vcombine.low %v9145_v23, %v9153_v24  ;;  %v20786_v23 = vld [vmem:[#allocation23 + $0x400] sm:$0xff]  }
0x1336   : > { %v17995_v32 = vcombine.high %v9146_v6, %v9154_v19  ;;  %v17994_v31 = vcombine.low %v9146_v6, %v9154_v19  ;;  %v20787_v24 = vld [vmem:[#allocation23 + $0x480] sm:$0xff]   ;;  %v20788_v6 = vld [vmem:[#allocation23 + $0x448] sm:$0xff]  }
0x1337   : > { %10132 = vmatpush1.bf16.msra.mxu0 %v18004_v33  ;;  %10173 = vmatpush1.bf16.msra.mxu1 %v18006_v2  ;;  %v9161_v33 = vld [vmem:[#allocation20 + $0x5b0] sm:$0xff]  ;;  %v20789_v19 = vld [vmem:[#allocation23 + $0x4c8] sm:$0xff]  }
0x1338   : > { %10133 = vmatprep.subr.bf16.mxu0 %v18021_v34  ;;  %10174 = vmatprep.subr.bf16.mxu1 %v18023_v47  ;;  %v9169_v2 = vld [vmem:[#allocation20 + $0x5f0] sm:$0xff]  ;;  %v9162_v34 = vld [vmem:[#allocation20 + $0x5b8] sm:$0xff] }
0x1339   : > { %v9170_v47 = vld [vmem:[#allocation20 + $0x5f8] sm:$0xff]  ;;  %v18009_v21 = vcombine.high %v9161_v33, %v9169_v2  ;;  %v18008_v63 = vcombine.low %v9161_v33, %v9169_v2  ;;  %v20794_v33 = vld [vmem:[#allocation23 + $0x410] sm:$0xff]  }
0x133a   : > { %v18011_v39 = vcombine.high %v9162_v34, %v9170_v47  ;;  %v18010_v48 = vcombine.low %v9162_v34, %v9170_v47  ;;  %v20795_v2 = vld [vmem:[#allocation23 + $0x490] sm:$0xff]   ;;  %v20796_v34 = vld [vmem:[#allocation23 + $0x458] sm:$0xff]  }
0x133b   : > { %10134 = vmatpush1.bf16.msra.mxu0 %v18020_v40  ;;  %10175 = vmatpush1.bf16.msra.mxu1 %v18022_v41  ;;  %v9177_v40 = vld [vmem:[#allocation20 + $0x630] sm:$0xff]  ;;  %v20797_v47 = vld [vmem:[#allocation23 + $0x4d8] sm:$0xff]  }
0x133c   : > { %10135 = vmatprep.subr.bf16.mxu0 %v18037_v42  ;;  %10176 = vmatprep.subr.bf16.mxu1 %v18039_v26  ;;  %v9185_v41 = vld [vmem:[#allocation20 + $0x670] sm:$0xff]  ;;  %v9178_v42 = vld [vmem:[#allocation20 + $0x638] sm:$0xff] }
0x133d   : > { %v9186_v26 = vld [vmem:[#allocation20 + $0x678] sm:$0xff]  ;;  %v18025_v49 = vcombine.high %v9177_v40, %v9185_v41  ;;  %v18024_v55 = vcombine.low %v9177_v40, %v9185_v41  ;;  %v20803_v40 = vld [vmem:[#allocation23 + $0x4a0] sm:$0xff]  }
0x133e   : > { %v18027_v44 = vcombine.high %v9178_v42, %v9186_v26  ;;  %v18026_v38 = vcombine.low %v9178_v42, %v9186_v26  ;;  %v20804_v41 = vld [vmem:[#allocation23 + $0x468] sm:$0xff]  }
0x133f   : > { %10136 = vmatpush1.bf16.msra.mxu0 %v18036_v12  ;;  %10177 = vmatpush1.bf16.msra.mxu1 %v18038_v11  ;;  %v9193_v12 = vld [vmem:[#allocation20 + $0x6b0] sm:$0xff]  ;;  %v20805_v42 = vld [vmem:[#allocation23 + $0x4e8] sm:$0xff]  }
0x1340   : > { %10137 = vmatprep.subr.bf16.mxu0 %v18053_v50  ;;  %10178 = vmatprep.subr.bf16.mxu1 %v18055_v51  ;;  %v9201_v11 = vld [vmem:[#allocation20 + $0x6f0] sm:$0xff]  ;;  %v9194_v50 = vld [vmem:[#allocation20 + $0x6b8] sm:$0xff] }
0x1341   : > { %v9202_v51 = vld [vmem:[#allocation20 + $0x6f8] sm:$0xff]  ;;  %v18041_v27 = vcombine.high %v9193_v12, %v9201_v11  ;;  %v18040_v59 = vcombine.low %v9193_v12, %v9201_v11  ;;  %v20811_v12 = vld [vmem:[#allocation23 + $0x4b0] sm:$0xff]   ;;  %v20812_v11 = vld [vmem:[#allocation23 + $0x478] sm:$0xff]  }
0x1342   : > { %v18043_v46 = vcombine.high %v9194_v50, %v9202_v51  ;;  %v18042_v43 = vcombine.low %v9194_v50, %v9202_v51  ;;  %v20806_v26 = vld [vmem:[#allocation23 + $0x428] sm:$0xff]   ;;  %v20813_v50 = vld [vmem:[#allocation23 + $0x4f8] sm:$0xff]  }
0x1343   : > { %10138 = vmatpush1.bf16.msra.mxu0 %v18052_v52  ;;  %10179 = vmatpush1.bf16.msra.mxu1 %v18054_v53  ;;  %v9209_v52 = vld [vmem:[#allocation20 + $0x730] sm:$0xff]  ;;  %v20814_v51 = vld [vmem:[#allocation23 + $0x438] sm:$0xff]  }
0x1344   : > { %10139 = vmatprep.subr.bf16.mxu0 %v18069_v54  ;;  %10180 = vmatprep.subr.bf16.mxu1 %v18071_v45  ;;  %v9217_v53 = vld [vmem:[#allocation20 + $0x770] sm:$0xff]  ;;  %v9210_v54 = vld [vmem:[#allocation20 + $0x738] sm:$0xff] }
0x1345   : > { %v9218_v45 = vld [vmem:[#allocation20 + $0x778] sm:$0xff]  ;;  %v18057_v62 = vcombine.high %v9209_v52, %v9217_v53  ;;  %v18056_v58 = vcombine.low %v9209_v52, %v9217_v53 }
0x1346   : > { %v18059_v0 = vcombine.high %v9210_v54, %v9218_v45  ;;  %v18058_v37 = vcombine.low %v9210_v54, %v9218_v45 }
0x1347   : > { %10140 = vmatpush1.bf16.msra.mxu0 %v18068_v60  ;;  %10181 = vmatpush1.bf16.msra.mxu1 %v18070_v1  ;;  %v9225_v60 = vld [vmem:[#allocation20 + $0x7b0] sm:$0xff] }
0x1348   : > { %10207 = vmatprep.subr.bf16.mxu0 %v17961_v57  ;;  %10248 = vmatprep.subr.bf16.mxu1 %v17963_v29  ;;  %v9233_v1 = vld [vmem:[#allocation20 + $0x7f0] sm:$0xff]  ;;  %v9226_v57 = vld [vmem:[#allocation20 + $0x7b8] sm:$0xff] }
0x1349   : > { %v9234_v29 = vld [vmem:[#allocation20 + $0x7f8] sm:$0xff]  ;;  %v18073_v3 = vcombine.high %v9225_v60, %v9233_v1 }
0x134a   : > { %10158 = vmatmul.mubr.bf16.vlgmr.msra.gmra.mrb[224].mxu0 %v23397_v16  ;;  %10199 = vmatmul.mubr.bf16.vlgmr.msra.gmra.mrb[244].mxu1 %v23397_v16  ;;  %v18075_v35 = vcombine.high %v9226_v57, %v9234_v29 }
0x134b   : > { %10208 = vmatpush1.bf16.msra.mxu0 %v17960_v5  ;;  %10249 = vmatpush1.bf16.msra.mxu1 %v17962_v8  ;;  %v18072_v5 = vcombine.low %v9225_v60, %v9233_v1  ;;  %v18074_v8 = vcombine.low %v9226_v57, %v9234_v29 }
0x134c   : > { %10209 = vmatprep.subr.bf16.mxu0 %v17977_v9  ;;  %10250 = vmatprep.subr.bf16.mxu1 %v17979_v13  ;;  %v20784_v9 = vld [vmem:[#allocation23 + $0x440] sm:$0xff]  }
0x134d   : > { %10239 = vmatprep.mubr.bf16.mxu0 %v21951_v28  ;;  %10280 = vmatprep.mubr.bf16.mxu1 %v21951_v28  ;;  %v20785_v13 = vld [vmem:[#allocation23 + $0x4c0] sm:$0xff]  }
0x134f   : > { %10210 = vmatpush1.bf16.msra.mxu0 %v17976_v25  ;;  %10251 = vmatpush1.bf16.msra.mxu1 %v17978_v30  ;;  %v20790_v25 = vld [vmem:[#allocation23 + $0x408] sm:$0xff]  }
0x1350   : > { %10211 = vmatprep.subr.bf16.mxu0 %v17993_v36  ;;  %10252 = vmatprep.subr.bf16.mxu1 %v17995_v32  ;;  %v20791_v30 = vld [vmem:[#allocation23 + $0x488] sm:$0xff]   ;;  %v20792_v36 = vld [vmem:[#allocation23 + $0x450] sm:$0xff]  }
0x1351   : > { %v20793_v32 = vld [vmem:[#allocation23 + $0x4d0] sm:$0xff]  }
0x1353   : > { %10212 = vmatpush1.bf16.msra.mxu0 %v17992_v20  ;;  %10253 = vmatpush1.bf16.msra.mxu1 %v17994_v31  ;;  %v20798_v20 = vld [vmem:[#allocation23 + $0x418] sm:$0xff]   ;;  %v20800_v31 = vld [vmem:[#allocation23 + $0x460] sm:$0xff]  }
0x1354   : > { %10213 = vmatprep.subr.bf16.mxu0 %v18009_v21  ;;  %10254 = vmatprep.subr.bf16.mxu1 %v18011_v39  ;;  %v20801_v21 = vld [vmem:[#allocation23 + $0x4e0] sm:$0xff]  }
0x1355   : > { %v20802_v39 = vld [vmem:[#allocation23 + $0x420] sm:$0xff]  }
0x1357   : > { %10214 = vmatpush1.bf16.msra.mxu0 %v18008_v63  ;;  %10255 = vmatpush1.bf16.msra.mxu1 %v18010_v48  ;;  %v20807_v63 = vld [vmem:[#allocation23 + $0x4a8] sm:$0xff]   ;;  %v20808_v48 = vld [vmem:[#allocation23 + $0x470] sm:$0xff]  }
0x1358   : > { %10215 = vmatprep.subr.bf16.mxu0 %v18025_v49  ;;  %10256 = vmatprep.subr.bf16.mxu1 %v18027_v44  ;;  %v20809_v49 = vld [vmem:[#allocation23 + $0x4f0] sm:$0xff]  }
0x1359   : > { %v20810_v44 = vld [vmem:[#allocation23 + $0x430] sm:$0xff]  }
0x135b   : > { %10216 = vmatpush1.bf16.msra.mxu0 %v18024_v55  ;;  %10257 = vmatpush1.bf16.msra.mxu1 %v18026_v38  ;;  %v20815_v55 = vld [vmem:[#allocation23 + $0x4b8] sm:$0xff]   ;;  %v20816_v38 = vld [vmem:[#allocation23 + $0x540] sm:$0xff]  }
0x135c   : > { %10217 = vmatprep.subr.bf16.mxu0 %v18041_v27  ;;  %10258 = vmatprep.subr.bf16.mxu1 %v18043_v46  ;;  %v20817_v27 = vld [vmem:[#allocation23 + $0x5c0] sm:$0xff]  }
0x135d   : > { %v23413_v46 = vld [vmem:[#allocation22 + $0x10] sm:$0xff] }
0x135e   : > { %v9244_v52 = vrot.slane %v23413_v46, %v23035_v14  ;;  %v9252_v53 = vrot.slane %v23413_v46, %v23038_v15  ;;  %v9248_v54 = vrot.slane %v23413_v46, %v23043_v17  ;;  %v9256_v45 = vrot.slane %v23413_v46, %v23046_v18 }
0x135f   : > { %10218 = vmatpush1.bf16.msra.mxu0 %v18040_v59  ;;  %10259 = vmatpush1.bf16.msra.mxu1 %v18042_v43 }
0x1360   : > { %10219 = vmatprep.subr.bf16.mxu0 %v18057_v62  ;;  %10260 = vmatprep.subr.bf16.mxu1 %v18059_v0 }
0x1363   : > { %10220 = vmatpush1.bf16.msra.mxu0 %v18056_v58  ;;  %10261 = vmatpush1.bf16.msra.mxu1 %v18058_v37 }
0x1364   : > { %10221 = vmatprep.subr.bf16.mxu0 %v18073_v3  ;;  %10262 = vmatprep.subr.bf16.mxu1 %v18075_v35 }
0x1367   : > { %10222 = vmatpush1.bf16.msra.mxu0 %v18072_v5  ;;  %10263 = vmatpush1.bf16.msra.mxu1 %v18074_v8 }
0x1368   : > { %18957 = vmatprep.subr.bf16.mxu0 %v20784_v9  ;;  %18979 = vmatprep.subr.bf16.mxu1 %v20785_v13 }
0x136a   : > { %10240 = vmatmul.mubr.bf16.vlgmr.msra.gmra.mrb[228].mxu0 %v23397_v16  ;;  %10281 = vmatmul.mubr.bf16.vlgmr.msra.gmra.mrb[248].mxu1 %v23397_v16  ;;  %v20799_v16 = vld [vmem:[#allocation23 + $0x498] sm:$0xff]  }
0x136b   : > { %18958 = vmatpush3.bf16.msra.mxu0 %v20786_v23  ;;  %18980 = vmatpush3.bf16.msra.mxu1 %v20787_v24 }
0x136c   : > { %18959 = vmatprep.subr.bf16.mxu0 %v20788_v6  ;;  %18981 = vmatprep.subr.bf16.mxu1 %v20789_v19  ;;  %v20818_v6 = vld [vmem:[#allocation23 + $0x500] sm:$0xff]  }
0x136d   : > { %v20819_v19 = vld [vmem:[#allocation23 + $0x580] sm:$0xff]  }
0x136f   : > { %18960 = vmatpush3.bf16.msra.mxu0 %v20790_v25  ;;  %18982 = vmatpush3.bf16.msra.mxu1 %v20791_v30 }
0x1370   : > { %18961 = vmatprep.subr.bf16.mxu0 %v20792_v36  ;;  %18983 = vmatprep.subr.bf16.mxu1 %v20793_v32  ;;  %v20820_v36 = vld [vmem:[#allocation23 + $0x548] sm:$0xff]  }
0x1371   : > { %v20821_v32 = vld [vmem:[#allocation23 + $0x5c8] sm:$0xff]  }
0x1373   : > { %18962 = vmatpush3.bf16.msra.mxu0 %v20794_v33  ;;  %18984 = vmatpush3.bf16.msra.mxu1 %v20795_v2  ;;  %v20822_v33 = vld [vmem:[#allocation23 + $0x508] sm:$0xff]  }
0x1374   : > { %18963 = vmatprep.subr.bf16.mxu0 %v20796_v34  ;;  %18985 = vmatprep.subr.bf16.mxu1 %v20797_v47  ;;  %v20823_v2 = vld [vmem:[#allocation23 + $0x588] sm:$0xff]   ;;  %v20824_v34 = vld [vmem:[#allocation23 + $0x550] sm:$0xff]  }
0x1375   : > { %v20825_v47 = vld [vmem:[#allocation23 + $0x5d0] sm:$0xff]  }
0x1377   : > { %18964 = vmatpush3.bf16.msra.mxu0 %v20798_v20  ;;  %18986 = vmatpush3.bf16.msra.mxu1 %v20799_v16  ;;  %v20826_v20 = vld [vmem:[#allocation23 + $0x510] sm:$0xff]  }
0x1378   : > { %18965 = vmatprep.subr.bf16.mxu0 %v20800_v31  ;;  %18987 = vmatprep.subr.bf16.mxu1 %v20801_v21  ;;  %v20827_v16 = vld [vmem:[#allocation23 + $0x590] sm:$0xff]   ;;  %v20828_v31 = vld [vmem:[#allocation23 + $0x558] sm:$0xff]  }
0x1379   : > { %v20829_v21 = vld [vmem:[#allocation23 + $0x5d8] sm:$0xff]  }
0x137b   : > { %18966 = vmatpush3.bf16.msra.mxu0 %v20802_v39  ;;  %18988 = vmatpush3.bf16.msra.mxu1 %v20803_v40  ;;  %v20830_v39 = vld [vmem:[#allocation23 + $0x518] sm:$0xff]  }
0x137c   : > { %18967 = vmatprep.subr.bf16.mxu0 %v20804_v41  ;;  %18989 = vmatprep.subr.bf16.mxu1 %v20805_v42  ;;  %v20831_v40 = vld [vmem:[#allocation23 + $0x598] sm:$0xff]   ;;  %v20832_v41 = vld [vmem:[#allocation23 + $0x560] sm:$0xff]  }
0x137d   : > { %v20833_v42 = vld [vmem:[#allocation23 + $0x5e0] sm:$0xff]  }
0x137f   : > { %18968 = vmatpush3.bf16.msra.mxu0 %v20806_v26  ;;  %18990 = vmatpush3.bf16.msra.mxu1 %v20807_v63  ;;  %v20834_v26 = vld [vmem:[#allocation23 + $0x520] sm:$0xff]  }
0x1380   : > { %18969 = vmatprep.subr.bf16.mxu0 %v20808_v48  ;;  %18991 = vmatprep.subr.bf16.mxu1 %v20809_v49  ;;  %v20835_v63 = vld [vmem:[#allocation23 + $0x5a0] sm:$0xff]   ;;  %v20836_v48 = vld [vmem:[#allocation23 + $0x568] sm:$0xff]  }
0x1381   : > { %v20837_v49 = vld [vmem:[#allocation23 + $0x5e8] sm:$0xff]  }
0x1383   : > { %18970 = vmatpush3.bf16.msra.mxu0 %v20810_v44  ;;  %18992 = vmatpush3.bf16.msra.mxu1 %v20811_v12  ;;  %v20838_v44 = vld [vmem:[#allocation23 + $0x528] sm:$0xff]  }
0x1384   : > { %18971 = vmatprep.subr.bf16.mxu0 %v20812_v11  ;;  %18993 = vmatprep.subr.bf16.mxu1 %v20813_v50  ;;  %v20839_v12 = vld [vmem:[#allocation23 + $0x5a8] sm:$0xff]   ;;  %v20840_v11 = vld [vmem:[#allocation23 + $0x570] sm:$0xff]  }
0x1385   : > { %v20841_v50 = vld [vmem:[#allocation23 + $0x5f0] sm:$0xff]  }
0x1387   : > { %18972 = vmatpush3.bf16.msra.mxu0 %v20814_v51  ;;  %18994 = vmatpush3.bf16.msra.mxu1 %v20815_v55  ;;  %v9260_v51 = vrot.slane %v23413_v46, %v23057_v4  ;;  %v9268_v55 = vrot.slane %v23413_v46, %v23060_v10 }
0x1388   : > { %19001 = vmatprep.subr.bf16.mxu0 %v20816_v38  ;;  %19023 = vmatprep.subr.bf16.mxu1 %v20817_v27  ;;  %v9264_v38 = vrot.slane %v23413_v46, %v23063_v7  ;;  %v9272_v27 = vrot.slane %v23413_v46, %v23066_v61  ;;  %v20847_v46 = vld [vmem:[#allocation23 + $0x5b8] sm:$0xff]  }
0x13dd   : > { %v9995_v59 = vpop.f32.mrb[216].mxu0  ;;  %v10036_v43 = vpop.f32.mrb[236].mxu1 }
0x13de   : > { %v9996_v62 = vadd.f32 %v9995_v59, %v9244_v52  ;;  %v10037_v0 = vadd.f32 %v10036_v43, %v9252_v53  ;;  %v9997_v60 = vpop.f32.mrb[217].mxu0  ;;  %v10038_v1 = vpop.f32.mrb[237].mxu1  ;;  %v20842_v52 = vld [vmem:[#allocation23 + $0x530] sm:$0xff]  }
0x13df   : > { %v9998_v57 = vadd.f32 %v9997_v60, %v9248_v54  ;;  %v10039_v29 = vadd.f32 %v10038_v1, %v9256_v45  ;;  %v9999_v58 = vpop.f32.mrb[218].mxu0  ;;  %v10040_v37 = vpop.f32.mrb[238].mxu1  ;;  %v20843_v53 = vld [vmem:[#allocation23 + $0x5b0] sm:$0xff]   ;;  %v20844_v54 = vld [vmem:[#allocation23 + $0x578] sm:$0xff]  }
0x13e0   : > { %v10289_v3 = vmax.f32 %v9996_v62, 0.0  ;;  %v10291_v35 = vmax.f32 %v10037_v0, 0.0  ;;  %v10000_v5 = vpop.f32.mrb[219].mxu0  ;;  %v10041_v8 = vpop.f32.mrb[239].mxu1  ;;  %v20845_v45 = vld [vmem:[#allocation23 + $0x5f8] sm:$0xff]  }
0x13e1   : > { %v10290_v9 = vmax.f32 %v9998_v57, 0.0  ;;  %v10292_v13 = vmax.f32 %v10039_v29, 0.0 }
0x13e2   : > { %v10562_v25 = vpack.c.bf16 %v10289_v3, %v10289_v3  ;;  %v10564_v30 = vpack.c.bf16 %v10291_v35, %v10291_v35  ;;  %v20846_v3 = vld [vmem:[#allocation23 + $0x538] sm:$0xff]  }
0x13e3   : > { %v10563_v23 = vpack.c.bf16 %v10290_v9, %v10290_v9  ;;  %v10565_v24 = vpack.c.bf16 %v10292_v13, %v10292_v13  ;;  %v20848_v13 = vld [vmem:[#allocation23 + $0x640] sm:$0xff]  }
0x13e5   : > { %11386 = vmatprep.mubr.bf16.mxu0 %v10563_v23  ;;  %11426 = vmatprep.mubr.bf16.mxu1 %v10565_v24  ;;  %v20849_v23 = vld [vmem:[#allocation23 + $0x6c0] sm:$0xff]  }
0x13e6   : > { %11387 = vmatmul.mubr.bf16.vlgmr.msra.gmra.mrb[232].mxu0 %v10562_v25  ;;  %11427 = vmatmul.mubr.bf16.vlgmr.msra.gmra.mrb[252].mxu1 %v10564_v30  ;;  %v20850_v30 = vld [vmem:[#allocation23 + $0x600] sm:$0xff]  }
0x13e7   : > { %19002 = vmatpush3.bf16.msra.mxu0 %v20818_v6  ;;  %19024 = vmatpush3.bf16.msra.mxu1 %v20819_v19 }
0x13e8   : > { %19003 = vmatprep.subr.bf16.mxu0 %v20820_v36  ;;  %19025 = vmatprep.subr.bf16.mxu1 %v20821_v32  ;;  %v20851_v36 = vld [vmem:[#allocation23 + $0x680] sm:$0xff]  }
0x13eb   : > { %19004 = vmatpush3.bf16.msra.mxu0 %v20822_v33  ;;  %19026 = vmatpush3.bf16.msra.mxu1 %v20823_v2  ;;  %v20852_v2 = vld [vmem:[#allocation23 + $0x648] sm:$0xff]  }
0x13ec   : > { %19005 = vmatprep.subr.bf16.mxu0 %v20824_v34  ;;  %19027 = vmatprep.subr.bf16.mxu1 %v20825_v47  ;;  %v20853_v34 = vld [vmem:[#allocation23 + $0x6c8] sm:$0xff]  }
0x13ed   : > { %v20854_v47 = vld [vmem:[#allocation23 + $0x608] sm:$0xff]  }
0x13ef   : > { %19006 = vmatpush3.bf16.msra.mxu0 %v20826_v20  ;;  %19028 = vmatpush3.bf16.msra.mxu1 %v20827_v16  ;;  %v20855_v20 = vld [vmem:[#allocation23 + $0x688] sm:$0xff]   ;;  %v20856_v16 = vld [vmem:[#allocation23 + $0x650] sm:$0xff]  }
0x13f0   : > { %19007 = vmatprep.subr.bf16.mxu0 %v20828_v31  ;;  %19029 = vmatprep.subr.bf16.mxu1 %v20829_v21  ;;  %v20857_v31 = vld [vmem:[#allocation23 + $0x6d0] sm:$0xff]  }
0x13f1   : > { %v20858_v21 = vld [vmem:[#allocation23 + $0x610] sm:$0xff]  }
0x13f3   : > { %19008 = vmatpush3.bf16.msra.mxu0 %v20830_v39  ;;  %19030 = vmatpush3.bf16.msra.mxu1 %v20831_v40  ;;  %v20859_v39 = vld [vmem:[#allocation23 + $0x690] sm:$0xff]   ;;  %v20860_v40 = vld [vmem:[#allocation23 + $0x658] sm:$0xff]  }
0x13f4   : > { %19009 = vmatprep.subr.bf16.mxu0 %v20832_v41  ;;  %19031 = vmatprep.subr.bf16.mxu1 %v20833_v42  ;;  %v20861_v41 = vld [vmem:[#allocation23 + $0x6d8] sm:$0xff]  }
0x13f5   : > { %v20862_v42 = vld [vmem:[#allocation23 + $0x618] sm:$0xff]  }
0x13f7   : > { %19010 = vmatpush3.bf16.msra.mxu0 %v20834_v26  ;;  %19032 = vmatpush3.bf16.msra.mxu1 %v20835_v63  ;;  %v20863_v26 = vld [vmem:[#allocation23 + $0x698] sm:$0xff]   ;;  %v20864_v63 = vld [vmem:[#allocation23 + $0x660] sm:$0xff]  }
0x13f8   : > { %19011 = vmatprep.subr.bf16.mxu0 %v20836_v48  ;;  %19033 = vmatprep.subr.bf16.mxu1 %v20837_v49  ;;  %v20865_v48 = vld [vmem:[#allocation23 + $0x6e0] sm:$0xff]  }
0x13f9   : > { %v20866_v49 = vld [vmem:[#allocation23 + $0x620] sm:$0xff]  }
0x13fb   : > { %19012 = vmatpush3.bf16.msra.mxu0 %v20838_v44  ;;  %19034 = vmatpush3.bf16.msra.mxu1 %v20839_v12  ;;  %v20867_v44 = vld [vmem:[#allocation23 + $0x6a0] sm:$0xff]   ;;  %v20868_v12 = vld [vmem:[#allocation23 + $0x668] sm:$0xff]  }
0x13fc   : > { %19013 = vmatprep.subr.bf16.mxu0 %v20840_v11  ;;  %19035 = vmatprep.subr.bf16.mxu1 %v20841_v50  ;;  %v20869_v11 = vld [vmem:[#allocation23 + $0x6e8] sm:$0xff]  }
0x13fd   : > { %v10077_v59 = vpop.f32.mrb[220].mxu0  ;;  %v10118_v43 = vpop.f32.mrb[240].mxu1  ;;  %v20870_v50 = vld [vmem:[#allocation23 + $0x628] sm:$0xff]  }
0x13fe   : > { %v10078_v62 = vadd.f32 %v10077_v59, %v9260_v51  ;;  %v10119_v0 = vadd.f32 %v10118_v43, %v9268_v55  ;;  %v10079_v60 = vpop.f32.mrb[221].mxu0  ;;  %v10120_v1 = vpop.f32.mrb[241].mxu1  ;;  %v20871_v51 = vld [vmem:[#allocation23 + $0x6a8] sm:$0xff]   ;;  %v20874_v59 = vld [vmem:[#allocation23 + $0x630] sm:$0xff]  }
0x13ff   : > { %v10080_v57 = vadd.f32 %v10079_v60, %v9264_v38  ;;  %v10121_v29 = vadd.f32 %v10120_v1, %v9272_v27  ;;  %v10081_v58 = vpop.f32.mrb[222].mxu0  ;;  %v10122_v37 = vpop.f32.mrb[242].mxu1  ;;  %19014 = vmatpush3.bf16.msra.mxu0 %v20842_v52  ;;  %19036 = vmatpush3.bf16.msra.mxu1 %v20843_v53  ;;  %v23431_v55 = vld [vmem:[#allocation22 + $0x18] sm:$0xff]  ;;  %v20872_v38 = vld [vmem:[#allocation23 + $0x670] sm:$0xff]  }
0x1400   : > { %v10293_v35 = vmax.f32 %v10078_v62, 0.0  ;;  %v10295_v5 = vmax.f32 %v10119_v0, 0.0  ;;  %v10082_v8 = vpop.f32.mrb[223].mxu0  ;;  %v10123_v9 = vpop.f32.mrb[243].mxu1  ;;  %19015 = vmatprep.subr.bf16.mxu0 %v20844_v54  ;;  %19037 = vmatprep.subr.bf16.mxu1 %v20845_v45  ;;  %v20873_v27 = vld [vmem:[#allocation23 + $0x6f0] sm:$0xff]   ;;  %v9276_v52 = vrot.slane %v23431_v55, %v23035_v14  ;;  %v9284_v53 = vrot.slane %v23431_v55, %v23038_v15  ;;  %v20876_v62 = vld [vmem:[#allocation23 + $0x678] sm:$0xff]  }
0x1401   : > { %v10294_v24 = vmax.f32 %v10080_v57, 0.0  ;;  %v10296_v6 = vmax.f32 %v10121_v29, 0.0  ;;  %v9280_v54 = vrot.slane %v23431_v55, %v23043_v17  ;;  %v9288_v45 = vrot.slane %v23431_v55, %v23046_v18  ;;  %v20875_v43 = vld [vmem:[#allocation23 + $0x6b0] sm:$0xff]   ;;  %v20877_v0 = vld [vmem:[#allocation23 + $0x6f8] sm:$0xff]  }
0x1402   : > { %v10566_v32 = vpack.c.bf16 %v10293_v35, %v10293_v35  ;;  %v10568_v33 = vpack.c.bf16 %v10295_v5, %v10295_v5  ;;  %v20878_v8 = vld [vmem:[#allocation23 + $0x638] sm:$0xff]  }
0x1403   : > { %v10567_v19 = vpack.c.bf16 %v10294_v24, %v10294_v24  ;;  %v10569_v25 = vpack.c.bf16 %v10296_v6, %v10296_v6  ;;  %19016 = vmatpush3.bf16.msra.mxu0 %v20846_v3  ;;  %19038 = vmatpush3.bf16.msra.mxu1 %v20847_v46  ;;  %v20879_v9 = vld [vmem:[#allocation23 + $0x6b8] sm:$0xff]  }
0x1404   : > { %19045 = vmatprep.subr.bf16.mxu0 %v20848_v13  ;;  %19067 = vmatprep.subr.bf16.mxu1 %v20849_v23 }
0x1405   : > { %11466 = vmatprep.mubr.bf16.mxu0 %v10567_v19  ;;  %11506 = vmatprep.mubr.bf16.mxu1 %v10569_v25  ;;  %v20880_v19 = vld [vmem:[#allocation23 + $0x740] sm:$0xff]  }
0x1406   : > { %11467 = vmatmul.mubr.bf16.vlgmr.msra.gmra.mrb[236].mxu0 %v10566_v32  ;;  %11507 = vmatmul.mubr.bf16.vlgmr.msra.gmra.mrb[0].mxu1 %v10568_v33  ;;  %v20881_v25 = vld [vmem:[#allocation23 + $0x7c0] sm:$0xff]  }
0x1407   : > { %19046 = vmatpush3.bf16.msra.mxu0 %v20850_v30  ;;  %19068 = vmatpush3.bf16.msra.mxu1 %v20851_v36 }
0x1408   : > { %19047 = vmatprep.subr.bf16.mxu0 %v20852_v2  ;;  %19069 = vmatprep.subr.bf16.mxu1 %v20853_v34  ;;  %v20882_v2 = vld [vmem:[#allocation23 + $0x700] sm:$0xff]  }
0x1409   : > { %v20883_v34 = vld [vmem:[#allocation23 + $0x780] sm:$0xff]  }
0x140b   : > { %19048 = vmatpush3.bf16.msra.mxu0 %v20854_v47  ;;  %19070 = vmatpush3.bf16.msra.mxu1 %v20855_v20 }
0x140c   : > { %19049 = vmatprep.subr.bf16.mxu0 %v20856_v16  ;;  %19071 = vmatprep.subr.bf16.mxu1 %v20857_v31  ;;  %v20884_v16 = vld [vmem:[#allocation23 + $0x748] sm:$0xff]  }
0x140d   : > { %v20885_v31 = vld [vmem:[#allocation23 + $0x7c8] sm:$0xff]  }
0x140f   : > { %19050 = vmatpush3.bf16.msra.mxu0 %v20858_v21  ;;  %19072 = vmatpush3.bf16.msra.mxu1 %v20859_v39  ;;  %v20886_v21 = vld [vmem:[#allocation23 + $0x708] sm:$0xff]  }
0x1410   : > { %19051 = vmatprep.subr.bf16.mxu0 %v20860_v40  ;;  %19073 = vmatprep.subr.bf16.mxu1 %v20861_v41  ;;  %v20887_v39 = vld [vmem:[#allocation23 + $0x788] sm:$0xff]   ;;  %v20888_v40 = vld [vmem:[#allocation23 + $0x750] sm:$0xff]  }
0x1411   : > { %v20889_v41 = vld [vmem:[#allocation23 + $0x7d0] sm:$0xff]  }
0x1413   : > { %19052 = vmatpush3.bf16.msra.mxu0 %v20862_v42  ;;  %19074 = vmatpush3.bf16.msra.mxu1 %v20863_v26  ;;  %v20890_v42 = vld [vmem:[#allocation23 + $0x710] sm:$0xff]  }
0x1414   : > { %19053 = vmatprep.subr.bf16.mxu0 %v20864_v63  ;;  %19075 = vmatprep.subr.bf16.mxu1 %v20865_v48  ;;  %v20891_v26 = vld [vmem:[#allocation23 + $0x790] sm:$0xff]   ;;  %v20892_v63 = vld [vmem:[#allocation23 + $0x758] sm:$0xff]  }
0x1415   : > { %v20893_v48 = vld [vmem:[#allocation23 + $0x7d8] sm:$0xff]  }
0x1417   : > { %19054 = vmatpush3.bf16.msra.mxu0 %v20866_v49  ;;  %19076 = vmatpush3.bf16.msra.mxu1 %v20867_v44  ;;  %v20894_v49 = vld [vmem:[#allocation23 + $0x718] sm:$0xff]  }
0x1418   : > { %19055 = vmatprep.subr.bf16.mxu0 %v20868_v12  ;;  %19077 = vmatprep.subr.bf16.mxu1 %v20869_v11  ;;  %v20895_v44 = vld [vmem:[#allocation23 + $0x798] sm:$0xff]   ;;  %v20896_v12 = vld [vmem:[#allocation23 + $0x760] sm:$0xff]  }
0x1419   : > { %v20897_v11 = vld [vmem:[#allocation23 + $0x7e0] sm:$0xff]  }
0x141b   : > { %19056 = vmatpush3.bf16.msra.mxu0 %v20870_v50  ;;  %19078 = vmatpush3.bf16.msra.mxu1 %v20871_v51  ;;  %v20898_v50 = vld [vmem:[#allocation23 + $0x720] sm:$0xff]  }
0x141c   : > { %19057 = vmatprep.subr.bf16.mxu0 %v20872_v38  ;;  %19079 = vmatprep.subr.bf16.mxu1 %v20873_v27  ;;  %v20899_v51 = vld [vmem:[#allocation23 + $0x7a0] sm:$0xff]   ;;  %v20900_v38 = vld [vmem:[#allocation23 + $0x768] sm:$0xff]  }
0x141d   : > { %v10159_v60 = vpop.f32.mrb[224].mxu0  ;;  %v10200_v1 = vpop.f32.mrb[244].mxu1  ;;  %v20901_v27 = vld [vmem:[#allocation23 + $0x7e8] sm:$0xff]  }
0x141e   : > { %v10160_v57 = vadd.f32 %v10159_v60, %v9276_v52  ;;  %v10201_v29 = vadd.f32 %v10200_v1, %v9284_v53  ;;  %v10161_v58 = vpop.f32.mrb[225].mxu0  ;;  %v10202_v37 = vpop.f32.mrb[245].mxu1  ;;  %v20902_v52 = vld [vmem:[#allocation23 + $0x728] sm:$0xff]   ;;  %v20906_v60 = vld [vmem:[#allocation23 + $0x730] sm:$0xff]  }
0x141f   : > { %v10162_v3 = vadd.f32 %v10161_v58, %v9280_v54  ;;  %v10203_v46 = vadd.f32 %v10202_v37, %v9288_v45  ;;  %v10163_v35 = vpop.f32.mrb[226].mxu0  ;;  %v10204_v5 = vpop.f32.mrb[246].mxu1  ;;  %19058 = vmatpush3.bf16.msra.mxu0 %v20874_v59  ;;  %19080 = vmatpush3.bf16.msra.mxu1 %v20875_v43  ;;  %v20903_v53 = vld [vmem:[#allocation23 + $0x7a8] sm:$0xff]   ;;  %v20904_v54 = vld [vmem:[#allocation23 + $0x770] sm:$0xff]   ;;  %v9292_v59 = vrot.slane %v23431_v55, %v23057_v4 }
0x1420   : > { %v10297_v13 = vmax.f32 %v10160_v57, 0.0  ;;  %v10299_v23 = vmax.f32 %v10201_v29, 0.0  ;;  %v10164_v24 = vpop.f32.mrb[227].mxu0  ;;  %v10205_v6 = vpop.f32.mrb[247].mxu1  ;;  %19059 = vmatprep.subr.bf16.mxu0 %v20876_v62  ;;  %19081 = vmatprep.subr.bf16.mxu1 %v20877_v0  ;;  %v20905_v45 = vld [vmem:[#allocation23 + $0x7f0] sm:$0xff]   ;;  %v9300_v43 = vrot.slane %v23431_v55, %v23060_v10  ;;  %v9296_v62 = vrot.slane %v23431_v55, %v23063_v7  ;;  %v20908_v57 = vld [vmem:[#allocation23 + $0x778] sm:$0xff]  }
0x1421   : > { %v10298_v30 = vmax.f32 %v10162_v3, 0.0  ;;  %v10300_v36 = vmax.f32 %v10203_v46, 0.0  ;;  %v9304_v0 = vrot.slane %v23431_v55, %v23066_v61  ;;  %v20907_v1 = vld [vmem:[#allocation23 + $0x7b0] sm:$0xff]   ;;  %v20909_v29 = vld [vmem:[#allocation23 + $0x7f8] sm:$0xff]  }
0x1422   : > { %v10570_v47 = vpack.c.bf16 %v10297_v13, %v10297_v13  ;;  %v10572_v20 = vpack.c.bf16 %v10299_v23, %v10299_v23  ;;  %v20910_v24 = vld [vmem:[#allocation23 + $0x738] sm:$0xff]  }
0x1423   : > { %v10571_v32 = vpack.c.bf16 %v10298_v30, %v10298_v30  ;;  %v10573_v33 = vpack.c.bf16 %v10300_v36, %v10300_v36  ;;  %19060 = vmatpush3.bf16.msra.mxu0 %v20878_v8  ;;  %19082 = vmatpush3.bf16.msra.mxu1 %v20879_v9  ;;  %v20911_v55 = vld [vmem:[#allocation23 + $0x7b8] sm:$0xff]  }
0x1424   : > { %19089 = vmatprep.subr.bf16.mxu0 %v20880_v19  ;;  %19111 = vmatprep.subr.bf16.mxu1 %v20881_v25 }
0x1425   : > { %11546 = vmatprep.mubr.bf16.mxu0 %v10571_v32  ;;  %11586 = vmatprep.mubr.bf16.mxu1 %v10573_v33 }
0x1426   : > { %11547 = vmatmul.mubr.bf16.vlgmr.msra.gmra.mrb[240].mxu0 %v10570_v47  ;;  %11587 = vmatmul.mubr.bf16.vlgmr.msra.gmra.mrb[4].mxu1 %v10572_v20 }
0x1427   : > { %19090 = vmatpush3.bf16.msra.mxu0 %v20882_v2  ;;  %19112 = vmatpush3.bf16.msra.mxu1 %v20883_v34 }
0x1428   : > { %19091 = vmatprep.subr.bf16.mxu0 %v20884_v16  ;;  %19113 = vmatprep.subr.bf16.mxu1 %v20885_v31  ;;  %v18076_v31 = vld [vmem:[#allocation25 + $0x1] ss:$0 sm:$0xff] }
0x142b   : > { %19092 = vmatpush3.bf16.msra.mxu0 %v20886_v21  ;;  %19114 = vmatpush3.bf16.msra.mxu1 %v20887_v39 }
0x142c   : > { %19093 = vmatprep.subr.bf16.mxu0 %v20888_v40  ;;  %19115 = vmatprep.subr.bf16.mxu1 %v20889_v41 }
0x142f   : > { %19094 = vmatpush3.bf16.msra.mxu0 %v20890_v42  ;;  %19116 = vmatpush3.bf16.msra.mxu1 %v20891_v26 }
0x1430   : > { %19095 = vmatprep.subr.bf16.mxu0 %v20892_v63  ;;  %19117 = vmatprep.subr.bf16.mxu1 %v20893_v48 }
0x1433   : > { %19096 = vmatpush3.bf16.msra.mxu0 %v20894_v49  ;;  %19118 = vmatpush3.bf16.msra.mxu1 %v20895_v44 }
0x1434   : > { %19097 = vmatprep.subr.bf16.mxu0 %v20896_v12  ;;  %19119 = vmatprep.subr.bf16.mxu1 %v20897_v11 }
0x1437   : > { %19098 = vmatpush3.bf16.msra.mxu0 %v20898_v50  ;;  %19120 = vmatpush3.bf16.msra.mxu1 %v20899_v51 }
0x1438   : > { %19099 = vmatprep.subr.bf16.mxu0 %v20900_v38  ;;  %19121 = vmatprep.subr.bf16.mxu1 %v20901_v27 }
0x143b   : > { %19100 = vmatpush3.bf16.msra.mxu0 %v20902_v52  ;;  %19122 = vmatpush3.bf16.msra.mxu1 %v20903_v53 }
0x143c   : > { %19101 = vmatprep.subr.bf16.mxu0 %v20904_v54  ;;  %19123 = vmatprep.subr.bf16.mxu1 %v20905_v45 }
0x143d   : > { %v10241_v58 = vpop.f32.mrb[228].mxu0  ;;  %v10282_v37 = vpop.f32.mrb[248].mxu1 }
0x143e   : > { %v10242_v3 = vadd.f32 %v10241_v58, %v9292_v59  ;;  %v10283_v46 = vadd.f32 %v10282_v37, %v9300_v43  ;;  %v10243_v35 = vpop.f32.mrb[229].mxu0  ;;  %v10284_v5 = vpop.f32.mrb[249].mxu1 }
0x143f   : > { %v10244_v8 = vadd.f32 %v10243_v35, %v9296_v62  ;;  %v10285_v9 = vadd.f32 %v10284_v5, %v9304_v0  ;;  %v10245_v13 = vpop.f32.mrb[230].mxu0  ;;  %v10286_v23 = vpop.f32.mrb[250].mxu1  ;;  %19102 = vmatpush3.bf16.msra.mxu0 %v20906_v60  ;;  %19124 = vmatpush3.bf16.msra.mxu1 %v20907_v1 }
0x1440   : > { %v10301_v6 = vmax.f32 %v10242_v3, 0.0  ;;  %v10303_v19 = vmax.f32 %v10283_v46, 0.0  ;;  %v10246_v25 = vpop.f32.mrb[231].mxu0  ;;  %v10287_v30 = vpop.f32.mrb[251].mxu1  ;;  %19103 = vmatprep.subr.bf16.mxu0 %v20908_v57  ;;  %19125 = vmatprep.subr.bf16.mxu1 %v20909_v29 }
0x1441   : > { %v10302_v36 = vmax.f32 %v10244_v8, 0.0  ;;  %v10304_v32 = vmax.f32 %v10285_v9, 0.0 }
0x1442   : > { %v10574_v34 = vpack.c.bf16 %v10301_v6, %v10301_v6  ;;  %v10576_v47 = vpack.c.bf16 %v10303_v19, %v10303_v19 }
0x1443   : > { %v10575_v33 = vpack.c.bf16 %v10302_v36, %v10302_v36  ;;  %v10577_v2 = vpack.c.bf16 %v10304_v32, %v10304_v32  ;;  %19104 = vmatpush3.bf16.msra.mxu0 %v20910_v24  ;;  %19126 = vmatpush3.bf16.msra.mxu1 %v20911_v55 }
0x1444   : > { %19995 = vmatprep.subr.bf16.mxu0 %v21949_v22  ;;  %20001 = vmatprep.subr.bf16.mxu1 %v21949_v22 }
0x1445   : > { %11626 = vmatprep.mubr.bf16.mxu0 %v10575_v33  ;;  %11666 = vmatprep.mubr.bf16.mxu1 %v10577_v2 }
0x1446   : > { %11627 = vmatmul.mubr.bf16.vlgmr.msra.gmra.mrb[244].mxu0 %v10574_v34  ;;  %11667 = vmatmul.mubr.bf16.vlgmr.msra.gmra.mrb[8].mxu1 %v10576_v47 }
0x1447   : > { %19997 = vmatprep.mubr.msk.bf16.mxu0 %vm21950_vm0, %v21949_v22  ;;  %20003 = vmatprep.mubr.msk.bf16.mxu1 %vm21950_vm0, %v21949_v22 }
0x14b9   : > { %v18973_v20 = vpop.f32.mrb[232].mxu0  ;;  %v18995_v16 = vpop.f32.mrb[252].mxu1 }
0x14ba   : > { %v18974_v21 = vpop.f32.mrb[233].mxu0  ;;  %v18996_v39 = vpop.f32.mrb[253].mxu1 }
0x14bb   : > { %v18975_v40 = vadd.f32 %v18974_v21, %v18973_v20  ;;  %v18997_v41 = vadd.f32 %v18996_v39, %v18995_v16  ;;  %v18976_v42 = vpop.f32.mrb[234].mxu0  ;;  %v18998_v26 = vpop.f32.mrb[254].mxu1  ;;  %v20912_v16 = vld [vmem:[#allocation8 + $0x80] sm:$0xff]  }
0x14bc   : > { %v18977_v63 = vpop.f32.mrb[235].mxu0  ;;  %v18999_v48 = vpop.f32.mrb[255].mxu1  ;;  %19996 = vmatpush3.bf16.xpose.msra.mxu0 %v20912_v16  ;;  %v18206_v26 = vld [vmem:[#allocation31 + $0x1] ss:$0 sm:$0xff] }
0x14bd   : > { %v11389_v49 = vadd.f32 %v18975_v40, %v18076_v31  ;;  %v20913_v31 = vld [vmem:[#allocation8 + $0x88] sm:$0xff]   ;;  %20007 = vmatprep.subr.bf16.mxu0 %v21949_v22 }
0x14be   : > { %20002 = vmatpush3.bf16.xpose.msra.mxu1 %v20913_v31 }
0x14bf   : > { %v11429_v44 = vadd.f32 %v18997_v41, %v11389_v49  ;;  %20013 = vmatprep.subr.bf16.mxu1 %v21949_v22  ;;  %v20914_v49 = vld [vmem:[#allocation8 + $0x90] sm:$0xff]  }
0x14d9   : > { %v19017_v12 = vpop.f32.mrb[236].mxu0  ;;  %v19039_v11 = vpop.f32.mrb[0].mxu1 }
0x14da   : > { %v19018_v50 = vpop.f32.mrb[237].mxu0  ;;  %v19040_v51 = vpop.f32.mrb[1].mxu1 }
0x14db   : > { %v19019_v38 = vadd.f32 %v19018_v50, %v19017_v12  ;;  %v19041_v27 = vadd.f32 %v19040_v51, %v19039_v11  ;;  %v19020_v52 = vpop.f32.mrb[238].mxu0  ;;  %v19042_v53 = vpop.f32.mrb[2].mxu1  ;;  %v20916_v11 = vld [vmem:[#allocation8 + $0xa0] sm:$0xff]   ;;  %v20917_v50 = vld [vmem:[#allocation8 + $0xa8] sm:$0xff]   ;;  %v20918_v51 = vld [vmem:[#allocation8 + $0xb0] sm:$0xff]  }
0x14dc   : > { %v19021_v54 = vpop.f32.mrb[239].mxu0  ;;  %v19043_v45 = vpop.f32.mrb[3].mxu1  ;;  %v20921_v52 = vld [vmem:[#allocation11 + $0x88] sm:$0xff]   ;;  %v20922_v53 = vld [vmem:[#allocation11 + $0x90] sm:$0xff]  }
0x14dd   : > { %v11469_v59 = vadd.f32 %v19019_v38, %v11429_v44  ;;  %v20915_v44 = vld [vmem:[#allocation8 + $0x98] sm:$0xff]   ;;  %v20923_v54 = vld [vmem:[#allocation11 + $0x98] sm:$0xff]  }
0x14de   : > { %v20919_v38 = vld [vmem:[#allocation8 + $0xb8] sm:$0xff]  }
0x14df   : > { %v11509_v43 = vadd.f32 %v19041_v27, %v11469_v59  ;;  %v20920_v27 = vld [vmem:[#allocation11 + $0x80] sm:$0xff]   ;;  %v20925_v59 = vld [vmem:[#allocation11 + $0xa8] sm:$0xff]  }
0x14e0   : > { %v20924_v45 = vld [vmem:[#allocation11 + $0xa0] sm:$0xff]  }
0x14f9   : > { %v19061_v62 = vpop.f32.mrb[240].mxu0  ;;  %v19083_v0 = vpop.f32.mrb[4].mxu1 }
0x14fa   : > { %v19062_v60 = vpop.f32.mrb[241].mxu0  ;;  %v19084_v1 = vpop.f32.mrb[5].mxu1 }
0x14fb   : > { %v19063_v57 = vadd.f32 %v19062_v60, %v19061_v62  ;;  %v19085_v29 = vadd.f32 %v19084_v1, %v19083_v0  ;;  %v19064_v58 = vpop.f32.mrb[242].mxu0  ;;  %v19086_v37 = vpop.f32.mrb[6].mxu1  ;;  %v20927_v62 = vld [vmem:[#allocation11 + $0xb8] sm:$0xff]   ;;  %v20929_v60 = vld [vmem:[#allocation14 + $0x88] sm:$0xff]   ;;  %v20930_v1 = vld [vmem:[#allocation14 + $0x90] sm:$0xff]  }
0x14fc   : > { %v19065_v3 = vpop.f32.mrb[243].mxu0  ;;  %v19087_v46 = vpop.f32.mrb[7].mxu1  ;;  %v20928_v0 = vld [vmem:[#allocation14 + $0x80] sm:$0xff]   ;;  %v20933_v58 = vld [vmem:[#allocation14 + $0xa8] sm:$0xff]   ;;  %v20934_v37 = vld [vmem:[#allocation14 + $0xb0] sm:$0xff]  }
0x14fd   : > { %v11549_v35 = vadd.f32 %v19063_v57, %v11509_v43  ;;  %v20926_v43 = vld [vmem:[#allocation11 + $0xb0] sm:$0xff]  }
0x14fe   : > { %v20931_v57 = vld [vmem:[#allocation14 + $0x98] sm:$0xff]  }
0x14ff   : > { %v11589_v5 = vadd.f32 %v19085_v29, %v11549_v35  ;;  %v20932_v29 = vld [vmem:[#allocation14 + $0xa0] sm:$0xff]   ;;  %v20935_v3 = vld [vmem:[#allocation14 + $0xb8] sm:$0xff]  }
0x1519   : > { %v19105_v8 = vpop.f32.mrb[244].mxu0  ;;  %v19127_v9 = vpop.f32.mrb[8].mxu1 }
0x151a   : > { %v19106_v13 = vpop.f32.mrb[245].mxu0  ;;  %v19128_v23 = vpop.f32.mrb[9].mxu1 }
0x151b   : > { %v19107_v24 = vadd.f32 %v19106_v13, %v19105_v8  ;;  %v19129_v55 = vadd.f32 %v19128_v23, %v19127_v9  ;;  %v19108_v6 = vpop.f32.mrb[246].mxu0  ;;  %v19130_v19 = vpop.f32.mrb[10].mxu1 }
0x151c   : > { %v19109_v25 = vpop.f32.mrb[247].mxu0  ;;  %v19131_v30 = vpop.f32.mrb[11].mxu1 }
0x151d   : > { %v11629_v36 = vadd.f32 %v19107_v24, %v11589_v5 }
0x151f   : > { %v11669_v32 = vadd.f32 %v19129_v55, %v11629_v36 }
0x1521   : > { %v11674_v33 = vadd.f32 %v11669_v32, %v23393_v56  ;;  %v18205_v56 = vld [vmem:[#allocation29 + $0x1] ss:$0 sm:$0xff] }
0x1523   : > { %11679 = vadd.xlane.f32.xlu0 %v11674_v33 }
0x15b0   : > { %v11680_v2 = vpop.xlane.xlu0 %11679 }
0x15b1   : > { %v11681_v34 = vmul.f32 0.0078125, %v11680_v2 }
0x15b3   : > { %v11682_v47 = vsub.f32 %v11674_v33, %v11681_v34 }
0x15b5   : > { %v11683_v20 = vmul.f32 %v11682_v47, %v11682_v47 }
0x15b7   : > { %11684 = vadd.xlane.f32.xlu1 %v11683_v20 }
0x1644   : > { %v11685_v21 = vpop.xlane.xlu1 %11684 }
0x1645   : > { %v11686_v39 = vmul.f32 0.0078125, %v11685_v21 }
0x1647   : > { %v11687_v40 = vadd.f32 1e-05, %v11686_v39 }
0x1649   : > { %21154 = vrsqrt.f32 %v11687_v40 }
0x1653   : > { %v21155_v41 = vpop.eup %21154 }
0x1654   : > { %v11689_v42 = vmul.f32 %v21155_v41, %v11682_v47 }
0x1656   : > { %v11696_v63 = vmul.f32 %v18205_v56, %v11689_v42 }
0x1658   : > { %v23458_v48 = vadd.f32 %v18206_v26, %v11696_v63 }
0x165a   : > { %v23462_v12 = vpack.c.bf16 %v23458_v48, %v23458_v48 }
0x165c   : > { %19998 = vmatmul.mubr.bf16.vlgmr.msra.gmra.mrb[248].mxu0 %v23462_v12  ;;  %20004 = vmatmul.mubr.bf16.vlgmr.msra.gmra.mrb[12].mxu1 %v23462_v12 }
0x165d   : > { %20008 = vmatpush3.bf16.xpose.msra.mxu0 %v20914_v49  ;;  %20014 = vmatpush3.bf16.xpose.msra.mxu1 %v20915_v44 }
0x165e   : > { %20009 = vmatprep.mubr.msk.bf16.mxu0 %vm21950_vm0, %v21949_v22  ;;  %20015 = vmatprep.mubr.msk.bf16.mxu1 %vm21950_vm0, %v21949_v22 }
0x165f   : > { %20019 = vmatprep.subr.bf16.mxu0 %v21949_v22  ;;  %20025 = vmatprep.subr.bf16.mxu1 %v21949_v22 }
0x1664   : > { %20010 = vmatmul.mubr.bf16.vlgmr.msra.gmra.mrb[252].mxu0 %v23462_v12  ;;  %20016 = vmatmul.mubr.bf16.vlgmr.msra.gmra.mrb[16].mxu1 %v23462_v12 }
0x1665   : > { %20020 = vmatpush3.bf16.xpose.msra.mxu0 %v20916_v11  ;;  %20026 = vmatpush3.bf16.xpose.msra.mxu1 %v20917_v50  ;;  %v18224_v11 = vld [vmem:[#allocation13 + $0x11] ss:$0 sm:$0xff] }
0x1666   : > { %20021 = vmatprep.mubr.msk.bf16.mxu0 %vm21950_vm0, %v21949_v22  ;;  %20027 = vmatprep.mubr.msk.bf16.mxu1 %vm21950_vm0, %v21949_v22 }
0x1667   : > { %20031 = vmatprep.subr.bf16.mxu0 %v21949_v22  ;;  %20037 = vmatprep.subr.bf16.mxu1 %v21949_v22 }
0x166c   : > { %20022 = vmatmul.mubr.bf16.vlgmr.msra.gmra.mrb[0].mxu0 %v23462_v12  ;;  %20028 = vmatmul.mubr.bf16.vlgmr.msra.gmra.mrb[20].mxu1 %v23462_v12 }
0x166d   : > { %20032 = vmatpush3.bf16.xpose.msra.mxu0 %v20918_v51  ;;  %20038 = vmatpush3.bf16.xpose.msra.mxu1 %v20919_v38 }
0x166e   : > { %20033 = vmatprep.mubr.msk.bf16.mxu0 %vm21950_vm0, %v21949_v22  ;;  %20039 = vmatprep.mubr.msk.bf16.mxu1 %vm21950_vm0, %v21949_v22 }
0x166f   : > { %20043 = vmatprep.subr.bf16.mxu0 %v21949_v22  ;;  %20049 = vmatprep.subr.bf16.mxu1 %v21949_v22 }
0x1674   : > { %20034 = vmatmul.mubr.bf16.vlgmr.msra.gmra.mrb[4].mxu0 %v23462_v12  ;;  %20040 = vmatmul.mubr.bf16.vlgmr.msra.gmra.mrb[24].mxu1 %v23462_v12 }
0x1675   : > { %20044 = vmatpush3.bf16.xpose.msra.mxu0 %v20920_v27  ;;  %20050 = vmatpush3.bf16.xpose.msra.mxu1 %v20921_v52 }
0x1676   : > { %20045 = vmatprep.mubr.msk.bf16.mxu0 %vm21950_vm0, %v21949_v22  ;;  %20051 = vmatprep.mubr.msk.bf16.mxu1 %vm21950_vm0, %v21949_v22 }
0x1677   : > { %20055 = vmatprep.subr.bf16.mxu0 %v21949_v22  ;;  %20061 = vmatprep.subr.bf16.mxu1 %v21949_v22 }
0x167c   : > { %20046 = vmatmul.mubr.bf16.vlgmr.msra.gmra.mrb[8].mxu0 %v23462_v12  ;;  %20052 = vmatmul.mubr.bf16.vlgmr.msra.gmra.mrb[28].mxu1 %v23462_v12 }
0x167d   : > { %20056 = vmatpush3.bf16.xpose.msra.mxu0 %v20922_v53  ;;  %20062 = vmatpush3.bf16.xpose.msra.mxu1 %v20923_v54 }
0x167e   : > { %20057 = vmatprep.mubr.msk.bf16.mxu0 %vm21950_vm0, %v21949_v22  ;;  %20063 = vmatprep.mubr.msk.bf16.mxu1 %vm21950_vm0, %v21949_v22 }
0x167f   : > { %20067 = vmatprep.subr.bf16.mxu0 %v21949_v22  ;;  %20073 = vmatprep.subr.bf16.mxu1 %v21949_v22 }
0x1684   : > { %20058 = vmatmul.mubr.bf16.vlgmr.msra.gmra.mrb[12].mxu0 %v23462_v12  ;;  %20064 = vmatmul.mubr.bf16.vlgmr.msra.gmra.mrb[32].mxu1 %v23462_v12 }
0x1685   : > { %20068 = vmatpush3.bf16.xpose.msra.mxu0 %v20924_v45  ;;  %20074 = vmatpush3.bf16.xpose.msra.mxu1 %v20925_v59 }
0x1686   : > { %20069 = vmatprep.mubr.msk.bf16.mxu0 %vm21950_vm0, %v21949_v22  ;;  %20075 = vmatprep.mubr.msk.bf16.mxu1 %vm21950_vm0, %v21949_v22 }
0x1687   : > { %20079 = vmatprep.subr.bf16.mxu0 %v21949_v22  ;;  %20085 = vmatprep.subr.bf16.mxu1 %v21949_v22 }
0x168c   : > { %20070 = vmatmul.mubr.bf16.vlgmr.msra.gmra.mrb[16].mxu0 %v23462_v12  ;;  %20076 = vmatmul.mubr.bf16.vlgmr.msra.gmra.mrb[36].mxu1 %v23462_v12 }
0x168d   : > { %20080 = vmatpush3.bf16.xpose.msra.mxu0 %v20926_v43  ;;  %20086 = vmatpush3.bf16.xpose.msra.mxu1 %v20927_v62 }
0x168e   : > { %20081 = vmatprep.mubr.msk.bf16.mxu0 %vm21950_vm0, %v21949_v22  ;;  %20087 = vmatprep.mubr.msk.bf16.mxu1 %vm21950_vm0, %v21949_v22 }
0x168f   : > { %20091 = vmatprep.subr.bf16.mxu0 %v21949_v22  ;;  %20097 = vmatprep.subr.bf16.mxu1 %v21949_v22 }
0x1694   : > { %20082 = vmatmul.mubr.bf16.vlgmr.msra.gmra.mrb[20].mxu0 %v23462_v12  ;;  %20088 = vmatmul.mubr.bf16.vlgmr.msra.gmra.mrb[40].mxu1 %v23462_v12 }
0x1695   : > { %20092 = vmatpush3.bf16.xpose.msra.mxu0 %v20928_v0  ;;  %20098 = vmatpush3.bf16.xpose.msra.mxu1 %v20929_v60  ;;  %v18207_v60 = vld [vmem:[#allocation10 + $0x10] ss:$0 sm:$0xff] }
0x1696   : > { %20093 = vmatprep.mubr.msk.bf16.mxu0 %vm21950_vm0, %v21949_v22  ;;  %20099 = vmatprep.mubr.msk.bf16.mxu1 %vm21950_vm0, %v21949_v22 }
0x1697   : > { %20103 = vmatprep.subr.bf16.mxu0 %v21949_v22  ;;  %20109 = vmatprep.subr.bf16.mxu1 %v21949_v22 }
0x169c   : > { %20094 = vmatmul.mubr.bf16.vlgmr.msra.gmra.mrb[24].mxu0 %v23462_v12  ;;  %20100 = vmatmul.mubr.bf16.vlgmr.msra.gmra.mrb[44].mxu1 %v23462_v12 }
0x169d   : > { %20104 = vmatpush3.bf16.xpose.msra.mxu0 %v20930_v1  ;;  %20110 = vmatpush3.bf16.xpose.msra.mxu1 %v20931_v57  ;;  %v18208_v1 = vld [vmem:[#allocation10 + $0x11] ss:$0 sm:$0xff] }
0x169e   : > { %20105 = vmatprep.mubr.msk.bf16.mxu0 %vm21950_vm0, %v21949_v22  ;;  %20111 = vmatprep.mubr.msk.bf16.mxu1 %vm21950_vm0, %v21949_v22 }
0x169f   : > { %20115 = vmatprep.subr.bf16.mxu0 %v21949_v22  ;;  %20121 = vmatprep.subr.bf16.mxu1 %v21949_v22 }
0x16a4   : > { %20106 = vmatmul.mubr.bf16.vlgmr.msra.gmra.mrb[28].mxu0 %v23462_v12  ;;  %20112 = vmatmul.mubr.bf16.vlgmr.msra.gmra.mrb[48].mxu1 %v23462_v12 }
0x16a5   : > { %20116 = vmatpush3.bf16.xpose.msra.mxu0 %v20932_v29  ;;  %20122 = vmatpush3.bf16.xpose.msra.mxu1 %v20933_v58  ;;  %v18225_v58 = vld [vmem:[#allocation13 + $0x12] ss:$0 sm:$0xff] }
0x16a6   : > { %20117 = vmatprep.mubr.msk.bf16.mxu0 %vm21950_vm0, %v21949_v22  ;;  %20123 = vmatprep.mubr.msk.bf16.mxu1 %vm21950_vm0, %v21949_v22 }
0x16a7   : > { %20127 = vmatprep.subr.bf16.mxu0 %v21949_v22  ;;  %20133 = vmatprep.subr.bf16.mxu1 %v21949_v22 }
0x16ac   : > { %20118 = vmatmul.mubr.bf16.vlgmr.msra.gmra.mrb[32].mxu0 %v23462_v12  ;;  %20124 = vmatmul.mubr.bf16.vlgmr.msra.gmra.mrb[52].mxu1 %v23462_v12 }
0x16ad   : > { %20128 = vmatpush3.bf16.xpose.msra.mxu0 %v20934_v37  ;;  %20134 = vmatpush3.bf16.xpose.msra.mxu1 %v20935_v3  ;;  %v18226_v37 = vld [vmem:[#allocation13 + $0x13] ss:$0 sm:$0xff] }
0x16ae   : > { %20129 = vmatprep.mubr.msk.bf16.mxu0 %vm21950_vm0, %v21949_v22  ;;  %20135 = vmatprep.mubr.msk.bf16.mxu1 %vm21950_vm0, %v21949_v22 }
0x16af   : > { %20139 = vmatprep.subr.bf16.mxu0 %v21949_v22  ;;  %20145 = vmatprep.subr.bf16.mxu1 %v21949_v22 }
0x16b4   : > { %20130 = vmatmul.mubr.bf16.vlgmr.msra.gmra.mrb[36].mxu0 %v23462_v12  ;;  %20136 = vmatmul.mubr.bf16.vlgmr.msra.gmra.mrb[56].mxu1 %v23462_v12  ;;  %v18223_v12 = vld [vmem:[#allocation13 + $0x10] ss:$0 sm:$0xff] }
0x16b5   : > { %20141 = vmatprep.mubr.msk.bf16.mxu0 %vm21950_vm0, %v21949_v22  ;;  %20147 = vmatprep.mubr.msk.bf16.mxu1 %vm21950_vm0, %v21949_v22 }
0x172f   : > { %v11819_v46 = vpop.f32.mrb[248].mxu0  ;;  %v11865_v35 = vpop.f32.mrb[12].mxu1 }
0x1730   : > { %v19999_v5 = vpop.f32.mrb[249].mxu0  ;;  %v20005_v8 = vpop.f32.mrb[13].mxu1  ;;  %v11820_v3 = vadd.f32 %v18207_v60, %v11819_v46  ;;  %v18209_v46 = vld [vmem:[#allocation10 + $0x12] ss:$0 sm:$0xff]  ;;  %v18230_v60 = vld [vmem:[#allocation13 + $0x17] ss:$0 sm:$0xff] }
0x1731   : > { %v11822_v9 = vpop.f32.mrb[250].mxu0  ;;  %v11868_v13 = vpop.f32.mrb[14].mxu1  ;;  %v11866_v5 = vadd.f32 %v18208_v1, %v11865_v35  ;;  %v18210_v35 = vld [vmem:[#allocation10 + $0x13] ss:$0 sm:$0xff] }
0x1732   : > { %v20000_v23 = vpop.f32.mrb[251].mxu0  ;;  %v20006_v24 = vpop.f32.mrb[15].mxu1 }
0x1737   : > { %v23558_v55 = vpop.f32.mrb[252].mxu0  ;;  %v23560_v6 = vpop.f32.mrb[16].mxu1 }
0x1738   : > { %v20011_v19 = vpop.f32.mrb[253].mxu0  ;;  %v20017_v25 = vpop.f32.mrb[17].mxu1 }
0x1739   : > { %v11914_v30 = vpop.f32.mrb[254].mxu0  ;;  %v11960_v36 = vpop.f32.mrb[18].mxu1 }
0x173a   : > { %v20012_v32 = vpop.f32.mrb[255].mxu0  ;;  %v20018_v33 = vpop.f32.mrb[19].mxu1  ;;  %v13031_v36 = vpack.c.bf16 %v11820_v3, %v11820_v3 }
0x173b   : > { %v13032_v32 = vpack.c.bf16 %v11866_v5, %v11866_v5 }
0x173f   : > { %v23562_v2 = vpop.f32.mrb[0].mxu0  ;;  %v23564_v34 = vpop.f32.mrb[20].mxu1 }
0x1740   : > { %v20023_v47 = vpop.f32.mrb[1].mxu0  ;;  %v20029_v20 = vpop.f32.mrb[21].mxu1 }
0x1741   : > { %v12006_v16 = vpop.f32.mrb[2].mxu0  ;;  %v12052_v31 = vpop.f32.mrb[22].mxu1 }
0x1742   : > { %v20024_v21 = vpop.f32.mrb[3].mxu0  ;;  %v20030_v39 = vpop.f32.mrb[23].mxu1 }
0x1743   : > { %v18227_v39 = vld [vmem:[#allocation13 + $0x14] ss:$0 sm:$0xff] }
0x1747   : > { %v23566_v40 = vpop.f32.mrb[4].mxu0  ;;  %v23568_v41 = vpop.f32.mrb[24].mxu1 }
0x1748   : > { %v20035_v56 = vpop.f32.mrb[5].mxu0  ;;  %v20041_v42 = vpop.f32.mrb[25].mxu1 }
0x1749   : > { %v12098_v26 = vpop.f32.mrb[6].mxu0  ;;  %v12144_v63 = vpop.f32.mrb[26].mxu1  ;;  %v18228_v56 = vld [vmem:[#allocation13 + $0x15] ss:$0 sm:$0xff]  ;;  %v11912_v42 = vadd.f32 %v18209_v46, %v23558_v55 }
0x174a   : > { %v20036_v49 = vpop.f32.mrb[7].mxu0  ;;  %v20042_v44 = vpop.f32.mrb[27].mxu1  ;;  %v11958_v26 = vadd.f32 %v18210_v35, %v23560_v6 }
0x174c   : > { %v13034_v6 = vpack.c.bf16 %v11958_v26, %v11958_v26 }
0x174f   : > { %v12261_v50 = vpop.f32.mrb[8].mxu0  ;;  %v12307_v51 = vpop.f32.mrb[28].mxu1 }
0x1750   : > { %v12262_v38 = vadd.f32 %v18223_v12, %v12261_v50  ;;  %v12308_v27 = vadd.f32 %v18224_v11, %v12307_v51  ;;  %v20047_v52 = vpop.f32.mrb[9].mxu0  ;;  %v20053_v53 = vpop.f32.mrb[29].mxu1 }
0x1751   : > { %v12264_v54 = vpop.f32.mrb[10].mxu0  ;;  %v12310_v45 = vpop.f32.mrb[30].mxu1 }
0x1752   : > { %v13039_v59 = vpack.c.bf16 %v12262_v38, %v12262_v38  ;;  %v13040_v43 = vpack.c.bf16 %v12308_v27, %v12308_v27  ;;  %v20048_v62 = vpop.f32.mrb[11].mxu0  ;;  %v20054_v0 = vpop.f32.mrb[31].mxu1  ;;  %v13033_v38 = vpack.c.bf16 %v11912_v42, %v11912_v42  ;;  %v18211_v45 = vld [vmem:[#allocation10 + $0x14] ss:$0 sm:$0xff] }
0x1753   : > { %v18229_v0 = vld [vmem:[#allocation13 + $0x16] ss:$0 sm:$0xff]  ;;  %v12004_v1 = vadd.f32 %v18211_v45, %v23562_v2 }
0x1754   : > { %v13051_v57 = vsel %vm2565_vm1, %v13039_v59, 0  ;;  %v13097_v29 = vsel %vm2565_vm1, %v13040_v43, 0  ;;  %v18212_v59 = vld [vmem:[#allocation10 + $0x15] ss:$0 sm:$0xff] }
0x1755   : > { %20140 = vmatpush3.bf16.xpose.msra.mxu0 %v13051_v57  ;;  %20146 = vmatpush3.bf16.xpose.msra.mxu1 %v13097_v29  ;;  %v12050_v57 = vadd.f32 %v18212_v59, %v23564_v34 }
0x1756   : > { %20151 = vmatprep.subr.bf16.mxu0 %v21949_v22  ;;  %20157 = vmatprep.subr.bf16.mxu1 %v21949_v22 }
0x1757   : > { %v12353_v8 = vpop.f32.mrb[12].mxu0  ;;  %v12399_v9 = vpop.f32.mrb[32].mxu1  ;;  %v13036_v34 = vpack.c.bf16 %v12050_v57, %v12050_v57 }
0x1758   : > { %v12354_v13 = vadd.f32 %v18225_v58, %v12353_v8  ;;  %v12400_v23 = vadd.f32 %v18226_v37, %v12399_v9  ;;  %v20059_v24 = vpop.f32.mrb[13].mxu0  ;;  %v20065_v19 = vpop.f32.mrb[33].mxu1 }
0x1759   : > { %v12356_v25 = vpop.f32.mrb[14].mxu0  ;;  %v12402_v30 = vpop.f32.mrb[34].mxu1 }
0x175a   : > { %v13041_v33 = vpack.c.bf16 %v12354_v13, %v12354_v13  ;;  %v13042_v47 = vpack.c.bf16 %v12400_v23, %v12400_v23  ;;  %v20060_v20 = vpop.f32.mrb[15].mxu0  ;;  %v20066_v16 = vpop.f32.mrb[35].mxu1  ;;  %v13035_v13 = vpack.c.bf16 %v12004_v1, %v12004_v1  ;;  %v18213_v30 = vld [vmem:[#allocation10 + $0x16] ss:$0 sm:$0xff] }
0x175b   : > { %v18240_v20 = vld [vmem:[#allocation16 + $0x11] ss:$0 sm:$0xff]  ;;  %v12096_v16 = vadd.f32 %v18213_v30, %v23566_v40 }
0x175c   : > { %v13143_v31 = vsel %vm2565_vm1, %v13041_v33, 0  ;;  %v13189_v21 = vsel %vm2565_vm1, %v13042_v47, 0  ;;  %20142 = vmatmul.mubr.msk.bf16.vlgmr.msra.gmra.mrb[40].mxu0 %vm2565_vm1, %v13031_v36  ;;  %20148 = vmatmul.mubr.msk.bf16.vlgmr.msra.gmra.mrb[60].mxu1 %vm2565_vm1, %v13032_v32  ;;  %v18214_v36 = vld [vmem:[#allocation10 + $0x17] ss:$0 sm:$0xff]  ;;  %v18239_v47 = vld [vmem:[#allocation16 + $0x10] ss:$0 sm:$0xff] }
0x175d   : > { %20152 = vmatpush3.bf16.xpose.msra.mxu0 %v13143_v31  ;;  %20158 = vmatpush3.bf16.xpose.msra.mxu1 %v13189_v21  ;;  %v12142_v46 = vadd.f32 %v18214_v36, %v23568_v41 }
0x175e   : > { %20153 = vmatprep.mubr.msk.bf16.mxu0 %vm21950_vm0, %v21949_v22  ;;  %20159 = vmatprep.mubr.msk.bf16.mxu1 %vm21950_vm0, %v21949_v22 }
0x175f   : > { %v12445_v63 = vpop.f32.mrb[16].mxu0  ;;  %v12491_v49 = vpop.f32.mrb[36].mxu1  ;;  %20163 = vmatprep.subr.bf16.mxu0 %v21949_v22  ;;  %20169 = vmatprep.subr.bf16.mxu1 %v21949_v22  ;;  %v13038_v41 = vpack.c.bf16 %v12142_v46, %v12142_v46 }
0x1760   : > { %v12446_v44 = vadd.f32 %v18227_v39, %v12445_v63  ;;  %v12492_v12 = vadd.f32 %v18228_v56, %v12491_v49  ;;  %v20071_v11 = vpop.f32.mrb[17].mxu0  ;;  %v20077_v50 = vpop.f32.mrb[37].mxu1  ;;  %v13037_v63 = vpack.c.bf16 %v12096_v16, %v12096_v16 }
0x1761   : > { %v12448_v51 = vpop.f32.mrb[18].mxu0  ;;  %v12494_v55 = vpop.f32.mrb[38].mxu1 }
0x1762   : > { %v13043_v27 = vpack.c.bf16 %v12446_v44, %v12446_v44  ;;  %v13044_v52 = vpack.c.bf16 %v12492_v12, %v12492_v12  ;;  %v20072_v53 = vpop.f32.mrb[19].mxu0  ;;  %v20078_v54 = vpop.f32.mrb[39].mxu1 }
0x1764   : > { %v13235_v43 = vsel %vm2565_vm1, %v13043_v27, 0  ;;  %v13281_v62 = vsel %vm2565_vm1, %v13044_v52, 0  ;;  %20154 = vmatmul.mubr.msk.bf16.vlgmr.msra.gmra.mrb[44].mxu0 %vm2565_vm1, %v13033_v38  ;;  %20160 = vmatmul.mubr.msk.bf16.vlgmr.msra.gmra.mrb[64].mxu1 %vm2565_vm1, %v13034_v6 }
0x1765   : > { %20164 = vmatpush3.bf16.xpose.msra.mxu0 %v13235_v43  ;;  %20170 = vmatpush3.bf16.xpose.msra.mxu1 %v13281_v62 }
0x1766   : > { %20165 = vmatprep.mubr.msk.bf16.mxu0 %vm21950_vm0, %v21949_v22  ;;  %20171 = vmatprep.mubr.msk.bf16.mxu1 %vm21950_vm0, %v21949_v22 }
0x1767   : > { %v12537_v29 = vpop.f32.mrb[20].mxu0  ;;  %v12583_v58 = vpop.f32.mrb[40].mxu1  ;;  %20175 = vmatprep.subr.bf16.mxu0 %v21949_v22  ;;  %20181 = vmatprep.subr.bf16.mxu1 %v21949_v22 }
0x1768   : > { %v12538_v37 = vadd.f32 %v18229_v0, %v12537_v29  ;;  %v12584_v3 = vadd.f32 %v18230_v60, %v12583_v58  ;;  %v20083_v5 = vpop.f32.mrb[21].mxu0  ;;  %v20089_v8 = vpop.f32.mrb[41].mxu1 }
0x1769   : > { %v12540_v9 = vpop.f32.mrb[22].mxu0  ;;  %v12586_v2 = vpop.f32.mrb[42].mxu1 }
0x176a   : > { %v13045_v23 = vpack.c.bf16 %v12538_v37, %v12538_v37  ;;  %v13046_v24 = vpack.c.bf16 %v12584_v3, %v12584_v3  ;;  %v20084_v19 = vpop.f32.mrb[23].mxu0  ;;  %v20090_v25 = vpop.f32.mrb[43].mxu1 }
0x176c   : > { %v13327_v32 = vsel %vm2565_vm1, %v13045_v23, 0  ;;  %v13373_v33 = vsel %vm2565_vm1, %v13046_v24, 0  ;;  %20166 = vmatmul.mubr.msk.bf16.vlgmr.msra.gmra.mrb[48].mxu0 %vm2565_vm1, %v13035_v13  ;;  %20172 = vmatmul.mubr.msk.bf16.vlgmr.msra.gmra.mrb[68].mxu1 %vm2565_vm1, %v13036_v34 }
0x176d   : > { %20176 = vmatpush3.bf16.xpose.msra.mxu0 %v13327_v32  ;;  %20182 = vmatpush3.bf16.xpose.msra.mxu1 %v13373_v33 }
0x176e   : > { %20177 = vmatprep.mubr.msk.bf16.mxu0 %vm21950_vm0, %v21949_v22  ;;  %20183 = vmatprep.mubr.msk.bf16.mxu1 %vm21950_vm0, %v21949_v22 }
0x176f   : > { %v12703_v35 = vpop.f32.mrb[24].mxu0  ;;  %v12749_v31 = vpop.f32.mrb[44].mxu1  ;;  %20187 = vmatprep.subr.bf16.mxu0 %v21949_v22  ;;  %20193 = vmatprep.subr.bf16.mxu1 %v21949_v22 }
0x1770   : > { %v12704_v21 = vadd.f32 %v18239_v47, %v12703_v35  ;;  %v12750_v39 = vadd.f32 %v18240_v20, %v12749_v31  ;;  %v20095_v56 = vpop.f32.mrb[25].mxu0  ;;  %v20101_v42 = vpop.f32.mrb[45].mxu1 }
0x1771   : > { %v12706_v26 = vpop.f32.mrb[26].mxu0  ;;  %v12752_v40 = vpop.f32.mrb[46].mxu1 }
0x1772   : > { %v13511_v49 = vpack.c.bf16 %v12704_v21, %v12704_v21  ;;  %v13512_v44 = vpack.c.bf16 %v12750_v39, %v12750_v39  ;;  %v20096_v12 = vpop.f32.mrb[27].mxu0  ;;  %v20102_v11 = vpop.f32.mrb[47].mxu1 }
0x1774   : > { %v13523_v50 = vsel %vm3042_vm2, %v13511_v49, 0  ;;  %v13569_v51 = vsel %vm3042_vm2, %v13512_v44, 0  ;;  %20178 = vmatmul.mubr.msk.bf16.vlgmr.msra.gmra.mrb[52].mxu0 %vm2565_vm1, %v13037_v63  ;;  %20184 = vmatmul.mubr.msk.bf16.vlgmr.msra.gmra.mrb[72].mxu1 %vm2565_vm1, %v13038_v41 }
0x1775   : > { %20188 = vmatpush3.bf16.msra.mxu0 %v13523_v50  ;;  %20194 = vmatpush3.bf16.msra.mxu1 %v13569_v51 }
0x1776   : > { %20189 = vmatprep.mubr.msk.bf16.mxu0 %vm21950_vm0, %v21949_v22  ;;  %20195 = vmatprep.mubr.msk.bf16.mxu1 %vm21950_vm0, %v21949_v22 }
0x1777   : > { %v23618_v55 = vpop.f32.mrb[28].mxu0  ;;  %v23620_v38 = vpop.f32.mrb[48].mxu1  ;;  %20199 = vmatprep.subr.bf16.mxu0 %v21949_v22  ;;  %20205 = vmatprep.subr.bf16.mxu1 %v21949_v22 }
0x1778   : > { %v20107_v6 = vpop.f32.mrb[29].mxu0  ;;  %v20113_v27 = vpop.f32.mrb[49].mxu1 }
0x1779   : > { %v12798_v52 = vpop.f32.mrb[30].mxu0  ;;  %v12844_v53 = vpop.f32.mrb[50].mxu1 }
0x177a   : > { %v20108_v54 = vpop.f32.mrb[31].mxu0  ;;  %v20114_v45 = vpop.f32.mrb[51].mxu1 }
0x177f   : > { %v23624_v59 = vpop.f32.mrb[32].mxu0  ;;  %v23626_v43 = vpop.f32.mrb[52].mxu1 }
0x1780   : > { %v20119_v62 = vpop.f32.mrb[33].mxu0  ;;  %v20125_v0 = vpop.f32.mrb[53].mxu1 }
0x1781   : > { %v12890_v60 = vpop.f32.mrb[34].mxu0  ;;  %v12936_v1 = vpop.f32.mrb[54].mxu1 }
0x1782   : > { %v20120_v57 = vpop.f32.mrb[35].mxu0  ;;  %v20126_v29 = vpop.f32.mrb[55].mxu1 }
0x1787   : > { %v23628_v58 = vpop.f32.mrb[36].mxu0  ;;  %v23630_v37 = vpop.f32.mrb[56].mxu1 }
0x1788   : > { %v20131_v3 = vpop.f32.mrb[37].mxu0  ;;  %v20137_v5 = vpop.f32.mrb[57].mxu1 }
0x1789   : > { %v12982_v8 = vpop.f32.mrb[38].mxu0  ;;  %v13028_v9 = vpop.f32.mrb[58].mxu1 }
0x178a   : > { %v20132_v2 = vpop.f32.mrb[39].mxu0  ;;  %v20138_v13 = vpop.f32.mrb[59].mxu1 }
0x182f   : > { %v13087_v34 = vpop.f32.mrb[40].mxu0  ;;  %v13133_v23 = vpop.f32.mrb[60].mxu1 }
0x1830   : > { %v20143_v24 = vpop.f32.mrb[41].mxu0  ;;  %v20149_v19 = vpop.f32.mrb[61].mxu1  ;;  %v13418_v25 = vsel %vm2934_vm3, %v13133_v23, -inf  ;;  %v13415_v30 = vsel %vm2934_vm3, %v13087_v34, -inf }
0x1831   : > { %13419 = vmax.xlane.f32.xlu1 %v13418_v25  ;;  %v13136_v36 = vpop.f32.mrb[62].mxu1  ;;  %13416 = vmax.xlane.f32.xlu0 %v13415_v30  ;;  %v13090_v32 = vpop.f32.mrb[42].mxu0 }
0x1832   : > { %v20144_v33 = vpop.f32.mrb[43].mxu0  ;;  %v20150_v47 = vpop.f32.mrb[63].mxu1 }
0x1837   : > { %v13179_v20 = vpop.f32.mrb[44].mxu0  ;;  %v13225_v16 = vpop.f32.mrb[64].mxu1 }
0x1838   : > { %v20155_v46 = vpop.f32.mrb[45].mxu0  ;;  %v20161_v35 = vpop.f32.mrb[65].mxu1  ;;  %v13424_v31 = vsel %vm2934_vm3, %v13225_v16, -inf  ;;  %v13421_v21 = vsel %vm2934_vm3, %v13179_v20, -inf }
0x1839   : > { %13425 = vmax.xlane.f32.xlu1 %v13424_v31  ;;  %v13228_v39 = vpop.f32.mrb[66].mxu1  ;;  %13422 = vmax.xlane.f32.xlu0 %v13421_v21  ;;  %v13182_v56 = vpop.f32.mrb[46].mxu0 }
0x183a   : > { %v20156_v42 = vpop.f32.mrb[47].mxu0  ;;  %v20162_v26 = vpop.f32.mrb[67].mxu1 }
0x183f   : > { %v13271_v40 = vpop.f32.mrb[48].mxu0  ;;  %v13317_v63 = vpop.f32.mrb[68].mxu1 }
0x1840   : > { %v20167_v41 = vpop.f32.mrb[49].mxu0  ;;  %v20173_v49 = vpop.f32.mrb[69].mxu1  ;;  %v13430_v44 = vsel %vm2934_vm3, %v13317_v63, -inf  ;;  %v13427_v12 = vsel %vm2934_vm3, %v13271_v40, -inf }
0x1841   : > { %13431 = vmax.xlane.f32.xlu1 %v13430_v44  ;;  %v13320_v11 = vpop.f32.mrb[70].mxu1  ;;  %13428 = vmax.xlane.f32.xlu0 %v13427_v12  ;;  %v13274_v50 = vpop.f32.mrb[50].mxu0 }
0x1842   : > { %v20168_v51 = vpop.f32.mrb[51].mxu0  ;;  %v20174_v6 = vpop.f32.mrb[71].mxu1 }
0x1847   : > { %v13363_v27 = vpop.f32.mrb[52].mxu0  ;;  %v13409_v52 = vpop.f32.mrb[72].mxu1 }
0x1848   : > { %v20179_v53 = vpop.f32.mrb[53].mxu0  ;;  %v20185_v54 = vpop.f32.mrb[73].mxu1  ;;  %v13436_v45 = vsel %vm2934_vm3, %v13409_v52, -inf  ;;  %v13433_v62 = vsel %vm2934_vm3, %v13363_v27, -inf }
0x1849   : > { %13437 = vmax.xlane.f32.xlu1 %v13436_v45  ;;  %v13412_v0 = vpop.f32.mrb[74].mxu1  ;;  %13434 = vmax.xlane.f32.xlu0 %v13433_v62  ;;  %v13366_v60 = vpop.f32.mrb[54].mxu0  ;;  %v18242_v62 = vld [vmem:[#allocation16 + $0x13] ss:$0 sm:$0xff] }
0x184a   : > { %v20180_v1 = vpop.f32.mrb[55].mxu0  ;;  %v20186_v57 = vpop.f32.mrb[75].mxu1  ;;  %v18241_v0 = vld [vmem:[#allocation16 + $0x12] ss:$0 sm:$0xff]  ;;  %v12842_v60 = vadd.f32 %v18242_v62, %v23620_v38 }
0x184b   : > { %v12796_v57 = vadd.f32 %v18241_v0, %v23618_v55  ;;  %v20937_v0 = vld [vmem:[#allocation17 + $0x88] sm:$0xff]  }
0x18be   : > { %v13420_v29 = vpop.xlane.xlu1 %13419  ;;  %v13417_v3 = vpop.xlane.xlu0 %13416 }
0x18bf   : > { %v13440_v5 = vsub.f32 %v13133_v23, %v13420_v29  ;;  %v13439_v8 = vsub.f32 %v13087_v34, %v13417_v3 }
0x18c1   : > { %v13449_v9 = vmul.f32 1.442695, %v13440_v5  ;;  %v13447_v2 = vmul.f32 1.442695, %v13439_v8  ;;  %v13514_v8 = vpack.c.bf16 %v12842_v60, %v12842_v60 }
0x18c3   : > { %21156 = vpow2.f32 %v13449_v9 }
0x18c4   : > { %21158 = vpow2.f32 %v13447_v2  ;;  %v13513_v2 = vpack.c.bf16 %v12796_v57, %v12796_v57 }
0x18c6   : > { %v13426_v13 = vpop.xlane.xlu1 %13425  ;;  %v13423_v24 = vpop.xlane.xlu0 %13422 }
0x18c7   : > { %v13442_v19 = vsub.f32 %v13225_v16, %v13426_v13  ;;  %v13441_v25 = vsub.f32 %v13179_v20, %v13423_v24  ;;  %v18244_v13 = vld [vmem:[#allocation16 + $0x15] ss:$0 sm:$0xff] }
0x18c8   : > { %v12934_v38 = vadd.f32 %v18244_v13, %v23626_v43 }
0x18c9   : > { %v13453_v30 = vmul.f32 1.442695, %v13442_v19  ;;  %v13451_v36 = vmul.f32 1.442695, %v13441_v25  ;;  %v18243_v19 = vld [vmem:[#allocation16 + $0x14] ss:$0 sm:$0xff] }
0x18cb   : > { %21160 = vpow2.f32 %v13453_v30 }
0x18cc   : > { %21162 = vpow2.f32 %v13451_v36  ;;  %v13661_v36 = vsel %vm3042_vm2, %v13514_v8, 0  ;;  %v20938_v8 = vld [vmem:[#allocation17 + $0x90] sm:$0xff]  }
0x18cd   : > { %v21157_v32 = vpop.eup %21156 }
0x18ce   : > { %v21159_v33 = vpop.eup %21158  ;;  %v13432_v47 = vpop.xlane.xlu1 %13431  ;;  %v13466_v35 = vsel %vm2934_vm3, %v21157_v32, 0.0 }
0x18cf   : > { %v13429_v46 = vpop.xlane.xlu0 %13428  ;;  %v13444_v23 = vsub.f32 %v13317_v63, %v13432_v47  ;;  %13467 = vadd.xlane.f32.xlu1 %v13466_v35  ;;  %v13463_v31 = vsel %vm2934_vm3, %v21159_v33, 0.0  ;;  %v13615_v47 = vsel %vm3042_vm2, %v13513_v2, 0  ;;  %v13516_v35 = vpack.c.bf16 %v12934_v38, %v12934_v38 }
0x18d0   : > { %v13443_v34 = vsub.f32 %v13271_v40, %v13429_v46  ;;  %13464 = vadd.xlane.f32.xlu0 %v13463_v31  ;;  %v12888_v46 = vadd.f32 %v18243_v19, %v23624_v59 }
0x18d1   : > { %v13457_v21 = vmul.f32 1.442695, %v13444_v23 }
0x18d2   : > { %v13455_v39 = vmul.f32 1.442695, %v13443_v34  ;;  %v13515_v23 = vpack.c.bf16 %v12888_v46, %v12888_v46  ;;  %v18246_v34 = vld [vmem:[#allocation16 + $0x17] ss:$0 sm:$0xff]  ;;  %v20940_v46 = vld [vmem:[#allocation17 + $0xa0] sm:$0xff]  }
0x18d3   : > { %21164 = vpow2.f32 %v13457_v21  ;;  %v18245_v21 = vld [vmem:[#allocation16 + $0x16] ss:$0 sm:$0xff] }
0x18d4   : > { %21166 = vpow2.f32 %v13455_v39 }
0x18d5   : > { %v23642_v20 = vpop.eup %21160 }
0x18d6   : > { %v23644_v16 = vpop.eup %21162  ;;  %v13438_v56 = vpop.xlane.xlu1 %13437  ;;  %v13472_v26 = vsel %vm2934_vm3, %v23642_v20, 0.0 }
0x18d7   : > { %v13435_v42 = vpop.xlane.xlu0 %13434  ;;  %v13446_v41 = vsub.f32 %v13409_v52, %v13438_v56  ;;  %13473 = vadd.xlane.f32.xlu1 %v13472_v26  ;;  %v13469_v40 = vsel %vm2934_vm3, %v23644_v16, 0.0  ;;  %v13026_v26 = vadd.f32 %v18246_v34, %v23630_v37 }
0x18d8   : > { %v13445_v63 = vsub.f32 %v13363_v27, %v13435_v42  ;;  %13470 = vadd.xlane.f32.xlu0 %v13469_v40  ;;  %v13753_v42 = vsel %vm3042_vm2, %v13516_v35, 0 }
0x18d9   : > { %v13461_v49 = vmul.f32 1.442695, %v13446_v41 }
0x18da   : > { %v13459_v44 = vmul.f32 1.442695, %v13445_v63  ;;  %v13707_v63 = vsel %vm3042_vm2, %v13515_v23, 0 }
0x18db   : > { %21168 = vpow2.f32 %v13461_v49  ;;  %v13518_v49 = vpack.c.bf16 %v13026_v26, %v13026_v26 }
0x18dc   : > { %21170 = vpow2.f32 %v13459_v44 }
0x18dd   : > { %v23650_v12 = vpop.eup %21164 }
0x18de   : > { %v23652_v11 = vpop.eup %21166  ;;  %v13478_v50 = vsel %vm2934_vm3, %v23650_v12, 0.0 }
0x18df   : > { %13479 = vadd.xlane.f32.xlu1 %v13478_v50  ;;  %v13475_v51 = vsel %vm2934_vm3, %v23652_v11, 0.0 }
0x18e0   : > { %13476 = vadd.xlane.f32.xlu0 %v13475_v51 }
0x18e5   : > { %v23658_v6 = vpop.eup %21168 }
0x18e6   : > { %v23660_v27 = vpop.eup %21170  ;;  %v13484_v52 = vsel %vm2934_vm3, %v23658_v6, 0.0 }
0x18e7   : > { %13485 = vadd.xlane.f32.xlu1 %v13484_v52  ;;  %v13481_v53 = vsel %vm2934_vm3, %v23660_v27, 0.0 }
0x18e8   : > { %13482 = vadd.xlane.f32.xlu0 %v13481_v53  ;;  %v13845_v53 = vsel %vm3042_vm2, %v13518_v49, 0 }
0x195c   : > { %v13468_v54 = vpop.xlane.xlu1 %13467 }
0x195d   : > { %21172 = vrcp.f32 %v13468_v54  ;;  %v13465_v45 = vpop.xlane.xlu0 %13464 }
0x195e   : > { %21174 = vrcp.f32 %v13465_v45 }
0x1964   : > { %v13474_v1 = vpop.xlane.xlu1 %13473 }
0x1965   : > { %21176 = vrcp.f32 %v13474_v1  ;;  %v13471_v29 = vpop.xlane.xlu0 %13470  ;;  %v20936_v1 = vld [vmem:[#allocation17 + $0x80] sm:$0xff]  }
0x1966   : > { %21178 = vrcp.f32 %v13471_v29 }
0x1967   : > { %v21173_v3 = vpop.eup %21172 }
0x1968   : > { %v21175_v5 = vpop.eup %21174  ;;  %v13490_v9 = vmul.f32 %v21173_v3, %v21157_v32 }
0x1969   : > { %v13488_v24 = vmul.f32 %v21175_v5, %v21159_v33 }
0x196a   : > { %v13504_v25 = vpack.c.bf16 %v13490_v9, %v13490_v9 }
0x196b   : > { %v13503_v30 = vpack.c.bf16 %v13488_v24, %v13488_v24 }
0x196c   : > { %20196 = vmatmul.mubr.msk.bf16.vlgmr.msra.gmra.mrb[76].mxu1 %vm2934_vm3, %v13504_v25  ;;  %v13480_v55 = vpop.xlane.xlu1 %13479 }
0x196d   : > { %20206 = vmatpush3.bf16.msra.mxu1 %v13661_v36  ;;  %21180 = vrcp.f32 %v13480_v55  ;;  %20190 = vmatmul.mubr.msk.bf16.vlgmr.msra.gmra.mrb[56].mxu0 %vm2934_vm3, %v13503_v30  ;;  %v13477_v32 = vpop.xlane.xlu0 %13476  ;;  %v20941_v36 = vld [vmem:[#allocation17 + $0xa8] sm:$0xff]  }
0x196e   : > { %20200 = vmatpush3.bf16.msra.mxu0 %v13615_v47  ;;  %21182 = vrcp.f32 %v13477_v32  ;;  %20201 = vmatprep.mubr.msk.bf16.mxu0 %vm21950_vm0, %v21949_v22 }
0x196f   : > { %v21177_v33 = vpop.eup %21176  ;;  %20207 = vmatprep.mubr.msk.bf16.mxu1 %vm21950_vm0, %v21949_v22  ;;  %20211 = vmatprep.subr.bf16.mxu0 %v21949_v22 }
0x1970   : > { %v21179_v43 = vpop.eup %21178  ;;  %v13494_v59 = vmul.f32 %v21177_v33, %v23642_v20  ;;  %20217 = vmatprep.subr.bf16.mxu1 %v21949_v22  ;;  %v12980_v20 = vadd.f32 %v18245_v21, %v23628_v58 }
0x1971   : > { %v13492_v31 = vmul.f32 %v21179_v43, %v23644_v16 }
0x1972   : > { %v13506_v39 = vpack.c.bf16 %v13494_v59, %v13494_v59  ;;  %v13517_v44 = vpack.c.bf16 %v12980_v20, %v12980_v20 }
0x1973   : > { %v13505_v56 = vpack.c.bf16 %v13492_v31, %v13492_v31  ;;  %v20943_v31 = vld [vmem:[#allocation17 + $0xb8] sm:$0xff]  }
0x1974   : > { %20208 = vmatmul.mubr.msk.bf16.vlgmr.msra.gmra.mrb[80].mxu1 %vm2934_vm3, %v13506_v39  ;;  %v13486_v41 = vpop.xlane.xlu1 %13485  ;;  %v13799_v54 = vsel %vm3042_vm2, %v13517_v44, 0 }
0x1975   : > { %20218 = vmatpush3.bf16.msra.mxu1 %v13753_v42  ;;  %21184 = vrcp.f32 %v13486_v41  ;;  %20202 = vmatmul.mubr.msk.bf16.vlgmr.msra.gmra.mrb[60].mxu0 %vm2934_vm3, %v13505_v56  ;;  %v13483_v40 = vpop.xlane.xlu0 %13482  ;;  %v20942_v42 = vld [vmem:[#allocation17 + $0xb0] sm:$0xff]  }
0x1976   : > { %20212 = vmatpush3.bf16.msra.mxu0 %v13707_v63  ;;  %21186 = vrcp.f32 %v13483_v40  ;;  %20213 = vmatprep.mubr.msk.bf16.mxu0 %vm21950_vm0, %v21949_v22 }
0x1977   : > { %v21181_v16 = vpop.eup %21180  ;;  %20219 = vmatprep.mubr.msk.bf16.mxu1 %vm21950_vm0, %v21949_v22  ;;  %20223 = vmatprep.subr.bf16.mxu0 %v21949_v22 }
0x1978   : > { %v21183_v37 = vpop.eup %21182  ;;  %v13498_v58 = vmul.f32 %v21181_v16, %v23650_v12  ;;  %20229 = vmatprep.subr.bf16.mxu1 %v21949_v22 }
0x1979   : > { %v13496_v50 = vmul.f32 %v21183_v37, %v23652_v11 }
0x197a   : > { %v13508_v51 = vpack.c.bf16 %v13498_v58, %v13498_v58 }
0x197b   : > { %v13507_v52 = vpack.c.bf16 %v13496_v50, %v13496_v50 }
0x197c   : > { %20220 = vmatmul.mubr.msk.bf16.vlgmr.msra.gmra.mrb[84].mxu1 %vm2934_vm3, %v13508_v51 }
0x197d   : > { %20214 = vmatmul.mubr.msk.bf16.vlgmr.msra.gmra.mrb[64].mxu0 %vm2934_vm3, %v13507_v52  ;;  %20230 = vmatpush3.bf16.msra.mxu1 %v13845_v53 }
0x197e   : > { %20224 = vmatpush3.bf16.msra.mxu0 %v13799_v54  ;;  %20225 = vmatprep.mubr.msk.bf16.mxu0 %vm21950_vm0, %v21949_v22 }
0x197f   : > { %v21185_v12 = vpop.eup %21184  ;;  %20231 = vmatprep.mubr.msk.bf16.mxu1 %vm21950_vm0, %v21949_v22  ;;  %20235 = vmatprep.subr.bf16.mxu0 %v21949_v22 }
0x1980   : > { %v21187_v11 = vpop.eup %21186  ;;  %v13502_v45 = vmul.f32 %v21185_v12, %v23658_v6  ;;  %20241 = vmatprep.subr.bf16.mxu1 %v21949_v22 }
0x1981   : > { %v13500_v62 = vmul.f32 %v21187_v11, %v23660_v27  ;;  %v20939_v27 = vld [vmem:[#allocation17 + $0x98] sm:$0xff]  }
0x1982   : > { %v13510_v60 = vpack.c.bf16 %v13502_v45, %v13502_v45 }
0x1983   : > { %v13509_v57 = vpack.c.bf16 %v13500_v62, %v13500_v62 }
0x1984   : > { %20232 = vmatmul.mubr.msk.bf16.vlgmr.msra.gmra.mrb[88].mxu1 %vm2934_vm3, %v13510_v60 }
0x1985   : > { %20226 = vmatmul.mubr.msk.bf16.vlgmr.msra.gmra.mrb[68].mxu0 %vm2934_vm3, %v13509_v57  ;;  %20242 = vmatpush3.bf16.msra.mxu1 %v20937_v0 }
0x1986   : > { %20236 = vmatpush3.bf16.msra.mxu0 %v20936_v1  ;;  %20237 = vmatprep.mubr.msk.bf16.mxu0 %vm21950_vm0, %v21949_v22 }
0x1987   : > { %20243 = vmatprep.mubr.msk.bf16.mxu1 %vm21950_vm0, %v21949_v22  ;;  %20247 = vmatprep.subr.bf16.mxu0 %v21949_v22 }
0x1988   : > { %20253 = vmatprep.subr.bf16.mxu1 %v21949_v22 }
0x1a3f   : > { %v13605_v6 = vpop.f32.mrb[76].mxu1 }
0x1a40   : > { %v13559_v29 = vpop.f32.mrb[56].mxu0  ;;  %v13888_v3 = vpack.c.bf16 %v13605_v6, %v13605_v6  ;;  %v20197_v5 = vpop.f32.mrb[77].mxu1 }
0x1a41   : > { %v13887_v9 = vpack.c.bf16 %v13559_v29, %v13559_v29  ;;  %v20191_v2 = vpop.f32.mrb[57].mxu0  ;;  %v13608_v13 = vpop.f32.mrb[78].mxu1 }
0x1a42   : > { %v13562_v24 = vpop.f32.mrb[58].mxu0  ;;  %v20198_v19 = vpop.f32.mrb[79].mxu1  ;;  %20244 = vmatmul.mubr.msk.bf16.vlgmr.msra.gmra.mrb[92].mxu1 %vm2565_vm1, %v13888_v3 }
0x1a43   : > { %v20192_v25 = vpop.f32.mrb[59].mxu0  ;;  %20238 = vmatmul.mubr.msk.bf16.vlgmr.msra.gmra.mrb[72].mxu0 %vm2565_vm1, %v13887_v9  ;;  %20254 = vmatpush3.bf16.msra.mxu1 %v20939_v27 }
0x1a44   : > { %20248 = vmatpush3.bf16.msra.mxu0 %v20938_v8  ;;  %20249 = vmatprep.mubr.msk.bf16.mxu0 %vm21950_vm0, %v21949_v22 }
0x1a45   : > { %20255 = vmatprep.mubr.msk.bf16.mxu1 %vm21950_vm0, %v21949_v22  ;;  %20259 = vmatprep.subr.bf16.mxu0 %v21949_v22 }
0x1a46   : > { %20265 = vmatprep.subr.bf16.mxu1 %v21949_v22 }
0x1a47   : > { %v13697_v30 = vpop.f32.mrb[80].mxu1 }
0x1a48   : > { %v13651_v38 = vpop.f32.mrb[60].mxu0  ;;  %v13890_v55 = vpack.c.bf16 %v13697_v30, %v13697_v30  ;;  %v20209_v47 = vpop.f32.mrb[81].mxu1 }
0x1a49   : > { %v13889_v32 = vpack.c.bf16 %v13651_v38, %v13651_v38  ;;  %v20203_v33 = vpop.f32.mrb[61].mxu0  ;;  %v13700_v43 = vpop.f32.mrb[82].mxu1 }
0x1a4a   : > { %v13654_v35 = vpop.f32.mrb[62].mxu0  ;;  %v20210_v59 = vpop.f32.mrb[83].mxu1  ;;  %20256 = vmatmul.mubr.msk.bf16.vlgmr.msra.gmra.mrb[96].mxu1 %vm2565_vm1, %v13890_v55 }
0x1a4b   : > { %v20204_v23 = vpop.f32.mrb[63].mxu0  ;;  %20250 = vmatmul.mubr.msk.bf16.vlgmr.msra.gmra.mrb[76].mxu0 %vm2565_vm1, %v13889_v32  ;;  %20266 = vmatpush3.bf16.msra.mxu1 %v20941_v36 }
0x1a4c   : > { %20260 = vmatpush3.bf16.msra.mxu0 %v20940_v46  ;;  %20261 = vmatprep.mubr.msk.bf16.mxu0 %vm21950_vm0, %v21949_v22 }
0x1a4d   : > { %20267 = vmatprep.mubr.msk.bf16.mxu1 %vm21950_vm0, %v21949_v22  ;;  %20271 = vmatprep.subr.bf16.mxu0 %v21949_v22 }
0x1a4e   : > { %20277 = vmatprep.subr.bf16.mxu1 %v21949_v22 }
0x1a4f   : > { %v13789_v34 = vpop.f32.mrb[84].mxu1 }
0x1a50   : > { %v13743_v21 = vpop.f32.mrb[64].mxu0  ;;  %v13892_v39 = vpack.c.bf16 %v13789_v34, %v13789_v34  ;;  %v20221_v56 = vpop.f32.mrb[85].mxu1 }
0x1a51   : > { %v13891_v26 = vpack.c.bf16 %v13743_v21, %v13743_v21  ;;  %v20215_v41 = vpop.f32.mrb[65].mxu0  ;;  %v13792_v63 = vpop.f32.mrb[86].mxu1  ;;  %v18287_v56 = vld [vmem:[#allocation19 + $0x2] ss:$0 sm:$0xff] }
0x1a52   : > { %v13746_v20 = vpop.f32.mrb[66].mxu0  ;;  %v20222_v40 = vpop.f32.mrb[87].mxu1  ;;  %20268 = vmatmul.mubr.msk.bf16.vlgmr.msra.gmra.mrb[100].mxu1 %vm2565_vm1, %v13892_v39 }
0x1a53   : > { %v20216_v16 = vpop.f32.mrb[67].mxu0  ;;  %20262 = vmatmul.mubr.msk.bf16.vlgmr.msra.gmra.mrb[80].mxu0 %vm2565_vm1, %v13891_v26  ;;  %20278 = vmatpush3.bf16.msra.mxu1 %v20943_v31 }
0x1a54   : > { %20272 = vmatpush3.bf16.msra.mxu0 %v20942_v42  ;;  %20273 = vmatprep.mubr.msk.bf16.mxu0 %vm21950_vm0, %v21949_v22  ;;  %v14351_v16 = vld [vmem:[#allocation20 + $0x800] sm:$0xff] }
0x1a55   : > { %20279 = vmatprep.mubr.msk.bf16.mxu1 %vm21950_vm0, %v21949_v22 }
0x1a57   : > { %v13881_v37 = vpop.f32.mrb[88].mxu1 }
0x1a58   : > { %v13835_v49 = vpop.f32.mrb[68].mxu0  ;;  %v13894_v58 = vpack.c.bf16 %v13881_v37, %v13881_v37  ;;  %v20233_v44 = vpop.f32.mrb[89].mxu1  ;;  %v14359_v37 = vld [vmem:[#allocation20 + $0x840] sm:$0xff] }
0x1a59   : > { %v13893_v50 = vpack.c.bf16 %v13835_v49, %v13835_v49  ;;  %v20227_v51 = vpop.f32.mrb[69].mxu0  ;;  %v13884_v52 = vpop.f32.mrb[90].mxu1  ;;  %v14352_v49 = vld [vmem:[#allocation20 + $0x808] sm:$0xff]  ;;  %v18291_v44 = vcombine.high %v14351_v16, %v14359_v37 }
0x1a5a   : > { %v13838_v53 = vpop.f32.mrb[70].mxu0  ;;  %v20234_v54 = vpop.f32.mrb[91].mxu1  ;;  %20280 = vmatmul.mubr.msk.bf16.vlgmr.msra.gmra.mrb[104].mxu1 %vm2565_vm1, %v13894_v58  ;;  %v18290_v58 = vcombine.low %v14351_v16, %v14359_v37  ;;  %v14367_v51 = vld [vmem:[#allocation20 + $0x880] sm:$0xff]  ;;  %v14448_v16 = vld [vmem:[#allocation20 + $0xb08] sm:$0xff] }
0x1a5b   : > { %v20228_v12 = vpop.f32.mrb[71].mxu0  ;;  %20274 = vmatmul.mubr.msk.bf16.vlgmr.msra.gmra.mrb[84].mxu0 %vm2565_vm1, %v13893_v50  ;;  %15278 = vmatprep.mubr.bf16.mxu1 %v21951_v28  ;;  %v14360_v50 = vld [vmem:[#allocation20 + $0x848] sm:$0xff]  ;;  %v14375_v52 = vld [vmem:[#allocation20 + $0x8c0] sm:$0xff] }
0x1a5c   : > { %15237 = vmatprep.mubr.bf16.mxu0 %v21951_v28  ;;  %v18292_v53 = vcombine.low %v14352_v49, %v14360_v50  ;;  %v18293_v54 = vcombine.high %v14352_v49, %v14360_v50  ;;  %v18307_v12 = vcombine.high %v14367_v51, %v14375_v52  ;;  %15205 = vmatprep.subr.bf16.mxu0 %v18291_v44  ;;  %v14456_v49 = vld [vmem:[#allocation20 + $0xb48] sm:$0xff] }
0x1a5d   : > { %15206 = vmatpush1.bf16.msra.mxu0 %v18290_v58  ;;  %v18388_v44 = vcombine.low %v14448_v16, %v14456_v49  ;;  %v18389_v50 = vcombine.high %v14448_v16, %v14456_v49  ;;  %v14417_v16 = vld [vmem:[#allocation20 + $0xa10] sm:$0xff]  ;;  %v14418_v49 = vld [vmem:[#allocation20 + $0xa18] sm:$0xff] }
0x1a5e   : > { %15246 = vmatprep.subr.bf16.mxu1 %v18293_v54  ;;  %15207 = vmatprep.subr.bf16.mxu0 %v18307_v12  ;;  %v14472_v12 = vld [vmem:[#allocation20 + $0xbc8] sm:$0xff] }
0x1a5f   : > { %15247 = vmatpush1.bf16.msra.mxu1 %v18292_v53  ;;  %v14464_v53 = vld [vmem:[#allocation20 + $0xb88] sm:$0xff] }
0x1b15   : > { %v14004_v11 = vpop.f32.mrb[92].mxu1 }
0x1b16   : > { %v13955_v45 = vpop.f32.mrb[72].mxu0  ;;  %v20245_v62 = vpop.f32.mrb[93].mxu1 }
0x1b17   : > { %v14304_v0 = vadd.f32 %v14004_v11, %v13955_v45  ;;  %v20239_v60 = vpop.f32.mrb[73].mxu0  ;;  %v14007_v1 = vpop.f32.mrb[94].mxu1  ;;  %v14368_v11 = vld [vmem:[#allocation20 + $0x888] sm:$0xff]  ;;  %v14383_v62 = vld [vmem:[#allocation20 + $0x900] sm:$0xff] }
0x1b18   : > { %v13958_v57 = vpop.f32.mrb[74].mxu0  ;;  %v20246_v6 = vpop.f32.mrb[95].mxu1  ;;  %v14376_v45 = vld [vmem:[#allocation20 + $0x8c8] sm:$0xff]  ;;  %v14391_v60 = vld [vmem:[#allocation20 + $0x940] sm:$0xff] }
0x1b19   : > { %v20240_v27 = vpop.f32.mrb[75].mxu0  ;;  %v14384_v1 = vld [vmem:[#allocation20 + $0x908] sm:$0xff]  ;;  %v18306_v57 = vcombine.low %v14367_v51, %v14375_v52  ;;  %v18308_v6 = vcombine.low %v14368_v11, %v14376_v45  ;;  %v14463_v51 = vld [vmem:[#allocation20 + $0xb80] sm:$0xff] }
0x1b1a   : > { %v18323_v27 = vcombine.high %v14383_v62, %v14391_v60  ;;  %v14471_v52 = vld [vmem:[#allocation20 + $0xbc0] sm:$0xff] }
0x1b1b   : > { %15208 = vmatpush1.bf16.msra.mxu0 %v18306_v57  ;;  %v18403_v54 = vcombine.high %v14463_v51, %v14471_v52 }
0x1b1c   : > { %15209 = vmatprep.subr.bf16.mxu0 %v18323_v27 }
0x1b1d   : > { %v14102_v29 = vpop.f32.mrb[96].mxu1 }
0x1b1e   : > { %v14053_v3 = vpop.f32.mrb[76].mxu0  ;;  %v20257_v5 = vpop.f32.mrb[97].mxu1 }
0x1b1f   : > { %v14305_v8 = vadd.f32 %v14304_v0, %v14053_v3  ;;  %v20251_v9 = vpop.f32.mrb[77].mxu0  ;;  %v14105_v2 = vpop.f32.mrb[98].mxu1  ;;  %v18309_v0 = vcombine.high %v14368_v11, %v14376_v45  ;;  %v18322_v3 = vcombine.low %v14383_v62, %v14391_v60  ;;  %v18402_v11 = vcombine.low %v14463_v51, %v14471_v52  ;;  %v14361_v60 = vld [vmem:[#allocation20 + $0x850] sm:$0xff] }
0x1b20   : > { %v14056_v13 = vpop.f32.mrb[78].mxu0  ;;  %v20258_v24 = vpop.f32.mrb[99].mxu1  ;;  %v18404_v45 = vcombine.low %v14464_v53, %v14472_v12  ;;  %v18405_v62 = vcombine.high %v14464_v53, %v14472_v12  ;;  %v14433_v53 = vld [vmem:[#allocation20 + $0xa90] sm:$0xff]  ;;  %v14434_v12 = vld [vmem:[#allocation20 + $0xa98] sm:$0xff] }
0x1b21   : > { %v14306_v19 = vadd.f32 %v14305_v8, %v14102_v29  ;;  %v20252_v25 = vpop.f32.mrb[79].mxu0  ;;  %15248 = vmatprep.subr.bf16.mxu1 %v18309_v0  ;;  %15210 = vmatpush1.bf16.msra.mxu0 %v18322_v3  ;;  %v14399_v24 = vld [vmem:[#allocation20 + $0x980] sm:$0xff]  ;;  %v14353_v0 = vld [vmem:[#allocation20 + $0x810] sm:$0xff] }
0x1b22   : > { %15249 = vmatpush1.bf16.msra.mxu1 %v18308_v6  ;;  %v14400_v25 = vld [vmem:[#allocation20 + $0x988] sm:$0xff]  ;;  %v18295_v57 = vcombine.high %v14353_v0, %v14361_v60  ;;  %v14362_v6 = vld [vmem:[#allocation20 + $0x858] sm:$0xff] }
0x1b25   : > { %v14200_v30 = vpop.f32.mrb[100].mxu1 }
0x1b26   : > { %v14151_v36 = vpop.f32.mrb[80].mxu0  ;;  %v20269_v38 = vpop.f32.mrb[101].mxu1 }
0x1b27   : > { %v14307_v55 = vadd.f32 %v14306_v19, %v14151_v36  ;;  %v20263_v47 = vpop.f32.mrb[81].mxu0  ;;  %v14203_v46 = vpop.f32.mrb[102].mxu1  ;;  %v14407_v19 = vld [vmem:[#allocation20 + $0x9c0] sm:$0xff]  ;;  %v14408_v36 = vld [vmem:[#allocation20 + $0x9c8] sm:$0xff] }
0x1b28   : > { %v14154_v32 = vpop.f32.mrb[82].mxu0  ;;  %v20270_v33 = vpop.f32.mrb[103].mxu1  ;;  %v18338_v38 = vcombine.low %v14399_v24, %v14407_v19  ;;  %v18341_v47 = vcombine.high %v14400_v25, %v14408_v36  ;;  %v14415_v46 = vld [vmem:[#allocation20 + $0xa00] sm:$0xff] }
0x1b29   : > { %v14308_v43 = vadd.f32 %v14307_v55, %v14200_v30  ;;  %v20264_v35 = vpop.f32.mrb[83].mxu0  ;;  %v18339_v30 = vcombine.high %v14399_v24, %v14407_v19  ;;  %v18340_v55 = vcombine.low %v14400_v25, %v14408_v36  ;;  %v14423_v32 = vld [vmem:[#allocation20 + $0xa40] sm:$0xff]  ;;  %v14416_v33 = vld [vmem:[#allocation20 + $0xa08] sm:$0xff]  ;;  %v18289_v19 = vld [vmem:[#allocation28 + $0x2] ss:$0 sm:$0xff] }
0x1b2a   : > { %v14424_v35 = vld [vmem:[#allocation20 + $0xa48] sm:$0xff]  ;;  %v14377_v36 = vld [vmem:[#allocation20 + $0x8d0] sm:$0xff] }
0x1b2b   : > { %15211 = vmatprep.subr.bf16.mxu0 %v18339_v30  ;;  %v14369_v30 = vld [vmem:[#allocation20 + $0x890] sm:$0xff] }
0x1b2c   : > { %15212 = vmatpush1.bf16.msra.mxu0 %v18338_v38  ;;  %v14370_v38 = vld [vmem:[#allocation20 + $0x898] sm:$0xff] }
0x1b2d   : > { %v14298_v59 = vpop.f32.mrb[104].mxu1 }
0x1b2e   : > { %v14249_v23 = vpop.f32.mrb[84].mxu0  ;;  %v20281_v34 = vpop.f32.mrb[105].mxu1 }
0x1b2f   : > { %v14309_v31 = vadd.f32 %v14308_v43, %v14249_v23  ;;  %v20275_v21 = vpop.f32.mrb[85].mxu0  ;;  %v14301_v39 = vpop.f32.mrb[106].mxu1  ;;  %v18355_v43 = vcombine.high %v14415_v46, %v14423_v32  ;;  %v18356_v23 = vcombine.low %v14416_v33, %v14424_v35  ;;  %v18357_v34 = vcombine.high %v14416_v33, %v14424_v35  ;;  %v14393_v35 = vld [vmem:[#allocation20 + $0x950] sm:$0xff] }
0x1b30   : > { %v14252_v42 = vpop.f32.mrb[86].mxu0  ;;  %v20282_v26 = vpop.f32.mrb[107].mxu1  ;;  %v14439_v21 = vld [vmem:[#allocation20 + $0xac0] sm:$0xff]  ;;  %v14432_v39 = vld [vmem:[#allocation20 + $0xa88] sm:$0xff] }
0x1b31   : > { %v14310_v41 = vadd.f32 %v14309_v31, %v14298_v59  ;;  %v20276_v63 = vpop.f32.mrb[87].mxu0  ;;  %v18354_v59 = vcombine.low %v14415_v46, %v14423_v32  ;;  %15213 = vmatprep.subr.bf16.mxu0 %v18355_v43  ;;  %v14431_v31 = vld [vmem:[#allocation20 + $0xa80] sm:$0xff]  ;;  %v14440_v42 = vld [vmem:[#allocation20 + $0xac8] sm:$0xff]  ;;  %v18311_v32 = vcombine.high %v14369_v30, %v14377_v36  ;;  %v14385_v43 = vld [vmem:[#allocation20 + $0x910] sm:$0xff] }
0x1b32   : > { %v18370_v26 = vcombine.low %v14431_v31, %v14439_v21  ;;  %v18373_v63 = vcombine.high %v14432_v39, %v14440_v42 }
0x1b33   : > { %v14319_v20 = vadd.f32 %v18287_v56, %v14310_v41  ;;  %15214 = vmatpush1.bf16.msra.mxu0 %v18354_v59  ;;  %v18371_v56 = vcombine.high %v14431_v31, %v14439_v21  ;;  %v18372_v41 = vcombine.low %v14432_v39, %v14440_v42  ;;  %v14386_v59 = vld [vmem:[#allocation20 + $0x918] sm:$0xff]  ;;  %v18327_v31 = vcombine.high %v14385_v43, %v14393_v35  ;;  %v14401_v39 = vld [vmem:[#allocation20 + $0x990] sm:$0xff] }
0x1b34   : > { %v14402_v42 = vld [vmem:[#allocation20 + $0x998] sm:$0xff] }
0x1b35   : > { %v14320_v40 = vadd.f32 %v14319_v20, %v23458_v48  ;;  %v14392_v48 = vld [vmem:[#allocation20 + $0x948] sm:$0xff]  ;;  %15215 = vmatprep.subr.bf16.mxu0 %v18371_v56  ;;  %v14447_v20 = vld [vmem:[#allocation20 + $0xb00] sm:$0xff]  ;;  %v14409_v56 = vld [vmem:[#allocation20 + $0x9d0] sm:$0xff] }
0x1b36   : > { %v18325_v29 = vcombine.high %v14384_v1, %v14392_v48  ;;  %v18324_v5 = vcombine.low %v14384_v1, %v14392_v48  ;;  %v14354_v1 = vld [vmem:[#allocation20 + $0x818] sm:$0xff]  ;;  %v18294_v48 = vcombine.low %v14353_v0, %v14361_v60 }
0x1b37   : > { %14325 = vadd.xlane.f32.xlu0 %v14320_v40  ;;  %15216 = vmatpush1.bf16.msra.mxu0 %v18370_v26  ;;  %v18296_v27 = vcombine.low %v14354_v1, %v14362_v6  ;;  %v14410_v26 = vld [vmem:[#allocation20 + $0x9d8] sm:$0xff] }
0x1b38   : > { %15250 = vmatprep.subr.bf16.mxu1 %v18325_v29  ;;  %v18297_v29 = vcombine.high %v14354_v1, %v14362_v6  ;;  %v14449_v1 = vld [vmem:[#allocation20 + $0xb10] sm:$0xff]  ;;  %v14458_v6 = vld [vmem:[#allocation20 + $0xb58] sm:$0xff] }
0x1b39   : > { %15251 = vmatpush1.bf16.msra.mxu1 %v18324_v5 }
0x1b3a   : > { %15252 = vmatprep.subr.bf16.mxu1 %v18341_v47 }
0x1b3d   : > { %15253 = vmatpush1.bf16.msra.mxu1 %v18340_v55  ;;  %v14378_v55 = vld [vmem:[#allocation20 + $0x8d8] sm:$0xff] }
0x1b3e   : > { %15254 = vmatprep.subr.bf16.mxu1 %v18357_v34  ;;  %v18313_v33 = vcombine.high %v14370_v38, %v14378_v55  ;;  %v18312_v34 = vcombine.low %v14370_v38, %v14378_v55  ;;  %v14355_v38 = vld [vmem:[#allocation20 + $0x820] sm:$0xff] }
0x1b3f   : > { %v14363_v55 = vld [vmem:[#allocation20 + $0x860] sm:$0xff] }
0x1b41   : > { %15255 = vmatpush1.bf16.msra.mxu1 %v18356_v23  ;;  %v14394_v23 = vld [vmem:[#allocation20 + $0x958] sm:$0xff] }
0x1b42   : > { %15256 = vmatprep.subr.bf16.mxu1 %v18373_v63  ;;  %v18329_v21 = vcombine.high %v14386_v59, %v14394_v23  ;;  %v18328_v63 = vcombine.low %v14386_v59, %v14394_v23  ;;  %v18299_v59 = vcombine.high %v14355_v38, %v14363_v55 }
0x1b45   : > { %15257 = vmatpush1.bf16.msra.mxu1 %v18372_v41  ;;  %v18326_v41 = vcombine.low %v14385_v43, %v14393_v35 }
0x1b46   : > { %15258 = vmatprep.subr.bf16.mxu1 %v18389_v50  ;;  %v18344_v50 = vcombine.low %v14402_v42, %v14410_v26 }
0x1b49   : > { %15259 = vmatpush1.bf16.msra.mxu1 %v18388_v44  ;;  %v18342_v44 = vcombine.low %v14401_v39, %v14409_v56 }
0x1b4a   : > { %15260 = vmatprep.subr.bf16.mxu1 %v18405_v62 }
0x1b4d   : > { %15261 = vmatpush1.bf16.msra.mxu1 %v18404_v45 }
0x1b4e   : > { %15328 = vmatprep.subr.bf16.mxu1 %v18297_v29 }
0x1bc4   : > { %v14326_v8 = vpop.xlane.xlu0 %14325 }
0x1bc5   : > { %v14327_v9 = vmul.f32 0.0078125, %v14326_v8 }
0x1bc7   : > { %v23743_v2 = vsub.f32 %v14320_v40, %v14327_v9  ;;  %v14455_v40 = vld [vmem:[#allocation20 + $0xb40] sm:$0xff] }
0x1bc8   : > { %v18387_v37 = vcombine.high %v14447_v20, %v14455_v40  ;;  %v18386_v58 = vcombine.low %v14447_v20, %v14455_v40  ;;  %v18343_v20 = vcombine.high %v14401_v39, %v14409_v56  ;;  %v18345_v40 = vcombine.high %v14402_v42, %v14410_v26 }
0x1bc9   : > { %v14329_v13 = vmul.f32 %v23743_v2, %v23743_v2  ;;  %v18298_v39 = vcombine.low %v14355_v38, %v14363_v55 }
0x1bca   : > { %15217 = vmatprep.subr.bf16.mxu0 %v18387_v37  ;;  %v14425_v37 = vld [vmem:[#allocation20 + $0xa50] sm:$0xff] }
0x1bcb   : > { %14330 = vadd.xlane.f32.xlu1 %v14329_v13  ;;  %15218 = vmatpush1.bf16.msra.mxu0 %v18386_v58  ;;  %v18288_v13 = vld [vmem:[#allocation26 + $0x2] ss:$0 sm:$0xff]  ;;  %v14426_v58 = vld [vmem:[#allocation20 + $0xa58] sm:$0xff]  ;;  %v18359_v51 = vcombine.high %v14417_v16, %v14425_v37  ;;  %v18358_v45 = vcombine.low %v14417_v16, %v14425_v37 }
0x1bcc   : > { %15219 = vmatprep.subr.bf16.mxu0 %v18403_v54  ;;  %v18361_v52 = vcombine.high %v14418_v49, %v14426_v58  ;;  %v14441_v54 = vld [vmem:[#allocation20 + $0xad0] sm:$0xff]  ;;  %v18360_v62 = vcombine.low %v14418_v49, %v14426_v58 }
0x1bcd   : > { %v18375_v0 = vcombine.high %v14433_v53, %v14441_v54 }
0x1bcf   : > { %15220 = vmatpush1.bf16.msra.mxu0 %v18402_v11  ;;  %v14442_v11 = vld [vmem:[#allocation20 + $0xad8] sm:$0xff] }
0x1bd0   : > { %15287 = vmatprep.subr.bf16.mxu0 %v18295_v57  ;;  %v18377_v60 = vcombine.high %v14434_v12, %v14442_v11  ;;  %v14450_v57 = vld [vmem:[#allocation20 + $0xb18] sm:$0xff]  ;;  %v18376_v29 = vcombine.low %v14434_v12, %v14442_v11 }
0x1c58   : > { %v14331_v3 = vpop.xlane.xlu1 %14330 }
0x1c59   : > { %v14332_v5 = vmul.f32 0.0078125, %v14331_v3 }
0x1c5b   : > { %v14333_v8 = vadd.f32 1e-05, %v14332_v5  ;;  %v18393_v5 = vcombine.high %v14450_v57, %v14458_v6 }
0x1c5d   : > { %21188 = vrsqrt.f32 %v14333_v8  ;;  %v14465_v8 = vld [vmem:[#allocation20 + $0xb90] sm:$0xff] }
0x1c67   : > { %v21189_v9 = vpop.eup %21188 }
0x1c68   : > { %v14335_v24 = vmul.f32 %v21189_v9, %v23743_v2  ;;  %v18310_v2 = vcombine.low %v14369_v30, %v14377_v36  ;;  %v14473_v9 = vld [vmem:[#allocation20 + $0xbd0] sm:$0xff] }
0x1c69   : > { %v18407_v30 = vcombine.high %v14465_v8, %v14473_v9  ;;  %v18406_v43 = vcombine.low %v14465_v8, %v14473_v9 }
0x1c6a   : > { %v14342_v25 = vmul.f32 %v18288_v13, %v14335_v24  ;;  %v14466_v13 = vld [vmem:[#allocation20 + $0xb98] sm:$0xff] }
0x1c6b   : > { %v14474_v24 = vld [vmem:[#allocation20 + $0xbd8] sm:$0xff] }
0x1c6c   : > { %v23748_v47 = vadd.f32 %v18289_v19, %v14342_v25  ;;  %v18392_v25 = vcombine.low %v14450_v57, %v14458_v6  ;;  %v18409_v36 = vcombine.high %v14466_v13, %v14474_v24  ;;  %v18408_v35 = vcombine.low %v14466_v13, %v14474_v24 }
0x1c6e   : > { %v23752_v46 = vpack.c.bf16 %v23748_v47, %v23748_v47 }
0x1c70   : > { %15238 = vmatmul.mubr.bf16.vlgmr.msra.gmra.mrb[88].mxu0 %v23752_v46  ;;  %15279 = vmatmul.mubr.bf16.vlgmr.msra.gmra.mrb[108].mxu1 %v23752_v46 }
0x1c71   : > { %15288 = vmatpush1.bf16.msra.mxu0 %v18294_v48  ;;  %15329 = vmatpush1.bf16.msra.mxu1 %v18296_v27  ;;  %v14457_v48 = vld [vmem:[#allocation20 + $0xb50] sm:$0xff]  ;;  %v18374_v27 = vcombine.low %v14433_v53, %v14441_v54 }
0x1c72   : > { %15289 = vmatprep.subr.bf16.mxu0 %v18311_v32  ;;  %15330 = vmatprep.subr.bf16.mxu1 %v18313_v33  ;;  %v18391_v3 = vcombine.high %v14449_v1, %v14457_v48  ;;  %v18390_v19 = vcombine.low %v14449_v1, %v14457_v48  ;;  %v14356_v32 = vld [vmem:[#allocation20 + $0x828] sm:$0xff] }
0x1c73   : > { %15319 = vmatprep.mubr.bf16.mxu0 %v21951_v28  ;;  %15360 = vmatprep.mubr.bf16.mxu1 %v21951_v28  ;;  %v14364_v33 = vld [vmem:[#allocation20 + $0x868] sm:$0xff] }
0x1c74   : > { %v18301_v23 = vcombine.high %v14356_v32, %v14364_v33  ;;  %v18300_v56 = vcombine.low %v14356_v32, %v14364_v33 }
0x1c75   : > { %15290 = vmatpush1.bf16.msra.mxu0 %v18310_v2  ;;  %15331 = vmatpush1.bf16.msra.mxu1 %v18312_v34  ;;  %v14371_v2 = vld [vmem:[#allocation20 + $0x8a0] sm:$0xff] }
0x1c76   : > { %15291 = vmatprep.subr.bf16.mxu0 %v18327_v31  ;;  %15332 = vmatprep.subr.bf16.mxu1 %v18329_v21  ;;  %v14379_v34 = vld [vmem:[#allocation20 + $0x8e0] sm:$0xff]  ;;  %v14372_v31 = vld [vmem:[#allocation20 + $0x8a8] sm:$0xff] }
0x1c77   : > { %v14380_v21 = vld [vmem:[#allocation20 + $0x8e8] sm:$0xff]  ;;  %v18315_v42 = vcombine.high %v14371_v2, %v14379_v34  ;;  %v18314_v16 = vcombine.low %v14371_v2, %v14379_v34 }
0x1c78   : > { %v18317_v26 = vcombine.high %v14372_v31, %v14380_v21  ;;  %v18316_v37 = vcombine.low %v14372_v31, %v14380_v21 }
0x1c79   : > { %15292 = vmatpush1.bf16.msra.mxu0 %v18326_v41  ;;  %15333 = vmatpush1.bf16.msra.mxu1 %v18328_v63  ;;  %v14387_v41 = vld [vmem:[#allocation20 + $0x920] sm:$0xff] }
0x1c7a   : > { %15293 = vmatprep.subr.bf16.mxu0 %v18343_v20  ;;  %15334 = vmatprep.subr.bf16.mxu1 %v18345_v40  ;;  %v14395_v63 = vld [vmem:[#allocation20 + $0x960] sm:$0xff]  ;;  %v14388_v20 = vld [vmem:[#allocation20 + $0x928] sm:$0xff] }
0x1c7b   : > { %v14396_v40 = vld [vmem:[#allocation20 + $0x968] sm:$0xff]  ;;  %v18331_v49 = vcombine.high %v14387_v41, %v14395_v63  ;;  %v18330_v53 = vcombine.low %v14387_v41, %v14395_v63 }
0x1c7c   : > { %v18333_v58 = vcombine.high %v14388_v20, %v14396_v40  ;;  %v18332_v54 = vcombine.low %v14388_v20, %v14396_v40 }
0x1c7d   : > { %15294 = vmatpush1.bf16.msra.mxu0 %v18342_v44  ;;  %15335 = vmatpush1.bf16.msra.mxu1 %v18344_v50  ;;  %v14403_v44 = vld [vmem:[#allocation20 + $0x9a0] sm:$0xff] }
0x1c7e   : > { %15295 = vmatprep.subr.bf16.mxu0 %v18359_v51  ;;  %15336 = vmatprep.subr.bf16.mxu1 %v18361_v52  ;;  %v14411_v50 = vld [vmem:[#allocation20 + $0x9e0] sm:$0xff]  ;;  %v14404_v51 = vld [vmem:[#allocation20 + $0x9a8] sm:$0xff] }
0x1c7f   : > { %v14412_v52 = vld [vmem:[#allocation20 + $0x9e8] sm:$0xff]  ;;  %v18347_v12 = vcombine.high %v14403_v44, %v14411_v50  ;;  %v18346_v1 = vcombine.low %v14403_v44, %v14411_v50 }
0x1c80   : > { %v18349_v11 = vcombine.high %v14404_v51, %v14412_v52  ;;  %v18348_v48 = vcombine.low %v14404_v51, %v14412_v52 }
0x1c81   : > { %15296 = vmatpush1.bf16.msra.mxu0 %v18358_v45  ;;  %15337 = vmatpush1.bf16.msra.mxu1 %v18360_v62  ;;  %v14419_v45 = vld [vmem:[#allocation20 + $0xa20] sm:$0xff] }
0x1c82   : > { %15297 = vmatprep.subr.bf16.mxu0 %v18375_v0  ;;  %15338 = vmatprep.subr.bf16.mxu1 %v18377_v60  ;;  %v14427_v62 = vld [vmem:[#allocation20 + $0xa60] sm:$0xff]  ;;  %v14420_v0 = vld [vmem:[#allocation20 + $0xa28] sm:$0xff] }
0x1c83   : > { %v14428_v60 = vld [vmem:[#allocation20 + $0xa68] sm:$0xff]  ;;  %v18363_v57 = vcombine.high %v14419_v45, %v14427_v62  ;;  %v18362_v8 = vcombine.low %v14419_v45, %v14427_v62 }
0x1c84   : > { %v18365_v6 = vcombine.high %v14420_v0, %v14428_v60  ;;  %v18364_v9 = vcombine.low %v14420_v0, %v14428_v60 }
0x1c85   : > { %15298 = vmatpush1.bf16.msra.mxu0 %v18374_v27  ;;  %15339 = vmatpush1.bf16.msra.mxu1 %v18376_v29  ;;  %v14435_v27 = vld [vmem:[#allocation20 + $0xaa0] sm:$0xff] }
0x1c86   : > { %15299 = vmatprep.subr.bf16.mxu0 %v18391_v3  ;;  %15340 = vmatprep.subr.bf16.mxu1 %v18393_v5  ;;  %v14443_v29 = vld [vmem:[#allocation20 + $0xae0] sm:$0xff]  ;;  %v14436_v3 = vld [vmem:[#allocation20 + $0xaa8] sm:$0xff] }
0x1c87   : > { %v14444_v5 = vld [vmem:[#allocation20 + $0xae8] sm:$0xff]  ;;  %v18379_v13 = vcombine.high %v14435_v27, %v14443_v29  ;;  %v18378_v38 = vcombine.low %v14435_v27, %v14443_v29 }
0x1c88   : > { %v18381_v24 = vcombine.high %v14436_v3, %v14444_v5  ;;  %v18380_v55 = vcombine.low %v14436_v3, %v14444_v5 }
0x1c89   : > { %15300 = vmatpush1.bf16.msra.mxu0 %v18390_v19  ;;  %15341 = vmatpush1.bf16.msra.mxu1 %v18392_v25  ;;  %v14451_v19 = vld [vmem:[#allocation20 + $0xb20] sm:$0xff] }
0x1c8a   : > { %15301 = vmatprep.subr.bf16.mxu0 %v18407_v30  ;;  %15342 = vmatprep.subr.bf16.mxu1 %v18409_v36  ;;  %v14459_v25 = vld [vmem:[#allocation20 + $0xb60] sm:$0xff]  ;;  %v14452_v30 = vld [vmem:[#allocation20 + $0xb28] sm:$0xff] }
0x1c8b   : > { %v14460_v36 = vld [vmem:[#allocation20 + $0xb68] sm:$0xff]  ;;  %v18395_v32 = vcombine.high %v14451_v19, %v14459_v25  ;;  %v18394_v2 = vcombine.low %v14451_v19, %v14459_v25 }
0x1c8c   : > { %v18397_v33 = vcombine.high %v14452_v30, %v14460_v36  ;;  %v18396_v34 = vcombine.low %v14452_v30, %v14460_v36  ;;  %v14437_v36 = vld [vmem:[#allocation20 + $0xab0] sm:$0xff] }
0x1c8d   : > { %15302 = vmatpush1.bf16.msra.mxu0 %v18406_v43  ;;  %15343 = vmatpush1.bf16.msra.mxu1 %v18408_v35  ;;  %v14467_v43 = vld [vmem:[#allocation20 + $0xba0] sm:$0xff] }
0x1c8e   : > { %15369 = vmatprep.subr.bf16.mxu0 %v18299_v59  ;;  %15410 = vmatprep.subr.bf16.mxu1 %v18301_v23  ;;  %v14475_v35 = vld [vmem:[#allocation20 + $0xbe0] sm:$0xff]  ;;  %v14468_v59 = vld [vmem:[#allocation20 + $0xba8] sm:$0xff] }
0x1c8f   : > { %v14476_v23 = vld [vmem:[#allocation20 + $0xbe8] sm:$0xff]  ;;  %v18411_v31 = vcombine.high %v14467_v43, %v14475_v35  ;;  %v18410_v41 = vcombine.low %v14467_v43, %v14475_v35 }
0x1c90   : > { %15320 = vmatmul.mubr.bf16.vlgmr.msra.gmra.mrb[92].mxu0 %v23752_v46  ;;  %15361 = vmatmul.mubr.bf16.vlgmr.msra.gmra.mrb[112].mxu1 %v23752_v46  ;;  %v18413_v21 = vcombine.high %v14468_v59, %v14476_v23  ;;  %v18412_v63 = vcombine.low %v14468_v59, %v14476_v23  ;;  %v14453_v23 = vld [vmem:[#allocation20 + $0xb30] sm:$0xff] }
0x1c91   : > { %15370 = vmatpush1.bf16.msra.mxu0 %v18298_v39  ;;  %15411 = vmatpush1.bf16.msra.mxu1 %v18300_v56  ;;  %v14357_v39 = vld [vmem:[#allocation20 + $0x830] sm:$0xff] }
0x1c92   : > { %15371 = vmatprep.subr.bf16.mxu0 %v18315_v42  ;;  %15412 = vmatprep.subr.bf16.mxu1 %v18317_v26  ;;  %v14365_v56 = vld [vmem:[#allocation20 + $0x870] sm:$0xff]  ;;  %v14358_v42 = vld [vmem:[#allocation20 + $0x838] sm:$0xff] }
0x1c93   : > { %15401 = vmatprep.mubr.bf16.mxu0 %v21951_v28  ;;  %15442 = vmatprep.mubr.bf16.mxu1 %v21951_v28  ;;  %v14366_v26 = vld [vmem:[#allocation20 + $0x878] sm:$0xff]  ;;  %v18303_v20 = vcombine.high %v14357_v39, %v14365_v56  ;;  %v18302_v44 = vcombine.low %v14357_v39, %v14365_v56 }
0x1c94   : > { %v18305_v40 = vcombine.high %v14358_v42, %v14366_v26  ;;  %v18304_v50 = vcombine.low %v14358_v42, %v14366_v26  ;;  %v14469_v26 = vld [vmem:[#allocation20 + $0xbb0] sm:$0xff] }
0x1c95   : > { %15372 = vmatpush1.bf16.msra.mxu0 %v18314_v16  ;;  %15413 = vmatpush1.bf16.msra.mxu1 %v18316_v37  ;;  %v14373_v16 = vld [vmem:[#allocation20 + $0x8b0] sm:$0xff] }
0x1c96   : > { %15373 = vmatprep.subr.bf16.mxu0 %v18331_v49  ;;  %15414 = vmatprep.subr.bf16.mxu1 %v18333_v58  ;;  %v14381_v37 = vld [vmem:[#allocation20 + $0x8f0] sm:$0xff]  ;;  %v14374_v49 = vld [vmem:[#allocation20 + $0x8b8] sm:$0xff] }
0x1c97   : > { %v14382_v58 = vld [vmem:[#allocation20 + $0x8f8] sm:$0xff]  ;;  %v18319_v51 = vcombine.high %v14373_v16, %v14381_v37  ;;  %v18318_v45 = vcombine.low %v14373_v16, %v14381_v37 }
0x1c98   : > { %v18321_v52 = vcombine.high %v14374_v49, %v14382_v58  ;;  %v18320_v62 = vcombine.low %v14374_v49, %v14382_v58 }
0x1c99   : > { %15374 = vmatpush1.bf16.msra.mxu0 %v18330_v53  ;;  %15415 = vmatpush1.bf16.msra.mxu1 %v18332_v54  ;;  %v14389_v53 = vld [vmem:[#allocation20 + $0x930] sm:$0xff] }
0x1c9a   : > { %15375 = vmatprep.subr.bf16.mxu0 %v18347_v12  ;;  %15416 = vmatprep.subr.bf16.mxu1 %v18349_v11  ;;  %v14397_v54 = vld [vmem:[#allocation20 + $0x970] sm:$0xff]  ;;  %v14390_v12 = vld [vmem:[#allocation20 + $0x938] sm:$0xff] }
0x1c9b   : > { %v14398_v11 = vld [vmem:[#allocation20 + $0x978] sm:$0xff]  ;;  %v18335_v0 = vcombine.high %v14389_v53, %v14397_v54  ;;  %v18334_v27 = vcombine.low %v14389_v53, %v14397_v54  ;;  %v20947_v53 = vld [vmem:[#allocation23 + $0x880] sm:$0xff]  }
0x1c9c   : > { %v18337_v60 = vcombine.high %v14390_v12, %v14398_v11  ;;  %v18336_v29 = vcombine.low %v14390_v12, %v14398_v11  ;;  %v20948_v54 = vld [vmem:[#allocation23 + $0x848] sm:$0xff]  }
0x1c9d   : > { %15376 = vmatpush1.bf16.msra.mxu0 %v18346_v1  ;;  %15417 = vmatpush1.bf16.msra.mxu1 %v18348_v48  ;;  %v14405_v1 = vld [vmem:[#allocation20 + $0x9b0] sm:$0xff]  ;;  %v20949_v12 = vld [vmem:[#allocation23 + $0x8c8] sm:$0xff]  }
0x1c9e   : > { %15377 = vmatprep.subr.bf16.mxu0 %v18363_v57  ;;  %15418 = vmatprep.subr.bf16.mxu1 %v18365_v6  ;;  %v14413_v48 = vld [vmem:[#allocation20 + $0x9f0] sm:$0xff]  ;;  %v14406_v57 = vld [vmem:[#allocation20 + $0x9b8] sm:$0xff] }
0x1c9f   : > { %v14414_v6 = vld [vmem:[#allocation20 + $0x9f8] sm:$0xff]  ;;  %v18351_v3 = vcombine.high %v14405_v1, %v14413_v48  ;;  %v18350_v19 = vcombine.low %v14405_v1, %v14413_v48  ;;  %v20955_v1 = vld [vmem:[#allocation23 + $0x890] sm:$0xff]   ;;  %v20956_v48 = vld [vmem:[#allocation23 + $0x858] sm:$0xff]  }
0x1ca0   : > { %v18353_v5 = vcombine.high %v14406_v57, %v14414_v6  ;;  %v18352_v25 = vcombine.low %v14406_v57, %v14414_v6  ;;  %v20950_v11 = vld [vmem:[#allocation23 + $0x808] sm:$0xff]   ;;  %v20957_v57 = vld [vmem:[#allocation23 + $0x8d8] sm:$0xff]  }
0x1ca1   : > { %15378 = vmatpush1.bf16.msra.mxu0 %v18362_v8  ;;  %15419 = vmatpush1.bf16.msra.mxu1 %v18364_v9  ;;  %v14421_v8 = vld [vmem:[#allocation20 + $0xa30] sm:$0xff]  ;;  %v20958_v6 = vld [vmem:[#allocation23 + $0x818] sm:$0xff]  }
0x1ca2   : > { %15379 = vmatprep.subr.bf16.mxu0 %v18379_v13  ;;  %15420 = vmatprep.subr.bf16.mxu1 %v18381_v24  ;;  %v14429_v9 = vld [vmem:[#allocation20 + $0xa70] sm:$0xff]  ;;  %v14422_v13 = vld [vmem:[#allocation20 + $0xa38] sm:$0xff] }
0x1ca3   : > { %v14430_v24 = vld [vmem:[#allocation20 + $0xa78] sm:$0xff]  ;;  %v18367_v30 = vcombine.high %v14421_v8, %v14429_v9 }
0x1ca4   : > { %v18368_v43 = vcombine.low %v14422_v13, %v14430_v24 }
0x1ca5   : > { %15380 = vmatpush1.bf16.msra.mxu0 %v18378_v38  ;;  %15421 = vmatpush1.bf16.msra.mxu1 %v18380_v55  ;;  %v14445_v38 = vld [vmem:[#allocation20 + $0xaf0] sm:$0xff]  ;;  %v14438_v55 = vld [vmem:[#allocation20 + $0xab8] sm:$0xff] }
0x1ca6   : > { %15381 = vmatprep.subr.bf16.mxu0 %v18395_v32  ;;  %15422 = vmatprep.subr.bf16.mxu1 %v18397_v33  ;;  %v14446_v32 = vld [vmem:[#allocation20 + $0xaf8] sm:$0xff]  ;;  %v18366_v33 = vcombine.low %v14421_v8, %v14429_v9  ;;  %v18383_v35 = vcombine.high %v14437_v36, %v14445_v38 }
0x1ca7   : > { %v18385_v59 = vcombine.high %v14438_v55, %v14446_v32  ;;  %v18384_v39 = vcombine.low %v14438_v55, %v14446_v32  ;;  %v20964_v8 = vld [vmem:[#allocation23 + $0x868] sm:$0xff]   ;;  %v20974_v55 = vld [vmem:[#allocation23 + $0x838] sm:$0xff]  }
0x1ca8   : > { %v20965_v9 = vld [vmem:[#allocation23 + $0x8e8] sm:$0xff]   ;;  %v20975_v32 = vld [vmem:[#allocation23 + $0x8b8] sm:$0xff]  }
0x1ca9   : > { %15382 = vmatpush1.bf16.msra.mxu0 %v18394_v2  ;;  %15423 = vmatpush1.bf16.msra.mxu1 %v18396_v34  ;;  %v14461_v2 = vld [vmem:[#allocation20 + $0xb70] sm:$0xff]  ;;  %v14454_v34 = vld [vmem:[#allocation20 + $0xb38] sm:$0xff] }
0x1caa   : > { %15383 = vmatprep.subr.bf16.mxu0 %v18411_v31  ;;  %15424 = vmatprep.subr.bf16.mxu1 %v18413_v21  ;;  %v14462_v31 = vld [vmem:[#allocation20 + $0xb78] sm:$0xff]  ;;  %v18382_v21 = vcombine.low %v14437_v36, %v14445_v38  ;;  %v18399_v56 = vcombine.high %v14453_v23, %v14461_v2  ;;  %v20972_v36 = vld [vmem:[#allocation23 + $0x878] sm:$0xff]  }
0x1cab   : > { %v18401_v42 = vcombine.high %v14454_v34, %v14462_v31  ;;  %v18400_v16 = vcombine.low %v14454_v34, %v14462_v31  ;;  %v20973_v38 = vld [vmem:[#allocation23 + $0x8f8] sm:$0xff]  }
0x1cad   : > { %15384 = vmatpush1.bf16.msra.mxu0 %v18410_v41  ;;  %15425 = vmatpush1.bf16.msra.mxu1 %v18412_v63  ;;  %v14477_v41 = vld [vmem:[#allocation20 + $0xbf0] sm:$0xff]  ;;  %v14470_v63 = vld [vmem:[#allocation20 + $0xbb8] sm:$0xff] }
0x1cae   : > { %15451 = vmatprep.subr.bf16.mxu0 %v18303_v20  ;;  %15492 = vmatprep.subr.bf16.mxu1 %v18305_v40  ;;  %v14478_v20 = vld [vmem:[#allocation20 + $0xbf8] sm:$0xff]  ;;  %v18398_v40 = vcombine.low %v14453_v23, %v14461_v2  ;;  %v18415_v37 = vcombine.high %v14469_v26, %v14477_v41  ;;  %v18414_v58 = vcombine.low %v14469_v26, %v14477_v41 }
0x1caf   : > { %v18417_v49 = vcombine.high %v14470_v63, %v14478_v20 }
0x1cb0   : > { %15402 = vmatmul.mubr.bf16.vlgmr.msra.gmra.mrb[96].mxu0 %v23752_v46  ;;  %15443 = vmatmul.mubr.bf16.vlgmr.msra.gmra.mrb[116].mxu1 %v23752_v46 }
0x1cb1   : > { %15452 = vmatpush1.bf16.msra.mxu0 %v18302_v44  ;;  %15493 = vmatpush1.bf16.msra.mxu1 %v18304_v50  ;;  %v18416_v44 = vcombine.low %v14470_v63, %v14478_v20  ;;  %v20944_v50 = vld [vmem:[#allocation23 + $0x840] sm:$0xff]  }
0x1cb2   : > { %15453 = vmatprep.subr.bf16.mxu0 %v18319_v51  ;;  %15494 = vmatprep.subr.bf16.mxu1 %v18321_v52  ;;  %v20945_v51 = vld [vmem:[#allocation23 + $0x8c0] sm:$0xff]  }
0x1cb3   : > { %15483 = vmatprep.mubr.bf16.mxu0 %v21951_v28  ;;  %15524 = vmatprep.mubr.bf16.mxu1 %v21951_v28  ;;  %v18369_v28 = vcombine.high %v14422_v13, %v14430_v24  ;;  %v20946_v52 = vld [vmem:[#allocation23 + $0x800] sm:$0xff]   ;;  %v20966_v13 = vld [vmem:[#allocation23 + $0x828] sm:$0xff]  }
0x1cb4   : > { %v20967_v24 = vld [vmem:[#allocation23 + $0x8a8] sm:$0xff]  }
0x1cb5   : > { %15454 = vmatpush1.bf16.msra.mxu0 %v18318_v45  ;;  %15495 = vmatpush1.bf16.msra.mxu1 %v18320_v62  ;;  %v20951_v45 = vld [vmem:[#allocation23 + $0x888] sm:$0xff]   ;;  %v20952_v62 = vld [vmem:[#allocation23 + $0x850] sm:$0xff]  }
0x1cb6   : > { %15455 = vmatprep.subr.bf16.mxu0 %v18335_v0  ;;  %15496 = vmatprep.subr.bf16.mxu1 %v18337_v60  ;;  %v20953_v0 = vld [vmem:[#allocation23 + $0x8d0] sm:$0xff]  }
0x1cb7   : > { %v20954_v60 = vld [vmem:[#allocation23 + $0x810] sm:$0xff]  }
0x1cb9   : > { %15456 = vmatpush1.bf16.msra.mxu0 %v18334_v27  ;;  %15497 = vmatpush1.bf16.msra.mxu1 %v18336_v29  ;;  %v20960_v27 = vld [vmem:[#allocation23 + $0x860] sm:$0xff]  }
0x1cba   : > { %15457 = vmatprep.subr.bf16.mxu0 %v18351_v3  ;;  %15498 = vmatprep.subr.bf16.mxu1 %v18353_v5  ;;  %v20961_v29 = vld [vmem:[#allocation23 + $0x8e0] sm:$0xff]  }
0x1cbb   : > { %v20962_v3 = vld [vmem:[#allocation23 + $0x820] sm:$0xff]  }
0x1cbc   : > { %v20963_v5 = vld [vmem:[#allocation23 + $0x8a0] sm:$0xff]  }
0x1cbd   : > { %15458 = vmatpush1.bf16.msra.mxu0 %v18350_v19  ;;  %15499 = vmatpush1.bf16.msra.mxu1 %v18352_v25  ;;  %v20968_v19 = vld [vmem:[#allocation23 + $0x870] sm:$0xff]  }
0x1cbe   : > { %15459 = vmatprep.subr.bf16.mxu0 %v18367_v30  ;;  %15500 = vmatprep.subr.bf16.mxu1 %v18369_v28  ;;  %v20969_v25 = vld [vmem:[#allocation23 + $0x8f0] sm:$0xff]  }
0x1cbf   : > { %v20970_v30 = vld [vmem:[#allocation23 + $0x830] sm:$0xff]  }
0x1cc0   : > { %v20971_v28 = vld [vmem:[#allocation23 + $0x8b0] sm:$0xff]  }
0x1cc1   : > { %15460 = vmatpush1.bf16.msra.mxu0 %v18366_v33  ;;  %15501 = vmatpush1.bf16.msra.mxu1 %v18368_v43  ;;  %v20976_v33 = vld [vmem:[#allocation23 + $0x940] sm:$0xff]  }
0x1cc2   : > { %15461 = vmatprep.subr.bf16.mxu0 %v18383_v35  ;;  %15502 = vmatprep.subr.bf16.mxu1 %v18385_v59  ;;  %v20977_v43 = vld [vmem:[#allocation23 + $0x9c0] sm:$0xff]   ;;  %v23768_v35 = vld [vmem:[#allocation22 + $0x20] sm:$0xff] }
0x1cc3   : > { %v14488_v59 = vrot.slane %v23768_v35, %v23035_v14  ;;  %v14496_v23 = vrot.slane %v23768_v35, %v23038_v15  ;;  %v14492_v2 = vrot.slane %v23768_v35, %v23043_v17  ;;  %v14500_v34 = vrot.slane %v23768_v35, %v23046_v18 }
0x1cc5   : > { %15462 = vmatpush1.bf16.msra.mxu0 %v18382_v21  ;;  %15503 = vmatpush1.bf16.msra.mxu1 %v18384_v39 }
0x1cc6   : > { %15463 = vmatprep.subr.bf16.mxu0 %v18399_v56  ;;  %15504 = vmatprep.subr.bf16.mxu1 %v18401_v42 }
0x1cc9   : > { %15464 = vmatpush1.bf16.msra.mxu0 %v18398_v40  ;;  %15505 = vmatpush1.bf16.msra.mxu1 %v18400_v16 }
0x1cca   : > { %15465 = vmatprep.subr.bf16.mxu0 %v18415_v37  ;;  %15506 = vmatprep.subr.bf16.mxu1 %v18417_v49 }
0x1ccd   : > { %15466 = vmatpush1.bf16.msra.mxu0 %v18414_v58  ;;  %15507 = vmatpush1.bf16.msra.mxu1 %v18416_v44 }
0x1cce   : > { %19229 = vmatprep.subr.bf16.mxu0 %v20944_v50  ;;  %19251 = vmatprep.subr.bf16.mxu1 %v20945_v51 }
0x1cd0   : > { %15484 = vmatmul.mubr.bf16.vlgmr.msra.gmra.mrb[100].mxu0 %v23752_v46  ;;  %15525 = vmatmul.mubr.bf16.vlgmr.msra.gmra.mrb[120].mxu1 %v23752_v46  ;;  %v20959_v46 = vld [vmem:[#allocation23 + $0x898] sm:$0xff]  }
0x1cd1   : > { %19230 = vmatpush3.bf16.msra.mxu0 %v20946_v52  ;;  %19252 = vmatpush3.bf16.msra.mxu1 %v20947_v53  ;;  %v20978_v53 = vld [vmem:[#allocation23 + $0x900] sm:$0xff]  }
0x1cd2   : > { %19231 = vmatprep.subr.bf16.mxu0 %v20948_v54  ;;  %19253 = vmatprep.subr.bf16.mxu1 %v20949_v12  ;;  %v20979_v54 = vld [vmem:[#allocation23 + $0x980] sm:$0xff]  }
0x1cd5   : > { %19232 = vmatpush3.bf16.msra.mxu0 %v20950_v11  ;;  %19254 = vmatpush3.bf16.msra.mxu1 %v20951_v45  ;;  %v20980_v45 = vld [vmem:[#allocation23 + $0x948] sm:$0xff]  }
0x1cd6   : > { %19233 = vmatprep.subr.bf16.mxu0 %v20952_v62  ;;  %19255 = vmatprep.subr.bf16.mxu1 %v20953_v0  ;;  %v20981_v62 = vld [vmem:[#allocation23 + $0x9c8] sm:$0xff]  }
0x1cd7   : > { %v20982_v0 = vld [vmem:[#allocation23 + $0x908] sm:$0xff]  }
0x1cd9   : > { %19234 = vmatpush3.bf16.msra.mxu0 %v20954_v60  ;;  %19256 = vmatpush3.bf16.msra.mxu1 %v20955_v1  ;;  %v20983_v60 = vld [vmem:[#allocation23 + $0x988] sm:$0xff]   ;;  %v20984_v1 = vld [vmem:[#allocation23 + $0x950] sm:$0xff]  }
0x1cda   : > { %19235 = vmatprep.subr.bf16.mxu0 %v20956_v48  ;;  %19257 = vmatprep.subr.bf16.mxu1 %v20957_v57  ;;  %v20985_v48 = vld [vmem:[#allocation23 + $0x9d0] sm:$0xff]  }
0x1cdb   : > { %v20986_v57 = vld [vmem:[#allocation23 + $0x910] sm:$0xff]  }
0x1cdd   : > { %19236 = vmatpush3.bf16.msra.mxu0 %v20958_v6  ;;  %19258 = vmatpush3.bf16.msra.mxu1 %v20959_v46  ;;  %v20987_v6 = vld [vmem:[#allocation23 + $0x990] sm:$0xff]   ;;  %v20988_v46 = vld [vmem:[#allocation23 + $0x958] sm:$0xff]  }
0x1cde   : > { %19237 = vmatprep.subr.bf16.mxu0 %v20960_v27  ;;  %19259 = vmatprep.subr.bf16.mxu1 %v20961_v29  ;;  %v20989_v27 = vld [vmem:[#allocation23 + $0x9d8] sm:$0xff]  }
0x1cdf   : > { %v20990_v29 = vld [vmem:[#allocation23 + $0x918] sm:$0xff]  }
0x1ce1   : > { %19238 = vmatpush3.bf16.msra.mxu0 %v20962_v3  ;;  %19260 = vmatpush3.bf16.msra.mxu1 %v20963_v5  ;;  %v20991_v3 = vld [vmem:[#allocation23 + $0x998] sm:$0xff]   ;;  %v20992_v5 = vld [vmem:[#allocation23 + $0x960] sm:$0xff]  }
0x1ce2   : > { %19239 = vmatprep.subr.bf16.mxu0 %v20964_v8  ;;  %19261 = vmatprep.subr.bf16.mxu1 %v20965_v9  ;;  %v20993_v8 = vld [vmem:[#allocation23 + $0x9e0] sm:$0xff]  }
0x1ce3   : > { %v20994_v9 = vld [vmem:[#allocation23 + $0x920] sm:$0xff]  }
0x1ce5   : > { %19240 = vmatpush3.bf16.msra.mxu0 %v20966_v13  ;;  %19262 = vmatpush3.bf16.msra.mxu1 %v20967_v24  ;;  %v20995_v13 = vld [vmem:[#allocation23 + $0x9a0] sm:$0xff]   ;;  %v20996_v24 = vld [vmem:[#allocation23 + $0x968] sm:$0xff]  }
0x1ce6   : > { %19241 = vmatprep.subr.bf16.mxu0 %v20968_v19  ;;  %19263 = vmatprep.subr.bf16.mxu1 %v20969_v25  ;;  %v20997_v19 = vld [vmem:[#allocation23 + $0x9e8] sm:$0xff]  }
0x1ce7   : > { %v20998_v25 = vld [vmem:[#allocation23 + $0x928] sm:$0xff]  }
0x1ce9   : > { %19242 = vmatpush3.bf16.msra.mxu0 %v20970_v30  ;;  %19264 = vmatpush3.bf16.msra.mxu1 %v20971_v28  ;;  %v20999_v30 = vld [vmem:[#allocation23 + $0x9a8] sm:$0xff]   ;;  %v21000_v28 = vld [vmem:[#allocation23 + $0x970] sm:$0xff]  }
0x1cea   : > { %19243 = vmatprep.subr.bf16.mxu0 %v20972_v36  ;;  %19265 = vmatprep.subr.bf16.mxu1 %v20973_v38  ;;  %v21001_v36 = vld [vmem:[#allocation23 + $0x9f0] sm:$0xff]   ;;  %v14504_v38 = vrot.slane %v23768_v35, %v23057_v4 }
0x1ced   : > { %19244 = vmatpush3.bf16.msra.mxu0 %v20974_v55  ;;  %19266 = vmatpush3.bf16.msra.mxu1 %v20975_v32  ;;  %v14512_v55 = vrot.slane %v23768_v35, %v23060_v10  ;;  %v14508_v32 = vrot.slane %v23768_v35, %v23063_v7 }
0x1cee   : > { %19273 = vmatprep.subr.bf16.mxu0 %v20976_v33  ;;  %19295 = vmatprep.subr.bf16.mxu1 %v20977_v43  ;;  %v14516_v33 = vrot.slane %v23768_v35, %v23066_v61  ;;  %v21002_v43 = vld [vmem:[#allocation23 + $0x930] sm:$0xff]   ;;  %v21007_v35 = vld [vmem:[#allocation23 + $0x9b8] sm:$0xff]  }
0x1d43   : > { %v15239_v31 = vpop.f32.mrb[88].mxu0  ;;  %v15280_v21 = vpop.f32.mrb[108].mxu1 }
0x1d44   : > { %v15240_v39 = vadd.f32 %v15239_v31, %v14488_v59  ;;  %v15281_v56 = vadd.f32 %v15280_v21, %v14496_v23  ;;  %v15241_v42 = vpop.f32.mrb[89].mxu0  ;;  %v15282_v26 = vpop.f32.mrb[109].mxu1  ;;  %v21003_v59 = vld [vmem:[#allocation23 + $0x9b0] sm:$0xff]   ;;  %v21004_v23 = vld [vmem:[#allocation23 + $0x978] sm:$0xff]  }
0x1d45   : > { %v15242_v41 = vadd.f32 %v15241_v42, %v14492_v2  ;;  %v15283_v63 = vadd.f32 %v15282_v26, %v14500_v34  ;;  %v15243_v20 = vpop.f32.mrb[90].mxu0  ;;  %v15284_v40 = vpop.f32.mrb[110].mxu1  ;;  %v21005_v2 = vld [vmem:[#allocation23 + $0x9f8] sm:$0xff]  }
0x1d46   : > { %v15533_v16 = vmax.f32 %v15240_v39, 0.0  ;;  %v15535_v37 = vmax.f32 %v15281_v56, 0.0  ;;  %v15244_v49 = vpop.f32.mrb[91].mxu0  ;;  %v15285_v58 = vpop.f32.mrb[111].mxu1  ;;  %v21006_v40 = vld [vmem:[#allocation23 + $0x938] sm:$0xff]  }
0x1d47   : > { %v15534_v44 = vmax.f32 %v15242_v41, 0.0  ;;  %v15536_v50 = vmax.f32 %v15283_v63, 0.0 }
0x1d48   : > { %v15806_v12 = vpack.c.bf16 %v15533_v16, %v15533_v16  ;;  %v15808_v11 = vpack.c.bf16 %v15535_v37, %v15535_v37 }
0x1d49   : > { %v15807_v51 = vpack.c.bf16 %v15534_v44, %v15534_v44  ;;  %v15809_v52 = vpack.c.bf16 %v15536_v50, %v15536_v50  ;;  %v21008_v44 = vld [vmem:[#allocation23 + $0xa40] sm:$0xff]  }
0x1d4a   : > { %v21009_v50 = vld [vmem:[#allocation23 + $0xac0] sm:$0xff]  }
0x1d4b   : > { %16630 = vmatprep.mubr.bf16.mxu0 %v15807_v51  ;;  %16670 = vmatprep.mubr.bf16.mxu1 %v15809_v52 }
0x1d4c   : > { %16631 = vmatmul.mubr.bf16.vlgmr.msra.gmra.mrb[104].mxu0 %v15806_v12  ;;  %16671 = vmatmul.mubr.bf16.vlgmr.msra.gmra.mrb[124].mxu1 %v15808_v11  ;;  %v21010_v12 = vld [vmem:[#allocation23 + $0xa00] sm:$0xff]  }
0x1d4d   : > { %19274 = vmatpush3.bf16.msra.mxu0 %v20978_v53  ;;  %19296 = vmatpush3.bf16.msra.mxu1 %v20979_v54  ;;  %v21011_v11 = vld [vmem:[#allocation23 + $0xa80] sm:$0xff]  }
0x1d4e   : > { %19275 = vmatprep.subr.bf16.mxu0 %v20980_v45  ;;  %19297 = vmatprep.subr.bf16.mxu1 %v20981_v62 }
0x1d51   : > { %19276 = vmatpush3.bf16.msra.mxu0 %v20982_v0  ;;  %19298 = vmatpush3.bf16.msra.mxu1 %v20983_v60  ;;  %v21012_v0 = vld [vmem:[#allocation23 + $0xa48] sm:$0xff]  }
0x1d52   : > { %19277 = vmatprep.subr.bf16.mxu0 %v20984_v1  ;;  %19299 = vmatprep.subr.bf16.mxu1 %v20985_v48  ;;  %v21013_v60 = vld [vmem:[#allocation23 + $0xac8] sm:$0xff]  }
0x1d53   : > { %v21014_v1 = vld [vmem:[#allocation23 + $0xa08] sm:$0xff]  }
0x1d54   : > { %v21015_v48 = vld [vmem:[#allocation23 + $0xa88] sm:$0xff]  }
0x1d55   : > { %19278 = vmatpush3.bf16.msra.mxu0 %v20986_v57  ;;  %19300 = vmatpush3.bf16.msra.mxu1 %v20987_v6  ;;  %v21016_v57 = vld [vmem:[#allocation23 + $0xa50] sm:$0xff]  }
0x1d56   : > { %19279 = vmatprep.subr.bf16.mxu0 %v20988_v46  ;;  %19301 = vmatprep.subr.bf16.mxu1 %v20989_v27  ;;  %v21017_v6 = vld [vmem:[#allocation23 + $0xad0] sm:$0xff]  }
0x1d57   : > { %v21018_v46 = vld [vmem:[#allocation23 + $0xa10] sm:$0xff]  }
0x1d58   : > { %v21019_v27 = vld [vmem:[#allocation23 + $0xa90] sm:$0xff]  }
0x1d59   : > { %19280 = vmatpush3.bf16.msra.mxu0 %v20990_v29  ;;  %19302 = vmatpush3.bf16.msra.mxu1 %v20991_v3  ;;  %v21020_v29 = vld [vmem:[#allocation23 + $0xa58] sm:$0xff]  }
0x1d5a   : > { %19281 = vmatprep.subr.bf16.mxu0 %v20992_v5  ;;  %19303 = vmatprep.subr.bf16.mxu1 %v20993_v8  ;;  %v21021_v3 = vld [vmem:[#allocation23 + $0xad8] sm:$0xff]  }
0x1d5b   : > { %v21022_v5 = vld [vmem:[#allocation23 + $0xa18] sm:$0xff]  }
0x1d5c   : > { %v21023_v8 = vld [vmem:[#allocation23 + $0xa98] sm:$0xff]  }
0x1d5d   : > { %19282 = vmatpush3.bf16.msra.mxu0 %v20994_v9  ;;  %19304 = vmatpush3.bf16.msra.mxu1 %v20995_v13  ;;  %v21024_v9 = vld [vmem:[#allocation23 + $0xa60] sm:$0xff]  }
0x1d5e   : > { %19283 = vmatprep.subr.bf16.mxu0 %v20996_v24  ;;  %19305 = vmatprep.subr.bf16.mxu1 %v20997_v19  ;;  %v21025_v13 = vld [vmem:[#allocation23 + $0xae0] sm:$0xff]  }
0x1d5f   : > { %v21026_v24 = vld [vmem:[#allocation23 + $0xa20] sm:$0xff]  }
0x1d60   : > { %v21027_v19 = vld [vmem:[#allocation23 + $0xaa0] sm:$0xff]  }
0x1d61   : > { %19284 = vmatpush3.bf16.msra.mxu0 %v20998_v25  ;;  %19306 = vmatpush3.bf16.msra.mxu1 %v20999_v30  ;;  %v21028_v25 = vld [vmem:[#allocation23 + $0xa68] sm:$0xff]  }
0x1d62   : > { %19285 = vmatprep.subr.bf16.mxu0 %v21000_v28  ;;  %19307 = vmatprep.subr.bf16.mxu1 %v21001_v36  ;;  %v21029_v30 = vld [vmem:[#allocation23 + $0xae8] sm:$0xff]  }
0x1d63   : > { %v15321_v34 = vpop.f32.mrb[92].mxu0  ;;  %v15362_v31 = vpop.f32.mrb[112].mxu1  ;;  %v21030_v28 = vld [vmem:[#allocation23 + $0xa28] sm:$0xff]  }
0x1d64   : > { %v15322_v21 = vadd.f32 %v15321_v34, %v14504_v38  ;;  %v15363_v39 = vadd.f32 %v15362_v31, %v14512_v55  ;;  %v15323_v56 = vpop.f32.mrb[93].mxu0  ;;  %v15364_v42 = vpop.f32.mrb[113].mxu1  ;;  %v21031_v36 = vld [vmem:[#allocation23 + $0xaa8] sm:$0xff]   ;;  %v23786_v38 = vld [vmem:[#allocation22 + $0x28] sm:$0xff]  ;;  %v21032_v55 = vld [vmem:[#allocation23 + $0xa70] sm:$0xff]  }
0x1d65   : > { %v15324_v26 = vadd.f32 %v15323_v56, %v14508_v32  ;;  %v15365_v41 = vadd.f32 %v15364_v42, %v14516_v33  ;;  %v15325_v63 = vpop.f32.mrb[94].mxu0  ;;  %v15366_v20 = vpop.f32.mrb[114].mxu1  ;;  %19286 = vmatpush3.bf16.msra.mxu0 %v21002_v43  ;;  %19308 = vmatpush3.bf16.msra.mxu1 %v21003_v59  ;;  %v21033_v32 = vld [vmem:[#allocation23 + $0xaf0] sm:$0xff]   ;;  %v14520_v33 = vrot.slane %v23786_v38, %v23035_v14  ;;  %v21036_v31 = vld [vmem:[#allocation23 + $0xa78] sm:$0xff]  }
0x1d66   : > { %v15537_v16 = vmax.f32 %v15322_v21, 0.0  ;;  %v15539_v37 = vmax.f32 %v15363_v39, 0.0  ;;  %v15326_v49 = vpop.f32.mrb[95].mxu0  ;;  %v15367_v58 = vpop.f32.mrb[115].mxu1  ;;  %19287 = vmatprep.subr.bf16.mxu0 %v21004_v23  ;;  %19309 = vmatprep.subr.bf16.mxu1 %v21005_v2  ;;  %v14528_v43 = vrot.slane %v23786_v38, %v23038_v15  ;;  %v14524_v59 = vrot.slane %v23786_v38, %v23043_v17  ;;  %v21034_v2 = vld [vmem:[#allocation23 + $0xa30] sm:$0xff]   ;;  %v21037_v21 = vld [vmem:[#allocation23 + $0xaf8] sm:$0xff]  }
0x1d67   : > { %v15538_v51 = vmax.f32 %v15324_v26, 0.0  ;;  %v15540_v52 = vmax.f32 %v15365_v41, 0.0  ;;  %v14532_v23 = vrot.slane %v23786_v38, %v23046_v18  ;;  %v21035_v34 = vld [vmem:[#allocation23 + $0xab0] sm:$0xff]   ;;  %v21038_v17 = vld [vmem:[#allocation23 + $0xa38] sm:$0xff]   ;;  %v21040_v58 = vld [vmem:[#allocation23 + $0xb40] sm:$0xff]  }
0x1d68   : > { %v15810_v45 = vpack.c.bf16 %v15537_v16, %v15537_v16  ;;  %v15812_v62 = vpack.c.bf16 %v15539_v37, %v15539_v37  ;;  %v21039_v18 = vld [vmem:[#allocation23 + $0xab8] sm:$0xff]  }
0x1d69   : > { %v15811_v53 = vpack.c.bf16 %v15538_v51, %v15538_v51  ;;  %v15813_v54 = vpack.c.bf16 %v15540_v52, %v15540_v52  ;;  %19288 = vmatpush3.bf16.msra.mxu0 %v21006_v40  ;;  %19310 = vmatpush3.bf16.msra.mxu1 %v21007_v35 }
0x1d6a   : > { %19317 = vmatprep.subr.bf16.mxu0 %v21008_v44  ;;  %19339 = vmatprep.subr.bf16.mxu1 %v21009_v50  ;;  %v21041_v44 = vld [vmem:[#allocation23 + $0xbc0] sm:$0xff]  }
0x1d6b   : > { %16710 = vmatprep.mubr.bf16.mxu0 %v15811_v53  ;;  %16750 = vmatprep.mubr.bf16.mxu1 %v15813_v54  ;;  %v21042_v54 = vld [vmem:[#allocation23 + $0xb00] sm:$0xff]  }
0x1d6c   : > { %16711 = vmatmul.mubr.bf16.vlgmr.msra.gmra.mrb[108].mxu0 %v15810_v45  ;;  %16751 = vmatmul.mubr.bf16.vlgmr.msra.gmra.mrb[128].mxu1 %v15812_v62  ;;  %v21044_v62 = vld [vmem:[#allocation23 + $0xb48] sm:$0xff]  }
0x1d6d   : > { %19318 = vmatpush3.bf16.msra.mxu0 %v21010_v12  ;;  %19340 = vmatpush3.bf16.msra.mxu1 %v21011_v11  ;;  %v21043_v12 = vld [vmem:[#allocation23 + $0xb80] sm:$0xff]  }
0x1d6e   : > { %19319 = vmatprep.subr.bf16.mxu0 %v21012_v0  ;;  %19341 = vmatprep.subr.bf16.mxu1 %v21013_v60  ;;  %v21045_v0 = vld [vmem:[#allocation23 + $0xbc8] sm:$0xff]  }
0x1d6f   : > { %v21046_v60 = vld [vmem:[#allocation23 + $0xb08] sm:$0xff]  }
0x1d71   : > { %19320 = vmatpush3.bf16.msra.mxu0 %v21014_v1  ;;  %19342 = vmatpush3.bf16.msra.mxu1 %v21015_v48  ;;  %v21047_v1 = vld [vmem:[#allocation23 + $0xb88] sm:$0xff]   ;;  %v21048_v48 = vld [vmem:[#allocation23 + $0xb50] sm:$0xff]  }
0x1d72   : > { %19321 = vmatprep.subr.bf16.mxu0 %v21016_v57  ;;  %19343 = vmatprep.subr.bf16.mxu1 %v21017_v6  ;;  %v21049_v57 = vld [vmem:[#allocation23 + $0xbd0] sm:$0xff]  }
0x1d73   : > { %v21050_v6 = vld [vmem:[#allocation23 + $0xb10] sm:$0xff]  }
0x1d75   : > { %19322 = vmatpush3.bf16.msra.mxu0 %v21018_v46  ;;  %19344 = vmatpush3.bf16.msra.mxu1 %v21019_v27  ;;  %v21051_v46 = vld [vmem:[#allocation23 + $0xb90] sm:$0xff]   ;;  %v21052_v27 = vld [vmem:[#allocation23 + $0xb58] sm:$0xff]  }
0x1d76   : > { %19323 = vmatprep.subr.bf16.mxu0 %v21020_v29  ;;  %19345 = vmatprep.subr.bf16.mxu1 %v21021_v3  ;;  %v21053_v29 = vld [vmem:[#allocation23 + $0xbd8] sm:$0xff]  }
0x1d77   : > { %v21054_v3 = vld [vmem:[#allocation23 + $0xb18] sm:$0xff]  }
0x1d79   : > { %19324 = vmatpush3.bf16.msra.mxu0 %v21022_v5  ;;  %19346 = vmatpush3.bf16.msra.mxu1 %v21023_v8  ;;  %v21055_v5 = vld [vmem:[#allocation23 + $0xb98] sm:$0xff]   ;;  %v21056_v8 = vld [vmem:[#allocation23 + $0xb60] sm:$0xff]  }
0x1d7a   : > { %19325 = vmatprep.subr.bf16.mxu0 %v21024_v9  ;;  %19347 = vmatprep.subr.bf16.mxu1 %v21025_v13  ;;  %v21057_v9 = vld [vmem:[#allocation23 + $0xbe0] sm:$0xff]  }
0x1d7b   : > { %v21058_v13 = vld [vmem:[#allocation23 + $0xb20] sm:$0xff]  }
0x1d7d   : > { %19326 = vmatpush3.bf16.msra.mxu0 %v21026_v24  ;;  %19348 = vmatpush3.bf16.msra.mxu1 %v21027_v19  ;;  %v21059_v24 = vld [vmem:[#allocation23 + $0xba0] sm:$0xff]   ;;  %v21060_v19 = vld [vmem:[#allocation23 + $0xb68] sm:$0xff]  }
0x1d7e   : > { %19327 = vmatprep.subr.bf16.mxu0 %v21028_v25  ;;  %19349 = vmatprep.subr.bf16.mxu1 %v21029_v30  ;;  %v21061_v25 = vld [vmem:[#allocation23 + $0xbe8] sm:$0xff]  }
0x1d7f   : > { %v21062_v30 = vld [vmem:[#allocation23 + $0xb28] sm:$0xff]  }
0x1d81   : > { %19328 = vmatpush3.bf16.msra.mxu0 %v21030_v28  ;;  %19350 = vmatpush3.bf16.msra.mxu1 %v21031_v36  ;;  %v21063_v28 = vld [vmem:[#allocation23 + $0xba8] sm:$0xff]   ;;  %v21064_v36 = vld [vmem:[#allocation23 + $0xb70] sm:$0xff]  }
0x1d82   : > { %19329 = vmatprep.subr.bf16.mxu0 %v21032_v55  ;;  %19351 = vmatprep.subr.bf16.mxu1 %v21033_v32  ;;  %v21065_v55 = vld [vmem:[#allocation23 + $0xbf0] sm:$0xff]   ;;  %v14536_v32 = vrot.slane %v23786_v38, %v23057_v4 }
0x1d83   : > { %v15403_v39 = vpop.f32.mrb[96].mxu0  ;;  %v15444_v56 = vpop.f32.mrb[116].mxu1 }
0x1d84   : > { %v15404_v14 = vadd.f32 %v15403_v39, %v14520_v33  ;;  %v15445_v42 = vadd.f32 %v15444_v56, %v14528_v43  ;;  %v15405_v26 = vpop.f32.mrb[97].mxu0  ;;  %v15446_v15 = vpop.f32.mrb[117].mxu1  ;;  %v14544_v33 = vrot.slane %v23786_v38, %v23060_v10  ;;  %v14540_v43 = vrot.slane %v23786_v38, %v23063_v7  ;;  %v21070_v7 = vld [vmem:[#allocation23 + $0xb38] sm:$0xff]  }
0x1d85   : > { %v15406_v41 = vadd.f32 %v15405_v26, %v14524_v59  ;;  %v15447_v63 = vadd.f32 %v15446_v15, %v14532_v23  ;;  %v15407_v20 = vpop.f32.mrb[98].mxu0  ;;  %v15448_v40 = vpop.f32.mrb[118].mxu1  ;;  %19330 = vmatpush3.bf16.msra.mxu0 %v21034_v2  ;;  %19352 = vmatpush3.bf16.msra.mxu1 %v21035_v34  ;;  %v14548_v59 = vrot.slane %v23786_v38, %v23066_v61  ;;  %v21066_v23 = vld [vmem:[#allocation23 + $0xb30] sm:$0xff]   ;;  %v21068_v34 = vld [vmem:[#allocation23 + $0xb78] sm:$0xff]  }
0x1d86   : > { %v15541_v35 = vmax.f32 %v15404_v14, 0.0  ;;  %v15543_v16 = vmax.f32 %v15445_v42, 0.0  ;;  %v15408_v37 = vpop.f32.mrb[99].mxu0  ;;  %v15449_v49 = vpop.f32.mrb[119].mxu1  ;;  %19331 = vmatprep.subr.bf16.mxu0 %v21036_v31  ;;  %19353 = vmatprep.subr.bf16.mxu1 %v21037_v21  ;;  %v21067_v2 = vld [vmem:[#allocation23 + $0xbb0] sm:$0xff]   ;;  %v21069_v31 = vld [vmem:[#allocation23 + $0xbf8] sm:$0xff]  }
0x1d87   : > { %v15542_v50 = vmax.f32 %v15406_v41, 0.0  ;;  %v15544_v51 = vmax.f32 %v15447_v63, 0.0  ;;  %v21071_v61 = vld [vmem:[#allocation23 + $0xbb8] sm:$0xff]  }
0x1d88   : > { %v15814_v11 = vpack.c.bf16 %v15541_v35, %v15541_v35  ;;  %v15816_v45 = vpack.c.bf16 %v15543_v16, %v15543_v16 }
0x1d89   : > { %v15815_v52 = vpack.c.bf16 %v15542_v50, %v15542_v50  ;;  %v15817_v53 = vpack.c.bf16 %v15544_v51, %v15544_v51  ;;  %19332 = vmatpush3.bf16.msra.mxu0 %v21038_v17  ;;  %19354 = vmatpush3.bf16.msra.mxu1 %v21039_v18  ;;  %v18418_v50 = vld [vmem:[#allocation25 + $0x2] ss:$0 sm:$0xff] }
0x1d8a   : > { %19361 = vmatprep.subr.bf16.mxu0 %v21040_v58  ;;  %19383 = vmatprep.subr.bf16.mxu1 %v21041_v44 }
0x1d8b   : > { %16790 = vmatprep.mubr.bf16.mxu0 %v15815_v52  ;;  %16830 = vmatprep.mubr.bf16.mxu1 %v15817_v53 }
0x1d8c   : > { %16791 = vmatmul.mubr.bf16.vlgmr.msra.gmra.mrb[112].mxu0 %v15814_v11  ;;  %16831 = vmatmul.mubr.bf16.vlgmr.msra.gmra.mrb[132].mxu1 %v15816_v45 }
0x1d8d   : > { %19362 = vmatpush3.bf16.msra.mxu0 %v21042_v54  ;;  %19384 = vmatpush3.bf16.msra.mxu1 %v21043_v12 }
0x1d8e   : > { %19363 = vmatprep.subr.bf16.mxu0 %v21044_v62  ;;  %19385 = vmatprep.subr.bf16.mxu1 %v21045_v0 }
0x1d91   : > { %19364 = vmatpush3.bf16.msra.mxu0 %v21046_v60  ;;  %19386 = vmatpush3.bf16.msra.mxu1 %v21047_v1 }
0x1d92   : > { %19365 = vmatprep.subr.bf16.mxu0 %v21048_v48  ;;  %19387 = vmatprep.subr.bf16.mxu1 %v21049_v57 }
0x1d95   : > { %19366 = vmatpush3.bf16.msra.mxu0 %v21050_v6  ;;  %19388 = vmatpush3.bf16.msra.mxu1 %v21051_v46 }
0x1d96   : > { %19367 = vmatprep.subr.bf16.mxu0 %v21052_v27  ;;  %19389 = vmatprep.subr.bf16.mxu1 %v21053_v29 }
0x1d99   : > { %19368 = vmatpush3.bf16.msra.mxu0 %v21054_v3  ;;  %19390 = vmatpush3.bf16.msra.mxu1 %v21055_v5 }
0x1d9a   : > { %19369 = vmatprep.subr.bf16.mxu0 %v21056_v8  ;;  %19391 = vmatprep.subr.bf16.mxu1 %v21057_v9 }
0x1d9d   : > { %19370 = vmatpush3.bf16.msra.mxu0 %v21058_v13  ;;  %19392 = vmatpush3.bf16.msra.mxu1 %v21059_v24 }
0x1d9e   : > { %19371 = vmatprep.subr.bf16.mxu0 %v21060_v19  ;;  %19393 = vmatprep.subr.bf16.mxu1 %v21061_v25 }
0x1da1   : > { %19372 = vmatpush3.bf16.msra.mxu0 %v21062_v30  ;;  %19394 = vmatpush3.bf16.msra.mxu1 %v21063_v28 }
0x1da2   : > { %19373 = vmatprep.subr.bf16.mxu0 %v21064_v36  ;;  %19395 = vmatprep.subr.bf16.mxu1 %v21065_v55 }
0x1da3   : > { %v15485_v21 = vpop.f32.mrb[100].mxu0  ;;  %v15526_v39 = vpop.f32.mrb[120].mxu1 }
0x1da4   : > { %v15486_v4 = vadd.f32 %v15485_v21, %v14536_v32  ;;  %v15527_v56 = vadd.f32 %v15526_v39, %v14544_v33  ;;  %v15487_v14 = vpop.f32.mrb[101].mxu0  ;;  %v15528_v10 = vpop.f32.mrb[121].mxu1 }
0x1da5   : > { %v15488_v42 = vadd.f32 %v15487_v14, %v14540_v43  ;;  %v15529_v26 = vadd.f32 %v15528_v10, %v14548_v59  ;;  %v15489_v15 = vpop.f32.mrb[102].mxu0  ;;  %v15530_v41 = vpop.f32.mrb[122].mxu1  ;;  %19374 = vmatpush3.bf16.msra.mxu0 %v21066_v23  ;;  %19396 = vmatpush3.bf16.msra.mxu1 %v21067_v2 }
0x1da6   : > { %v15545_v38 = vmax.f32 %v15486_v4, 0.0  ;;  %v15547_v63 = vmax.f32 %v15527_v56, 0.0  ;;  %v15490_v20 = vpop.f32.mrb[103].mxu0  ;;  %v15531_v40 = vpop.f32.mrb[123].mxu1  ;;  %19375 = vmatprep.subr.bf16.mxu0 %v21068_v34  ;;  %19397 = vmatprep.subr.bf16.mxu1 %v21069_v31 }
0x1da7   : > { %v15546_v17 = vmax.f32 %v15488_v42, 0.0  ;;  %v15548_v18 = vmax.f32 %v15529_v26, 0.0  ;;  %v21072_v20 = vld [vmem:[%s24065_s19] sm:$0xff]   ;;  %v21073_v40 = vld [vmem:[%s24065_s19 + $0x8] sm:$0xff]  }
0x1da8   : > { %v15818_v37 = vpack.c.bf16 %v15545_v38, %v15545_v38  ;;  %v15820_v49 = vpack.c.bf16 %v15547_v63, %v15547_v63 }
0x1da9   : > { %v15819_v35 = vpack.c.bf16 %v15546_v17, %v15546_v17  ;;  %v15821_v16 = vpack.c.bf16 %v15548_v18, %v15548_v18  ;;  %19376 = vmatpush3.bf16.msra.mxu0 %v21070_v7  ;;  %19398 = vmatpush3.bf16.msra.mxu1 %v21071_v61  ;;  %v21075_v17 = vld [vmem:[%s24065_s19 + $0x18] sm:$0xff]   ;;  %v21076_v18 = vld [vmem:[%s24065_s19 + $0x20] sm:$0xff]  }
0x1daa   : > { %20283 = vmatprep.subr.bf16.mxu0 %v21949_v22  ;;  %20303 = vmatprep.subr.bf16.mxu1 %v21949_v22 }
0x1dab   : > { %16870 = vmatprep.mubr.bf16.mxu0 %v15819_v35  ;;  %16910 = vmatprep.mubr.bf16.mxu1 %v15821_v16  ;;  %v21077_v35 = vld [vmem:[%s24065_s19 + $0x28] sm:$0xff]   ;;  %v21078_v16 = vld [vmem:[%s24065_s19 + $0x30] sm:$0xff]  }
0x1dac   : > { %16871 = vmatmul.mubr.bf16.vlgmr.msra.gmra.mrb[116].mxu0 %v15818_v37  ;;  %16911 = vmatmul.mubr.bf16.vlgmr.msra.gmra.mrb[136].mxu1 %v15820_v49  ;;  %v21079_v37 = vld [vmem:[%s24065_s19 + $0x38] sm:$0xff]   ;;  %v21080_v49 = vld [vmem:[%s24066_s4] sm:$0xff]  }
0x1dad   : > { %20299 = vmatprep.mubr.msk.bf16.mxu0 %vm21950_vm0, %v21949_v22  ;;  %20311 = vmatprep.mubr.msk.bf16.mxu1 %vm21950_vm0, %v21949_v22 }
0x1dae   : > { %20284 = vmatpush3.bf16.msra.mxu0 %v21072_v20  ;;  %20304 = vmatpush3.bf16.msra.mxu1 %v21080_v49 }
0x1daf   : > { %20285 = vmatprep.subr.bf16.mxu0 %v21949_v22  ;;  %20305 = vmatprep.subr.bf16.mxu1 %v21949_v22 }
0x1db2   : > { %20286 = vmatpush3.bf16.msra.mxu0 %v21073_v40 }
0x1db3   : > { %20287 = vmatprep.subr.bf16.mxu0 %v21949_v22 }
0x1e1f   : > { %v19245_v58 = vpop.f32.mrb[104].mxu0  ;;  %v19267_v44 = vpop.f32.mrb[124].mxu1 }
0x1e20   : > { %v19246_v51 = vpop.f32.mrb[105].mxu0  ;;  %v19268_v52 = vpop.f32.mrb[125].mxu1 }
0x1e21   : > { %v19247_v53 = vadd.f32 %v19246_v51, %v19245_v58  ;;  %v19269_v54 = vadd.f32 %v19268_v52, %v19267_v44  ;;  %v19248_v12 = vpop.f32.mrb[106].mxu0  ;;  %v19270_v11 = vpop.f32.mrb[126].mxu1  ;;  %v21081_v58 = vld [vmem:[%s24066_s4 + $0x8] sm:$0xff]  }
0x1e22   : > { %v19249_v45 = vpop.f32.mrb[107].mxu0  ;;  %v19271_v62 = vpop.f32.mrb[127].mxu1  ;;  %20306 = vmatpush3.bf16.msra.mxu1 %v21081_v58  ;;  %v18548_v12 = vld [vmem:[#allocation31 + $0x2] ss:$0 sm:$0xff] }
0x1e23   : > { %v16633_v0 = vadd.f32 %v19247_v53, %v18418_v50  ;;  %20307 = vmatprep.subr.bf16.mxu1 %v21949_v22  ;;  %v18547_v53 = vld [vmem:[#allocation29 + $0x2] ss:$0 sm:$0xff] }
0x1e25   : > { %v16673_v60 = vadd.f32 %v19269_v54, %v16633_v0 }
0x1e3f   : > { %v19289_v1 = vpop.f32.mrb[108].mxu0  ;;  %v19311_v48 = vpop.f32.mrb[128].mxu1 }
0x1e40   : > { %v19290_v57 = vpop.f32.mrb[109].mxu0  ;;  %v19312_v6 = vpop.f32.mrb[129].mxu1 }
0x1e41   : > { %v19291_v46 = vadd.f32 %v19290_v57, %v19289_v1  ;;  %v19313_v27 = vadd.f32 %v19312_v6, %v19311_v48  ;;  %v19292_v29 = vpop.f32.mrb[110].mxu0  ;;  %v19314_v3 = vpop.f32.mrb[130].mxu1 }
0x1e42   : > { %v19293_v5 = vpop.f32.mrb[111].mxu0  ;;  %v19315_v8 = vpop.f32.mrb[131].mxu1  ;;  %v21083_v29 = vld [vmem:[%s24066_s4 + $0x18] sm:$0xff]   ;;  %v16974_v3 = vld [vmem:[#allocation32] sm:$0x1] }
0x1e43   : > { %v16713_v9 = vadd.f32 %v19291_v46, %v16673_v60 }
0x1e45   : > { %v16753_v13 = vadd.f32 %v19313_v27, %v16713_v9  ;;  %v21082_v27 = vld [vmem:[%s24066_s4 + $0x10] sm:$0xff]   ;;  %s21786_s4 = sshll.u32 %s21952_s3, 4  ;;  %s21787_s4 = int_to_ptr.vmem [resolvable:$false] %s21786_s4 }
0x1e46   : > { %20308 = vmatpush3.bf16.msra.mxu1 %v21082_v27  ;;  %s21788_s10 = scalar_lea.vmem %s21787_s4, 32  ;;  %p21789_p13 = scmp.lt.s32.totalorder %s17162_s7, %s21787_s4 }
0x1e47   : > { %20309 = vmatprep.subr.bf16.mxu1 %v21949_v22  ;;  %p21790_p0 = scmp.lt.s32.totalorder %s21788_s10, %s21782_s9 }
0x1e49   : > { %p21791_p2 = por %p21790_p0, %p21789_p13 }
0x1e4a   : > { %20310 = vmatpush3.bf16.msra.mxu1 %v21083_v29 }
0x1e4b   : > { %p21792_p3 = pnand %p21791_p2, %p21785_p1 }
0x1e5f   : > { %v19333_v24 = vpop.f32.mrb[112].mxu0  ;;  %v19355_v19 = vpop.f32.mrb[132].mxu1 }
0x1e60   : > { %v19334_v25 = vpop.f32.mrb[113].mxu0  ;;  %v19356_v30 = vpop.f32.mrb[133].mxu1 }
0x1e61   : > { %v19335_v28 = vadd.f32 %v19334_v25, %v19333_v24  ;;  %v19357_v36 = vadd.f32 %v19356_v30, %v19355_v19  ;;  %v19336_v55 = vpop.f32.mrb[114].mxu0  ;;  %v19358_v32 = vpop.f32.mrb[134].mxu1 }
0x1e62   : > { %v19337_v33 = vpop.f32.mrb[115].mxu0  ;;  %v19359_v43 = vpop.f32.mrb[135].mxu1 }
0x1e63   : > { %v16793_v59 = vadd.f32 %v19335_v28, %v16753_v13 }
0x1e65   : > { %v16833_v23 = vadd.f32 %v19357_v36, %v16793_v59 }
0x1e7f   : > { %v19377_v2 = vpop.f32.mrb[116].mxu0  ;;  %v19399_v34 = vpop.f32.mrb[136].mxu1 }
0x1e80   : > { %v19378_v31 = vpop.f32.mrb[117].mxu0  ;;  %v19400_v21 = vpop.f32.mrb[137].mxu1 }
0x1e81   : > { %v19379_v39 = vadd.f32 %v19378_v31, %v19377_v2  ;;  %v19401_v4 = vadd.f32 %v19400_v21, %v19399_v34  ;;  %v19380_v56 = vpop.f32.mrb[118].mxu0  ;;  %v19402_v14 = vpop.f32.mrb[138].mxu1 }
0x1e82   : > { %v19381_v10 = vpop.f32.mrb[119].mxu0  ;;  %v19403_v42 = vpop.f32.mrb[139].mxu1 }
0x1e83   : > { %v16873_v26 = vadd.f32 %v19379_v39, %v16833_v23 }
0x1e85   : > { %v16913_v15 = vadd.f32 %v19401_v4, %v16873_v26 }
0x1e87   : > { %v16918_v41 = vadd.f32 %v16913_v15, %v23748_v47  ;;  %v21074_v47 = vld [vmem:[%s24065_s19 + $0x10] sm:$0xff]  }
0x1e88   : > { %20288 = vmatpush3.bf16.msra.mxu0 %v21074_v47 }
0x1e89   : > { %16923 = vadd.xlane.f32.xlu0 %v16918_v41  ;;  %20289 = vmatprep.subr.bf16.mxu0 %v21949_v22 }
0x1e8c   : > { %20290 = vmatpush3.bf16.msra.mxu0 %v21075_v17 }
0x1e8d   : > { %20291 = vmatprep.subr.bf16.mxu0 %v21949_v22 }
0x1e90   : > { %20292 = vmatpush3.bf16.msra.mxu0 %v21076_v18 }
0x1e91   : > { %20293 = vmatprep.subr.bf16.mxu0 %v21949_v22 }
0x1e94   : > { %20294 = vmatpush3.bf16.msra.mxu0 %v21077_v35 }
0x1e95   : > { %20295 = vmatprep.subr.bf16.mxu0 %v21949_v22 }
0x1e98   : > { %20296 = vmatpush3.bf16.msra.mxu0 %v21078_v16 }
0x1e99   : > { %20297 = vmatprep.subr.bf16.mxu0 %v21949_v22 }
0x1e9c   : > { %20298 = vmatpush3.bf16.msra.mxu0 %v21079_v37 }
0x1f16   : > { %v16924_v7 = vpop.xlane.xlu0 %16923 }
0x1f17   : > { %v16925_v61 = vmul.f32 0.0078125, %v16924_v7 }
0x1f19   : > { %v16926_v38 = vsub.f32 %v16918_v41, %v16925_v61 }
0x1f1b   : > { %v16927_v63 = vmul.f32 %v16926_v38, %v16926_v38 }
0x1f1d   : > { %16928 = vadd.xlane.f32.xlu1 %v16927_v63 }
0x1faa   : > { %v16929_v44 = vpop.xlane.xlu1 %16928 }
0x1fab   : > { %v16930_v50 = vmul.f32 0.0078125, %v16929_v44 }
0x1fad   : > { %v16931_v51 = vadd.f32 1e-05, %v16930_v50 }
0x1faf   : > { %21190 = vrsqrt.f32 %v16931_v51 }
0x1fb9   : > { %v21191_v52 = vpop.eup %21190 }
0x1fba   : > { %v16933_v54 = vmul.f32 %v21191_v52, %v16926_v38 }
0x1fbc   : > { %v16940_v11 = vmul.f32 %v18547_v53, %v16933_v54 }
0x1fbe   : > { %v16947_v45 = vadd.f32 %v18548_v12, %v16940_v11 }
0x1fc0   : > { %v16948_v62 = vrot.slane %v16947_v45, 4 }
0x1fc2   : > { %v16949_v0 = vadd.f32 %v16948_v62, %v16947_v45 }
0x1fc4   : > { %v16950_v60 = vrot.slane %v16949_v0, 2 }
0x1fc6   : > { %v16951_v1 = vadd.f32 %v16950_v60, %v16949_v0 }
0x1fc8   : > { %v16952_v48 = vrot.slane %v16951_v1, 1 }
0x1fca   : > { %v16953_v57 = vadd.f32 %v16952_v48, %v16951_v1 }
0x1fcc   : > { %v16955_v6 = vmul.f32 0.125, %v16953_v57 }
0x1fce   : > { %v16973_v46 = vpack.c.bf16 %v16955_v6, %v16955_v6  ;;  %16956 = vst [vmem:[%s1040_s2] sm:$0x1] %v16955_v6 }
0x1fd0   : > { %20300 = vmatmul.mubr.bf16.vlgmr.msra.gmra.mrb[120].mxu0 %v16973_v46 }
0x20a3   : > { %v17057_v5 = vpop.f32.mrb[120].mxu0 }
0x20a4   : > { %v17058_v8 = vadd.f32 %v17057_v5, %v16974_v3  ;;  %v20301_v9 = vpop.f32.mrb[121].mxu0 }
0x20a5   : > { %v17060_v13 = vpop.f32.mrb[122].mxu0 }
0x20a6   : > { %v17063_v24 = vmax.f32 %v17058_v8, 0.0  ;;  %v20302_v19 = vpop.f32.mrb[123].mxu0 }
0x20a8   : > { %v17072_v25 = vpack.c.bf16 %v17063_v24, %v17063_v24 }
0x20aa   : > { %20312 = vmatmul.mubr.msk.bf16.vlgmr.msra.gmra.mrb[140].mxu1 %vm17098_vm4, %v17072_v25 }
0x20ab   : > { %21795 = shalt.err (!%p21792_p3)
}
0x20ac   : > { %s21796_s2 = scalar_lea.hbm %s23864_s0, 16  ;;  %s21800_s3 = scalar_lea.hbm %s24067_s23, 32 }
0x20ad   : > { %p21797_p4 = scmp.ne.s32.totalorder %s23864_s0, %s21796_s2  ;;  %p21801_p8 = scmp.lt.u32.totalorder %s23864_s0, %s24067_s23 }
0x20ae   : > { %p21802_p5 = scmp.lt.u32.totalorder %s21800_s3, %s21796_s2  ;;  %p21804_p6 = scmp.lt.u32.totalorder %s21796_s2, %s23864_s0 }
0x20af   : > { %p21798_p10 = pnand %p21797_p4, %p24068_p9 }
0x20b0   : > { %p21803_p7 = por %p21802_p5, %p21801_p8 }
0x20b1   : > { %p21799_p11 = pneg %p21798_p10 }
0x20b2   : > { %p21805_p12 = por %p21804_p6, %p21803_p7 }
0x20b4   : > { %p21806_p1 = pnand %p21805_p12, %p21799_p11 }
0x20b6   : > { %21809 = shalt.err (!%p21806_p1)
}
0x20b7   : > { %20397 = dma.vmem_to_hbm [thread:$0]  (%p24068_p9), %s17162_s7, 16, %s23864_s0, %s17145_s26   ;;  %v17073_v22 = vld [vmem:[#allocation34] sm:$0x1]  ;;  %vm17142_vm5 = vcmask 73728  }
0x20b8   : > { %s1046_s10 = scalar_lea.vmem [#allocation36], %s22661_s27  ;;  %s24069_s1 = sshll.u32 %s24044_s30, 4 }
0x20b9   : > { %s17174_s9 = sshll.u32 %s1046_s10, 4  ;;  %s24070_s6 = sld [smem:[#allocation71_spill]]  ;;  %s23892_s9 = int_to_ptr.vmem [resolvable:$true] %s17174_s9 }
0x20ba   : > { %s17149_s7 = scalar_lea.sflag [#allocation37], %s22661_s27  ;;  %s21810_s0 = scalar_lea.vmem %s23892_s9, 16 }
0x20bb   : > { %p21811_p13 = scmp.ne.s32.totalorder %s23892_s9, %s21810_s0  ;;  %s21953_s30 = smov [#allocation36]  }
0x20bc   : > { %s21814_s26 = sshll.u32 %s21953_s30, 4  ;;  %s21815_s26 = int_to_ptr.vmem [resolvable:$false] %s21814_s26 }
0x20bd   : > { %p21812_p0 = pnand %p21811_p13, %p24068_p9  ;;  %s21816_s4 = scalar_lea.vmem %s21815_s26, 32 }
0x20be   : > { %p21817_p3 = scmp.lt.s32.totalorder %s23892_s9, %s21815_s26  ;;  %p21818_p4 = scmp.lt.s32.totalorder %s21816_s4, %s21810_s0 }
0x20bf   : > { %s23890_s3 = scalar_lea.hbm %s24070_s6, %s24069_s1  ;;  %p21813_p2 = pneg %p21812_p0 }
0x20c0   : > { %p21819_p10 = por %p21818_p4, %p21817_p3 }
0x20c2   : > { %p21820_p11 = pnand %p21819_p10, %p21813_p2 }
0x217d   : > { %v17136_v30 = vpop.f32.mrb[140].mxu1 }
0x217e   : > { %v17137_v28 = vadd.f32 %v17136_v30, %v17073_v22  ;;  %v20313_v36 = vpop.f32.mrb[141].mxu1 }
0x217f   : > { %v17139_v55 = vpop.f32.mrb[142].mxu1 }
0x2180   : > { %v20314_v32 = vpop.f32.mrb[143].mxu1  ;;  %17143 = vst.msk [vmem:[%s1046_s10] sm:$0x1] %vm17142_vm5, %v17137_v28 }
0x2181   : > { %21823 = shalt.err (!%p21820_p11)
}
0x2182   : > { %s21824_s27 = scalar_lea.hbm %s23890_s3, 16  ;;  %s21828_s2 = scalar_lea.hbm %s24070_s6, 32 }
0x2183   : > { %p21825_p8 = scmp.ne.s32.totalorder %s23890_s3, %s21824_s27  ;;  %p21829_p6 = scmp.lt.u32.totalorder %s23890_s3, %s24070_s6 }
0x2184   : > { %p21830_p12 = scmp.lt.u32.totalorder %s21828_s2, %s21824_s27  ;;  %p21832_p13 = scmp.lt.u32.totalorder %s21824_s27, %s23890_s3 }
0x2185   : > { %p21826_p5 = pnand %p21825_p8, %p24068_p9 }
0x2186   : > { %p21831_p1 = por %p21830_p12, %p21829_p6 }
0x2187   : > { %p21827_p7 = pneg %p21826_p5 }
0x2188   : > { %p21833_p0 = por %p21832_p13, %p21831_p1 }
0x218a   : > { %p21834_p2 = pnand %p21833_p0, %p21827_p7 }
0x218c   : > { %21837 = shalt.err (!%p21834_p2)
}
0x218d   : > { %20398 = dma.vmem_to_hbm [thread:$0]  (%p24068_p9), %s23892_s9, 16, %s23890_s3, %s17149_s7  }
0x218e PF: > { %s24071_s0 = sld [smem:[#allocation51_spill]]  ;;  %s24072_s26 = sld [smem:[#allocation54_spill]] }
0x218f   : > { %p24073_p3 = scmp.ne.s32.totalorder %s24038_s5, 0 }
0x2194   : > { %s17186_s4 = sand.u32 1, %s24071_s0   ;;  %p24074_p4 = scmp.ge.s32.totalorder %s24072_s26, 2 }
0x2195   : > { %s17187_s10 = scalar_lea.sflag [#allocation4], %s17186_s4 }
0x2196   : > { %p20467_p10 = pnand %p24074_p4, %p24073_p3 }
0x2198   : > { %21899 = dma.done.wait (!%p20467_p10), %s17187_s10, 16  }
0x2199   : > { %21901 = vsyncadd (!%p20467_p10), %s17187_s10, 4294967280  ;;  %s17195_s27 = scalar_lea.sflag [#allocation37], %s17186_s4 }
0x219a   : > { %21903 = dma.done.wait (!%p20467_p10), %s17195_s27, 16  }
0x219b   : > { %21905 = vsyncadd (!%p20467_p10), %s17195_s27, 4294967280  ;;  %s24075_s5 = sld [smem:[#allocation52_spill]]  ;;  %s24076_s26 = sld [smem:[#allocation53_spill]] }
0x219c   : > { %p51_p9 = scmp.ge.s32.totalorder %s22585_s28, 4   ;;  %s24077_s27 = smov %s22596_s8 }
0x219e   :  { %53 = sbr.rel (!%p51_p9) target bundleno = 33 (0x21), region = 286 }
0x21a5   :  { %17199 = vsyncpa [#allocation3], 1 }
0x21a6   :  { %17201 = vsyncpa [#allocation3 + $0x1], 1 }
0x21a7   :  { %17202 = vsyncpa [#allocation6], 1 }
0x21a8   :  { %17203 = vsyncpa [#allocation9], 1 }
0x21a9   :  { %17204 = vsyncpa [#allocation12], 1 }
0x21aa   :  { %17205 = vsyncpa [#allocation15], 1 }
0x21ab   :  { %17206 = vsyncpa [#allocation18], 1 }
0x21ac   :  { %17207 = vsyncpa [#allocation21], 1 }
0x21ad   :  { %17208 = vsyncpa [#allocation24], 1 }
0x21ae   :  { %17209 = vsyncpa [#allocation27], 1 }
0x21af   :  { %17210 = vsyncpa [#allocation30], 1 }
0x21b0   :  { %17211 = vsyncpa [#allocation33], 1 }
0x21b1   :  { %17212 = vsyncpa [#allocation4], 1 }
0x21b2   :  { %17214 = vsyncpa [#allocation4 + $0x1], 1 }
0x21b3   :  { %17215 = vsyncpa [#allocation37], 1 }
0x21b4   :  { %17217 = vsyncpa [#allocation37 + $0x1], 1 }

</bundles_post_ra>
